<compile_context>
chip_gen: v5e
topology: v5e:2x2
jax: 0.10.0
libtpu: 0.0.40
codegen_flags: <defaults>
</compile_context>

<pallas_src>
import math

import jax
import jax.numpy as jnp
from jax.experimental import pallas as pl
from jax.experimental.pallas import tpu as pltpu

NUM_HEADS = 4          # nn.TransformerEncoderLayer(hidden_dim, nhead=4)
FFN_DIM = 2048         # PyTorch default dim_feedforward
NA_PAD = 8             # pad num_anchors(=3) / site(=1) channels to 8 lanes; sliced on host
OUT_LANES = 128        # packed lane-dense output slab width
SSD_SCALES = (0.17, 0.5, 1.0)

# Row indices inside the packed (14, H) "hvecs" parameter.
(HV_RED_B, HV_OUT_B, HV_LN1_G, HV_LN1_B, HV_FF_B2,
 HV_LN2_G, HV_LN2_B, HV_DEC_B1) = range(8)
HV_SSD_B0 = 8                       # rows 8..10: SSD feature-conv biases
HV_DEC_B2, HV_DEC_B3, HV_HEAD_B = 11, 12, 13
HV_ROWS = 14


# ----------------------------- in-kernel helpers -----------------------------

def _layernorm(x, g, b, eps=1e-5):
    mu = jnp.mean(x, axis=-1, keepdims=True)
    var = jnp.mean((x - mu) ** 2, axis=-1, keepdims=True)
    return (x - mu) * jax.lax.rsqrt(var + eps) * g + b


# --------------------------------- the kernel --------------------------------

def site_predictor_kernel(x_ref,
                          red_w_ref, wqkv_ref, bqkv_ref, out_w_ref,
                          ff_w1_ref, ff_b1_ref, ff_w2_ref,
                          dec_w1_ref, dec_w2_ref, dec_w3_ref,
                          ssd_fw_ref, head_w_ref, hv_ref,
                          out_ref):
    Bblk, W, Din = x_ref.shape
    BW = Bblk * W
    H = out_w_ref.shape[0]
    hd = H // NUM_HEADS
    bf16, f32 = jnp.bfloat16, jnp.float32

    # Packed (14, H) row vectors: biases + LayerNorm params.
    hv = hv_ref[...]
    red_b = hv[HV_RED_B:HV_RED_B + 1]
    out_b = hv[HV_OUT_B:HV_OUT_B + 1]
    ln1_g = hv[HV_LN1_G:HV_LN1_G + 1]
    ln1_b = hv[HV_LN1_B:HV_LN1_B + 1]
    ff_b2 = hv[HV_FF_B2:HV_FF_B2 + 1]
    ln2_g = hv[HV_LN2_G:HV_LN2_G + 1]
    ln2_b = hv[HV_LN2_B:HV_LN2_B + 1]
    dec_b1 = hv[HV_DEC_B1:HV_DEC_B1 + 1]
    dec_b2 = hv[HV_DEC_B2:HV_DEC_B2 + 1, :H // 2]
    dec_b3 = hv[HV_DEC_B3:HV_DEC_B3 + 1, :NA_PAD]
    head_b = hv[HV_HEAD_B:HV_HEAD_B + 1, :2 * NA_PAD]

    # Per-sample conv edge validity: row t has a "prev" iff t % W != 0 and a
    # "next" iff t % W != W - 1.  pltpu.roll wraps across sample boundaries, but
    # the masks zero those rows, so no cross-sample / stale data ever leaks in.
    wpos = jax.lax.broadcasted_iota(jnp.int32, (BW, 1), 0) % W
    prev_ok = wpos != 0
    next_ok = wpos != (W - 1)

    def conv1d_k3(x, w_taps, b):
        """Conv1d(kernel=3, padding=1) over the per-sample window axis.

        x: (BW, Cin) f32 rows (Bblk samples stacked), w_taps: (3, Cin, Cout) bf16
        (tap 0 -> x[t-1], 1 -> x[t], 2 -> x[t+1]), b: (1, Cout) f32.
        The +-1 shifts are XLU sublane rolls: no scratch VMEM, no extra ld/st.
        """
        x_prev = jnp.where(prev_ok, pltpu.roll(x, shift=1, axis=0), 0.0)
        x_next = jnp.where(next_ok, pltpu.roll(x, shift=BW - 1, axis=0), 0.0)
        y = (jnp.dot(x_prev.astype(bf16), w_taps[0], preferred_element_type=f32)
             + jnp.dot(x.astype(bf16), w_taps[1], preferred_element_type=f32)
             + jnp.dot(x_next.astype(bf16), w_taps[2], preferred_element_type=f32))
        return y + b

    x = x_ref[...].reshape(BW, Din)                     # channels-last, flattened rows

    # ---- ReduceDimLayer: Conv1d(Din->H, k3, p1) + ReLU ----
    z = jnp.maximum(conv1d_k3(x, red_w_ref[...], red_b), 0.0)              # (BW, H)

    # ---- SiteEncoder: single TransformerEncoderLayer (post-norm, eval mode) ----
    # Fused q|k|v projection: one (BW,H)@(H,3H) matmul, 1/sqrt(hd) folded into q.
    qkv = jnp.dot(z.astype(bf16), wqkv_ref[...],
                  preferred_element_type=f32) + bqkv_ref[...]               # (BW, 3H)
    q3 = qkv[:, :H].astype(bf16).reshape(Bblk, W, H)
    k3 = qkv[:, H:2 * H].astype(bf16).reshape(Bblk, W, H)
    v3 = qkv[:, 2 * H:].astype(bf16).reshape(Bblk, W, H)

    # Per-head score matmuls (batched over samples), then ONE softmax over all
    # heads stacked on the leading (major) axis.
    # TODO(synk): a (batch, head)-batched dot_general would remove the per-head
    # loop entirely but needs a major<->minor transpose of the hd-wide head axis,
    # which Mosaic does not lower cleanly; keep the head loop for the dots only.
    scores = []
    for h in range(NUM_HEADS):
        sl = slice(h * hd, (h + 1) * hd)
        scores.append(jax.lax.dot_general(
            q3[:, :, sl], k3[:, :, sl], (((2,), (2,)), ((0,), (0,))),
            preferred_element_type=f32))                                    # (Bblk, W, W)
    s_all = jnp.concatenate(scores, axis=0)                                 # (NH*Bblk, W, W)
    s_all = s_all - jnp.max(s_all, axis=-1, keepdims=True)
    p_all = jnp.exp(s_all)
    p_all = p_all * pl.reciprocal(jnp.sum(p_all, axis=-1, keepdims=True), approx=True)
    p_all = p_all.astype(bf16)

    heads = []
    for h in range(NUM_HEADS):
        sl = slice(h * hd, (h + 1) * hd)
        heads.append(jax.lax.dot_general(
            p_all[h * Bblk:(h + 1) * Bblk], v3[:, :, sl],
            (((2,), (1,)), ((0,), (0,))), preferred_element_type=f32))      # (Bblk, W, hd)
    attn = jnp.concatenate(heads, axis=-1).reshape(BW, H)
    attn = jnp.dot(attn.astype(bf16), out_w_ref[...],
                   preferred_element_type=f32) + out_b

    src = _layernorm(z + attn, ln1_g, ln1_b)
    # FFN: keep the (BW, FFN_DIM) intermediate bf16 to bound live VMEM.
    # TODO(synk): chunk the FFN_DIM axis for very large BW on v7x (32 MiB scoped VMEM).
    h1 = jnp.maximum(
        jnp.dot(src.astype(bf16), ff_w1_ref[...], preferred_element_type=f32)
        + ff_b1_ref[...], 0.0).astype(bf16)
    h2 = jnp.dot(h1, ff_w2_ref[...], preferred_element_type=f32) + ff_b2
    enc = _layernorm(src + h2, ln2_g, ln2_b)                                # (BW, H)

    # ---- SiteDecoder: Linear(H,H)+ReLU -> Linear(H,H/2)+ReLU -> Linear(H/2,1), sigmoid ----
    d = jnp.maximum(
        jnp.dot(enc.astype(bf16), dec_w1_ref[...], preferred_element_type=f32) + dec_b1, 0.0)
    d = jnp.maximum(
        jnp.dot(d.astype(bf16), dec_w2_ref[...], preferred_element_type=f32) + dec_b2, 0.0)
    logit = jnp.dot(d.astype(bf16), dec_w3_ref[...],
                    preferred_element_type=f32) + dec_b3                    # (BW, 8), lane 0 real
    site = jax.nn.sigmoid(logit)

    # ---- SSDModule: 3x (Conv1d(H,H,k3)+ReLU) -> fused loc|cls head conv ----
    f = enc
    for l in range(3):
        f = jnp.maximum(
            conv1d_k3(f, ssd_fw_ref[l], hv[HV_SSD_B0 + l:HV_SSD_B0 + l + 1]), 0.0)
    head = conv1d_k3(f, head_w_ref[...], head_b)                            # (BW, 16): loc | cls

    # ---- pack into one lane-dense 128-wide slab: site | loc | cls | zero-pad ----
    pad = jnp.zeros((BW, OUT_LANES - 3 * NA_PAD), f32)
    out_ref[...] = jnp.concatenate([site, head, pad], axis=-1).reshape(Bblk, W, OUT_LANES)


# --------------------------------- host glue ----------------------------------

def _full_spec(shape):
    nd = len(shape)
    return pl.BlockSpec(shape, lambda b, nd=nd: (0,) * nd)


def generate_anchors(window_size, scales):
    anchors = []
    for pos in range(window_size):
        for scale in scales:
            center = (pos + 0.5) / window_size
            span = int(scale * window_size)      # int() truncation, as in the PyTorch code
            anchors.append([center, float(span)])
    return jnp.asarray(anchors, dtype=jnp.float32)


def init_params(key, input_dim, hidden_dim, ffn_dim=FFN_DIM, num_anchors=3):
    assert hidden_dim % NUM_HEADS == 0 and hidden_dim >= 2 * NA_PAD
    ks = iter(jax.random.split(key, 48))

    def w(shape, scale=0.08):
        return jax.random.normal(next(ks), shape, jnp.float32) * scale

    def bf(a):
        return a.astype(jnp.bfloat16)

    def conv_taps(cout, cin):
        # PyTorch Conv1d weight (cout, cin, 3) -> taps (3, cin, cout)
        return jnp.transpose(w((cout, cin, 3)), (2, 1, 0))

    H = hidden_dim
    hd = H // NUM_HEADS
    scale = 1.0 / math.sqrt(hd)
    p = {}
    p['red_w'] = bf(conv_taps(H, input_dim))                          # (3, Din, H)
    red_b = w((H,))

    in_w = w((3 * H, H))                                              # MHA in_proj_weight (3H, H)
    in_b = w((3 * H,))
    p['wqkv'] = bf(jnp.concatenate(                                   # (H, 3H), scale folded in q
        [in_w[:H].T * scale, in_w[H:2 * H].T, in_w[2 * H:].T], axis=1))
    p['bqkv'] = jnp.concatenate(
        [in_b[:H] * scale, in_b[H:2 * H], in_b[2 * H:]])[None]        # (1, 3H)

    p['out_w'] = bf(w((H, H)).T)                                      # out_proj.weight.T
    out_b = w((H,))
    ln1_g, ln1_b = jnp.ones((H,), jnp.float32), jnp.zeros((H,), jnp.float32)
    p['ff_w1'] = bf(w((ffn_dim, H), 0.03).T)                          # linear1.weight.T -> (H, ffn)
    p['ff_b1'] = w((1, ffn_dim), 0.03)
    p['ff_w2'] = bf(w((H, ffn_dim), 0.03).T)                          # linear2.weight.T -> (ffn, H)
    ff_b2 = w((H,))
    ln2_g, ln2_b = jnp.ones((H,), jnp.float32), jnp.zeros((H,), jnp.float32)

    p['dec_w1'] = bf(w((H, H)).T)
    dec_b1 = w((H,))
    p['dec_w2'] = bf(w((H // 2, H)).T)                                # (H, H//2)
    dec_b2 = w((H // 2,))
    p['dec_w3'] = bf(jnp.pad(w((1, H // 2)).T, ((0, 0), (0, NA_PAD - 1))))   # (H//2, 8)
    dec_b3 = w((1,))

    p['ssd_fw'] = bf(jnp.stack([conv_taps(H, H) for _ in range(3)]))  # (3, 3, H, H)
    ssd_fb = [w((H,)) for _ in range(3)]
    apad = NA_PAD - num_anchors
    loc_w = jnp.pad(conv_taps(num_anchors, H), ((0, 0), (0, 0), (0, apad)))  # (3, H, 8)
    cls_w = jnp.pad(conv_taps(num_anchors, H), ((0, 0), (0, 0), (0, apad)))
    p['head_w'] = bf(jnp.concatenate([loc_w, cls_w], axis=-1))        # (3, H, 16): loc | cls
    head_b = jnp.concatenate([jnp.pad(w((num_anchors,)), (0, apad)),
                              jnp.pad(w((num_anchors,)), (0, apad))])

    def row(v):
        v = jnp.asarray(v, jnp.float32).reshape(-1)
        return jnp.pad(v, (0, H - v.shape[0]))

    p['hvecs'] = jnp.stack([row(red_b), row(out_b), row(ln1_g), row(ln1_b),
                            row(ff_b2), row(ln2_g), row(ln2_b), row(dec_b1),
                            row(ssd_fb[0]), row(ssd_fb[1]), row(ssd_fb[2]),
                            row(dec_b2), row(dec_b3), row(head_b)])   # (14, H)
    assert p['hvecs'].shape == (HV_ROWS, H)
    return p


_PARAM_ORDER = ['red_w', 'wqkv', 'bqkv', 'out_w', 'ff_w1', 'ff_b1', 'ff_w2',
                'dec_w1', 'dec_w2', 'dec_w3', 'ssd_fw', 'head_w', 'hvecs']


def site_predictor_forward(x, params, anchor_scales=SSD_SCALES, block_b=None):
    B, W, Din = x.shape
    NA = len(anchor_scales)
    H = params['out_w'].shape[0]

    # Block sizing: target >= 256 flattened rows per grid step (amortize per-step
    # overhead / MXU fill-drain); weights are resident, so larger blocks add no
    # HBM traffic.  Grid stays "parallel" so an even step count shards across
    # v7x's two TensorCores when B is large enough.
    if block_b is None:
        block_b = max(1, (256 + W - 1) // W)
    block_b = max(1, min(block_b, B))
    if W % 8 != 0:
        block_b = 1   # (Bblk,W,C) <-> (Bblk*W,C) reshape needs W % 8 == 0
        # TODO(synk): pad W to a multiple of 8 instead of dropping to 1 sample/step.
    Bp = ((B + block_b - 1) // block_b) * block_b
    if Bp != B:
        x = jnp.pad(x, ((0, Bp - B), (0, 0), (0, 0)))

    weights = [params[kname] for kname in _PARAM_ORDER]
    in_specs = ([pl.BlockSpec((block_b, W, Din), lambda b: (b, 0, 0))]
                + [_full_spec(wgt.shape) for wgt in weights])
    out_specs = pl.BlockSpec((block_b, W, OUT_LANES), lambda b: (b, 0, 0))
    out_shape = jax.ShapeDtypeStruct((Bp, W, OUT_LANES), jnp.float32)

    # Advisory cost estimate (FFN matmuls dominate the flops).
    flops_per_row = (
        2 * 3 * Din * H                       # reduce conv (3 taps)
        + 2 * H * 3 * H                       # fused qkv projection
        + 2 * 2 * W * H                       # attn scores + p@v
        + 2 * H * H                           # out projection
        + 2 * 2 * H * FFN_DIM                 # FFN
        + 2 * H * H + 2 * H * (H // 2) + 2 * (H // 2) * NA_PAD   # decoder
        + 3 * 2 * 3 * H * H                   # SSD feature convs
        + 2 * 3 * H * 2 * NA_PAD              # fused loc|cls head conv
    )
    cost = pl.CostEstimate(
        flops=int(Bp * W * flops_per_row),
        transcendentals=int(Bp * W * (NUM_HEADS * W + NA_PAD)),
        bytes_accessed=int(Bp * W * Din * 4 + Bp * W * OUT_LANES * 4
                           + sum(wgt.size * wgt.dtype.itemsize for wgt in weights)),
    )

    out = pl.pallas_call(
        site_predictor_kernel,
        grid=(Bp // block_b,),
        in_specs=in_specs,
        out_specs=out_specs,
        out_shape=out_shape,
        compiler_params=pltpu.CompilerParams(dimension_semantics=("parallel",)),
        cost_estimate=cost,
    )(x, *weights)

    out = out[:B]
    site_prob = out[:, :, 0]                                               # (B, W)
    loc_pred = out[:, :, NA_PAD:NA_PAD + NA].reshape(B, W * NA, 1)
    cls_pred = out[:, :, 2 * NA_PAD:2 * NA_PAD + NA].reshape(B, W * NA)
    anchors = generate_anchors(W, anchor_scales)
    return site_prob, (loc_pred, cls_pred, anchors)


if __name__ == "__main__":
    # batch, window_size(=seq), input_dim, hidden_dim; default block_b puts the
    # whole 8x16=128-row batch in a single grid step with resident bf16 weights.
    B, W, Din, H = 8, 16, 64, 32
    key = jax.random.PRNGKey(0)
    kx, kp = jax.random.split(key)
    x = jax.random.normal(kx, (B, W, Din), jnp.float32)
    params = init_params(kp, Din, H)

    site_prob, (loc_pred, cls_pred, anchors) = site_predictor_forward(x, params)
    jax.block_until_ready((site_prob, loc_pred, cls_pred, anchors))

    assert site_prob.shape == (B, W)
    assert loc_pred.shape == (B, W * 3, 1)
    assert cls_pred.shape == (B, W * 3)
    assert anchors.shape == (W * 3, 2)
    assert bool(jnp.all(jnp.isfinite(site_prob)))
    assert bool(jnp.all((site_prob >= 0.0) & (site_prob <= 1.0)))
    assert bool(jnp.all(jnp.isfinite(loc_pred))) and bool(jnp.all(jnp.isfinite(cls_pred)))
    print("KERNEL_OK")
</pallas_src>

<mosaic_0001>
module attributes {stable_mosaic.version = 11 : i64} {
  func.func @site_predictor_kernel(%arg0: i32, %arg1: memref<8x16x64xf32, #tpu.memory_space<vmem>>, %arg2: memref<3x64x32xbf16, #tpu.memory_space<vmem>>, %arg3: memref<32x96xbf16, #tpu.memory_space<vmem>>, %arg4: memref<1x96xf32, #tpu.memory_space<vmem>>, %arg5: memref<32x32xbf16, #tpu.memory_space<vmem>>, %arg6: memref<32x2048xbf16, #tpu.memory_space<vmem>>, %arg7: memref<1x2048xf32, #tpu.memory_space<vmem>>, %arg8: memref<2048x32xbf16, #tpu.memory_space<vmem>>, %arg9: memref<32x32xbf16, #tpu.memory_space<vmem>>, %arg10: memref<32x16xbf16, #tpu.memory_space<vmem>>, %arg11: memref<16x8xbf16, #tpu.memory_space<vmem>>, %arg12: memref<3x3x32x32xbf16, #tpu.memory_space<vmem>>, %arg13: memref<3x32x16xbf16, #tpu.memory_space<vmem>>, %arg14: memref<14x32xf32, #tpu.memory_space<vmem>>, %arg15: memref<8x16x128xf32, #tpu.memory_space<vmem>>) attributes {dimension_semantics = [#tpu.dimension_semantics<parallel>], iteration_bounds = array<i64: 1>, scalar_prefetch = 0 : i64, scratch_operands = 0 : i64, tpu.core_type = #tpu.core_type<tc>, window_params = [{transform_indices = @transform_0, window_bounds = array<i64: 8, 16, 64>}, {pipeline_mode = #tpu.pipeline_mode<synchronous>, transform_indices = @transform_1, window_bounds = array<i64: 3, 64, 32>}, {pipeline_mode = #tpu.pipeline_mode<synchronous>, transform_indices = @transform_2, window_bounds = array<i64: 32, 96>}, {pipeline_mode = #tpu.pipeline_mode<synchronous>, transform_indices = @transform_3, window_bounds = array<i64: 1, 96>}, {pipeline_mode = #tpu.pipeline_mode<synchronous>, transform_indices = @transform_4, window_bounds = array<i64: 32, 32>}, {pipeline_mode = #tpu.pipeline_mode<synchronous>, transform_indices = @transform_5, window_bounds = array<i64: 32, 2048>}, {pipeline_mode = #tpu.pipeline_mode<synchronous>, transform_indices = @transform_6, window_bounds = array<i64: 1, 2048>}, {pipeline_mode = #tpu.pipeline_mode<synchronous>, transform_indices = @transform_7, window_bounds = array<i64: 2048, 32>}, {pipeline_mode = #tpu.pipeline_mode<synchronous>, transform_indices = @transform_8, window_bounds = array<i64: 32, 32>}, {pipeline_mode = #tpu.pipeline_mode<synchronous>, transform_indices = @transform_9, window_bounds = array<i64: 32, 16>}, {pipeline_mode = #tpu.pipeline_mode<synchronous>, transform_indices = @transform_10, window_bounds = array<i64: 16, 8>}, {pipeline_mode = #tpu.pipeline_mode<synchronous>, transform_indices = @transform_11, window_bounds = array<i64: 3, 3, 32, 32>}, {pipeline_mode = #tpu.pipeline_mode<synchronous>, transform_indices = @transform_12, window_bounds = array<i64: 3, 32, 16>}, {pipeline_mode = #tpu.pipeline_mode<synchronous>, transform_indices = @transform_13, window_bounds = array<i64: 14, 32>}, {transform_indices = @transform_14, window_bounds = array<i64: 8, 16, 128>}]} {
    %c0 = arith.constant 0 : index
    %c0_0 = arith.constant 0 : index
    %0 = vector.load %arg14[%c0, %c0_0] : memref<14x32xf32, #tpu.memory_space<vmem>>, vector<14x32xf32>
    %1 = vector.extract_strided_slice %0 {offsets = [0, 0], sizes = [1, 32], strides = [1, 1]} : vector<14x32xf32> to vector<1x32xf32>
    %2 = vector.extract_strided_slice %0 {offsets = [1, 0], sizes = [1, 32], strides = [1, 1]} : vector<14x32xf32> to vector<1x32xf32>
    %3 = vector.extract_strided_slice %0 {offsets = [2, 0], sizes = [1, 32], strides = [1, 1]} : vector<14x32xf32> to vector<1x32xf32>
    %4 = vector.extract_strided_slice %0 {offsets = [3, 0], sizes = [1, 32], strides = [1, 1]} : vector<14x32xf32> to vector<1x32xf32>
    %5 = vector.extract_strided_slice %0 {offsets = [4, 0], sizes = [1, 32], strides = [1, 1]} : vector<14x32xf32> to vector<1x32xf32>
    %6 = vector.extract_strided_slice %0 {offsets = [5, 0], sizes = [1, 32], strides = [1, 1]} : vector<14x32xf32> to vector<1x32xf32>
    %7 = vector.extract_strided_slice %0 {offsets = [6, 0], sizes = [1, 32], strides = [1, 1]} : vector<14x32xf32> to vector<1x32xf32>
    %8 = vector.extract_strided_slice %0 {offsets = [7, 0], sizes = [1, 32], strides = [1, 1]} : vector<14x32xf32> to vector<1x32xf32>
    %9 = vector.extract_strided_slice %0 {offsets = [11, 0], sizes = [1, 16], strides = [1, 1]} : vector<14x32xf32> to vector<1x16xf32>
    %10 = vector.extract_strided_slice %0 {offsets = [12, 0], sizes = [1, 8], strides = [1, 1]} : vector<14x32xf32> to vector<1x8xf32>
    %11 = vector.extract_strided_slice %0 {offsets = [13, 0], sizes = [1, 16], strides = [1, 1]} : vector<14x32xf32> to vector<1x16xf32>
    %12 = tpu.iota {dimensions = array<i32: 0>} : vector<128x1xi32>
    %c16_i32 = arith.constant 16 : i32
    %c0_i32 = arith.constant 0 : i32
    %13 = arith.cmpi eq, %c16_i32, %c0_i32 : i32
    %c1_i32 = arith.constant 1 : i32
    %14 = arith.select %13, %c1_i32, %c16_i32 : i32
    %15 = vector.broadcast %14 : i32 to vector<128x1xi32>
    %16 = arith.remsi %12, %15 : vector<128x1xi32>
    %c0_i32_1 = arith.constant 0 : i32
    %17 = vector.broadcast %c0_i32_1 : i32 to vector<128x1xi32>
    %18 = arith.cmpi ne, %16, %17 : vector<128x1xi32>
    %c0_i32_2 = arith.constant 0 : i32
    %19 = vector.broadcast %c0_i32_2 : i32 to vector<128x1xi32>
    %20 = arith.cmpi slt, %16, %19 : vector<128x1xi32>
    %c0_i32_3 = arith.constant 0 : i32
    %21 = arith.cmpi slt, %14, %c0_i32_3 : i32
    %22 = vector.broadcast %21 : i1 to vector<128x1xi1>
    %23 = vector.broadcast %22 : vector<128x1xi1> to vector<128x1xi1>
    %24 = arith.xori %20, %23 : vector<128x1xi1>
    %25 = arith.andi %24, %18 : vector<128x1xi1>
    %26 = vector.broadcast %14 : i32 to vector<128x1xi32>
    %27 = arith.addi %16, %26 : vector<128x1xi32>
    %28 = arith.select %25, %27, %16 : vector<128x1xi1>, vector<128x1xi32>
    %c0_i32_4 = arith.constant 0 : i32
    %29 = vector.broadcast %c0_i32_4 : i32 to vector<128x1xi32>
    %30 = arith.cmpi ne, %28, %29 : vector<128x1xi32>
    %c15_i32 = arith.constant 15 : i32
    %31 = vector.broadcast %c15_i32 : i32 to vector<128x1xi32>
    %32 = arith.cmpi ne, %28, %31 : vector<128x1xi32>
    %c0_5 = arith.constant 0 : index
    %c0_6 = arith.constant 0 : index
    %c0_7 = arith.constant 0 : index
    %33 = vector.load %arg1[%c0_5, %c0_6, %c0_7] : memref<8x16x64xf32, #tpu.memory_space<vmem>>, vector<8x16x64xf32>
    %34 = vector.shape_cast %33 : vector<8x16x64xf32> to vector<128x64xf32>
    %c0_8 = arith.constant 0 : index
    %c0_9 = arith.constant 0 : index
    %c0_10 = arith.constant 0 : index
    %35 = vector.load %arg2[%c0_8, %c0_9, %c0_10] : memref<3x64x32xbf16, #tpu.memory_space<vmem>>, vector<3x64x32xbf16>
    %c1_i32_11 = arith.constant 1 : i32
    %36 = tpu.dynamic_rotate %34 by %c1_i32_11 dim 0 : vector<128x64xf32>, i32 -> vector<128x64xf32>
    %cst = arith.constant 0.000000e+00 : f32
    %37 = vector.shape_cast %30 : vector<128x1xi1> to vector<128x1xi1>
    %38 = vector.broadcast %37 : vector<128x1xi1> to vector<128x64xi1>
    %39 = vector.broadcast %cst : f32 to vector<128x64xf32>
    %40 = arith.select %38, %36, %39 : vector<128x64xi1>, vector<128x64xf32>
    %c127_i32 = arith.constant 127 : i32
    %41 = tpu.dynamic_rotate %34 by %c127_i32 dim 0 : vector<128x64xf32>, i32 -> vector<128x64xf32>
    %cst_12 = arith.constant 0.000000e+00 : f32
    %42 = vector.shape_cast %32 : vector<128x1xi1> to vector<128x1xi1>
    %43 = vector.broadcast %42 : vector<128x1xi1> to vector<128x64xi1>
    %44 = vector.broadcast %cst_12 : f32 to vector<128x64xf32>
    %45 = arith.select %43, %41, %44 : vector<128x64xi1>, vector<128x64xf32>
    %46 = arith.truncf %40 : vector<128x64xf32> to vector<128x64xbf16>
    %47 = vector.extract_strided_slice %35 {offsets = [0, 0, 0], sizes = [1, 64, 32], strides = [1, 1, 1]} : vector<3x64x32xbf16> to vector<1x64x32xbf16>
    %48 = vector.shape_cast %47 : vector<1x64x32xbf16> to vector<64x32xbf16>
    %cst_13 = arith.constant dense<0.000000e+00> : vector<128x32xf32>
    %49 = tpu.matmul %46, %48, %cst_13 {dimension_numbers = #tpu.dot_dimension_numbers<[1], [0], [0], [1], [0, 0, 1, 1], [], []>} : vector<128x64xbf16>, vector<64x32xbf16>, vector<128x32xf32> -> vector<128x32xf32>
    %50 = arith.truncf %34 : vector<128x64xf32> to vector<128x64xbf16>
    %51 = vector.extract_strided_slice %35 {offsets = [1, 0, 0], sizes = [1, 64, 32], strides = [1, 1, 1]} : vector<3x64x32xbf16> to vector<1x64x32xbf16>
    %52 = vector.shape_cast %51 : vector<1x64x32xbf16> to vector<64x32xbf16>
    %cst_14 = arith.constant dense<0.000000e+00> : vector<128x32xf32>
    %53 = tpu.matmul %50, %52, %cst_14 {dimension_numbers = #tpu.dot_dimension_numbers<[1], [0], [0], [1], [0, 0, 1, 1], [], []>} : vector<128x64xbf16>, vector<64x32xbf16>, vector<128x32xf32> -> vector<128x32xf32>
    %54 = arith.addf %49, %53 : vector<128x32xf32>
    %55 = arith.truncf %45 : vector<128x64xf32> to vector<128x64xbf16>
    %56 = vector.extract_strided_slice %35 {offsets = [2, 0, 0], sizes = [1, 64, 32], strides = [1, 1, 1]} : vector<3x64x32xbf16> to vector<1x64x32xbf16>
    %57 = vector.shape_cast %56 : vector<1x64x32xbf16> to vector<64x32xbf16>
    %cst_15 = arith.constant dense<0.000000e+00> : vector<128x32xf32>
    %58 = tpu.matmul %55, %57, %cst_15 {dimension_numbers = #tpu.dot_dimension_numbers<[1], [0], [0], [1], [0, 0, 1, 1], [], []>} : vector<128x64xbf16>, vector<64x32xbf16>, vector<128x32xf32> -> vector<128x32xf32>
    %59 = arith.addf %54, %58 : vector<128x32xf32>
    %60 = vector.broadcast %1 : vector<1x32xf32> to vector<128x32xf32>
    %61 = arith.addf %59, %60 : vector<128x32xf32>
    %cst_16 = arith.constant 0.000000e+00 : f32
    %62 = vector.broadcast %cst_16 : f32 to vector<128x32xf32>
    %63 = arith.maximumf %61, %62 : vector<128x32xf32>
    %64 = arith.truncf %63 : vector<128x32xf32> to vector<128x32xbf16>
    %c0_17 = arith.constant 0 : index
    %c0_18 = arith.constant 0 : index
    %65 = vector.load %arg3[%c0_17, %c0_18] : memref<32x96xbf16, #tpu.memory_space<vmem>>, vector<32x96xbf16>
    %cst_19 = arith.constant dense<0.000000e+00> : vector<128x96xf32>
    %66 = tpu.matmul %64, %65, %cst_19 {dimension_numbers = #tpu.dot_dimension_numbers<[1], [0], [0], [1], [0, 0, 1, 1], [], []>} : vector<128x32xbf16>, vector<32x96xbf16>, vector<128x96xf32> -> vector<128x96xf32>
    %c0_20 = arith.constant 0 : index
    %c0_21 = arith.constant 0 : index
    %67 = vector.load %arg4[%c0_20, %c0_21] : memref<1x96xf32, #tpu.memory_space<vmem>>, vector<1x96xf32>
    %68 = vector.broadcast %67 : vector<1x96xf32> to vector<128x96xf32>
    %69 = arith.addf %66, %68 : vector<128x96xf32>
    %70 = vector.extract_strided_slice %69 {offsets = [0, 0], sizes = [128, 32], strides = [1, 1]} : vector<128x96xf32> to vector<128x32xf32>
    %71 = arith.truncf %70 : vector<128x32xf32> to vector<128x32xbf16>
    %72 = vector.shape_cast %71 : vector<128x32xbf16> to vector<8x16x32xbf16>
    %73 = vector.extract_strided_slice %69 {offsets = [0, 32], sizes = [128, 32], strides = [1, 1]} : vector<128x96xf32> to vector<128x32xf32>
    %74 = arith.truncf %73 : vector<128x32xf32> to vector<128x32xbf16>
    %75 = vector.shape_cast %74 : vector<128x32xbf16> to vector<8x16x32xbf16>
    %76 = vector.extract_strided_slice %69 {offsets = [0, 64], sizes = [128, 32], strides = [1, 1]} : vector<128x96xf32> to vector<128x32xf32>
    %77 = arith.truncf %76 : vector<128x32xf32> to vector<128x32xbf16>
    %78 = vector.shape_cast %77 : vector<128x32xbf16> to vector<8x16x32xbf16>
    %79 = vector.extract_strided_slice %72 {offsets = [0, 0, 0], sizes = [8, 16, 8], strides = [1, 1, 1]} : vector<8x16x32xbf16> to vector<8x16x8xbf16>
    %80 = vector.extract_strided_slice %75 {offsets = [0, 0, 0], sizes = [8, 16, 8], strides = [1, 1, 1]} : vector<8x16x32xbf16> to vector<8x16x8xbf16>
    %cst_22 = arith.constant dense<0.000000e+00> : vector<8x16x16xf32>
    %81 = tpu.matmul %79, %80, %cst_22 {dimension_numbers = #tpu.dot_dimension_numbers<[2], [2], [1], [1], [0, 0, 0, 1, 1, 1], [0], [0]>} : vector<8x16x8xbf16>, vector<8x16x8xbf16>, vector<8x16x16xf32> -> vector<8x16x16xf32>
    %82 = vector.extract_strided_slice %72 {offsets = [0, 0, 8], sizes = [8, 16, 8], strides = [1, 1, 1]} : vector<8x16x32xbf16> to vector<8x16x8xbf16>
    %83 = vector.extract_strided_slice %75 {offsets = [0, 0, 8], sizes = [8, 16, 8], strides = [1, 1, 1]} : vector<8x16x32xbf16> to vector<8x16x8xbf16>
    %cst_23 = arith.constant dense<0.000000e+00> : vector<8x16x16xf32>
    %84 = tpu.matmul %82, %83, %cst_23 {dimension_numbers = #tpu.dot_dimension_numbers<[2], [2], [1], [1], [0, 0, 0, 1, 1, 1], [0], [0]>} : vector<8x16x8xbf16>, vector<8x16x8xbf16>, vector<8x16x16xf32> -> vector<8x16x16xf32>
    %85 = vector.extract_strided_slice %72 {offsets = [0, 0, 16], sizes = [8, 16, 8], strides = [1, 1, 1]} : vector<8x16x32xbf16> to vector<8x16x8xbf16>
    %86 = vector.extract_strided_slice %75 {offsets = [0, 0, 16], sizes = [8, 16, 8], strides = [1, 1, 1]} : vector<8x16x32xbf16> to vector<8x16x8xbf16>
    %cst_24 = arith.constant dense<0.000000e+00> : vector<8x16x16xf32>
    %87 = tpu.matmul %85, %86, %cst_24 {dimension_numbers = #tpu.dot_dimension_numbers<[2], [2], [1], [1], [0, 0, 0, 1, 1, 1], [0], [0]>} : vector<8x16x8xbf16>, vector<8x16x8xbf16>, vector<8x16x16xf32> -> vector<8x16x16xf32>
    %88 = vector.extract_strided_slice %72 {offsets = [0, 0, 24], sizes = [8, 16, 8], strides = [1, 1, 1]} : vector<8x16x32xbf16> to vector<8x16x8xbf16>
    %89 = vector.extract_strided_slice %75 {offsets = [0, 0, 24], sizes = [8, 16, 8], strides = [1, 1, 1]} : vector<8x16x32xbf16> to vector<8x16x8xbf16>
    %cst_25 = arith.constant dense<0.000000e+00> : vector<8x16x16xf32>
    %90 = tpu.matmul %88, %89, %cst_25 {dimension_numbers = #tpu.dot_dimension_numbers<[2], [2], [1], [1], [0, 0, 0, 1, 1, 1], [0], [0]>} : vector<8x16x8xbf16>, vector<8x16x8xbf16>, vector<8x16x16xf32> -> vector<8x16x16xf32>
    %91 = tpu.concatenate %81, %84, %87, %90 in 0 : vector<8x16x16xf32>, vector<8x16x16xf32>, vector<8x16x16xf32>, vector<8x16x16xf32> -> vector<32x16x16xf32>
    %cst_26 = arith.constant dense<0xFF800000> : vector<32x16xf32>
    %92 = vector.multi_reduction <maximumf>, %91, %cst_26 [2] : vector<32x16x16xf32> to vector<32x16xf32>
    %93 = vector.shape_cast %92 : vector<32x16xf32> to vector<32x16x1xf32>
    %94 = vector.broadcast %93 : vector<32x16x1xf32> to vector<32x16x16xf32>
    %95 = arith.subf %91, %94 : vector<32x16x16xf32>
    %96 = math.exp %95 : vector<32x16x16xf32>
    %cst_27 = arith.constant dense<0.000000e+00> : vector<32x16xf32>
    %97 = vector.multi_reduction <add>, %96, %cst_27 [2] : vector<32x16x16xf32> to vector<32x16xf32>
    %98 = vector.shape_cast %97 : vector<32x16xf32> to vector<32x16x1xf32>
    %99 = tpu.reciprocal %98 {approx = true} : vector<32x16x1xf32> -> vector<32x16x1xf32>
    %100 = vector.broadcast %99 : vector<32x16x1xf32> to vector<32x16x16xf32>
    %101 = arith.mulf %96, %100 : vector<32x16x16xf32>
    %102 = arith.truncf %101 : vector<32x16x16xf32> to vector<32x16x16xbf16>
    %103 = vector.extract_strided_slice %102 {offsets = [0, 0, 0], sizes = [8, 16, 16], strides = [1, 1, 1]} : vector<32x16x16xbf16> to vector<8x16x16xbf16>
    %104 = vector.extract_strided_slice %78 {offsets = [0, 0, 0], sizes = [8, 16, 8], strides = [1, 1, 1]} : vector<8x16x32xbf16> to vector<8x16x8xbf16>
    %cst_28 = arith.constant dense<0.000000e+00> : vector<8x16x8xf32>
    %105 = tpu.matmul %103, %104, %cst_28 {dimension_numbers = #tpu.dot_dimension_numbers<[2], [1], [1], [2], [0, 0, 0, 1, 1, 2], [0], [0]>} : vector<8x16x16xbf16>, vector<8x16x8xbf16>, vector<8x16x8xf32> -> vector<8x16x8xf32>
    %106 = vector.extract_strided_slice %102 {offsets = [8, 0, 0], sizes = [8, 16, 16], strides = [1, 1, 1]} : vector<32x16x16xbf16> to vector<8x16x16xbf16>
    %107 = vector.extract_strided_slice %78 {offsets = [0, 0, 8], sizes = [8, 16, 8], strides = [1, 1, 1]} : vector<8x16x32xbf16> to vector<8x16x8xbf16>
    %cst_29 = arith.constant dense<0.000000e+00> : vector<8x16x8xf32>
    %108 = tpu.matmul %106, %107, %cst_29 {dimension_numbers = #tpu.dot_dimension_numbers<[2], [1], [1], [2], [0, 0, 0, 1, 1, 2], [0], [0]>} : vector<8x16x16xbf16>, vector<8x16x8xbf16>, vector<8x16x8xf32> -> vector<8x16x8xf32>
    %109 = vector.extract_strided_slice %102 {offsets = [16, 0, 0], sizes = [8, 16, 16], strides = [1, 1, 1]} : vector<32x16x16xbf16> to vector<8x16x16xbf16>
    %110 = vector.extract_strided_slice %78 {offsets = [0, 0, 16], sizes = [8, 16, 8], strides = [1, 1, 1]} : vector<8x16x32xbf16> to vector<8x16x8xbf16>
    %cst_30 = arith.constant dense<0.000000e+00> : vector<8x16x8xf32>
    %111 = tpu.matmul %109, %110, %cst_30 {dimension_numbers = #tpu.dot_dimension_numbers<[2], [1], [1], [2], [0, 0, 0, 1, 1, 2], [0], [0]>} : vector<8x16x16xbf16>, vector<8x16x8xbf16>, vector<8x16x8xf32> -> vector<8x16x8xf32>
    %112 = vector.extract_strided_slice %102 {offsets = [24, 0, 0], sizes = [8, 16, 16], strides = [1, 1, 1]} : vector<32x16x16xbf16> to vector<8x16x16xbf16>
    %113 = vector.extract_strided_slice %78 {offsets = [0, 0, 24], sizes = [8, 16, 8], strides = [1, 1, 1]} : vector<8x16x32xbf16> to vector<8x16x8xbf16>
    %cst_31 = arith.constant dense<0.000000e+00> : vector<8x16x8xf32>
    %114 = tpu.matmul %112, %113, %cst_31 {dimension_numbers = #tpu.dot_dimension_numbers<[2], [1], [1], [2], [0, 0, 0, 1, 1, 2], [0], [0]>} : vector<8x16x16xbf16>, vector<8x16x8xbf16>, vector<8x16x8xf32> -> vector<8x16x8xf32>
    %115 = tpu.concatenate %105, %108, %111, %114 in 2 : vector<8x16x8xf32>, vector<8x16x8xf32>, vector<8x16x8xf32>, vector<8x16x8xf32> -> vector<8x16x32xf32>
    %116 = vector.shape_cast %115 : vector<8x16x32xf32> to vector<128x32xf32>
    %117 = arith.truncf %116 : vector<128x32xf32> to vector<128x32xbf16>
    %c0_32 = arith.constant 0 : index
    %c0_33 = arith.constant 0 : index
    %118 = vector.load %arg5[%c0_32, %c0_33] : memref<32x32xbf16, #tpu.memory_space<vmem>>, vector<32x32xbf16>
    %cst_34 = arith.constant dense<0.000000e+00> : vector<128x32xf32>
    %119 = tpu.matmul %117, %118, %cst_34 {dimension_numbers = #tpu.dot_dimension_numbers<[1], [0], [0], [1], [0, 0, 1, 1], [], []>} : vector<128x32xbf16>, vector<32x32xbf16>, vector<128x32xf32> -> vector<128x32xf32>
    %120 = vector.broadcast %2 : vector<1x32xf32> to vector<128x32xf32>
    %121 = arith.addf %119, %120 : vector<128x32xf32>
    %122 = arith.addf %63, %121 : vector<128x32xf32>
    %cst_35 = arith.constant dense<0.000000e+00> : vector<128xf32>
    %123 = vector.multi_reduction <add>, %122, %cst_35 [1] : vector<128x32xf32> to vector<128xf32>
    %124 = vector.shape_cast %123 : vector<128xf32> to vector<128x1xf32>
    %cst_36 = arith.constant 3.200000e+01 : f32
    %125 = vector.broadcast %cst_36 : f32 to vector<128x1xf32>
    %126 = arith.divf %124, %125 : vector<128x1xf32>
    %127 = vector.broadcast %126 : vector<128x1xf32> to vector<128x32xf32>
    %128 = arith.subf %122, %127 : vector<128x32xf32>
    %129 = arith.mulf %128, %128 : vector<128x32xf32>
    %cst_37 = arith.constant dense<0.000000e+00> : vector<128xf32>
    %130 = vector.multi_reduction <add>, %129, %cst_37 [1] : vector<128x32xf32> to vector<128xf32>
    %131 = vector.shape_cast %130 : vector<128xf32> to vector<128x1xf32>
    %cst_38 = arith.constant 3.200000e+01 : f32
    %132 = vector.broadcast %cst_38 : f32 to vector<128x1xf32>
    %133 = arith.divf %131, %132 : vector<128x1xf32>
    %134 = vector.broadcast %126 : vector<128x1xf32> to vector<128x32xf32>
    %135 = arith.subf %122, %134 : vector<128x32xf32>
    %cst_39 = arith.constant 9.99999974E-6 : f32
    %136 = vector.broadcast %cst_39 : f32 to vector<128x1xf32>
    %137 = arith.addf %133, %136 : vector<128x1xf32>
    %138 = math.rsqrt %137 : vector<128x1xf32>
    %139 = vector.broadcast %138 : vector<128x1xf32> to vector<128x32xf32>
    %140 = arith.mulf %135, %139 : vector<128x32xf32>
    %141 = vector.broadcast %3 : vector<1x32xf32> to vector<128x32xf32>
    %142 = arith.mulf %140, %141 : vector<128x32xf32>
    %143 = vector.broadcast %4 : vector<1x32xf32> to vector<128x32xf32>
    %144 = arith.addf %142, %143 : vector<128x32xf32>
    %145 = arith.truncf %144 : vector<128x32xf32> to vector<128x32xbf16>
    %c0_40 = arith.constant 0 : index
    %c0_41 = arith.constant 0 : index
    %146 = vector.load %arg6[%c0_40, %c0_41] : memref<32x2048xbf16, #tpu.memory_space<vmem>>, vector<32x2048xbf16>
    %cst_42 = arith.constant dense<0.000000e+00> : vector<128x2048xf32>
    %147 = tpu.matmul %145, %146, %cst_42 {dimension_numbers = #tpu.dot_dimension_numbers<[1], [0], [0], [1], [0, 0, 1, 1], [], []>} : vector<128x32xbf16>, vector<32x2048xbf16>, vector<128x2048xf32> -> vector<128x2048xf32>
    %c0_43 = arith.constant 0 : index
    %c0_44 = arith.constant 0 : index
    %148 = vector.load %arg7[%c0_43, %c0_44] : memref<1x2048xf32, #tpu.memory_space<vmem>>, vector<1x2048xf32>
    %149 = vector.broadcast %148 : vector<1x2048xf32> to vector<128x2048xf32>
    %150 = arith.addf %147, %149 : vector<128x2048xf32>
    %cst_45 = arith.constant 0.000000e+00 : f32
    %151 = vector.broadcast %cst_45 : f32 to vector<128x2048xf32>
    %152 = arith.maximumf %150, %151 : vector<128x2048xf32>
    %153 = arith.truncf %152 : vector<128x2048xf32> to vector<128x2048xbf16>
    %c0_46 = arith.constant 0 : index
    %c0_47 = arith.constant 0 : index
    %154 = vector.load %arg8[%c0_46, %c0_47] : memref<2048x32xbf16, #tpu.memory_space<vmem>>, vector<2048x32xbf16>
    %cst_48 = arith.constant dense<0.000000e+00> : vector<128x32xf32>
    %155 = tpu.matmul %153, %154, %cst_48 {dimension_numbers = #tpu.dot_dimension_numbers<[1], [0], [0], [1], [0, 0, 1, 1], [], []>} : vector<128x2048xbf16>, vector<2048x32xbf16>, vector<128x32xf32> -> vector<128x32xf32>
    %156 = vector.broadcast %5 : vector<1x32xf32> to vector<128x32xf32>
    %157 = arith.addf %155, %156 : vector<128x32xf32>
    %158 = arith.addf %144, %157 : vector<128x32xf32>
    %cst_49 = arith.constant dense<0.000000e+00> : vector<128xf32>
    %159 = vector.multi_reduction <add>, %158, %cst_49 [1] : vector<128x32xf32> to vector<128xf32>
    %160 = vector.shape_cast %159 : vector<128xf32> to vector<128x1xf32>
    %cst_50 = arith.constant 3.200000e+01 : f32
    %161 = vector.broadcast %cst_50 : f32 to vector<128x1xf32>
    %162 = arith.divf %160, %161 : vector<128x1xf32>
    %163 = vector.broadcast %162 : vector<128x1xf32> to vector<128x32xf32>
    %164 = arith.subf %158, %163 : vector<128x32xf32>
    %165 = arith.mulf %164, %164 : vector<128x32xf32>
    %cst_51 = arith.constant dense<0.000000e+00> : vector<128xf32>
    %166 = vector.multi_reduction <add>, %165, %cst_51 [1] : vector<128x32xf32> to vector<128xf32>
    %167 = vector.shape_cast %166 : vector<128xf32> to vector<128x1xf32>
    %cst_52 = arith.constant 3.200000e+01 : f32
    %168 = vector.broadcast %cst_52 : f32 to vector<128x1xf32>
    %169 = arith.divf %167, %168 : vector<128x1xf32>
    %170 = vector.broadcast %162 : vector<128x1xf32> to vector<128x32xf32>
    %171 = arith.subf %158, %170 : vector<128x32xf32>
    %cst_53 = arith.constant 9.99999974E-6 : f32
    %172 = vector.broadcast %cst_53 : f32 to vector<128x1xf32>
    %173 = arith.addf %169, %172 : vector<128x1xf32>
    %174 = math.rsqrt %173 : vector<128x1xf32>
    %175 = vector.broadcast %174 : vector<128x1xf32> to vector<128x32xf32>
    %176 = arith.mulf %171, %175 : vector<128x32xf32>
    %177 = vector.broadcast %6 : vector<1x32xf32> to vector<128x32xf32>
    %178 = arith.mulf %176, %177 : vector<128x32xf32>
    %179 = vector.broadcast %7 : vector<1x32xf32> to vector<128x32xf32>
    %180 = arith.addf %178, %179 : vector<128x32xf32>
    %181 = arith.truncf %180 : vector<128x32xf32> to vector<128x32xbf16>
    %c0_54 = arith.constant 0 : index
    %c0_55 = arith.constant 0 : index
    %182 = vector.load %arg9[%c0_54, %c0_55] : memref<32x32xbf16, #tpu.memory_space<vmem>>, vector<32x32xbf16>
    %cst_56 = arith.constant dense<0.000000e+00> : vector<128x32xf32>
    %183 = tpu.matmul %181, %182, %cst_56 {dimension_numbers = #tpu.dot_dimension_numbers<[1], [0], [0], [1], [0, 0, 1, 1], [], []>} : vector<128x32xbf16>, vector<32x32xbf16>, vector<128x32xf32> -> vector<128x32xf32>
    %184 = vector.broadcast %8 : vector<1x32xf32> to vector<128x32xf32>
    %185 = arith.addf %183, %184 : vector<128x32xf32>
    %cst_57 = arith.constant 0.000000e+00 : f32
    %186 = vector.broadcast %cst_57 : f32 to vector<128x32xf32>
    %187 = arith.maximumf %185, %186 : vector<128x32xf32>
    %188 = arith.truncf %187 : vector<128x32xf32> to vector<128x32xbf16>
    %c0_58 = arith.constant 0 : index
    %c0_59 = arith.constant 0 : index
    %189 = vector.load %arg10[%c0_58, %c0_59] : memref<32x16xbf16, #tpu.memory_space<vmem>>, vector<32x16xbf16>
    %cst_60 = arith.constant dense<0.000000e+00> : vector<128x16xf32>
    %190 = tpu.matmul %188, %189, %cst_60 {dimension_numbers = #tpu.dot_dimension_numbers<[1], [0], [0], [1], [0, 0, 1, 1], [], []>} : vector<128x32xbf16>, vector<32x16xbf16>, vector<128x16xf32> -> vector<128x16xf32>
    %191 = vector.broadcast %9 : vector<1x16xf32> to vector<128x16xf32>
    %192 = arith.addf %190, %191 : vector<128x16xf32>
    %cst_61 = arith.constant 0.000000e+00 : f32
    %193 = vector.broadcast %cst_61 : f32 to vector<128x16xf32>
    %194 = arith.maximumf %192, %193 : vector<128x16xf32>
    %195 = arith.truncf %194 : vector<128x16xf32> to vector<128x16xbf16>
    %c0_62 = arith.constant 0 : index
    %c0_63 = arith.constant 0 : index
    %196 = vector.load %arg11[%c0_62, %c0_63] : memref<16x8xbf16, #tpu.memory_space<vmem>>, vector<16x8xbf16>
    %cst_64 = arith.constant dense<0.000000e+00> : vector<128x8xf32>
    %197 = tpu.matmul %195, %196, %cst_64 {dimension_numbers = #tpu.dot_dimension_numbers<[1], [0], [0], [1], [0, 0, 1, 1], [], []>} : vector<128x16xbf16>, vector<16x8xbf16>, vector<128x8xf32> -> vector<128x8xf32>
    %198 = vector.broadcast %10 : vector<1x8xf32> to vector<128x8xf32>
    %199 = arith.addf %197, %198 : vector<128x8xf32>
    %200 = arith.negf %199 : vector<128x8xf32>
    %201 = math.exp %200 : vector<128x8xf32>
    %cst_65 = arith.constant 1.000000e+00 : f32
    %202 = vector.broadcast %cst_65 : f32 to vector<128x8xf32>
    %203 = arith.addf %202, %201 : vector<128x8xf32>
    %204 = arith.divf %202, %203 : vector<128x8xf32>
    %c0_66 = arith.constant 0 : index
    %c0_67 = arith.constant 0 : index
    %c0_68 = arith.constant 0 : index
    %c0_69 = arith.constant 0 : index
    %205 = vector.load %arg12[%c0_66, %c0_67, %c0_68, %c0_69] : memref<3x3x32x32xbf16, #tpu.memory_space<vmem>>, vector<1x3x32x32xbf16>
    %206 = vector.shape_cast %205 : vector<1x3x32x32xbf16> to vector<3x32x32xbf16>
    %207 = vector.extract_strided_slice %0 {offsets = [8, 0], sizes = [1, 32], strides = [1, 1]} : vector<14x32xf32> to vector<1x32xf32>
    %c1_i32_70 = arith.constant 1 : i32
    %208 = tpu.dynamic_rotate %180 by %c1_i32_70 dim 0 : vector<128x32xf32>, i32 -> vector<128x32xf32>
    %cst_71 = arith.constant 0.000000e+00 : f32
    %209 = vector.shape_cast %30 : vector<128x1xi1> to vector<128x1xi1>
    %210 = vector.broadcast %209 : vector<128x1xi1> to vector<128x32xi1>
    %211 = vector.broadcast %cst_71 : f32 to vector<128x32xf32>
    %212 = arith.select %210, %208, %211 : vector<128x32xi1>, vector<128x32xf32>
    %c127_i32_72 = arith.constant 127 : i32
    %213 = tpu.dynamic_rotate %180 by %c127_i32_72 dim 0 : vector<128x32xf32>, i32 -> vector<128x32xf32>
    %cst_73 = arith.constant 0.000000e+00 : f32
    %214 = vector.shape_cast %32 : vector<128x1xi1> to vector<128x1xi1>
    %215 = vector.broadcast %214 : vector<128x1xi1> to vector<128x32xi1>
    %216 = vector.broadcast %cst_73 : f32 to vector<128x32xf32>
    %217 = arith.select %215, %213, %216 : vector<128x32xi1>, vector<128x32xf32>
    %218 = arith.truncf %212 : vector<128x32xf32> to vector<128x32xbf16>
    %219 = vector.extract_strided_slice %206 {offsets = [0, 0, 0], sizes = [1, 32, 32], strides = [1, 1, 1]} : vector<3x32x32xbf16> to vector<1x32x32xbf16>
    %220 = vector.shape_cast %219 : vector<1x32x32xbf16> to vector<32x32xbf16>
    %cst_74 = arith.constant dense<0.000000e+00> : vector<128x32xf32>
    %221 = tpu.matmul %218, %220, %cst_74 {dimension_numbers = #tpu.dot_dimension_numbers<[1], [0], [0], [1], [0, 0, 1, 1], [], []>} : vector<128x32xbf16>, vector<32x32xbf16>, vector<128x32xf32> -> vector<128x32xf32>
    %222 = arith.truncf %180 : vector<128x32xf32> to vector<128x32xbf16>
    %223 = vector.extract_strided_slice %206 {offsets = [1, 0, 0], sizes = [1, 32, 32], strides = [1, 1, 1]} : vector<3x32x32xbf16> to vector<1x32x32xbf16>
    %224 = vector.shape_cast %223 : vector<1x32x32xbf16> to vector<32x32xbf16>
    %cst_75 = arith.constant dense<0.000000e+00> : vector<128x32xf32>
    %225 = tpu.matmul %222, %224, %cst_75 {dimension_numbers = #tpu.dot_dimension_numbers<[1], [0], [0], [1], [0, 0, 1, 1], [], []>} : vector<128x32xbf16>, vector<32x32xbf16>, vector<128x32xf32> -> vector<128x32xf32>
    %226 = arith.addf %221, %225 : vector<128x32xf32>
    %227 = arith.truncf %217 : vector<128x32xf32> to vector<128x32xbf16>
    %228 = vector.extract_strided_slice %206 {offsets = [2, 0, 0], sizes = [1, 32, 32], strides = [1, 1, 1]} : vector<3x32x32xbf16> to vector<1x32x32xbf16>
    %229 = vector.shape_cast %228 : vector<1x32x32xbf16> to vector<32x32xbf16>
    %cst_76 = arith.constant dense<0.000000e+00> : vector<128x32xf32>
    %230 = tpu.matmul %227, %229, %cst_76 {dimension_numbers = #tpu.dot_dimension_numbers<[1], [0], [0], [1], [0, 0, 1, 1], [], []>} : vector<128x32xbf16>, vector<32x32xbf16>, vector<128x32xf32> -> vector<128x32xf32>
    %231 = arith.addf %226, %230 : vector<128x32xf32>
    %232 = vector.broadcast %207 : vector<1x32xf32> to vector<128x32xf32>
    %233 = arith.addf %231, %232 : vector<128x32xf32>
    %cst_77 = arith.constant 0.000000e+00 : f32
    %234 = vector.broadcast %cst_77 : f32 to vector<128x32xf32>
    %235 = arith.maximumf %233, %234 : vector<128x32xf32>
    %c1 = arith.constant 1 : index
    %c0_78 = arith.constant 0 : index
    %c0_79 = arith.constant 0 : index
    %c0_80 = arith.constant 0 : index
    %236 = vector.load %arg12[%c1, %c0_78, %c0_79, %c0_80] : memref<3x3x32x32xbf16, #tpu.memory_space<vmem>>, vector<1x3x32x32xbf16>
    %237 = vector.shape_cast %236 : vector<1x3x32x32xbf16> to vector<3x32x32xbf16>
    %238 = vector.extract_strided_slice %0 {offsets = [9, 0], sizes = [1, 32], strides = [1, 1]} : vector<14x32xf32> to vector<1x32xf32>
    %c1_i32_81 = arith.constant 1 : i32
    %239 = tpu.dynamic_rotate %235 by %c1_i32_81 dim 0 : vector<128x32xf32>, i32 -> vector<128x32xf32>
    %cst_82 = arith.constant 0.000000e+00 : f32
    %240 = vector.shape_cast %30 : vector<128x1xi1> to vector<128x1xi1>
    %241 = vector.broadcast %240 : vector<128x1xi1> to vector<128x32xi1>
    %242 = vector.broadcast %cst_82 : f32 to vector<128x32xf32>
    %243 = arith.select %241, %239, %242 : vector<128x32xi1>, vector<128x32xf32>
    %c127_i32_83 = arith.constant 127 : i32
    %244 = tpu.dynamic_rotate %235 by %c127_i32_83 dim 0 : vector<128x32xf32>, i32 -> vector<128x32xf32>
    %cst_84 = arith.constant 0.000000e+00 : f32
    %245 = vector.shape_cast %32 : vector<128x1xi1> to vector<128x1xi1>
    %246 = vector.broadcast %245 : vector<128x1xi1> to vector<128x32xi1>
    %247 = vector.broadcast %cst_84 : f32 to vector<128x32xf32>
    %248 = arith.select %246, %244, %247 : vector<128x32xi1>, vector<128x32xf32>
    %249 = arith.truncf %243 : vector<128x32xf32> to vector<128x32xbf16>
    %250 = vector.extract_strided_slice %237 {offsets = [0, 0, 0], sizes = [1, 32, 32], strides = [1, 1, 1]} : vector<3x32x32xbf16> to vector<1x32x32xbf16>
    %251 = vector.shape_cast %250 : vector<1x32x32xbf16> to vector<32x32xbf16>
    %cst_85 = arith.constant dense<0.000000e+00> : vector<128x32xf32>
    %252 = tpu.matmul %249, %251, %cst_85 {dimension_numbers = #tpu.dot_dimension_numbers<[1], [0], [0], [1], [0, 0, 1, 1], [], []>} : vector<128x32xbf16>, vector<32x32xbf16>, vector<128x32xf32> -> vector<128x32xf32>
    %253 = arith.truncf %235 : vector<128x32xf32> to vector<128x32xbf16>
    %254 = vector.extract_strided_slice %237 {offsets = [1, 0, 0], sizes = [1, 32, 32], strides = [1, 1, 1]} : vector<3x32x32xbf16> to vector<1x32x32xbf16>
    %255 = vector.shape_cast %254 : vector<1x32x32xbf16> to vector<32x32xbf16>
    %cst_86 = arith.constant dense<0.000000e+00> : vector<128x32xf32>
    %256 = tpu.matmul %253, %255, %cst_86 {dimension_numbers = #tpu.dot_dimension_numbers<[1], [0], [0], [1], [0, 0, 1, 1], [], []>} : vector<128x32xbf16>, vector<32x32xbf16>, vector<128x32xf32> -> vector<128x32xf32>
    %257 = arith.addf %252, %256 : vector<128x32xf32>
    %258 = arith.truncf %248 : vector<128x32xf32> to vector<128x32xbf16>
    %259 = vector.extract_strided_slice %237 {offsets = [2, 0, 0], sizes = [1, 32, 32], strides = [1, 1, 1]} : vector<3x32x32xbf16> to vector<1x32x32xbf16>
    %260 = vector.shape_cast %259 : vector<1x32x32xbf16> to vector<32x32xbf16>
    %cst_87 = arith.constant dense<0.000000e+00> : vector<128x32xf32>
    %261 = tpu.matmul %258, %260, %cst_87 {dimension_numbers = #tpu.dot_dimension_numbers<[1], [0], [0], [1], [0, 0, 1, 1], [], []>} : vector<128x32xbf16>, vector<32x32xbf16>, vector<128x32xf32> -> vector<128x32xf32>
    %262 = arith.addf %257, %261 : vector<128x32xf32>
    %263 = vector.broadcast %238 : vector<1x32xf32> to vector<128x32xf32>
    %264 = arith.addf %262, %263 : vector<128x32xf32>
    %cst_88 = arith.constant 0.000000e+00 : f32
    %265 = vector.broadcast %cst_88 : f32 to vector<128x32xf32>
    %266 = arith.maximumf %264, %265 : vector<128x32xf32>
    %c2 = arith.constant 2 : index
    %c0_89 = arith.constant 0 : index
    %c0_90 = arith.constant 0 : index
    %c0_91 = arith.constant 0 : index
    %267 = vector.load %arg12[%c2, %c0_89, %c0_90, %c0_91] : memref<3x3x32x32xbf16, #tpu.memory_space<vmem>>, vector<1x3x32x32xbf16>
    %268 = vector.shape_cast %267 : vector<1x3x32x32xbf16> to vector<3x32x32xbf16>
    %269 = vector.extract_strided_slice %0 {offsets = [10, 0], sizes = [1, 32], strides = [1, 1]} : vector<14x32xf32> to vector<1x32xf32>
    %c1_i32_92 = arith.constant 1 : i32
    %270 = tpu.dynamic_rotate %266 by %c1_i32_92 dim 0 : vector<128x32xf32>, i32 -> vector<128x32xf32>
    %cst_93 = arith.constant 0.000000e+00 : f32
    %271 = vector.shape_cast %30 : vector<128x1xi1> to vector<128x1xi1>
    %272 = vector.broadcast %271 : vector<128x1xi1> to vector<128x32xi1>
    %273 = vector.broadcast %cst_93 : f32 to vector<128x32xf32>
    %274 = arith.select %272, %270, %273 : vector<128x32xi1>, vector<128x32xf32>
    %c127_i32_94 = arith.constant 127 : i32
    %275 = tpu.dynamic_rotate %266 by %c127_i32_94 dim 0 : vector<128x32xf32>, i32 -> vector<128x32xf32>
    %cst_95 = arith.constant 0.000000e+00 : f32
    %276 = vector.shape_cast %32 : vector<128x1xi1> to vector<128x1xi1>
    %277 = vector.broadcast %276 : vector<128x1xi1> to vector<128x32xi1>
    %278 = vector.broadcast %cst_95 : f32 to vector<128x32xf32>
    %279 = arith.select %277, %275, %278 : vector<128x32xi1>, vector<128x32xf32>
    %280 = arith.truncf %274 : vector<128x32xf32> to vector<128x32xbf16>
    %281 = vector.extract_strided_slice %268 {offsets = [0, 0, 0], sizes = [1, 32, 32], strides = [1, 1, 1]} : vector<3x32x32xbf16> to vector<1x32x32xbf16>
    %282 = vector.shape_cast %281 : vector<1x32x32xbf16> to vector<32x32xbf16>
    %cst_96 = arith.constant dense<0.000000e+00> : vector<128x32xf32>
    %283 = tpu.matmul %280, %282, %cst_96 {dimension_numbers = #tpu.dot_dimension_numbers<[1], [0], [0], [1], [0, 0, 1, 1], [], []>} : vector<128x32xbf16>, vector<32x32xbf16>, vector<128x32xf32> -> vector<128x32xf32>
    %284 = arith.truncf %266 : vector<128x32xf32> to vector<128x32xbf16>
    %285 = vector.extract_strided_slice %268 {offsets = [1, 0, 0], sizes = [1, 32, 32], strides = [1, 1, 1]} : vector<3x32x32xbf16> to vector<1x32x32xbf16>
    %286 = vector.shape_cast %285 : vector<1x32x32xbf16> to vector<32x32xbf16>
    %cst_97 = arith.constant dense<0.000000e+00> : vector<128x32xf32>
    %287 = tpu.matmul %284, %286, %cst_97 {dimension_numbers = #tpu.dot_dimension_numbers<[1], [0], [0], [1], [0, 0, 1, 1], [], []>} : vector<128x32xbf16>, vector<32x32xbf16>, vector<128x32xf32> -> vector<128x32xf32>
    %288 = arith.addf %283, %287 : vector<128x32xf32>
    %289 = arith.truncf %279 : vector<128x32xf32> to vector<128x32xbf16>
    %290 = vector.extract_strided_slice %268 {offsets = [2, 0, 0], sizes = [1, 32, 32], strides = [1, 1, 1]} : vector<3x32x32xbf16> to vector<1x32x32xbf16>
    %291 = vector.shape_cast %290 : vector<1x32x32xbf16> to vector<32x32xbf16>
    %cst_98 = arith.constant dense<0.000000e+00> : vector<128x32xf32>
    %292 = tpu.matmul %289, %291, %cst_98 {dimension_numbers = #tpu.dot_dimension_numbers<[1], [0], [0], [1], [0, 0, 1, 1], [], []>} : vector<128x32xbf16>, vector<32x32xbf16>, vector<128x32xf32> -> vector<128x32xf32>
    %293 = arith.addf %288, %292 : vector<128x32xf32>
    %294 = vector.broadcast %269 : vector<1x32xf32> to vector<128x32xf32>
    %295 = arith.addf %293, %294 : vector<128x32xf32>
    %cst_99 = arith.constant 0.000000e+00 : f32
    %296 = vector.broadcast %cst_99 : f32 to vector<128x32xf32>
    %297 = arith.maximumf %295, %296 : vector<128x32xf32>
    %c0_100 = arith.constant 0 : index
    %c0_101 = arith.constant 0 : index
    %c0_102 = arith.constant 0 : index
    %298 = vector.load %arg13[%c0_100, %c0_101, %c0_102] : memref<3x32x16xbf16, #tpu.memory_space<vmem>>, vector<3x32x16xbf16>
    %c1_i32_103 = arith.constant 1 : i32
    %299 = tpu.dynamic_rotate %297 by %c1_i32_103 dim 0 : vector<128x32xf32>, i32 -> vector<128x32xf32>
    %cst_104 = arith.constant 0.000000e+00 : f32
    %300 = vector.shape_cast %30 : vector<128x1xi1> to vector<128x1xi1>
    %301 = vector.broadcast %300 : vector<128x1xi1> to vector<128x32xi1>
    %302 = vector.broadcast %cst_104 : f32 to vector<128x32xf32>
    %303 = arith.select %301, %299, %302 : vector<128x32xi1>, vector<128x32xf32>
    %c127_i32_105 = arith.constant 127 : i32
    %304 = tpu.dynamic_rotate %297 by %c127_i32_105 dim 0 : vector<128x32xf32>, i32 -> vector<128x32xf32>
    %cst_106 = arith.constant 0.000000e+00 : f32
    %305 = vector.shape_cast %32 : vector<128x1xi1> to vector<128x1xi1>
    %306 = vector.broadcast %305 : vector<128x1xi1> to vector<128x32xi1>
    %307 = vector.broadcast %cst_106 : f32 to vector<128x32xf32>
    %308 = arith.select %306, %304, %307 : vector<128x32xi1>, vector<128x32xf32>
    %309 = arith.truncf %303 : vector<128x32xf32> to vector<128x32xbf16>
    %310 = vector.extract_strided_slice %298 {offsets = [0, 0, 0], sizes = [1, 32, 16], strides = [1, 1, 1]} : vector<3x32x16xbf16> to vector<1x32x16xbf16>
    %311 = vector.shape_cast %310 : vector<1x32x16xbf16> to vector<32x16xbf16>
    %cst_107 = arith.constant dense<0.000000e+00> : vector<128x16xf32>
    %312 = tpu.matmul %309, %311, %cst_107 {dimension_numbers = #tpu.dot_dimension_numbers<[1], [0], [0], [1], [0, 0, 1, 1], [], []>} : vector<128x32xbf16>, vector<32x16xbf16>, vector<128x16xf32> -> vector<128x16xf32>
    %313 = arith.truncf %297 : vector<128x32xf32> to vector<128x32xbf16>
    %314 = vector.extract_strided_slice %298 {offsets = [1, 0, 0], sizes = [1, 32, 16], strides = [1, 1, 1]} : vector<3x32x16xbf16> to vector<1x32x16xbf16>
    %315 = vector.shape_cast %314 : vector<1x32x16xbf16> to vector<32x16xbf16>
    %cst_108 = arith.constant dense<0.000000e+00> : vector<128x16xf32>
    %316 = tpu.matmul %313, %315, %cst_108 {dimension_numbers = #tpu.dot_dimension_numbers<[1], [0], [0], [1], [0, 0, 1, 1], [], []>} : vector<128x32xbf16>, vector<32x16xbf16>, vector<128x16xf32> -> vector<128x16xf32>
    %317 = arith.addf %312, %316 : vector<128x16xf32>
    %318 = arith.truncf %308 : vector<128x32xf32> to vector<128x32xbf16>
    %319 = vector.extract_strided_slice %298 {offsets = [2, 0, 0], sizes = [1, 32, 16], strides = [1, 1, 1]} : vector<3x32x16xbf16> to vector<1x32x16xbf16>
    %320 = vector.shape_cast %319 : vector<1x32x16xbf16> to vector<32x16xbf16>
    %cst_109 = arith.constant dense<0.000000e+00> : vector<128x16xf32>
    %321 = tpu.matmul %318, %320, %cst_109 {dimension_numbers = #tpu.dot_dimension_numbers<[1], [0], [0], [1], [0, 0, 1, 1], [], []>} : vector<128x32xbf16>, vector<32x16xbf16>, vector<128x16xf32> -> vector<128x16xf32>
    %322 = arith.addf %317, %321 : vector<128x16xf32>
    %323 = vector.broadcast %11 : vector<1x16xf32> to vector<128x16xf32>
    %324 = arith.addf %322, %323 : vector<128x16xf32>
    %cst_110 = arith.constant 0.000000e+00 : f32
    %325 = vector.broadcast %cst_110 : f32 to vector<128x104xf32>
    %326 = tpu.concatenate %204, %324, %325 in 1 : vector<128x8xf32>, vector<128x16xf32>, vector<128x104xf32> -> vector<128x128xf32>
    %327 = vector.shape_cast %326 : vector<128x128xf32> to vector<8x16x128xf32>
    %c0_111 = arith.constant 0 : index
    %c0_112 = arith.constant 0 : index
    %c0_113 = arith.constant 0 : index
    %328 = vector.load %arg15[%c0_111, %c0_112, %c0_113] : memref<8x16x128xf32, #tpu.memory_space<vmem>>, vector<8x16x128xf32>
    tpu.vector_store %arg15[%c0_111, %c0_112, %c0_113], %327 {strides = array<i32>} : memref<8x16x128xf32, #tpu.memory_space<vmem>>, vector<8x16x128xf32>,
    return
  }
  func.func @transform_0(%arg0: i32) -> (i32, i32, i32) {
    %c0_i32 = arith.constant 0 : i32
    %c0_i32_0 = arith.constant 0 : i32
    %c0_i32_1 = arith.constant 0 : i32
    return %arg0, %c0_i32, %c0_i32_0 : i32, i32, i32
  }
  func.func @transform_1(%arg0: i32) -> (i32, i32, i32) {
    %c0_i32 = arith.constant 0 : i32
    %c0_i32_0 = arith.constant 0 : i32
    %c0_i32_1 = arith.constant 0 : i32
    %c0_i32_2 = arith.constant 0 : i32
    return %c0_i32, %c0_i32_0, %c0_i32_1 : i32, i32, i32
  }
  func.func @transform_2(%arg0: i32) -> (i32, i32) {
    %c0_i32 = arith.constant 0 : i32
    %c0_i32_0 = arith.constant 0 : i32
    %c0_i32_1 = arith.constant 0 : i32
    return %c0_i32, %c0_i32_0 : i32, i32
  }
  func.func @transform_3(%arg0: i32) -> (i32, i32) {
    %c0_i32 = arith.constant 0 : i32
    %c0_i32_0 = arith.constant 0 : i32
    %c0_i32_1 = arith.constant 0 : i32
    return %c0_i32, %c0_i32_0 : i32, i32
  }
  func.func @transform_4(%arg0: i32) -> (i32, i32) {
    %c0_i32 = arith.constant 0 : i32
    %c0_i32_0 = arith.constant 0 : i32
    %c0_i32_1 = arith.constant 0 : i32
    return %c0_i32, %c0_i32_0 : i32, i32
  }
  func.func @transform_5(%arg0: i32) -> (i32, i32) {
    %c0_i32 = arith.constant 0 : i32
    %c0_i32_0 = arith.constant 0 : i32
    %c0_i32_1 = arith.constant 0 : i32
    return %c0_i32, %c0_i32_0 : i32, i32
  }
  func.func @transform_6(%arg0: i32) -> (i32, i32) {
    %c0_i32 = arith.constant 0 : i32
    %c0_i32_0 = arith.constant 0 : i32
    %c0_i32_1 = arith.constant 0 : i32
    return %c0_i32, %c0_i32_0 : i32, i32
  }
  func.func @transform_7(%arg0: i32) -> (i32, i32) {
    %c0_i32 = arith.constant 0 : i32
    %c0_i32_0 = arith.constant 0 : i32
    %c0_i32_1 = arith.constant 0 : i32
    return %c0_i32, %c0_i32_0 : i32, i32
  }
  func.func @transform_8(%arg0: i32) -> (i32, i32) {
    %c0_i32 = arith.constant 0 : i32
    %c0_i32_0 = arith.constant 0 : i32
    %c0_i32_1 = arith.constant 0 : i32
    return %c0_i32, %c0_i32_0 : i32, i32
  }
  func.func @transform_9(%arg0: i32) -> (i32, i32) {
    %c0_i32 = arith.constant 0 : i32
    %c0_i32_0 = arith.constant 0 : i32
    %c0_i32_1 = arith.constant 0 : i32
    return %c0_i32, %c0_i32_0 : i32, i32
  }
  func.func @transform_10(%arg0: i32) -> (i32, i32) {
    %c0_i32 = arith.constant 0 : i32
    %c0_i32_0 = arith.constant 0 : i32
    %c0_i32_1 = arith.constant 0 : i32
    return %c0_i32, %c0_i32_0 : i32, i32
  }
  func.func @transform_11(%arg0: i32) -> (i32, i32, i32, i32) {
    %c0_i32 = arith.constant 0 : i32
    %c0_i32_0 = arith.constant 0 : i32
    %c0_i32_1 = arith.constant 0 : i32
    %c0_i32_2 = arith.constant 0 : i32
    %c0_i32_3 = arith.constant 0 : i32
    return %c0_i32, %c0_i32_0, %c0_i32_1, %c0_i32_2 : i32, i32, i32, i32
  }
  func.func @transform_12(%arg0: i32) -> (i32, i32, i32) {
    %c0_i32 = arith.constant 0 : i32
    %c0_i32_0 = arith.constant 0 : i32
    %c0_i32_1 = arith.constant 0 : i32
    %c0_i32_2 = arith.constant 0 : i32
    return %c0_i32, %c0_i32_0, %c0_i32_1 : i32, i32, i32
  }
  func.func @transform_13(%arg0: i32) -> (i32, i32) {
    %c0_i32 = arith.constant 0 : i32
    %c0_i32_0 = arith.constant 0 : i32
    %c0_i32_1 = arith.constant 0 : i32
    return %c0_i32, %c0_i32_0 : i32, i32
  }
  func.func @transform_14(%arg0: i32) -> (i32, i32, i32) {
    %c0_i32 = arith.constant 0 : i32
    %c0_i32_0 = arith.constant 0 : i32
    %c0_i32_1 = arith.constant 0 : i32
    return %arg0, %c0_i32, %c0_i32_0 : i32, i32, i32
  }
}

</mosaic_0001>

<bundles_post_ra>
// kernel: tpu_custom_call.1
= control target key start
LH: loop header
LB: loop body
LE: loop exit
PB: predicated region body
PF: predicated region fallthrough
CT: control target
= control target key end

     0   :  { %v51_v3 = vlaneseq  ;;  %v17844_v22 = vmov 0  ;;  %s17688_s0 = inlined_call_operand.vmem [shape: f32[8,16,64], index: 0, kind: input, shape index: {}]   ;;  %s17689_s1 = inlined_call_operand.vmem [shape: bf16[3,64,32], index: 1, kind: input, shape index: {}]   ;;  %s17690_s2 = inlined_call_operand.vmem [shape: bf16[32,96], index: 2, kind: input, shape index: {}]   ;;  %s17691_s3 = inlined_call_operand.vmem [shape: f32[1,96], index: 3, kind: input, shape index: {}]   ;;  %s17692_s4 = inlined_call_operand.vmem [shape: bf16[32,32], index: 4, kind: input, shape index: {}]   ;;  %s17693_s5 = inlined_call_operand.vmem [shape: bf16[32,2048], index: 5, kind: input, shape index: {}]   ;;  %s17694_s6 = inlined_call_operand.vmem [shape: f32[1,2048], index: 6, kind: input, shape index: {}]   ;;  %s17695_s7 = inlined_call_operand.vmem [shape: bf16[2048,32], index: 7, kind: input, shape index: {}]   ;;  %s17696_s8 = inlined_call_operand.vmem [shape: bf16[32,32], index: 8, kind: input, shape index: {}]   ;;  %s17697_s9 = inlined_call_operand.vmem [shape: bf16[32,16], index: 9, kind: input, shape index: {}]   ;;  %s17698_s10 = inlined_call_operand.vmem [shape: bf16[16,8], index: 10, kind: input, shape index: {}]   ;;  %s17699_s11 = inlined_call_operand.vmem [shape: bf16[3,3,32,32], index: 11, kind: input, shape index: {}]   ;;  %s17700_s12 = inlined_call_operand.vmem [shape: bf16[3,32,16], index: 12, kind: input, shape index: {}]   ;;  %s17701_s13 = inlined_call_operand.vmem [shape: f32[14,32], index: 13, kind: input, shape index: {}]   ;;  %s17702_s14 = inlined_call_operand.hbm [shape: f32[8,16,128], index: 14, kind: output, shape index: {}]  }
   0x1   :  { %v11395_v0 = vld [vmem:[%s17689_s1 + $0x38] sm:$0xff]  ;;  %v11394_v4 = vld [vmem:[%s17689_s1 + $0x30] sm:$0xff]  ;;  %v12262_v8 = vld [vmem:[%s17688_s0] sm:$0xff] }
   0x2   :  { %v11391_v1 = vld [vmem:[%s17689_s1 + $0x18] sm:$0xff]  ;;  %563 = vmatpush.bf16.msra.mxu0 %v11395_v0  ;;  %v11390_v5 = vld [vmem:[%s17689_s1 + $0x10] sm:$0xff]  ;;  %v12254_v6 = vshrl.u32 %v51_v3, 7  ;;  %v293_v9 = vld [vmem:[%s17688_s0 + $0x8] sm:$0xff]  ;;  %v332_v13 = vrot.slane %v12262_v8, 7  ;;  %v413_v19 = vrot.slane %v12262_v8, 1 }
   0x3   :  { %v11399_v2 = vld [vmem:[%s17689_s1 + $0x58] sm:$0xff]  ;;  %660 = vmatpush.bf16.msra.mxu1 %v11391_v1  ;;  %v11398_v7 = vld [vmem:[%s17689_s1 + $0x50] sm:$0xff]  ;;  %v11393_v12 = vld [vmem:[%s17689_s1 + $0x28] sm:$0xff]  ;;  %v414_v14 = vrot.slane %v293_v9, 1  ;;  %v333_v18 = vrot.slane %v293_v9, 7 }
   0x4   :  { %17843 = vst [vmem:[#allocation5_spill] sm:$0xff] %v12254_v6  ;;  %765 = vmatpush.bf16.msra.mxu2 %v11399_v2  ;;  %v72_v10 = vand.u32 15, %v12254_v6  ;;  %v12271_v11 = vld [vmem:[%s17688_s0 + $0x78] sm:$0xff]  ;;  %vm17703_vm0 = vcmp.lt.s32.totalorder %v12254_v6, 1  ;;  %vm17808_vm1 = vcmp.lt.s32.totalorder %v12254_v6, 7  ;;  %v294_v15 = vld [vmem:[%s17688_s0 + $0x10] sm:$0xff] }
   0x5   :  { %v11389_v16 = vld [vmem:[%s17689_s1 + $0x8] sm:$0xff]  ;;  %v347_v20 = vrot.slane %v12271_v11, 7  ;;  %v53_v21 = vadd.s32 8, %v12254_v6  ;;  %v415_v23 = vrot.slane %v294_v15, 1 }
   0x6   :  { %564 = vmatpush.bf16.msra.mxu0 %v11394_v4  ;;  %v11397_v17 = vld [vmem:[%s17689_s1 + $0x48] sm:$0xff]  ;;  %vm12291_vm2 = vcmp.ne.s32.totalorder %v72_v10, 0 }
   0x7   :  { %661 = vmatpush.bf16.msra.mxu1 %v11390_v5  ;;  %v17845_v22 = vsel %vm12291_vm2, 4294967295, %v17844_v22 }
   0x8   :  { %766 = vmatpush.bf16.msra.mxu2 %v11398_v7  ;;  %17846 = vst [vmem:[#allocation6_spill] sm:$0xff] %v17845_v22 }
   0x9   :  { %19 = vsyncpa [#allocation3], 0  ;;  %v364_v24 = vsel %vm17703_vm0, %v347_v20, %v332_v13  ;;  %v79_v25 = vand.u32 15, %v53_v21  ;;  %v443_v26 = vsel %vm17808_vm1, %v414_v14, %v415_v23  ;;  %v11392_v27 = vld [vmem:[%s17689_s1 + $0x20] sm:$0xff]  ;;  %v363_v29 = vsel %vm17703_vm0, %v332_v13, %v333_v18  ;;  %v295_v40 = vld [vmem:[%s17688_s0 + $0x18] sm:$0xff]  ;;  %s12147_s25 = smov 120  }
   0xa   :  { %565 = vmatpush.bf16.msra.mxu0 %v11393_v12  ;;  %v11388_v28 = vld [vmem:[%s17689_s1] sm:$0xff]  ;;  %v397_v30 = vsel %vm12291_vm2, %v364_v24, 0.0  ;;  %v17847_v31 = vmov 0  ;;  %v444_v33 = vsel %vm17808_vm1, %v413_v19, %v414_v14  ;;  %v502_v35 = vpack.c.bf16 %v293_v9, %v12262_v8  ;;  %v297_v61 = vld [vmem:[%s17688_s0 + $0x28] sm:$0xff]  ;;  %v298_v62 = vld [vmem:[%s17688_s0 + $0x30] sm:$0xff]  ;;  %s12148_s26 = smov 88  }
   0xb   :  { %662 = vmatpush.bf16.msra.mxu1 %v11389_v16  ;;  %vm12311_vm3 = vcmp.ne.s32.totalorder %v79_v25, 15  ;;  %v11396_v32 = vld [vmem:[%s17689_s1 + $0x40] sm:$0xff]  ;;  %v494_v36 = vpack.c.bf16 %v363_v29, %v397_v30  ;;  %vm534_vm4 = vcmask 523264   ;;  %v54_v38 = vadd.s32 16, %v12254_v6  ;;  %v299_v24 = vld [vmem:[%s17688_s0 + $0x38] sm:$0xff]  ;;  %s12150_s27 = smov 64  }
   0xc   :  { %v17848_v31 = vsel %vm12311_vm3, 4294967295, %v17847_v31  ;;  %767 = vmatpush.bf16.msra.mxu2 %v11397_v17  ;;  %v479_v34 = vsel %vm12311_vm3, %v443_v26, 0.0  ;;  %v55_v39 = vadd.s32 24, %v12254_v6  ;;  %v296_v41 = vld [vmem:[%s17688_s0 + $0x20] sm:$0xff]  ;;  %v334_v43 = vrot.slane %v294_v15, 7  ;;  %s12151_s28 = smov 80  }
   0xd   :  { %17849 = vst [vmem:[#allocation7_spill] sm:$0xff] %v17848_v31  ;;  %v705_v37 = vpack.c.bf16 %v479_v34, %v444_v33  ;;  %v86_v42 = vand.u32 15, %v54_v38  ;;  %v416_v45 = vrot.slane %v295_v40, 1  ;;  %v417_v46 = vrot.slane %v296_v41, 1  ;;  %v300_v25 = vld [vmem:[%s17688_s0 + $0x40] sm:$0xff]  ;;  %s12152_s1 = smov 112  }
   0xe   :  { %566 = vmatpush.bf16.msra.mxu0 %v11392_v27  ;;  %v93_v44 = vand.u32 15, %v55_v39  ;;  %v335_v47 = vrot.slane %v295_v40, 7  ;;  %v17850_v48 = vmov 0  ;;  %v362_v49 = vsel %vm17703_vm0, %v333_v18, %v334_v43  ;;  %s12153_s29 = smov 56   ;;  %s12154_s30 = smov 104  }
   0xf   :  { %663 = vmatpush.bf16.msra.mxu1 %v11388_v28  ;;  %vm12336_vm5 = vcmp.ne.s32.totalorder %v86_v42, 0  ;;  %v17853_v50 = vmov 0  ;;  %v441_v51 = vsel %vm17808_vm1, %v416_v45, %v417_v46  ;;  %v442_v54 = vsel %vm17808_vm1, %v415_v23, %v416_v45  ;;  %s12155_s15 = smov 72   ;;  %s12156_s16 = smov 48  }
  0x10   :  { %768 = vmatpush.bf16.msra.mxu2 %v11396_v32  ;;  %v17851_v48 = vsel %vm12336_vm5, 4294967295, %v17850_v48  ;;  %vm12342_vm6 = vcmp.ne.s32.totalorder %v93_v44, 15  ;;  %v361_v52 = vsel %vm17703_vm0, %v334_v43, %v335_v47  ;;  %v399_v53 = vsel %vm12336_vm5, %v362_v49, 0.0  ;;  %s12157_s17 = smov 40   ;;  %s12158_s18 = smov 8  }
  0x11   :  { %10192 = vmatmul.msk.bf16.vlgmr.msra.gmra.mxu0 %vm534_vm4, %v502_v35  ;;  %17852 = vst [vmem:[#allocation8_spill] sm:$0xff] %v17851_v48  ;;  %v17854_v50 = vsel %vm12342_vm6, 4294967295, %v17853_v50  ;;  %v481_v55 = vsel %vm12342_vm6, %v441_v51, 0.0  ;;  %v503_v56 = vpack.c.bf16 %v295_v40, %v294_v15  ;;  %v495_v57 = vpack.c.bf16 %v361_v52, %v399_v53  ;;  %s12160_s19 = smov 24   ;;  %s12162_s20 = smov [#allocation2]  }
  0x12   :  { %10216 = vmatmul.msk.bf16.vlgmr.msra.gmra.mxu1 %vm534_vm4, %v494_v36  ;;  %17855 = vst [vmem:[#allocation9_spill] sm:$0xff] %v17854_v50  ;;  %v706_v58 = vpack.c.bf16 %v481_v55, %v442_v54  ;;  %v56_v59 = vadd.s32 32, %v12254_v6  ;;  %v57_v60 = vadd.s32 40, %v12254_v6  ;;  %v336_v0 = vrot.slane %v296_v41, 7  ;;  %s10162_s21 = sshll.u32 %s12162_s20, 4  ;;  %s10163_s21 = int_to_ptr.vmem [resolvable:$true] %s10162_s21 }
  0x13   :  { %10240 = vmatmul.msk.bf16.vlgmr.msra.gmra.mxu2 %vm534_vm4, %v705_v37  ;;  %v418_v2 = vrot.slane %v297_v61, 1  ;;  %v419_v3 = vrot.slane %v298_v62, 1  ;;  %v337_v4 = vrot.slane %v297_v61, 7  ;;  %v17856_v5 = vmov 0 }
  0x14   :  { %v100_v63 = vand.u32 15, %v56_v59  ;;  %v107_v1 = vand.u32 15, %v57_v60  ;;  %v360_v7 = vsel %vm17703_vm0, %v335_v47, %v336_v0  ;;  %v17859_v9 = vmov 0  ;;  %v302_v47 = vld [vmem:[%s17688_s0 + $0x50] sm:$0xff] }
  0x15   :  { %v439_v10 = vsel %vm17808_vm1, %v418_v2, %v419_v3  ;;  %v359_v12 = vsel %vm17703_vm0, %v336_v0, %v337_v4  ;;  %v440_v14 = vsel %vm17808_vm1, %v417_v46, %v418_v2  ;;  %v504_v16 = vpack.c.bf16 %v297_v61, %v296_v41  ;;  %v301_v46 = vld [vmem:[%s17688_s0 + $0x48] sm:$0xff] }
  0x16   :  { %vm12367_vm7 = vcmp.ne.s32.totalorder %v100_v63, 0  ;;  %vm12373_vm8 = vcmp.ne.s32.totalorder %v107_v1, 15  ;;  %v58_v21 = vadd.s32 48, %v12254_v6  ;;  %v59_v23 = vadd.s32 56, %v12254_v6 }
  0x17   :  { %v17857_v5 = vsel %vm12367_vm7, 4294967295, %v17856_v5  ;;  %v17860_v9 = vsel %vm12373_vm8, 4294967295, %v17859_v9  ;;  %v401_v13 = vsel %vm12367_vm7, %v360_v7, 0.0  ;;  %v483_v15 = vsel %vm12373_vm8, %v439_v10, 0.0  ;;  %v303_v7 = vld [vmem:[%s17688_s0 + $0x58] sm:$0xff]  ;;  %v304_v10 = vld [vmem:[%s17688_s0 + $0x60] sm:$0xff] }
  0x18   :  { %17858 = vst [vmem:[#allocation10_spill] sm:$0xff] %v17857_v5  ;;  %v496_v17 = vpack.c.bf16 %v359_v12, %v401_v13  ;;  %v707_v18 = vpack.c.bf16 %v483_v15, %v440_v14  ;;  %v114_v26 = vand.u32 15, %v58_v21  ;;  %v338_v27 = vrot.slane %v298_v62, 7 }
  0x19   :  { %17861 = vst [vmem:[#allocation11_spill] sm:$0xff] %v17860_v9  ;;  %v121_v28 = vand.u32 15, %v59_v23  ;;  %v420_v29 = vrot.slane %v299_v24, 1  ;;  %v421_v30 = vrot.slane %v300_v25, 1  ;;  %v339_v32 = vrot.slane %v299_v24, 7 }
  0x1a   :  { %vm12398_vm9 = vcmp.ne.s32.totalorder %v114_v26, 0  ;;  %v17862_v33 = vmov 0  ;;  %v358_v34 = vsel %vm17703_vm0, %v337_v4, %v338_v27  ;;  %v17865_v35 = vmov 0 }
  0x1b   :  { %v17863_v33 = vsel %vm12398_vm9, 4294967295, %v17862_v33  ;;  %vm12404_vm10 = vcmp.ne.s32.totalorder %v121_v28, 15  ;;  %v437_v36 = vsel %vm17808_vm1, %v420_v29, %v421_v30  ;;  %v357_v37 = vsel %vm17703_vm0, %v338_v27, %v339_v32 }
  0x1c   :  { %17864 = vst [vmem:[#allocation12_spill] sm:$0xff] %v17863_v33  ;;  %v17866_v35 = vsel %vm12404_vm10, 4294967295, %v17865_v35  ;;  %v403_v38 = vsel %vm12398_vm9, %v358_v34, 0.0  ;;  %v438_v39 = vsel %vm17808_vm1, %v419_v3, %v420_v29  ;;  %v485_v40 = vsel %vm12404_vm10, %v437_v36, 0.0  ;;  %v305_v36 = vld [vmem:[%s17688_s0 + $0x68] sm:$0xff] }
  0x1d   :  { %17867 = vst [vmem:[#allocation13_spill] sm:$0xff] %v17866_v35  ;;  %v505_v41 = vpack.c.bf16 %v299_v24, %v298_v62  ;;  %v497_v42 = vpack.c.bf16 %v357_v37, %v403_v38  ;;  %v708_v43 = vpack.c.bf16 %v485_v40, %v438_v39  ;;  %v60_v44 = vadd.s32 64, %v12254_v6  ;;  %v306_v37 = vld [vmem:[%s17688_s0 + $0x70] sm:$0xff]  ;;  %s12159_s0 = smov 16  }
  0x1e   :  { %v61_v45 = vadd.s32 72, %v12254_v6  ;;  %v340_v51 = vrot.slane %v300_v25, 7  ;;  %v422_v53 = vrot.slane %v301_v46, 1  ;;  %v423_v54 = vrot.slane %v302_v47, 1 }
  0x1f   :  { %v128_v49 = vand.u32 15, %v60_v44  ;;  %v341_v55 = vrot.slane %v301_v46, 7  ;;  %v506_v0 = vpack.c.bf16 %v301_v46, %v300_v25  ;;  %v62_v3 = vadd.s32 80, %v12254_v6 }
  0x20   :  { %v135_v52 = vand.u32 15, %v61_v45  ;;  %v435_v59 = vsel %vm17808_vm1, %v422_v53, %v423_v54  ;;  %v436_v62 = vsel %vm17808_vm1, %v421_v30, %v422_v53  ;;  %v63_v4 = vadd.s32 88, %v12254_v6 }
  0x21   :  { %10193 = vmatmul.msk.bf16.gmra.mxu0 %vm534_vm4, %v503_v56  ;;  %vm12429_vm11 = vcmp.ne.s32.totalorder %v128_v49, 0  ;;  %v17868_v56 = vmov 0  ;;  %v355_v60 = vsel %vm17703_vm0, %v340_v51, %v341_v55  ;;  %v142_v12 = vand.u32 15, %v62_v3 }
  0x22   :  { %10217 = vmatmul.msk.bf16.gmra.mxu1 %vm534_vm4, %v495_v57  ;;  %v17869_v56 = vsel %vm12429_vm11, 4294967295, %v17868_v56  ;;  %v356_v57 = vsel %vm17703_vm0, %v339_v32, %v340_v51  ;;  %vm12435_vm12 = vcmp.ne.s32.totalorder %v135_v52, 15  ;;  %v342_v13 = vrot.slane %v302_v47, 7 }
  0x23   :  { %10241 = vmatmul.msk.bf16.gmra.mxu2 %vm534_vm4, %v706_v58  ;;  %17870 = vst [vmem:[#allocation14_spill] sm:$0xff] %v17869_v56  ;;  %v17871_v58 = vmov 0  ;;  %v405_v61 = vsel %vm12429_vm11, %v356_v57, 0.0  ;;  %v487_v63 = vsel %vm12435_vm12, %v435_v59, 0.0  ;;  %v149_v14 = vand.u32 15, %v63_v4 }
  0x24   :  { %v17872_v58 = vsel %vm12435_vm12, 4294967295, %v17871_v58  ;;  %v498_v1 = vpack.c.bf16 %v355_v60, %v405_v61  ;;  %v709_v2 = vpack.c.bf16 %v487_v63, %v436_v62  ;;  %v424_v15 = vrot.slane %v303_v7, 1  ;;  %v11401_v60 = vld [vmem:[%s17690_s2 + $0x8] sm:$0xff]  ;;  %v11400_v61 = vld [vmem:[%s17690_s2] sm:$0xff] }
  0x25   :  { %17873 = vst [vmem:[#allocation15_spill] sm:$0xff] %v17872_v58  ;;  %vm12460_vm13 = vcmp.ne.s32.totalorder %v142_v12, 0  ;;  %v354_v21 = vsel %vm17703_vm0, %v341_v55, %v342_v13  ;;  %vm12466_vm14 = vcmp.ne.s32.totalorder %v149_v14, 15  ;;  %v17877_v23 = vmov 0  ;;  %918 = vmatpush.bf16.msra.mxu3 %v11401_v60 }
  0x26   :  { %v17878_v23 = vsel %vm12466_vm14, 4294967295, %v17877_v23  ;;  %v407_v26 = vsel %vm12460_vm13, %v354_v21, 0.0  ;;  %v434_v27 = vsel %vm17808_vm1, %v423_v54, %v424_v15  ;;  %v507_v29 = vpack.c.bf16 %v303_v7, %v302_v47 }
  0x27   :  { %17879 = vst [vmem:[#allocation17_spill] sm:$0xff] %v17878_v23  ;;  %v65_v34 = vadd.s32 104, %v12254_v6  ;;  %v426_v39 = vrot.slane %v305_v36, 1  ;;  %v427_v40 = vrot.slane %v306_v37, 1  ;;  %v344_v49 = vrot.slane %v304_v10, 7 }
  0x28   :  { %v345_v51 = vrot.slane %v305_v36, 7  ;;  %v17883_v52 = vmov 0  ;;  %vm17886_vm2 = vcmp.lt.s32.totalorder %v12254_v6, 1  ;;  %v508_v57 = vpack.c.bf16 %v305_v36, %v304_v10 }
  0x29   :  { %v163_v38 = vand.u32 15, %v65_v34  ;;  %919 = vmatpush.bf16.msra.mxu3 %v11400_v61  ;;  %v67_v62 = vadd.s32 120, %v12254_v6  ;;  %v17888_v3 = vmov 0  ;;  %v509_v21 = vpack.c.bf16 %v12271_v11, %v306_v37 }
  0x2b   :  { %vm12490_vm15 = vcmp.ne.s32.totalorder %v163_v38, 15  ;;  %v177_v63 = vand.u32 15, %v67_v62 }
  0x31   :  { %10194 = vmatmul.msk.bf16.gmra.mxu0 %vm534_vm4, %v504_v16  ;;  %v425_v16 = vrot.slane %v304_v10, 1 }
  0x32   :  { %10218 = vmatmul.msk.bf16.gmra.mxu1 %vm534_vm4, %v496_v17  ;;  %v343_v17 = vrot.slane %v303_v7, 7  ;;  %v66_v7 = vadd.s32 112, %v12254_v6 }
  0x33   :  { %10242 = vmatmul.msk.bf16.gmra.mxu2 %vm534_vm4, %v707_v18  ;;  %v17874_v18 = vmov 0  ;;  %v433_v24 = vsel %vm17808_vm1, %v424_v15, %v425_v16  ;;  %v432_v44 = vsel %vm17808_vm1, %v425_v16, %v426_v39  ;;  %v346_v15 = vrot.slane %v306_v37, 7 }
  0x34   :  { %v17875_v18 = vsel %vm12460_vm13, 4294967295, %v17874_v18  ;;  %v353_v25 = vsel %vm17703_vm0, %v342_v13, %v343_v17  ;;  %v489_v28 = vsel %vm12466_vm14, %v433_v24, 0.0  ;;  %v352_v53 = vsel %vm17886_vm2, %v343_v17, %v344_v49  ;;  %vm17887_vm14 = vmmov %vm17886_vm2 }
  0x35   :  { %17876 = vst [vmem:[#allocation16_spill] sm:$0xff] %v17875_v18  ;;  %v499_v30 = vpack.c.bf16 %v353_v25, %v407_v26  ;;  %v710_v32 = vpack.c.bf16 %v489_v28, %v434_v27  ;;  %v351_v54 = vsel %vm17887_vm14, %v344_v49, %v345_v51  ;;  %vm12522_vm2 = vcmp.ne.s32.totalorder %v177_v63, 15 }
  0x36   :  { %v17889_v3 = vsel %vm12522_vm2, 4294967295, %v17888_v3  ;;  %v170_v14 = vand.u32 15, %v66_v7  ;;  %v17891_v16 = vmov 0 }
  0x37   :  { %17890 = vst [vmem:[#allocation20_spill] sm:$0xff] %v17889_v3 }
  0x38   :  { %vm12536_vm14 = vcmp.ne.s32.totalorder %v170_v14, 0 }
  0x39   :  { %v17892_v16 = vsel %vm12536_vm14, 4294967295, %v17891_v16 }
  0x3a   :  { %17893 = vst [vmem:[#allocation21_spill] sm:$0xff] %v17892_v16 }
  0x41   :  { %10195 = vmatmul.msk.bf16.gmra.mxu0 %vm534_vm4, %v505_v41  ;;  %v17880_v41 = vmov 0 }
  0x42   :  { %10219 = vmatmul.msk.bf16.gmra.mxu1 %vm534_vm4, %v497_v42  ;;  %v17881_v41 = vsel %vm12490_vm15, 4294967295, %v17880_v41  ;;  %v431_v42 = vsel %vm17808_vm1, %v426_v39, %v427_v40 }
  0x43   :  { %10243 = vmatmul.msk.bf16.gmra.mxu2 %vm534_vm4, %v708_v43  ;;  %17882 = vst [vmem:[#allocation18_spill] sm:$0xff] %v17881_v41  ;;  %v64_v43 = vadd.s32 96, %v12254_v6  ;;  %v491_v45 = vsel %vm12490_vm15, %v431_v42, 0.0  ;;  %vm17894_vm15 = vcmp.lt.s32.totalorder %v12254_v6, 1 }
  0x44   :  { %v711_v46 = vpack.c.bf16 %v491_v45, %v432_v44  ;;  %v350_v8 = vsel %vm17894_vm15, %v345_v51, %v346_v15 }
  0x45   :  { %v156_v47 = vand.u32 15, %v64_v43  ;;  %v411_v17 = vsel %vm12536_vm14, %v350_v8, 0.0 }
  0x47   :  { %vm12502_vm0 = vcmp.ne.s32.totalorder %v156_v47, 0 }
  0x48   :  { %v17884_v52 = vsel %vm12502_vm0, 4294967295, %v17883_v52  ;;  %v409_v55 = vsel %vm12502_vm0, %v352_v53, 0.0  ;;  %vm17895_vm0 = vmmov %vm17894_vm15  ;;  %vm17811_vm15 = vcmask 130048  }
  0x49   :  { %17885 = vst [vmem:[#allocation19_spill] sm:$0xff] %v17884_v52  ;;  %v500_v59 = vpack.c.bf16 %v351_v54, %v409_v55 }
  0x51   :  { %10196 = vmatmul.msk.bf16.gmra.mxu0 %vm534_vm4, %v506_v0  ;;  %v428_v0 = vrot.slane %v12271_v11, 1 }
  0x52   :  { %10220 = vmatmul.msk.bf16.gmra.mxu1 %vm534_vm4, %v498_v1 }
  0x53   :  { %10244 = vmatmul.msk.bf16.gmra.mxu2 %vm534_vm4, %v709_v2  ;;  %v445_v4 = vsel %vm17808_vm1, %v428_v0, %v413_v19  ;;  %v430_v10 = vsel %vm17808_vm1, %v427_v40, %v428_v0  ;;  %v349_v19 = vsel %vm17895_vm0, %v346_v15, %v347_v20  ;;  %vm17836_vm0 = vcmask 261120  }
  0x54   :  { %v493_v12 = vsel %vm12522_vm2, %v445_v4, 0.0  ;;  %v501_v24 = vpack.c.bf16 %v349_v19, %v411_v17  ;;  %vm17809_vm1 = vcmask 195584  }
  0x55   :  { %v712_v13 = vpack.c.bf16 %v493_v12, %v430_v10 }
  0x61   :  { %10197 = vmatmul.msk.bf16.gmra.mxu0 %vm534_vm4, %v507_v29  ;;  %v49_v29 = vld [vmem:[%s17701_s13] sm:$0xff] }
  0x62   :  { %10221 = vmatmul.msk.bf16.gmra.mxu1 %vm534_vm4, %v499_v30  ;;  %v12554_v20 = vperm.slane %v49_v29, 0 }
  0x63   :  { %10245 = vmatmul.msk.bf16.gmra.mxu2 %vm534_vm4, %v710_v32 }
  0x71   :  { %10198 = vmatmul.msk.bf16.gmra.mxu0 %vm534_vm4, %v508_v57 }
  0x72   :  { %10222 = vmatmul.msk.bf16.gmra.mxu1 %vm534_vm4, %v500_v59 }
  0x73   :  { %10246 = vmatmul.msk.bf16.gmra.mxu2 %vm534_vm4, %v711_v46 }
  0x81   :  { %10199 = vmatmul.msk.bf16.gmra.mxu0 %vm534_vm4, %v509_v21 }
  0x82   :  { %10223 = vmatmul.msk.bf16.gmra.mxu1 %vm534_vm4, %v501_v24 }
  0x83   :  { %10247 = vmatmul.msk.bf16.gmra.mxu2 %vm534_vm4, %v712_v13  ;;  %vm17810_vm4 = vcmask 64512  }
  0x8e   :  { %v568_v1 = vpop.f32.mrf.mxu0 }
  0x8f   :  { %v665_v2 = vpop.f32.mrf.mxu1 }
  0x90   :  { %v666_v26 = vadd.f32 %v665_v2, %v568_v1 }
  0x96   :  { %v770_v25 = vpop.f32.mrf.mxu2  ;;  %v570_v27 = vpop.f32.mrf.mxu0 }
  0x97   :  { %v667_v28 = vpop.f32.mrf.mxu1  ;;  %v810_v30 = vadd.f32 %v770_v25, %v666_v26 }
  0x98   :  { %v668_v32 = vadd.f32 %v667_v28, %v570_v27 }
  0x99   :  { %v12557_v11 = vadd.f32 %v12554_v20, %v810_v30 }
  0x9b   :  { %17896 = vst [vmem:[#allocation22_spill] sm:$0xff] %v12557_v11  ;;  %v17727_v40 = vmax.f32 %v12557_v11, 0.0 }
  0x9e   :  { %v772_v34 = vpop.f32.mrf.mxu2  ;;  %v573_v37 = vpop.f32.mrf.mxu0 }
  0x9f   :  { %v811_v36 = vadd.f32 %v772_v34, %v668_v32  ;;  %v670_v38 = vpop.f32.mrf.mxu1 }
  0xa0   :  { %v671_v43 = vadd.f32 %v670_v38, %v573_v37 }
  0xa1   :  { %v12560_v39 = vadd.f32 %v12554_v20, %v811_v36 }
  0xa3   :  { %17897 = vst [vmem:[#allocation23_spill] sm:$0xff] %v12560_v39  ;;  %v17726_v42 = vmax.f32 %v12560_v39, 0.0 }
  0xa5   :  { %v859_v44 = vpack.c.bf16 %v17726_v42, %v17727_v40 }
  0xa6   :  { %v775_v45 = vpop.f32.mrf.mxu2  ;;  %v575_v46 = vpop.f32.mrf.mxu0 }
  0xa7   :  { %10256 = vmatmul.msk.bf16.vlgmr.msra.gmra.mxu3 %vm17836_vm0, %v859_v44  ;;  %v672_v47 = vpop.f32.mrf.mxu1  ;;  %v812_v49 = vadd.f32 %v775_v45, %v671_v43 }
  0xa8   :  { %v673_v51 = vadd.f32 %v672_v47, %v575_v46 }
  0xa9   :  { %v12570_v53 = vadd.f32 %v12554_v20, %v812_v49 }
  0xab   :  { %17898 = vst [vmem:[#allocation24_spill] sm:$0xff] %v12570_v53  ;;  %v17725_v60 = vmax.f32 %v12570_v53, 0.0 }
  0xae   :  { %v777_v54 = vpop.f32.mrf.mxu2  ;;  %v578_v57 = vpop.f32.mrf.mxu0 }
  0xaf   :  { %v813_v55 = vadd.f32 %v777_v54, %v673_v51  ;;  %v675_v59 = vpop.f32.mrf.mxu1 }
  0xb0   :  { %v676_v63 = vadd.f32 %v675_v59, %v578_v57 }
  0xb1   :  { %v12574_v61 = vadd.f32 %v12554_v20, %v813_v55 }
  0xb3   :  { %17899 = vst [vmem:[#allocation25_spill] sm:$0xff] %v12574_v61  ;;  %v17724_v62 = vmax.f32 %v12574_v61, 0.0 }
  0xb5   :  { %v860_v0 = vpack.c.bf16 %v17724_v62, %v17725_v60 }
  0xb6   :  { %v780_v1 = vpop.f32.mrf.mxu2  ;;  %v580_v2 = vpop.f32.mrf.mxu0 }
  0xb7   :  { %10257 = vmatmul.msk.bf16.gmra.mxu3 %vm17836_vm0, %v860_v0  ;;  %v677_v4 = vpop.f32.mrf.mxu1  ;;  %v814_v7 = vadd.f32 %v780_v1, %v676_v63 }
  0xb8   :  { %v678_v10 = vadd.f32 %v677_v4, %v580_v2 }
  0xb9   :  { %v12583_v12 = vadd.f32 %v12554_v20, %v814_v7 }
  0xbb   :  { %17900 = vst [vmem:[#allocation26_spill] sm:$0xff] %v12583_v12  ;;  %v17723_v19 = vmax.f32 %v12583_v12, 0.0 }
  0xbe   :  { %v782_v13 = vpop.f32.mrf.mxu2  ;;  %v583_v15 = vpop.f32.mrf.mxu0 }
  0xbf   :  { %v815_v14 = vadd.f32 %v782_v13, %v678_v10  ;;  %v680_v8 = vpop.f32.mrf.mxu1 }
  0xc0   :  { %v681_v25 = vadd.f32 %v680_v8, %v583_v15 }
  0xc1   :  { %v12587_v17 = vadd.f32 %v12554_v20, %v815_v14 }
  0xc3   :  { %17901 = vst [vmem:[#allocation27_spill] sm:$0xff] %v12587_v17  ;;  %v17722_v21 = vmax.f32 %v12587_v17, 0.0 }
  0xc5   :  { %v861_v24 = vpack.c.bf16 %v17722_v21, %v17723_v19 }
  0xc6   :  { %v785_v26 = vpop.f32.mrf.mxu2  ;;  %v585_v27 = vpop.f32.mrf.mxu0 }
  0xc7   :  { %10258 = vmatmul.msk.bf16.gmra.mxu3 %vm17836_vm0, %v861_v24  ;;  %v682_v28 = vpop.f32.mrf.mxu1  ;;  %v816_v29 = vadd.f32 %v785_v26, %v681_v25 }
  0xc8   :  { %v683_v30 = vadd.f32 %v682_v28, %v585_v27 }
  0xc9   :  { %v12596_v32 = vadd.f32 %v12554_v20, %v816_v29 }
  0xcb   :  { %17902 = vst [vmem:[#allocation28_spill] sm:$0xff] %v12596_v32  ;;  %v17721_v43 = vmax.f32 %v12596_v32, 0.0 }
  0xce   :  { %v787_v34 = vpop.f32.mrf.mxu2  ;;  %v588_v37 = vpop.f32.mrf.mxu0 }
  0xcf   :  { %v817_v36 = vadd.f32 %v787_v34, %v683_v30  ;;  %v685_v38 = vpop.f32.mrf.mxu1 }
  0xd0   :  { %v686_v47 = vadd.f32 %v685_v38, %v588_v37 }
  0xd1   :  { %v12600_v44 = vadd.f32 %v12554_v20, %v817_v36 }
  0xd3   :  { %17903 = vst [vmem:[#allocation29_spill] sm:$0xff] %v12600_v44  ;;  %v17720_v45 = vmax.f32 %v12600_v44, 0.0 }
  0xd5   :  { %v862_v46 = vpack.c.bf16 %v17720_v45, %v17721_v43 }
  0xd6   :  { %v790_v49 = vpop.f32.mrf.mxu2  ;;  %v590_v51 = vpop.f32.mrf.mxu0 }
  0xd7   :  { %10259 = vmatmul.msk.bf16.gmra.mxu3 %vm17836_vm0, %v862_v46  ;;  %v687_v54 = vpop.f32.mrf.mxu1  ;;  %v818_v55 = vadd.f32 %v790_v49, %v686_v47 }
  0xd8   :  { %v688_v57 = vadd.f32 %v687_v54, %v590_v51 }
  0xd9   :  { %v12609_v59 = vadd.f32 %v12554_v20, %v818_v55 }
  0xdb   :  { %17904 = vst [vmem:[#allocation30_spill] sm:$0xff] %v12609_v59  ;;  %v17719_v4 = vmax.f32 %v12609_v59, 0.0 }
  0xde   :  { %v792_v63 = vpop.f32.mrf.mxu2  ;;  %v593_v1 = vpop.f32.mrf.mxu0 }
  0xdf   :  { %v819_v0 = vadd.f32 %v792_v63, %v688_v57  ;;  %v690_v2 = vpop.f32.mrf.mxu1 }
  0xe0   :  { %v691_v14 = vadd.f32 %v690_v2, %v593_v1 }
  0xe1   :  { %v12613_v7 = vadd.f32 %v12554_v20, %v819_v0 }
  0xe3   :  { %17905 = vst [vmem:[#allocation31_spill] sm:$0xff] %v12613_v7  ;;  %v17718_v10 = vmax.f32 %v12613_v7, 0.0 }
  0xe5   :  { %v863_v13 = vpack.c.bf16 %v17718_v10, %v17719_v4 }
  0xe6   :  { %v795_v15 = vpop.f32.mrf.mxu2  ;;  %v595_v8 = vpop.f32.mrf.mxu0 }
  0xe7   :  { %10260 = vmatmul.msk.bf16.gmra.mxu3 %vm17836_vm0, %v863_v13  ;;  %v692_v24 = vpop.f32.mrf.mxu1  ;;  %v820_v25 = vadd.f32 %v795_v15, %v691_v14 }
  0xe8   :  { %v693_v26 = vadd.f32 %v692_v24, %v595_v8 }
  0xe9   :  { %v12622_v27 = vadd.f32 %v12554_v20, %v820_v25 }
  0xeb   :  { %17906 = vst [vmem:[#allocation32_spill] sm:$0xff] %v12622_v27  ;;  %v17717_v30 = vmax.f32 %v12622_v27, 0.0 }
  0xee   :  { %v797_v28 = vpop.f32.mrf.mxu2  ;;  %v598_v38 = vpop.f32.mrf.mxu0 }
  0xef   :  { %v821_v29 = vadd.f32 %v797_v28, %v693_v26  ;;  %v695_v46 = vpop.f32.mrf.mxu1 }
  0xf0   :  { %v696_v47 = vadd.f32 %v695_v46, %v598_v38 }
  0xf1   :  { %v12626_v34 = vadd.f32 %v12554_v20, %v821_v29 }
  0xf3   :  { %17907 = vst [vmem:[#allocation33_spill] sm:$0xff] %v12626_v34  ;;  %v17716_v36 = vmax.f32 %v12626_v34, 0.0 }
  0xf5   :  { %v864_v37 = vpack.c.bf16 %v17716_v36, %v17717_v30 }
  0xf6   :  { %v800_v49 = vpop.f32.mrf.mxu2  ;;  %v600_v54 = vpop.f32.mrf.mxu0 }
  0xf7   :  { %10261 = vmatmul.msk.bf16.gmra.mxu3 %vm17836_vm0, %v864_v37  ;;  %v822_v51 = vadd.f32 %v800_v49, %v696_v47  ;;  %v697_v55 = vpop.f32.mrf.mxu1 }
  0xf8   :  { %v698_v63 = vadd.f32 %v697_v55, %v600_v54 }
  0xf9   :  { %v12635_v57 = vadd.f32 %v12554_v20, %v822_v51 }
  0xfb   :  { %17908 = vst [vmem:[#allocation34_spill] sm:$0xff] %v12635_v57  ;;  %v17715_v2 = vmax.f32 %v12635_v57, 0.0 }
  0xfe   :  { %v802_v0 = vpop.f32.mrf.mxu2  ;;  %v603_v8 = vpop.f32.mrf.mxu0 }
  0xff   :  { %v823_v1 = vadd.f32 %v802_v0, %v698_v63  ;;  %v700_v24 = vpop.f32.mrf.mxu1 }
 0x100   :  { %v701_v29 = vadd.f32 %v700_v24, %v603_v8 }
 0x101   :  { %v12639_v13 = vadd.f32 %v12554_v20, %v823_v1  ;;  %v12663_v1 = vld [vmem:[%s17691_s3] ss:$0 sm:$0xff]  ;;  %s12149_s3 = smov 96  }
 0x103   :  { %17909 = vst [vmem:[#allocation35_spill] sm:$0xff] %v12639_v13  ;;  %v17714_v14 = vmax.f32 %v12639_v13, 0.0 }
 0x105   :  { %v865_v15 = vpack.c.bf16 %v17714_v14, %v17715_v2 }
 0x106   :  { %v805_v25 = vpop.f32.mrf.mxu2  ;;  %v605_v26 = vpop.f32.mrf.mxu0 }
 0x107   :  { %10262 = vmatmul.msk.bf16.gmra.mxu3 %vm17836_vm0, %v865_v15  ;;  %v702_v28 = vpop.f32.mrf.mxu1  ;;  %v824_v46 = vadd.f32 %v805_v25, %v701_v29 }
 0x108   :  { %v703_v37 = vadd.f32 %v702_v28, %v605_v26 }
 0x109   :  { %v12648_v49 = vadd.f32 %v12554_v20, %v824_v46 }
 0x10b   :  { %17910 = vst [vmem:[#allocation36_spill] sm:$0xff] %v12648_v49  ;;  %v17713_v54 = vmax.f32 %v12648_v49, 0.0 }
 0x10e   :  { %v807_v38 = vpop.f32.mrf.mxu2 }
 0x10f   :  { %v825_v47 = vadd.f32 %v807_v38, %v703_v37 }
 0x111   :  { %v12651_v51 = vadd.f32 %v12554_v20, %v825_v47 }
 0x113   :  { %17911 = vst [vmem:[#allocation37_spill] sm:$0xff] %v12651_v51  ;;  %v17712_v55 = vmax.f32 %v12651_v51, 0.0 }
 0x115   :  { %v866_v63 = vpack.c.bf16 %v17712_v55, %v17713_v54 }
 0x117   :  { %10263 = vmatmul.msk.bf16.gmra.mxu3 %vm17836_vm0, %v866_v63 }
 0x12a   :  { %v921_v0 = vpop.f32.mrf.mxu3 }
 0x12b   :  { %v922_v20 = vadd.f32 %v12663_v1, %v921_v0 }
 0x12d   :  { %v961_v8 = vpack.c.bf16 %v922_v20, %v922_v20 }
 0x12f   :  { %v979_v26 = vunpack.c.l.b16 %v961_v8 }
 0x132   :  { %v923_v15 = vpop.f32.mrf.mxu3 }
 0x133   :  { %v924_v24 = vadd.f32 %v12663_v1, %v923_v15 }
 0x135   :  { %v962_v25 = vpack.c.bf16 %v924_v24, %v924_v24 }
 0x137   :  { %v980_v28 = vunpack.c.l.b16 %v962_v25 }
 0x139   :  { %v12667_v29 = vpack.c.b16 %v980_v28, %v979_v26 }
 0x13a   :  { %v926_v37 = vpop.f32.mrf.mxu3 }
 0x13b   :  { %17912 = vst [vmem:[#allocation38_spill] sm:$0xff] %v12667_v29  ;;  %1194 = vrot.lane.b32.xlu2 %v12667_v29, %s12147_s25  ;;  %1196 = vrot.lane.b32.xlu1 %v12667_v29, %s12148_s26  ;;  %v927_v47 = vadd.f32 %v12663_v1, %v926_v37 }
 0x13c   :  { %982 = vrot.lane.b32.xlu0 %v12667_v29, %s12149_s3 }
 0x13d   :  { %v963_v20 = vpack.c.bf16 %v927_v47, %v927_v47 }
 0x13f   :  { %v1007_v8 = vunpack.c.l.b16 %v963_v20 }
 0x142   :  { %v928_v38 = vpop.f32.mrf.mxu3 }
 0x143   :  { %2544 = vrot.lane.b32.xlu2 %v12667_v29, %s12150_s27  ;;  %1388 = vrot.lane.b32.xlu1 %v12667_v29, %s12151_s28  ;;  %v929_v46 = vadd.f32 %v12663_v1, %v928_v38 }
 0x144   :  { %1386 = vrot.lane.b32.xlu0 %v12667_v29, %s12152_s1 }
 0x145   :  { %v964_v63 = vpack.c.bf16 %v929_v46, %v929_v46 }
 0x147   :  { %v1008_v15 = vunpack.c.l.b16 %v964_v63 }
 0x149   :  { %v12689_v24 = vpack.c.b16 %v1008_v15, %v1007_v8 }
 0x14a   :  { %v931_v0 = vpop.f32.mrf.mxu3 }
 0x14b   :  { %2744 = vrot.lane.b32.xlu2 %v12667_v29, %s12153_s29  ;;  %1578 = vrot.lane.b32.xlu1 %v12667_v29, %s12154_s30  ;;  %17913 = vst [vmem:[#allocation39_spill] sm:$0xff] %v12689_v24  ;;  %v932_v37 = vadd.f32 %v12663_v1, %v931_v0 }
 0x14c   :  { %1580 = vrot.lane.b32.xlu0 %v12667_v29, %s12155_s15 }
 0x14d   :  { %v965_v46 = vpack.c.bf16 %v932_v37, %v932_v37 }
 0x14f   :  { %v1034_v15 = vunpack.c.l.b16 %v965_v46 }
 0x152   :  { %v933_v25 = vpop.f32.mrf.mxu3 }
 0x153   :  { %1220 = vrot.lane.b32.xlu2 %v12689_v24, %s12148_s26  ;;  %1010 = vrot.lane.b32.xlu1 %v12689_v24, %s12149_s3  ;;  %v934_v28 = vadd.f32 %v12663_v1, %v933_v25 }
 0x154   :  { %2944 = vrot.lane.b32.xlu0 %v12667_v29, %s12156_s16 }
 0x155   :  { %v966_v38 = vpack.c.bf16 %v934_v28, %v934_v28 }
 0x157   :  { %v1035_v63 = vunpack.c.l.b16 %v966_v38 }
 0x159   :  { %v12713_v25 = vpack.c.b16 %v1035_v63, %v1034_v15 }
 0x15a   :  { %v936_v26 = vpop.f32.mrf.mxu3 }
 0x15b   :  { %1218 = vrot.lane.b32.xlu2 %v12689_v24, %s12147_s25  ;;  %1412 = vrot.lane.b32.xlu1 %v12689_v24, %s12151_s28  ;;  %v937_v8 = vadd.f32 %v12663_v1, %v936_v26  ;;  %17914 = vst [vmem:[#allocation40_spill] sm:$0xff] %v12713_v25 }
 0x15c   :  { %1604 = vrot.lane.b32.xlu0 %v12689_v24, %s12155_s15 }
 0x15d   :  { %v967_v28 = vpack.c.bf16 %v937_v8, %v937_v8 }
 0x15f   :  { %v1061_v38 = vunpack.c.l.b16 %v967_v28 }
 0x162   :  { %v938_v47 = vpop.f32.mrf.mxu3 }
 0x163   :  { %1410 = vrot.lane.b32.xlu2 %v12689_v24, %s12152_s1  ;;  %2569 = vrot.lane.b32.xlu1 %v12689_v24, %s12150_s27  ;;  %v939_v20 = vadd.f32 %v12663_v1, %v938_v47 }
 0x164   :  { %1602 = vrot.lane.b32.xlu0 %v12689_v24, %s12154_s30 }
 0x165   :  { %v968_v0 = vpack.c.bf16 %v939_v20, %v939_v20 }
 0x167   :  { %v1062_v37 = vunpack.c.l.b16 %v968_v0 }
 0x169   :  { %v12721_v47 = vpack.c.b16 %v1062_v37, %v1061_v38 }
 0x16a   :  { %v941_v55 = vpop.f32.mrf.mxu3 }
 0x16b   :  { %2769 = vrot.lane.b32.xlu2 %v12689_v24, %s12153_s29  ;;  %1244 = vrot.lane.b32.xlu1 %v12713_v25, %s12148_s26  ;;  %17915 = vst [vmem:[#allocation41_spill] sm:$0xff] %v12721_v47  ;;  %v942_v46 = vadd.f32 %v12663_v1, %v941_v55 }
 0x16c   :  { %2969 = vrot.lane.b32.xlu0 %v12689_v24, %s12156_s16 }
 0x16d   :  { %v969_v20 = vpack.c.bf16 %v942_v46, %v942_v46 }
 0x16f   :  { %v1088_v8 = vunpack.c.l.b16 %v969_v20 }
 0x172   :  { %v943_v26 = vpop.f32.mrf.mxu3 }
 0x173   :  { %1037 = vrot.lane.b32.xlu2 %v12713_v25, %s12149_s3  ;;  %1626 = vrot.lane.b32.xlu1 %v12713_v25, %s12154_s30  ;;  %v944_v63 = vadd.f32 %v12663_v1, %v943_v26 }
 0x174   :  { %1268 = vrot.lane.b32.xlu0 %v12721_v47, %s12148_s26 }
 0x175   :  { %v970_v15 = vpack.c.bf16 %v944_v63, %v944_v63 }
 0x177   :  { %v1089_v0 = vunpack.c.l.b16 %v970_v15 }
 0x179   :  { %v12743_v28 = vpack.c.b16 %v1089_v0, %v1088_v8 }
 0x17a   :  { %v946_v55 = vpop.f32.mrf.mxu3 }
 0x17b   :  { %1242 = vrot.lane.b32.xlu2 %v12713_v25, %s12147_s25  ;;  %2594 = vrot.lane.b32.xlu1 %v12713_v25, %s12150_s27  ;;  %17916 = vst [vmem:[#allocation42_spill] sm:$0xff] %v12743_v28  ;;  %v947_v46 = vadd.f32 %v12663_v1, %v946_v55 }
 0x17c   :  { %1652 = vrot.lane.b32.xlu0 %v12721_v47, %s12155_s15 }
 0x17d   :  { %v971_v20 = vpack.c.bf16 %v947_v46, %v947_v46 }
 0x17f   :  { %v1115_v0 = vunpack.c.l.b16 %v971_v20 }
 0x182   :  { %v948_v38 = vpop.f32.mrf.mxu3 }
 0x183   :  { %1436 = vrot.lane.b32.xlu2 %v12713_v25, %s12151_s28  ;;  %1064 = vrot.lane.b32.xlu1 %v12721_v47, %s12149_s3  ;;  %v949_v63 = vadd.f32 %v12663_v1, %v948_v38 }
 0x184   :  { %2819 = vrot.lane.b32.xlu0 %v12721_v47, %s12153_s29 }
 0x185   :  { %v972_v15 = vpack.c.bf16 %v949_v63, %v949_v63 }
 0x187   :  { %v1116_v54 = vunpack.c.l.b16 %v972_v15 }
 0x189   :  { %v12777_v2 = vpack.c.b16 %v1116_v54, %v1115_v0 }
 0x18a   :  { %v951_v14 = vpop.f32.mrf.mxu3 }
 0x18b   :  { %1434 = vrot.lane.b32.xlu2 %v12713_v25, %s12152_s1  ;;  %1266 = vrot.lane.b32.xlu1 %v12721_v47, %s12147_s25  ;;  %17917 = vst [vmem:[#allocation43_spill] sm:$0xff] %v12777_v2  ;;  %v952_v20 = vadd.f32 %v12663_v1, %v951_v14 }
 0x18c   :  { %1091 = vrot.lane.b32.xlu0 %v12743_v28, %s12149_s3 }
 0x192   :  { %v953_v54 = vpop.f32.mrf.mxu3 }
 0x193   :  { %1628 = vrot.lane.b32.xlu2 %v12713_v25, %s12155_s15  ;;  %1460 = vrot.lane.b32.xlu1 %v12721_v47, %s12151_s28  ;;  %v954_v15 = vadd.f32 %v12663_v1, %v953_v54 }
 0x194   :  { %1290 = vrot.lane.b32.xlu0 %v12743_v28, %s12147_s25 }
 0x195   :  { %v12757_v37 = vpop.permute.xlu2 %1194  ;;  %v974_v14 = vpack.c.bf16 %v954_v15, %v954_v15 }
 0x197   :  { %v1143_v10 = vunpack.c.l.b16 %v974_v14 }
 0x19a   :  { %v956_v45 = vpop.f32.mrf.mxu3 }
 0x19b   :  { %2794 = vrot.lane.b32.xlu2 %v12713_v25, %s12153_s29  ;;  %1458 = vrot.lane.b32.xlu1 %v12721_v47, %s12152_s1 }
 0x19c   :  { %1676 = vrot.lane.b32.xlu0 %v12743_v28, %s12155_s15 }
 0x19d   :  { %v12765_v26 = vpop.permute.xlu2 %2544 }
 0x1a2   :  { %v958_v19 = vpop.f32.mrf.mxu3 }
 0x1a3   :  { %1650 = vrot.lane.b32.xlu2 %v12721_v47, %s12154_s30  ;;  %1484 = vrot.lane.b32.xlu1 %v12743_v28, %s12151_s28 }
 0x1a4   :  { %2644 = vrot.lane.b32.xlu0 %v12743_v28, %s12150_s27 }
 0x1a5   :  { %v12775_v8 = vpop.permute.xlu2 %2744 }
 0x1ab   :  { %2619 = vrot.lane.b32.xlu2 %v12721_v47, %s12150_s27  ;;  %1674 = vrot.lane.b32.xlu1 %v12743_v28, %s12154_s30 }
 0x1ac   :  { %1118 = vrot.lane.b32.xlu0 %v12777_v2, %s12149_s3 }
 0x1ad   :  { %v12785_v55 = vpop.permute.xlu2 %1220  ;;  %v12787_v38 = vpop.permute.xlu1 %1196 }
 0x1ae   :  { %v983_v46 = vpop.permute.xlu0 %982  ;;  %v1202_v5 = vsel %vm17810_vm4, %v12787_v38, 0 }
 0x1af   :  { %v989_v63 = vsel %vm17810_vm4, %v983_v46, 0 }
 0x1b0   :  { %998 = vmatpush.bf16.xpose.msrb.mxu3 %v989_v63  ;;  %v973_v63 = vpack.c.bf16 %v952_v20, %v952_v20 }
 0x1b2   :  { %v1142_v30 = vunpack.c.l.b16 %v973_v63 }
 0x1b3   :  { %1292 = vrot.lane.b32.xlu2 %v12743_v28, %s12148_s26  ;;  %2844 = vrot.lane.b32.xlu1 %v12743_v28, %s12153_s29 }
 0x1b4   :  { %1314 = vrot.lane.b32.xlu0 %v12777_v2, %s12147_s25  ;;  %v12818_v43 = vpack.c.b16 %v1143_v10, %v1142_v30  ;;  %v957_v10 = vadd.f32 %v12663_v1, %v956_v45  ;;  %v959_v30 = vadd.f32 %v12663_v1, %v958_v19 }
 0x1b5   :  { %v12798_v0 = vpop.permute.xlu2 %1218  ;;  %v12800_v36 = vpop.permute.xlu1 %1388 }
 0x1b6   :  { %v12802_v46 = vpop.permute.xlu0 %1386  ;;  %17918 = vst [vmem:[#allocation44_spill] sm:$0xff] %v12818_v43  ;;  %v975_v45 = vpack.c.bf16 %v957_v10, %v957_v10  ;;  %v1394_v51 = vsel %vm17810_vm4, %v12800_v36, 0 }
 0x1b7   :  { %10264 = vmatmul.msk.bf16.vlgmr.msrb.gmra.mxu3 %vm17810_vm4, %v12667_v29 }
 0x1b8   :  { %v1169_v19 = vunpack.c.l.b16 %v975_v45 }
 0x1bb   :  { %1482 = vrot.lane.b32.xlu2 %v12743_v28, %s12152_s1  ;;  %2869 = vrot.lane.b32.xlu1 %v12777_v2, %s12153_s29 }
 0x1bc   :  { %1508 = vrot.lane.b32.xlu0 %v12777_v2, %s12151_s28 }
 0x1bd   :  { %v12812_v54 = vpop.permute.xlu2 %1410  ;;  %v12814_v4 = vpop.permute.xlu1 %1578 }
 0x1be   :  { %v12816_v20 = vpop.permute.xlu0 %1580 }
 0x1c3   :  { %3044 = vrot.lane.b32.xlu2 %v12743_v28, %s12156_s16  ;;  %1145 = vrot.lane.b32.xlu1 %v12818_v43, %s12149_s3 }
 0x1c4   :  { %1506 = vrot.lane.b32.xlu0 %v12777_v2, %s12152_s1 }
 0x1c5   :  { %v12826_v15 = vpop.permute.xlu2 %2769  ;;  %v1011_v63 = vpop.permute.xlu1 %1010 }
 0x1c6   :  { %v12828_v14 = vpop.permute.xlu0 %2944  ;;  %v1016_v21 = vsel %vm17810_vm4, %v1011_v63, 0  ;;  %v976_v63 = vpack.c.bf16 %v959_v30, %v959_v30 }
 0x1c7   :  { %17919 = vst [vmem:[#allocation45_spill] sm:$0xff] %v12828_v14  ;;  %1025 = vmatpush.bf16.xpose.msrb.mxu0 %v1016_v21 }
 0x1c8   :  { %v1170_v1 = vunpack.c.l.b16 %v976_v63 }
 0x1cb   :  { %1316 = vrot.lane.b32.xlu2 %v12777_v2, %s12148_s26  ;;  %1338 = vrot.lane.b32.xlu1 %v12818_v43, %s12147_s25 }
 0x1cc   :  { %2669 = vrot.lane.b32.xlu0 %v12777_v2, %s12150_s27 }
 0x1cd   :  { %v1038_v62 = vpop.permute.xlu2 %1037  ;;  %v12839_v60 = vpop.permute.xlu1 %1412 }
 0x1ce   :  { %v12841_v42 = vpop.permute.xlu0 %1604  ;;  %10265 = vmatmul.msk.bf16.vlgmr.msrb.gmra.mxu0 %vm17810_vm4, %v12689_v24  ;;  %v1043_v21 = vsel %vm17810_vm4, %v1038_v62, 0  ;;  %v12860_v62 = vpack.c.b16 %v1170_v1, %v1169_v19 }
 0x1cf   :  { %1052 = vmatpush.bf16.xpose.msrb.mxu1 %v1043_v21 }
 0x1d0   :  { %17920 = vst [vmem:[#allocation46_spill] sm:$0xff] %v12860_v62 }
 0x1d3   :  { %1700 = vrot.lane.b32.xlu2 %v12777_v2, %s12155_s15  ;;  %2894 = vrot.lane.b32.xlu1 %v12818_v43, %s12153_s29 }
 0x1d4   :  { %1340 = vrot.lane.b32.xlu0 %v12818_v43, %s12148_s26 }
 0x1d5   :  { %v12852_v40 = vpop.permute.xlu2 %1242  ;;  %v12854_v3 = vpop.permute.xlu1 %2569 }
 0x1d6   :  { %v12856_v22 = vpop.permute.xlu0 %1602  ;;  %10266 = vmatmul.msk.bf16.vlgmr.msrb.gmra.mxu1 %vm17810_vm4, %v12713_v25 }
 0x1db   :  { %1698 = vrot.lane.b32.xlu2 %v12777_v2, %s12154_s30  ;;  %1556 = vrot.lane.b32.xlu1 %v12860_v62, %s12151_s28 }
 0x1dc   :  { %1722 = vrot.lane.b32.xlu0 %v12818_v43, %s12154_s30 }
 0x1dd   :  { %v12868_v10 = vpop.permute.xlu2 %1436  ;;  %v12870_v30 = vpop.permute.xlu1 %1244 }
 0x1de   :  { %v12872_v21 = vpop.permute.xlu0 %2969 }
 0x1df   :  { %17921 = vst [vmem:[#allocation47_spill] sm:$0xff] %v12872_v21 }
 0x1e3   :  { %1532 = vrot.lane.b32.xlu2 %v12818_v43, %s12151_s28  ;;  %1554 = vrot.lane.b32.xlu1 %v12860_v62, %s12152_s1 }
 0x1e4   :  { %2694 = vrot.lane.b32.xlu0 %v12818_v43, %s12150_s27 }
 0x1e5   :  { %v12880_v45 = vpop.permute.xlu2 %1434  ;;  %v12882_v63 = vpop.permute.xlu1 %1626 }
 0x1e6   :  { %v12884_v19 = vpop.permute.xlu0 %1268 }
 0x1eb   :  { %1530 = vrot.lane.b32.xlu2 %v12818_v43, %s12152_s1  ;;  %1748 = vrot.lane.b32.xlu1 %v12860_v62, %s12155_s15 }
 0x1ec   :  { %1172 = vrot.lane.b32.xlu0 %v12860_v62, %s12149_s3 }
 0x1ed   :  { %v12892_v1 = vpop.permute.xlu2 %1628  ;;  %v12894_v16 = vpop.permute.xlu1 %2594 }
 0x1ee   :  { %v12896_v41 = vpop.permute.xlu0 %1652 }
 0x1f3   :  { %1724 = vrot.lane.b32.xlu2 %v12818_v43, %s12155_s15  ;;  %2719 = vrot.lane.b32.xlu1 %v12860_v62, %s12150_s27 }
 0x1f4   :  { %1362 = vrot.lane.b32.xlu0 %v12860_v62, %s12147_s25 }
 0x1f5   :  { %v12904_v52 = vpop.permute.xlu2 %2794  ;;  %v1065_v23 = vpop.permute.xlu1 %1064 }
 0x1f6   :  { %v12906_v18 = vpop.permute.xlu0 %2819  ;;  %v1070_v58 = vsel %vm17810_vm4, %v1065_v23, 0 }
 0x1f7   :  { %17922 = vst [vmem:[#allocation48_spill] sm:$0xff] %v12906_v18  ;;  %1079 = vmatpush.bf16.xpose.msrb.mxu2 %v1070_v58 }
 0x1fb   :  { %1364 = vrot.lane.b32.xlu2 %v12860_v62, %s12148_s26 }
 0x1fd   :  { %v12911_v56 = vpop.permute.xlu2 %1650  ;;  %v12913_v35 = vpop.permute.xlu1 %1266 }
 0x1fe   :  { %v1092_v33 = vpop.permute.xlu0 %1091  ;;  %10267 = vmatmul.msk.bf16.vlgmr.msrb.gmra.mxu2 %vm17810_vm4, %v12721_v47 }
 0x1ff   :  { %v1097_v9 = vsel %vm17810_vm4, %v1092_v33, 0 }
 0x200   :  { %1106 = vmatpush.bf16.xpose.msra.mxu3 %v1097_v9 }
 0x203   :  { %1746 = vrot.lane.b32.xlu2 %v12860_v62, %s12154_s30 }
 0x205   :  { %v12922_v58 = vpop.permute.xlu2 %2619  ;;  %v12924_v23 = vpop.permute.xlu1 %1460 }
 0x206   :  { %v1291_v50 = vpop.permute.xlu0 %1290 }
 0x207   :  { %10268 = vmatmul.msk.bf16.vlgmr.msra.gmra.mxu3 %vm17810_vm4, %v12743_v28 }
 0x208   :  { %1211 = vmatpush.bf16.xpose.msrb.mxu3 %v1202_v5 }
 0x20d   :  { %v1293_v48 = vpop.permute.xlu2 %1292  ;;  %v12928_v31 = vpop.permute.xlu1 %1458 }
 0x20e   :  { %v1298_v33 = vsel %vm17810_vm4, %v1293_v48, 0  ;;  %v1677_v6 = vpop.permute.xlu0 %1676 }
 0x210   :  { %1307 = vmatpush.bf16.xpose.msra.mxu3 %v1298_v33  ;;  %v1226_v33 = vsel %vm17810_vm4, %v12785_v55, 0 }
 0x215   :  { %v1483_v9 = vpop.permute.xlu2 %1482  ;;  %v1485_v5 = vpop.permute.xlu1 %1484 }
 0x216   :  { %v12931_v38 = vpop.permute.xlu0 %2644 }
 0x217   :  { %10272 = vmatmul.msk.bf16.vlgmr.msrb.gmra.mxu3 %vm17810_vm4, %v12757_v37 }
 0x218   :  { %1403 = vmatpush.bf16.xpose.msrb.mxu3 %v1394_v51  ;;  %v1490_v51 = vsel %vm17810_vm4, %v1485_v5, 0  ;;  %v1418_v5 = vsel %vm17810_vm4, %v12839_v60, 0 }
 0x21d   :  { %v12937_v49 = vpop.permute.xlu2 %3044  ;;  %v12939_v13 = vpop.permute.xlu1 %1674 }
 0x21e   :  { %17923 = vst [vmem:[#allocation49_spill] sm:$0xff] %v12937_v49  ;;  %v1119_v57 = vpop.permute.xlu0 %1118 }
 0x21f   :  { %v1124_v48 = vsel %vm17810_vm4, %v1119_v57, 0 }
 0x220   :  { %1133 = vmatpush.bf16.xpose.msra.mxu0 %v1124_v48 }
 0x225   :  { %v1317_v34 = vpop.permute.xlu2 %1316  ;;  %v12944_v27 = vpop.permute.xlu1 %2844 }
 0x226   :  { %17924 = vst [vmem:[#allocation50_spill] sm:$0xff] %v12944_v27  ;;  %v1322_v36 = vsel %vm17810_vm4, %v1317_v34, 0  ;;  %v1315_v7 = vpop.permute.xlu0 %1314  ;;  %v1586_v34 = vsel %vm17810_vm4, %v12816_v20, 0 }
 0x227   :  { %10269 = vmatmul.msk.bf16.vlgmr.msra.gmra.mxu0 %vm17810_vm4, %v12777_v2  ;;  %10276 = vmatmul.msk.bf16.vlgmr.msra.gmra.mxu3 %vm17810_vm4, %v1291_v50  ;;  %v1250_v50 = vsel %vm17810_vm4, %v12870_v30, 0 }
 0x228   :  { %1235 = vmatpush.bf16.xpose.msrb.mxu0 %v1226_v33  ;;  %1499 = vmatpush.bf16.xpose.msra.mxu3 %v1490_v51 }
 0x22d   :  { %v12951_v57 = vpop.permute.xlu1 %2869  ;;  %v12953_v55 = vpop.permute.xlu2 %1700 }
 0x22e   :  { %17925 = vst [vmem:[#allocation51_spill] sm:$0xff] %v12951_v57  ;;  %v1509_v37 = vpop.permute.xlu0 %1508 }
 0x230   :  { %1331 = vmatpush.bf16.xpose.msra.mxu0 %v1322_v36 }
 0x235   :  { %v1146_v48 = vpop.permute.xlu1 %1145  ;;  %v12972_v60 = vpop.permute.xlu2 %1698 }
 0x236   :  { %v1151_v33 = vsel %vm17810_vm4, %v1146_v48, 0  ;;  %v12956_v59 = vpop.permute.xlu0 %1506  ;;  %v1682_v48 = vsel %vm17810_vm4, %v1677_v6, 0  ;;  %v1442_v6 = vsel %vm17810_vm4, %v12868_v10, 0 }
 0x237   :  { %10273 = vmatmul.msk.bf16.vlgmr.msrb.gmra.mxu0 %vm17810_vm4, %v12798_v0  ;;  %10280 = vmatmul.msk.bf16.vlgmr.msrb.gmra.mxu3 %vm17810_vm4, %v12802_v46 }
 0x238   :  { %1427 = vmatpush.bf16.xpose.msrb.mxu0 %v1418_v5  ;;  %1595 = vmatpush.bf16.xpose.msrb.mxu3 %v1586_v34 }
 0x239   :  { %1160 = vmatpush.bf16.xpose.msra.mxu1 %v1151_v33  ;;  %v1514_v33 = vsel %vm17810_vm4, %v1509_v37, 0 }
 0x23a   :  { %v12968_v36 = vpop.f32.mrf.mxu3 }
 0x23b   :  { %v1771_v20 = vsel %vm17811_vm15, %v12968_v36, -inf }
 0x23c   :  { %1772 = vmax.xlane.f32.xlu0 %v1771_v20 }
 0x23d   :  { %v1533_v34 = vpop.permute.xlu2 %1532 }
 0x23e   :  { %v12974_v0 = vpop.permute.xlu0 %2669 }
 0x240   :  { %10270 = vmatmul.msk.bf16.vlgmr.msra.gmra.mxu1 %vm17810_vm4, %v12818_v43 }
 0x241   :  { %1259 = vmatpush.bf16.xpose.msrb.mxu1 %v1250_v50 }
 0x242   :  { %v12978_v46 = vpop.f32.mrf.mxu3 }
 0x243   :  { %v1774_v30 = vsel %vm17811_vm15, %v12978_v46, -inf }
 0x244   :  { %1775 = vmax.xlane.f32.xlu1 %v1774_v30 }
 0x246   :  { %v1341_v51 = vpop.permute.xlu0 %1340 }
 0x247   :  { %v1346_v5 = vsel %vm17810_vm4, %v1341_v51, 0  ;;  %10277 = vmatmul.msk.bf16.vlgmr.msra.gmra.mxu0 %vm17810_vm4, %v1315_v7  ;;  %10284 = vmatmul.msk.bf16.vlgmr.msra.gmra.mxu3 %vm17810_vm4, %v1483_v9  ;;  %v1531_v7 = vpop.permute.xlu2 %1530 }
 0x248   :  { %1691 = vmatpush.bf16.xpose.msra.mxu3 %v1682_v48  ;;  %1523 = vmatpush.bf16.xpose.msra.mxu0 %v1514_v33  ;;  %v1610_v33 = vsel %vm17810_vm4, %v12841_v42, 0 }
 0x249   :  { %1355 = vmatpush.bf16.xpose.msra.mxu1 %v1346_v5 }
 0x24b   :  { %v12987_v50 = vpop.f32.mrf.mxu0 }
 0x24c   :  { %v1777_v20 = vsel %vm17811_vm15, %v12987_v50, -inf }
 0x24d   :  { %1778 = vmax.xlane.f32.xlu0 %v1777_v20 }
 0x24e   :  { %v12991_v30 = vpop.permute.xlu0 %1722 }
 0x250   :  { %10274 = vmatmul.msk.bf16.vlgmr.msrb.gmra.mxu1 %vm17810_vm4, %v12852_v40  ;;  %v1725_v40 = vpop.permute.xlu2 %1724 }
 0x251   :  { %1451 = vmatpush.bf16.xpose.msrb.mxu1 %v1442_v6  ;;  %v1339_v6 = vpop.permute.xlu1 %1338 }
 0x253   :  { %v12997_v9 = vpop.f32.mrf.mxu0  ;;  %v12999_v37 = vpop.f32.mrf.mxu1 }
 0x254   :  { %v1780_v51 = vsel %vm17811_vm15, %v12997_v9, -inf  ;;  %v1783_v5 = vsel %vm17811_vm15, %v12999_v37, -inf }
 0x255   :  { %1781 = vmax.xlane.f32.xlu2 %v1780_v51 }
 0x256   :  { %v13003_v48 = vpop.permute.xlu0 %2694 }
 0x257   :  { %10281 = vmatmul.msk.bf16.vlgmr.msrb.gmra.mxu0 %vm17810_vm4, %v12812_v54  ;;  %10288 = vmatmul.msk.bf16.vlgmr.msrb.gmra.mxu3 %vm17810_vm4, %v12814_v4  ;;  %v1274_v4 = vsel %vm17810_vm4, %v12884_v19, 0  ;;  %v1634_v19 = vsel %vm17810_vm4, %v12892_v1, 0 }
 0x258   :  { %1619 = vmatpush.bf16.xpose.msrb.mxu0 %v1610_v33  ;;  %2557 = vmatpush.bf16.msrb.mxu3 %v12765_v26  ;;  %v1538_v26 = vsel %vm17810_vm4, %v1533_v34, 0  ;;  %v1365_v51 = vpop.permute.xlu2 %1364  ;;  %v1706_v33 = vsel %vm17810_vm4, %v12953_v55, 0  ;;  %v1466_v55 = vsel %vm17810_vm4, %v12924_v23, 0 }
 0x25b   :  { %v13012_v10 = vpop.f32.mrf.mxu1 }
 0x25c   :  { %v1786_v20 = vsel %vm17811_vm15, %v13012_v10, -inf }
 0x25d   :  { %1784 = vmax.xlane.f32.xlu2 %v1783_v5  ;;  %1787 = vmax.xlane.f32.xlu1 %v1786_v20  ;;  %v1370_v5 = vsel %vm17810_vm4, %v1365_v51, 0 }
 0x25e   :  { %v1173_v42 = vpop.permute.xlu0 %1172 }
 0x25f   :  { %v1178_v54 = vsel %vm17810_vm4, %v1173_v42, 0 }
 0x260   :  { %10278 = vmatmul.msk.bf16.vlgmr.msra.gmra.mxu1 %vm17810_vm4, %v1339_v6  ;;  %1187 = vmatpush.bf16.xpose.msra.mxu2 %v1178_v54 }
 0x261   :  { %1547 = vmatpush.bf16.xpose.msra.mxu1 %v1538_v26 }
 0x266   :  { %v1363_v23 = vpop.permute.xlu0 %1362 }
 0x267   :  { %10271 = vmatmul.msk.bf16.vlgmr.msra.gmra.mxu2 %vm17810_vm4, %v12860_v62  ;;  %10285 = vmatmul.msk.bf16.vlgmr.msra.gmra.mxu0 %vm17810_vm4, %v12956_v59  ;;  %v13044_v59 = vpop.permute.xlu1 %2894 }
 0x268   :  { %1283 = vmatpush.bf16.xpose.msrb.mxu2 %v1274_v4  ;;  %10292 = vmatmul.msk.bf16.vlgmr.msra.gmra.mxu3 %vm17810_vm4, %v12939_v13  ;;  %17926 = vst [vmem:[#allocation52_spill] sm:$0xff] %v13044_v59  ;;  %v1730_v13 = vsel %vm17810_vm4, %v1725_v40, 0  ;;  %v1658_v40 = vsel %vm17810_vm4, %v12896_v41, 0 }
 0x269   :  { %1715 = vmatpush.bf16.xpose.msra.mxu0 %v1706_v33  ;;  %2657 = vmatpush.bf16.msra.mxu3 %v12931_v38 }
 0x270   :  { %1379 = vmatpush.bf16.xpose.msra.mxu2 %v1370_v5  ;;  %10282 = vmatmul.msk.bf16.vlgmr.msrb.gmra.mxu1 %vm17810_vm4, %v12880_v45 }
 0x271   :  { %1643 = vmatpush.bf16.xpose.msrb.mxu1 %v1634_v19 }
 0x277   :  { %10275 = vmatmul.msk.bf16.vlgmr.msrb.gmra.mxu2 %vm17810_vm4, %v12913_v35  ;;  %10289 = vmatmul.msk.bf16.vlgmr.msrb.gmra.mxu0 %vm17810_vm4, %v12856_v22  ;;  %v1557_v35 = vpop.permute.xlu1 %1556 }
 0x278   :  { %1475 = vmatpush.bf16.xpose.msrb.mxu2 %v1466_v55  ;;  %2582 = vmatpush.bf16.msrb.mxu0 %v12854_v3  ;;  %v1562_v22 = vsel %vm17810_vm4, %v1557_v35, 0  ;;  %v1747_v35 = vpop.permute.xlu2 %1746 }
 0x27f   :  { %v1555_v20 = vpop.permute.xlu1 %1554 }
 0x280   :  { %10286 = vmatmul.msk.bf16.vlgmr.msra.gmra.mxu1 %vm17810_vm4, %v1531_v7 }
 0x281   :  { %1739 = vmatpush.bf16.xpose.msra.mxu1 %v1730_v13  ;;  %v13048_v45 = vpop.f32.mrf.mxu2 }
 0x282   :  { %v1789_v1 = vsel %vm17811_vm15, %v13048_v45, -inf }
 0x283   :  { %1790 = vmax.xlane.f32.xlu1 %v1789_v1 }
 0x287   :  { %10279 = vmatmul.msk.bf16.vlgmr.msra.gmra.mxu2 %vm17810_vm4, %v1363_v23  ;;  %10293 = vmatmul.msk.bf16.vlgmr.msra.gmra.mxu0 %vm17810_vm4, %v12972_v60 }
 0x288   :  { %2682 = vmatpush.bf16.msra.mxu0 %v12974_v0  ;;  %1571 = vmatpush.bf16.xpose.msra.mxu2 %v1562_v22 }
 0x289   :  { %v13057_v3 = vpop.f32.mrf.mxu2 }
 0x28a   :  { %v13059_v38 = vpop.f32.mrf.mxu3  ;;  %v1792_v34 = vsel %vm17811_vm15, %v13057_v3, -inf }
 0x28b   :  { %1793 = vmax.xlane.f32.xlu0 %v1792_v34  ;;  %v1795_v7 = vsel %vm17811_vm15, %v13059_v38, -inf }
 0x28c   :  { %1796 = vmax.xlane.f32.xlu2 %v1795_v7 }
 0x290   :  { %10290 = vmatmul.msk.bf16.vlgmr.msrb.gmra.mxu1 %vm17810_vm4, %v12882_v63 }
 0x291   :  { %2607 = vmatpush.bf16.msrb.mxu1 %v12894_v16  ;;  %v1749_v16 = vpop.permute.xlu1 %1748 }
 0x292   :  { %v13068_v60 = vpop.f32.mrf.mxu3  ;;  %v1754_v41 = vsel %vm17810_vm4, %v1749_v16, 0 }
 0x293   :  { %v1798_v0 = vsel %vm17811_vm15, %v13068_v60, -inf }
 0x294   :  { %1799 = vmax.xlane.f32.xlu0 %v1798_v0 }
 0x297   :  { %10283 = vmatmul.msk.bf16.vlgmr.msrb.gmra.mxu2 %vm17810_vm4, %v12928_v31 }
 0x298   :  { %1667 = vmatpush.bf16.xpose.msrb.mxu2 %v1658_v40 }
 0x299   :  { %v2720_v23 = vpop.permute.xlu1 %2719 }
 0x29a   :  { %v13083_v6 = vpop.f32.mrf.mxu3 }
 0x2a0   :  { %10294 = vmatmul.msk.bf16.vlgmr.msra.gmra.mxu1 %vm17810_vm4, %v12991_v30  ;;  %v1819_v30 = vsel %vm17811_vm15, %v13083_v6, -inf }
 0x2a1   :  { %2707 = vmatpush.bf16.msra.mxu1 %v13003_v48 }
 0x2a2   :  { %v13093_v54 = vpop.f32.mrf.mxu3 }
 0x2a3   :  { %v1822_v26 = vsel %vm17811_vm15, %v13093_v54, -inf }
 0x2a4   :  { %v13079_v63 = vpop.f32.mrf.mxu0 }
 0x2a5   :  { %v1801_v42 = vsel %vm17811_vm15, %v13079_v63, -inf }
 0x2a6   :  { %1802 = vmax.xlane.f32.xlu1 %v1801_v42 }
 0x2a7   :  { %10287 = vmatmul.msk.bf16.vlgmr.msra.gmra.mxu2 %vm17810_vm4, %v1555_v20 }
 0x2a8   :  { %1763 = vmatpush.bf16.xpose.msra.mxu2 %v1754_v41 }
 0x2aa   :  { %v13104_v33 = vpop.f32.mrf.mxu3 }
 0x2ab   :  { %v1843_v19 = vsel %vm17811_vm15, %v13104_v33, -inf }
 0x2ac   :  { %v13087_v31 = vpop.f32.mrf.mxu0 }
 0x2ad   :  { %v1804_v48 = vsel %vm17811_vm15, %v13087_v31, -inf }
 0x2ae   :  { %1820 = vmax.xlane.f32.xlu1 %v1819_v30  ;;  %1805 = vmax.xlane.f32.xlu0 %v1804_v48 }
 0x2b2   :  { %v13121_v22 = vpop.f32.mrf.mxu3 }
 0x2b3   :  { %v1846_v34 = vsel %vm17811_vm15, %v13121_v22, -inf }
 0x2b4   :  { %v13095_v4 = vpop.f32.mrf.mxu0 }
 0x2b5   :  { %v1825_v51 = vsel %vm17811_vm15, %v13095_v4, -inf }
 0x2b6   :  { %1823 = vmax.xlane.f32.xlu0 %v1822_v26  ;;  %1826 = vmax.xlane.f32.xlu2 %v1825_v51 }
 0x2b7   :  { %10291 = vmatmul.msk.bf16.vlgmr.msrb.gmra.mxu2 %vm17810_vm4, %v12911_v56 }
 0x2b8   :  { %2632 = vmatpush.bf16.msrb.mxu2 %v12922_v58 }
 0x2ba   :  { %v13135_v42 = vpop.f32.mrf.mxu3 }
 0x2bb   :  { %v1867_v30 = vsel %vm17811_vm15, %v13135_v42, -inf }
 0x2bc   :  { %v13112_v13 = vpop.f32.mrf.mxu0 }
 0x2bd   :  { %v13106_v5 = vpop.f32.mrf.mxu1  ;;  %v1828_v58 = vsel %vm17811_vm15, %v13112_v13, -inf }
 0x2be   :  { %v1807_v55 = vsel %vm17811_vm15, %v13106_v5, -inf  ;;  %1844 = vmax.xlane.f32.xlu2 %v1843_v19 }
 0x2bf   :  { %1808 = vmax.xlane.f32.xlu1 %v1807_v55 }
 0x2c4   :  { %v13129_v40 = vpop.f32.mrf.mxu0 }
 0x2c5   :  { %v13114_v1 = vpop.f32.mrf.mxu1  ;;  %v1849_v20 = vsel %vm17811_vm15, %v13129_v40, -inf }
 0x2c6   :  { %v1810_v56 = vsel %vm17811_vm15, %v13114_v1, -inf }
 0x2c7   :  { %1811 = vmax.xlane.f32.xlu0 %v1810_v56  ;;  %1829 = vmax.xlane.f32.xlu1 %v1828_v58 }
 0x2c8   :  { %10295 = vmatmul.msk.bf16.vlgmr.msra.gmra.mxu2 %vm17810_vm4, %v1747_v35 }
 0x2c9   :  { %2732 = vmatpush.bf16.msra.mxu2 %v2720_v23  ;;  %v13157_v23 = vpop.f32.mrf.mxu3 }
 0x2ca   :  { %v1870_v61 = vsel %vm17811_vm15, %v13157_v23, -inf }
 0x2cc   :  { %v13133_v16 = vpop.f32.mrf.mxu0 }
 0x2cd   :  { %v13125_v7 = vpop.f32.mrf.mxu1  ;;  %v1852_v44 = vsel %vm17811_vm15, %v13133_v16, -inf }
 0x2ce   :  { %v1831_v0 = vsel %vm17811_vm15, %v13125_v7, -inf }
 0x2cf   :  { %1847 = vmax.xlane.f32.xlu1 %v1846_v34  ;;  %v1773_v34 = vpop.xlane.xlu0 %1772 }
 0x2d1   :  { %v13169_v12 = vpop.f32.mrf.mxu3 }
 0x2d4   :  { %v13143_v26 = vpop.f32.mrf.mxu0 }
 0x2d5   :  { %v13137_v41 = vpop.f32.mrf.mxu1  ;;  %v1873_v19 = vsel %vm17811_vm15, %v13143_v26, -inf }
 0x2d6   :  { %v1834_v58 = vsel %vm17811_vm15, %v13137_v41, -inf }
 0x2d7   :  { %1832 = vmax.xlane.f32.xlu1 %v1831_v0  ;;  %v1776_v0 = vpop.xlane.xlu1 %1775  ;;  %v1779_v17 = vpop.xlane.xlu0 %1778 }
 0x2dd   :  { %v13149_v55 = vpop.f32.mrf.mxu1 }
 0x2de   :  { %v1855_v32 = vsel %vm17811_vm15, %v13149_v55, -inf }
 0x2df   :  { %1850 = vmax.xlane.f32.xlu1 %v1849_v20  ;;  %v1963_v20 = vsub.f32 %v12968_v36, %v1773_v34  ;;  %v13171_v36 = vpop.f32.mrf.mxu0 }
 0x2e7   :  { %1868 = vmax.xlane.f32.xlu1 %v1867_v30  ;;  %v13160_v30 = vpop.f32.mrf.mxu1  ;;  %v13203_v11 = vpop.f32.mrf.mxu0 }
 0x2e8   :  { %v1858_v27 = vsel %vm17811_vm15, %v13160_v30, -inf }
 0x2ea   :  { %v13141_v48 = vpop.f32.mrf.mxu2 }
 0x2eb   :  { %v1813_v51 = vsel %vm17811_vm15, %v13141_v48, -inf }
 0x2ec   :  { %1814 = vmax.xlane.f32.xlu0 %v1813_v51  ;;  %v1964_v51 = vsub.f32 %v12978_v46, %v1776_v0  ;;  %v1965_v46 = vsub.f32 %v12987_v50, %v1779_v17  ;;  %v1782_v50 = vpop.xlane.xlu2 %1781 }
 0x2ed   :  { %v1966_v53 = vsub.f32 %v12997_v9, %v1782_v50  ;;  %v1788_v9 = vpop.xlane.xlu1 %1787 }
 0x2ef   :  { %1874 = vmax.xlane.f32.xlu1 %v1873_v19  ;;  %v13176_v0 = vpop.f32.mrf.mxu1 }
 0x2f0   :  { %v1879_v49 = vsel %vm17811_vm15, %v13176_v0, -inf }
 0x2f2   :  { %v13151_v56 = vpop.f32.mrf.mxu2 }
 0x2f3   :  { %v1816_v35 = vsel %vm17811_vm15, %v13151_v56, -inf }
 0x2f4   :  { %1835 = vmax.xlane.f32.xlu0 %v1834_v58  ;;  %1817 = vmax.xlane.f32.xlu2 %v1816_v35  ;;  %v2027_v58 = vmul.f32 1.442695, %v1963_v20  ;;  %v2029_v35 = vmul.f32 1.442695, %v1964_v51  ;;  %v2031_v20 = vmul.f32 1.442695, %v1965_v46 }
 0x2f6   :  { %11731 = vpow2.f32 %v2027_v58  ;;  %v13188_v58 = vpop.f32.mrf.mxu3  ;;  %v13217_v24 = vpop.xlane.xlu1 %1790 }
 0x2f7   :  { %11733 = vpow2.f32 %v2029_v35  ;;  %v1894_v46 = vsel %vm17811_vm15, %v13188_v58, -inf }
 0x2f8   :  { %11735 = vpow2.f32 %v2031_v20 }
 0x2fa   :  { %v13163_v19 = vpop.f32.mrf.mxu2 }
 0x2fb   :  { %v1837_v28 = vsel %vm17811_vm15, %v13163_v19, -inf }
 0x2fc   :  { %1853 = vmax.xlane.f32.xlu0 %v1852_v44  ;;  %1856 = vmax.xlane.f32.xlu2 %v1855_v32  ;;  %v1876_v32 = vsel %vm17811_vm15, %v13171_v36, -inf  ;;  %v13184_v51 = vpop.eup %11731 }
 0x2fd   :  { %v13186_v17 = vpop.eup %11733 }
 0x2fe   :  { %v2158_v39 = vsel %vm17811_vm15, %v13186_v17, 0.0  ;;  %v13201_v20 = vpop.eup %11735 }
 0x302   :  { %v13174_v34 = vpop.f32.mrf.mxu2 }
 0x303   :  { %v1840_v44 = vsel %vm17811_vm15, %v13174_v34, -inf }
 0x304   :  { %1871 = vmax.xlane.f32.xlu0 %v1870_v61  ;;  %1877 = vmax.xlane.f32.xlu2 %v1876_v32  ;;  %v2155_v61 = vsel %vm17811_vm15, %v13184_v51, 0.0  ;;  %v13199_v32 = vpop.f32.mrf.mxu1 }
 0x305   :  { %1841 = vmax.xlane.f32.xlu1 %v1840_v44  ;;  %v2033_v44 = vmul.f32 1.442695, %v1966_v53  ;;  %v1882_v29 = vsel %vm17811_vm15, %v13199_v32, -inf }
 0x307   :  { %11737 = vpow2.f32 %v2033_v44  ;;  %v1891_v44 = vsel %vm17811_vm15, %v13169_v12, -inf }
 0x30a   :  { %v13190_v35 = vpop.f32.mrf.mxu2 }
 0x30b   :  { %v1861_v21 = vsel %vm17811_vm15, %v13190_v35, -inf }
 0x30c   :  { %2159 = vadd.xlane.f32.xlu2 %v2158_v39  ;;  %2156 = vadd.xlane.f32.xlu0 %v2155_v61  ;;  %v2161_v39 = vsel %vm17811_vm15, %v13201_v20, 0.0  ;;  %v1897_v61 = vsel %vm17811_vm15, %v13203_v11, -inf  ;;  %v13213_v53 = vpop.f32.mrf.mxu1 }
 0x30d   :  { %1895 = vmax.xlane.f32.xlu1 %v1894_v46  ;;  %v13215_v46 = vpop.eup %11737 }
 0x30e   :  { %v2164_v47 = vsel %vm17811_vm15, %v13215_v46, 0.0 }
 0x312   :  { %v13205_v50 = vpop.f32.mrf.mxu2 }
 0x314   :  { %1838 = vmax.xlane.f32.xlu0 %v1837_v28  ;;  %2162 = vadd.xlane.f32.xlu2 %v2161_v39  ;;  %v1785_v28 = vpop.xlane.xlu2 %1784  ;;  %v13227_v39 = vpop.f32.mrf.mxu1 }
 0x315   :  { %1898 = vmax.xlane.f32.xlu1 %v1897_v61  ;;  %17928 = vst [vmem:[#allocation54_spill] sm:$0xff] %v13227_v39  ;;  %v1967_v61 = vsub.f32 %v12999_v37, %v1785_v28 }
 0x319   :  { %v13230_v59 = vpop.xlane.xlu1 %1802 }
 0x31a   :  { %v13219_v43 = vpop.f32.mrf.mxu2 }
 0x31b   :  { %17927 = vst [vmem:[#allocation53_spill] sm:$0xff] %v13219_v43 }
 0x31c   :  { %1892 = vmax.xlane.f32.xlu0 %v1891_v44  ;;  %1880 = vmax.xlane.f32.xlu2 %v1879_v49  ;;  %v1906_v44 = vsel %vm17811_vm15, %v13227_v39, -inf  ;;  %v2035_v49 = vmul.f32 1.442695, %v1967_v61  ;;  %v1797_v37 = vpop.xlane.xlu2 %1796  ;;  %v13255_v39 = vpop.f32.mrf.mxu0 }
 0x31d   :  { %2165 = vadd.xlane.f32.xlu1 %v2164_v47  ;;  %v13240_v47 = vpop.f32.mrf.mxu3  ;;  %v1971_v2 = vsub.f32 %v13059_v38, %v1797_v37  ;;  %v1968_v38 = vsub.f32 %v13012_v10, %v1788_v9  ;;  %v1900_v57 = vsel %vm17811_vm15, %v13255_v39, -inf }
 0x31e   :  { %11739 = vpow2.f32 %v2035_v49 }
 0x321   :  { %v1821_v61 = vpop.xlane.xlu1 %1820 }
 0x322   :  { %v13232_v14 = vpop.f32.mrf.mxu2  ;;  %v1979_v9 = vsub.f32 %v13083_v6, %v1821_v61 }
 0x324   :  { %1859 = vmax.xlane.f32.xlu0 %v1858_v27  ;;  %1862 = vmax.xlane.f32.xlu2 %v1861_v21  ;;  %v1915_v27 = vsel %vm17811_vm15, %v13240_v47, -inf  ;;  %v13251_v21 = vpop.xlane.xlu0 %1793  ;;  %v13253_v49 = vpop.eup %11739 }
 0x325   :  { %1907 = vmax.xlane.f32.xlu1 %v1906_v44  ;;  %v2043_v44 = vmul.f32 1.442695, %v1971_v2  ;;  %v2037_v2 = vmul.f32 1.442695, %v1968_v38  ;;  %v2059_v38 = vmul.f32 1.442695, %v1979_v9 }
 0x327   :  { %11741 = vpow2.f32 %v2043_v44  ;;  %v1864_v44 = vsel %vm17811_vm15, %v13205_v50, -inf }
 0x328   :  { %11743 = vpow2.f32 %v2037_v2  ;;  %v13281_v2 = vpop.f32.mrf.mxu3 }
 0x329   :  { %11745 = vpow2.f32 %v2059_v38  ;;  %v1918_v62 = vsel %vm17811_vm15, %v13281_v2, -inf  ;;  %v1888_v38 = vsel %vm17811_vm15, %v13232_v14, -inf }
 0x32a   :  { %v13242_v28 = vpop.f32.mrf.mxu2 }
 0x32b   :  { %17929 = vst [vmem:[#allocation55_spill] sm:$0xff] %v13242_v28  ;;  %v1909_v18 = vsel %vm17811_vm15, %v13242_v28, -inf }
 0x32c   :  { %1883 = vmax.xlane.f32.xlu0 %v1882_v29  ;;  %1916 = vmax.xlane.f32.xlu2 %v1915_v27  ;;  %v2167_v29 = vsel %vm17811_vm15, %v13253_v49, 0.0  ;;  %v13266_v27 = vpop.xlane.xlu0 %1799 }
 0x32d   :  { %1910 = vmax.xlane.f32.xlu1 %v1909_v18  ;;  %v13268_v10 = vpop.eup %11741 }
 0x32e   :  { %17931 = vst [vmem:[#allocation57_spill] sm:$0xff] %v13268_v10  ;;  %v2179_v25 = vsel %vm17811_vm15, %v13268_v10, 0.0 }
 0x332   :  { %v13258_v37 = vpop.f32.mrf.mxu2  ;;  %v1809_v18 = vpop.xlane.xlu1 %1808 }
 0x333   :  { %17930 = vst [vmem:[#allocation56_spill] sm:$0xff] %v13258_v37  ;;  %v1912_v28 = vsel %vm17811_vm15, %v13258_v37, -inf  ;;  %v1885_v37 = vsel %vm17811_vm15, %v13219_v43, -inf }
 0x334   :  { %1901 = vmax.xlane.f32.xlu0 %v1900_v57  ;;  %2168 = vadd.xlane.f32.xlu2 %v2167_v29  ;;  %v1806_v57 = vpop.xlane.xlu0 %1805  ;;  %v13279_v29 = vpop.eup %11743 }
 0x335   :  { %1913 = vmax.xlane.f32.xlu1 %v1912_v28  ;;  %v1974_v61 = vsub.f32 %v13087_v31, %v1806_v57  ;;  %v13292_v43 = vpop.eup %11745  ;;  %v1903_v57 = vsel %vm17811_vm15, %v13213_v53, -inf }
 0x336   :  { %17933 = vst [vmem:[#allocation59_spill] sm:$0xff] %v13292_v43 }
 0x337   :  { %v2049_v9 = vmul.f32 1.442695, %v1974_v61  ;;  %v13303_v61 = vpop.f32.mrf.mxu1 }
 0x338   :  { %17935 = vst [vmem:[#allocation61_spill] sm:$0xff] %v13303_v61 }
 0x339   :  { %11747 = vpow2.f32 %v2049_v9  ;;  %v1973_v9 = vsub.f32 %v13079_v63, %v13230_v59 }
 0x33a   :  { %v13277_v28 = vpop.xlane.xlu1 %1829  ;;  %v13283_v6 = vpop.f32.mrf.mxu2 }
 0x33b   :  { %17932 = vst [vmem:[#allocation58_spill] sm:$0xff] %v13283_v6 }
 0x33c   :  { %1865 = vmax.xlane.f32.xlu0 %v1864_v44  ;;  %1886 = vmax.xlane.f32.xlu2 %v1885_v37  ;;  %v2170_v37 = vsel %vm17811_vm15, %v13279_v29, 0.0  ;;  %v1824_v44 = vpop.xlane.xlu0 %1823 }
 0x33d   :  { %2180 = vadd.xlane.f32.xlu1 %v2179_v25  ;;  %v1933_v25 = vsel %vm17811_vm15, %v13283_v6, -inf  ;;  %v1980_v31 = vsub.f32 %v13093_v54, %v1824_v44  ;;  %v2203_v6 = vsel %vm17811_vm15, %v13292_v43, 0.0  ;;  %v1969_v54 = vsub.f32 %v13048_v45, %v13217_v24  ;;  %v1827_v24 = vpop.xlane.xlu2 %1826 }
 0x33e   :  { %v1975_v43 = vsub.f32 %v13106_v5, %v1809_v18  ;;  %v2047_v45 = vmul.f32 1.442695, %v1973_v9 }
 0x33f   :  { %v13322_v5 = vpop.f32.mrf.mxu1 }
 0x340   :  { %v2051_v59 = vmul.f32 1.442695, %v1975_v43  ;;  %17936 = vst [vmem:[#allocation62_spill] sm:$0xff] %v13322_v5  ;;  %v1930_v9 = vsel %vm17811_vm15, %v13322_v5, -inf }
 0x342   :  { %v1848_v10 = vpop.xlane.xlu1 %1847 }
 0x344   :  { %1919 = vmax.xlane.f32.xlu0 %v1918_v62  ;;  %2171 = vadd.xlane.f32.xlu2 %v2170_v37  ;;  %v13301_v62 = vpop.f32.mrf.mxu0  ;;  %v2061_v37 = vmul.f32 1.442695, %v1980_v31  ;;  %v13318_v63 = vpop.xlane.xlu0 %1811 }
 0x345   :  { %1934 = vmax.xlane.f32.xlu1 %v1933_v25  ;;  %17934 = vst [vmem:[#allocation60_spill] sm:$0xff] %v13301_v62  ;;  %v13305_v25 = vpop.eup %11747 }
 0x346   :  { %11749 = vpow2.f32 %v2061_v37  ;;  %v2188_v31 = vsel %vm17811_vm15, %v13305_v25, 0.0 }
 0x34a   :  { %v1833_v44 = vpop.xlane.xlu1 %1832 }
 0x34c   :  { %1904 = vmax.xlane.f32.xlu0 %v1903_v57  ;;  %1889 = vmax.xlane.f32.xlu2 %v1888_v38  ;;  %v1927_v57 = vsel %vm17811_vm15, %v13303_v61, -inf  ;;  %v2039_v38 = vmul.f32 1.442695, %v1969_v54  ;;  %v13320_v37 = vpop.f32.mrf.mxu0  ;;  %v13324_v18 = vpop.eup %11749  ;;  %v1988_v54 = vsub.f32 %v13121_v22, %v1848_v10 }
 0x34d   :  { %2204 = vadd.xlane.f32.xlu1 %v2203_v6  ;;  %v1921_v6 = vsel %vm17811_vm15, %v13301_v62, -inf  ;;  %v1924_v43 = vsel %vm17811_vm15, %v13320_v37, -inf }
 0x34e   :  { %11751 = vpow2.f32 %v2039_v38  ;;  %v2206_v38 = vsel %vm17811_vm15, %v13324_v18, 0.0 }
 0x34f   :  { %11753 = vpow2.f32 %v2047_v45 }
 0x350   :  { %11755 = vpow2.f32 %v2051_v59  ;;  %v1972_v59 = vsub.f32 %v13068_v60, %v13266_v27 }
 0x354   :  { %1922 = vmax.xlane.f32.xlu0 %v1921_v6  ;;  %1928 = vmax.xlane.f32.xlu2 %v1927_v57  ;;  %v1970_v6 = vsub.f32 %v13057_v3, %v13251_v21  ;;  %v1981_v57 = vsub.f32 %v13095_v4, %v1827_v24  ;;  %v13336_v21 = vpop.eup %11751  ;;  %v1845_v4 = vpop.xlane.xlu2 %1844  ;;  %v2077_v24 = vmul.f32 1.442695, %v1988_v54 }
 0x355   :  { %2189 = vadd.xlane.f32.xlu1 %v2188_v31  ;;  %v1851_v31 = vpop.xlane.xlu1 %1850  ;;  %v13340_v10 = vpop.eup %11753  ;;  %v2173_v54 = vsel %vm17811_vm15, %v13336_v21, 0.0 }
 0x356   :  { %v2041_v61 = vmul.f32 1.442695, %v1970_v6  ;;  %v2063_v3 = vmul.f32 1.442695, %v1981_v57  ;;  %v13342_v45 = vpop.eup %11755  ;;  %v1982_v6 = vsub.f32 %v13112_v13, %v13277_v28  ;;  %v1983_v57 = vsub.f32 %v13125_v7, %v1833_v44 }
 0x357   :  { %17937 = vst [vmem:[#allocation63_spill] sm:$0xff] %v13342_v45 }
 0x358   :  { %11757 = vpow2.f32 %v2041_v61  ;;  %v2191_v61 = vsel %vm17811_vm15, %v13342_v45, 0.0  ;;  %v2065_v60 = vmul.f32 1.442695, %v1982_v6  ;;  %v2067_v28 = vmul.f32 1.442695, %v1983_v57 }
 0x359   :  { %11759 = vpow2.f32 %v2063_v3 }
 0x35a   :  { %11761 = vpow2.f32 %v2077_v24  ;;  %v1989_v24 = vsub.f32 %v13129_v40, %v1851_v31 }
 0x35c   :  { %1925 = vmax.xlane.f32.xlu0 %v1924_v43  ;;  %1931 = vmax.xlane.f32.xlu2 %v1930_v9  ;;  %v2185_v43 = vsel %vm17811_vm15, %v13340_v10, 0.0  ;;  %v2045_v9 = vmul.f32 1.442695, %v1972_v59 }
 0x35d   :  { %2207 = vadd.xlane.f32.xlu1 %v2206_v38  ;;  %v13355_v27 = vpop.xlane.xlu1 %1868 }
 0x35e   :  { %v13357_v13 = vpop.eup %11757  ;;  %11763 = vpow2.f32 %v2045_v9 }
 0x35f   :  { %v13338_v22 = vpop.xlane.xlu0 %1814  ;;  %v13363_v38 = vpop.eup %11759  ;;  %11765 = vpow2.f32 %v2065_v60  ;;  %v2176_v6 = vsel %vm17811_vm15, %v13357_v13, 0.0 }
 0x360   :  { %v13365_v3 = vpop.eup %11761  ;;  %11767 = vpow2.f32 %v2067_v28  ;;  %v2209_v59 = vsel %vm17811_vm15, %v13363_v38, 0.0 }
 0x361   :  { %17938 = vst [vmem:[#allocation64_spill] sm:$0xff] %v13365_v3  ;;  %v2230_v57 = vsel %vm17811_vm15, %v13365_v3, 0.0 }
 0x364   :  { %2174 = vadd.xlane.f32.xlu0 %v2173_v54  ;;  %2186 = vadd.xlane.f32.xlu2 %v2185_v43  ;;  %v13374_v54 = vpop.eup %11763  ;;  %v2079_v43 = vmul.f32 1.442695, %v1989_v24 }
 0x365   :  { %2192 = vadd.xlane.f32.xlu1 %v2191_v61  ;;  %v13378_v60 = vpop.eup %11765  ;;  %v13380_v40 = vpop.xlane.xlu1 %1874  ;;  %v2182_v24 = vsel %vm17811_vm15, %v13374_v54, 0.0 }
 0x366   :  { %v13383_v28 = vpop.eup %11767  ;;  %11769 = vpow2.f32 %v2079_v43 }
 0x367   :  { %v13359_v7 = vpop.xlane.xlu2 %1817  ;;  %v13361_v44 = vpop.xlane.xlu0 %1835  ;;  %17939 = vst [vmem:[#allocation65_spill] sm:$0xff] %v13383_v28  ;;  %v2215_v5 = vsel %vm17811_vm15, %v13383_v28, 0.0 }
 0x36c   :  { %2210 = vadd.xlane.f32.xlu2 %v2209_v59  ;;  %2177 = vadd.xlane.f32.xlu0 %v2176_v6  ;;  %v1987_v59 = vsub.f32 %v13104_v33, %v1845_v4  ;;  %v13394_v33 = vpop.f32.mrf.mxu2 }
 0x36d   :  { %2231 = vadd.xlane.f32.xlu1 %v2230_v57  ;;  %v2212_v57 = vsel %vm17811_vm15, %v13378_v60, 0.0  ;;  %17940 = vst [vmem:[#allocation66_spill] sm:$0xff] %v13394_v33 }
 0x36f   :  { %v13376_v61 = vpop.xlane.xlu2 %1856  ;;  %v1854_v9 = vpop.xlane.xlu0 %1853 }
 0x370   :  { %v1990_v31 = vsub.f32 %v13133_v16, %v1854_v9  ;;  %v2075_v16 = vmul.f32 1.442695, %v1987_v59  ;;  %v1936_v59 = vsel %vm17811_vm15, %v13394_v33, -inf }
 0x372   :  { %v2081_v6 = vmul.f32 1.442695, %v1990_v31  ;;  %v13397_v31 = vpop.eup %11769 }
 0x373   :  { %v2233_v28 = vsel %vm17811_vm15, %v13397_v31, 0.0 }
 0x374   :  { %2213 = vadd.xlane.f32.xlu2 %v2212_v57  ;;  %2183 = vadd.xlane.f32.xlu0 %v2182_v24  ;;  %11771 = vpow2.f32 %v2081_v6  ;;  %v1976_v57 = vsub.f32 %v13114_v1, %v13318_v63 }
 0x375   :  { %2216 = vadd.xlane.f32.xlu1 %v2215_v5  ;;  %11773 = vpow2.f32 %v2075_v16  ;;  %v1977_v16 = vsub.f32 %v13141_v48, %v13338_v22 }
 0x377   :  { %v13392_v9 = vpop.xlane.xlu2 %1877  ;;  %v1872_v3 = vpop.xlane.xlu0 %1871 }
 0x378   :  { %v1842_v4 = vpop.xlane.xlu1 %1841  ;;  %v1996_v43 = vsub.f32 %v13157_v23, %v1872_v3 }
 0x379   :  { %v1986_v62 = vsub.f32 %v13174_v34, %v1842_v4  ;;  %v2053_v34 = vmul.f32 1.442695, %v1976_v57 }
 0x37a   :  { %v2093_v24 = vmul.f32 1.442695, %v1996_v43  ;;  %v13402_v6 = vpop.eup %11771 }
 0x37b   :  { %v2073_v5 = vmul.f32 1.442695, %v1986_v62  ;;  %v2236_v23 = vsel %vm17811_vm15, %v13402_v6, 0.0  ;;  %v13410_v3 = vpop.eup %11773 }
 0x37c   :  { %1937 = vmax.xlane.f32.xlu0 %v1936_v59  ;;  %2237 = vadd.xlane.f32.xlu2 %v2236_v23  ;;  %17941 = vst [vmem:[#allocation67_spill] sm:$0xff] %v13410_v3  ;;  %v2055_v59 = vmul.f32 1.442695, %v1977_v16 }
 0x37d   :  { %11775 = vpow2.f32 %v2073_v5  ;;  %2234 = vadd.xlane.f32.xlu1 %v2233_v28  ;;  %v2227_v28 = vsel %vm17811_vm15, %v13410_v3, 0.0 }
 0x37e   :  { %11777 = vpow2.f32 %v2093_v24 }
 0x37f   :  { %v2160_v1 = vpop.xlane.xlu2 %2159  ;;  %v2157_v63 = vpop.xlane.xlu0 %2156 }
 0x380   :  { %11779 = vrcp.f32 %v2160_v1  ;;  %v13412_v62 = vpop.xlane.xlu1 %1895 }
 0x381   :  { %11781 = vrcp.f32 %v2157_v63 }
 0x382   :  { %11783 = vpow2.f32 %v2053_v34 }
 0x383   :  { %v13416_v4 = vpop.eup %11775  ;;  %11785 = vpow2.f32 %v2055_v59 }
 0x384   :  { %17942 = vst [vmem:[#allocation68_spill] sm:$0xff] %v13416_v4  ;;  %v13420_v43 = vpop.eup %11777  ;;  %2228 = vadd.xlane.f32.xlu0 %v2227_v28  ;;  %v2224_v57 = vsel %vm17811_vm15, %v13416_v4, 0.0  ;;  %v1995_v4 = vsub.f32 %v13135_v42, %v13355_v27 }
 0x385   :  { %17943 = vst [vmem:[#allocation69_spill] sm:$0xff] %v13420_v43  ;;  %2225 = vadd.xlane.f32.xlu1 %v2224_v57  ;;  %v2254_v24 = vsel %vm17811_vm15, %v13420_v43, 0.0 }
 0x386   :  { %v11780_v5 = vpop.eup %11779  ;;  %2255 = vadd.xlane.f32.xlu2 %v2254_v24 }
 0x387   :  { %v11782_v23 = vpop.eup %11781  ;;  %v2412_v48 = vmul.f32 %v11780_v5, %v13186_v17  ;;  %v2163_v22 = vpop.xlane.xlu2 %2162 }
 0x388   :  { %v1839_v34 = vpop.xlane.xlu0 %1838  ;;  %v13427_v1 = vpop.eup %11783  ;;  %v2411_v63 = vmul.f32 %v11782_v23, %v13184_v51  ;;  %11787 = vrcp.f32 %v2163_v22  ;;  %v2091_v51 = vmul.f32 1.442695, %v1995_v4  ;;  %v1984_v4 = vsub.f32 %v13137_v41, %v13361_v44 }
 0x389   :  { %v13430_v28 = vpop.xlane.xlu1 %1898  ;;  %v1985_v33 = vsub.f32 %v13163_v19, %v1839_v34  ;;  %v2476_v57 = vpack.c.bf16 %v2412_v48, %v2412_v48  ;;  %v2194_v17 = vsel %vm17811_vm15, %v13427_v1, 0.0  ;;  %v13439_v19 = vpop.eup %11785 }
 0x38a   :  { %v2475_v16 = vpack.c.bf16 %v2411_v63, %v2411_v63  ;;  %v2197_v59 = vsel %vm17811_vm15, %v13439_v19, 0.0 }
 0x38b   :  { %v2071_v24 = vmul.f32 1.442695, %v1985_v33  ;;  %v2542_v43 = vunpack.c.l.b16 %v2476_v57 }
 0x38c   :  { %v2541_v5 = vunpack.c.l.b16 %v2475_v16  ;;  %2195 = vadd.xlane.f32.xlu0 %v2194_v17 }
 0x38d   :  { %11789 = vpow2.f32 %v2071_v24 }
 0x38e   :  { %v2543_v23 = vpack.c.b16 %v2542_v43, %v2541_v5  ;;  %v11788_v27 = vpop.eup %11787 }
 0x38f   :  { %v1881_v3 = vpop.xlane.xlu2 %1880 }
 0x390   :  { %v13437_v45 = vpop.xlane.xlu0 %1892  ;;  %v1999_v42 = vsub.f32 %v13176_v0, %v1881_v3  ;;  %10296 = vmatmul.msk.bf16.vlgmr.msrb.gmra.mxu3 %vm17811_vm15, %v2543_v23  ;;  %v2413_v0 = vmul.f32 %v11788_v27, %v13201_v20  ;;  %v2069_v3 = vmul.f32 1.442695, %v1984_v4  ;;  %v1978_v20 = vsub.f32 %v13151_v56, %v13359_v7 }
 0x391   :  { %v2166_v48 = vpop.xlane.xlu1 %2165  ;;  %2757 = vmatpush.bf16.msrb.mxu3 %v12775_v8  ;;  %v2004_v23 = vsub.f32 %v13188_v58, %v13412_v62  ;;  %v1991_v62 = vsub.f32 %v13149_v55, %v13376_v61  ;;  %v1997_v61 = vsub.f32 %v13143_v26, %v13380_v40  ;;  %v13506_v40 = vpop.f32.mrf.mxu3 }
 0x392   :  { %11791 = vrcp.f32 %v2166_v48  ;;  %v2099_v43 = vmul.f32 1.442695, %v1999_v42  ;;  %v2477_v41 = vpack.c.bf16 %v2413_v0, %v2413_v0 }
 0x393   :  { %v13444_v33 = vpop.eup %11789  ;;  %11793 = vpow2.f32 %v2091_v51  ;;  %v2109_v56 = vmul.f32 1.442695, %v2004_v23  ;;  %v2095_v23 = vmul.f32 1.442695, %v1997_v61 }
 0x394   :  { %v2221_v22 = vsel %vm17811_vm15, %v13444_v33, 0.0  ;;  %11795 = vpow2.f32 %v2099_v43  ;;  %2198 = vadd.xlane.f32.xlu0 %v2197_v59  ;;  %v2566_v42 = vunpack.c.l.b16 %v2477_v41  ;;  %v2083_v41 = vmul.f32 1.442695, %v1991_v62 }
 0x395   :  { %2222 = vadd.xlane.f32.xlu2 %v2221_v22  ;;  %11797 = vpow2.f32 %v2069_v3  ;;  %v1939_v62 = vsel %vm17811_vm15, %v13506_v40, -inf }
 0x397   :  { %v13453_v34 = vpop.xlane.xlu2 %1862 }
 0x398   :  { %v11792_v8 = vpop.eup %11791  ;;  %v1860_v63 = vpop.xlane.xlu0 %1859 }
 0x399   :  { %v13455_v57 = vpop.eup %11793  ;;  %v2414_v44 = vmul.f32 %v11792_v8, %v13215_v46  ;;  %v13458_v16 = vpop.xlane.xlu1 %1907  ;;  %v1992_v24 = vsub.f32 %v13160_v30, %v1860_v63  ;;  %v2057_v30 = vmul.f32 1.442695, %v1978_v20 }
 0x39a   :  { %v13461_v17 = vpop.eup %11795  ;;  %v2251_v46 = vsel %vm17811_vm15, %v13455_v57, 0.0 }
 0x39b   :  { %v2478_v5 = vpack.c.bf16 %v2414_v44, %v2414_v44  ;;  %v2085_v51 = vmul.f32 1.442695, %v1992_v24  ;;  %v2263_v48 = vsel %vm17811_vm15, %v13461_v17, 0.0  ;;  %v13471_v59 = vpop.eup %11797 }
 0x39c   :  { %2264 = vadd.xlane.f32.xlu1 %v2263_v48  ;;  %2252 = vadd.xlane.f32.xlu0 %v2251_v46  ;;  %v2218_v3 = vsel %vm17811_vm15, %v13471_v59, 0.0 }
 0x39d   :  { %v2567_v27 = vunpack.c.l.b16 %v2478_v5  ;;  %11799 = vpow2.f32 %v2085_v51 }
 0x39e   :  { %11801 = vpow2.f32 %v2057_v30 }
 0x39f   :  { %v2568_v4 = vpack.c.b16 %v2567_v27, %v2566_v42  ;;  %v1917_v7 = vpop.xlane.xlu2 %1916  ;;  %11803 = vpow2.f32 %v2109_v56 }
 0x3a0   :  { %v1884_v43 = vpop.xlane.xlu0 %1883  ;;  %v2011_v58 = vsub.f32 %v13240_v47, %v1917_v7 }
 0x3a1   :  { %v13473_v22 = vpop.xlane.xlu1 %1910  ;;  %10297 = vmatmul.msk.bf16.vlgmr.msrb.gmra.mxu0 %vm17811_vm15, %v2568_v4  ;;  %v2003_v4 = vsub.f32 %v13169_v12, %v13437_v45 }
 0x3a2   :  { %2782 = vmatpush.bf16.msrb.mxu0 %v12826_v15  ;;  %v2123_v0 = vmul.f32 1.442695, %v2011_v58  ;;  %v2000_v58 = vsub.f32 %v13199_v32, %v1884_v43  ;;  %v1998_v32 = vsub.f32 %v13171_v36, %v13392_v9 }
 0x3a3   :  { %v13482_v8 = vpop.eup %11799 }
 0x3a4   :  { %11805 = vpow2.f32 %v2123_v0  ;;  %2219 = vadd.xlane.f32.xlu0 %v2218_v3  ;;  %v2242_v63 = vsel %vm17811_vm15, %v13482_v8, 0.0  ;;  %v13486_v44 = vpop.eup %11801  ;;  %v2107_v0 = vmul.f32 1.442695, %v2003_v4  ;;  %v2101_v12 = vmul.f32 1.442695, %v2000_v58 }
 0x3a5   :  { %2243 = vadd.xlane.f32.xlu2 %v2242_v63  ;;  %v13490_v55 = vpop.eup %11803  ;;  %11807 = vpow2.f32 %v2083_v41  ;;  %v2200_v51 = vsel %vm17811_vm15, %v13486_v44, 0.0  ;;  %v2097_v9 = vmul.f32 1.442695, %v1998_v32 }
 0x3a6   :  { %v2278_v48 = vsel %vm17811_vm15, %v13490_v55, 0.0  ;;  %11809 = vpow2.f32 %v2095_v23 }
 0x3a7   :  { %v2169_v47 = vpop.xlane.xlu2 %2168 }
 0x3a8   :  { %v1902_v15 = vpop.xlane.xlu0 %1901  ;;  %11811 = vrcp.f32 %v2169_v47  ;;  %v13522_v47 = vpop.f32.mrf.mxu3 }
 0x3a9   :  { %v13488_v24 = vpop.xlane.xlu1 %1913 }
 0x3aa   :  { %v13494_v20 = vpop.eup %11805 }
 0x3ab   :  { %v2299_v5 = vsel %vm17811_vm15, %v13494_v20, 0.0  ;;  %v13504_v26 = vpop.eup %11807 }
 0x3ac   :  { %2300 = vadd.xlane.f32.xlu1 %v2299_v5  ;;  %2201 = vadd.xlane.f32.xlu0 %v2200_v51  ;;  %v2239_v7 = vsel %vm17811_vm15, %v13504_v26, 0.0  ;;  %v13518_v3 = vpop.eup %11809  ;;  %v2006_v51 = vsub.f32 %v13255_v39, %v1902_v15 }
 0x3ad   :  { %2279 = vadd.xlane.f32.xlu2 %v2278_v48  ;;  %v2257_v5 = vsel %vm17811_vm15, %v13518_v3, 0.0  ;;  %v1942_v48 = vsel %vm17811_vm15, %v13522_v47, -inf }
 0x3ae   :  { %v11812_v41 = vpop.eup %11811  ;;  %v2113_v39 = vmul.f32 1.442695, %v2006_v51 }
 0x3af   :  { %v13502_v46 = vpop.xlane.xlu2 %1886  ;;  %v2415_v61 = vmul.f32 %v11812_v41, %v13253_v49 }
 0x3b0   :  { %v1866_v42 = vpop.xlane.xlu0 %1865 }
 0x3b1   :  { %v13508_v27 = vpop.xlane.xlu1 %2180  ;;  %v1994_v30 = vsub.f32 %v13205_v50, %v1866_v42  ;;  %v2479_v42 = vpack.c.bf16 %v2415_v61, %v2415_v61 }
 0x3b3   :  { %v2089_v56 = vmul.f32 1.442695, %v1994_v30 }
 0x3b4   :  { %2240 = vadd.xlane.f32.xlu0 %v2239_v7 }
 0x3b5   :  { %11813 = vpow2.f32 %v2089_v56  ;;  %1940 = vmax.xlane.f32.xlu2 %v1939_v62  ;;  %v1993_v62 = vsub.f32 %v13190_v35, %v13453_v34 }
 0x3b7   :  { %v2172_v50 = vpop.xlane.xlu2 %2171  ;;  %v2087_v61 = vmul.f32 1.442695, %v1993_v62 }
 0x3b8   :  { %v1920_v63 = vpop.xlane.xlu0 %1919  ;;  %11815 = vrcp.f32 %v2172_v50 }
 0x3b9   :  { %v13520_v45 = vpop.xlane.xlu1 %1934  ;;  %11817 = vpow2.f32 %v2107_v0  ;;  %v2591_v0 = vunpack.c.l.b16 %v2479_v42  ;;  %v2012_v41 = vsub.f32 %v13281_v2, %v1920_v63  ;;  %v2005_v2 = vsub.f32 %v13203_v11, %v13430_v28 }
 0x3ba   :  { %11819 = vpow2.f32 %v2101_v12 }
 0x3bb   :  { %v13526_v43 = vpop.eup %11813  ;;  %11821 = vpow2.f32 %v2097_v9  ;;  %v2125_v51 = vmul.f32 1.442695, %v2012_v41 }
 0x3bc   :  { %2258 = vadd.xlane.f32.xlu0 %v2257_v5  ;;  %v2248_v23 = vsel %vm17811_vm15, %v13526_v43, 0.0  ;;  %11823 = vpow2.f32 %v2113_v39  ;;  %v17944_v39 = vld [vmem:[#allocation53_spill] sm:$0xff] }
 0x3bd   :  { %2249 = vadd.xlane.f32.xlu1 %v2248_v23  ;;  %1943 = vmax.xlane.f32.xlu2 %v1942_v48  ;;  %11825 = vpow2.f32 %v2087_v61 }
 0x3be   :  { %v11816_v36 = vpop.eup %11815  ;;  %11827 = vpow2.f32 %v2125_v51 }
 0x3bf   :  { %v2416_v49 = vmul.f32 %v11816_v36, %v13279_v29  ;;  %v1890_v30 = vpop.xlane.xlu2 %1889  ;;  %v13539_v56 = vpop.eup %11817  ;;  %v2111_v36 = vmul.f32 1.442695, %v2005_v2 }
 0x3c0   :  { %v13537_v4 = vpop.xlane.xlu0 %1904  ;;  %v13543_v58 = vpop.eup %11819  ;;  %v2275_v29 = vsel %vm17811_vm15, %v13539_v56, 0.0 }
 0x3c1   :  { %v13541_v15 = vpop.xlane.xlu1 %2204  ;;  %v2480_v7 = vpack.c.bf16 %v2416_v49, %v2416_v49  ;;  %v2266_v32 = vsel %vm17811_vm15, %v13543_v58, 0.0  ;;  %v13557_v34 = vpop.eup %11821  ;;  %11829 = vpow2.f32 %v2111_v36 }
 0x3c2   :  { %v13562_v63 = vpop.eup %11823  ;;  %v2260_v48 = vsel %vm17811_vm15, %v13557_v34, 0.0 }
 0x3c3   :  { %v2592_v50 = vunpack.c.l.b16 %v2480_v7  ;;  %v2284_v9 = vsel %vm17811_vm15, %v13562_v63, 0.0  ;;  %v13572_v49 = vpop.eup %11825  ;;  %v2001_v7 = vsub.f32 %v17944_v39, %v13502_v46  ;;  %v2002_v46 = vsub.f32 %v13232_v14, %v1890_v30 }
 0x3c4   :  { %2276 = vadd.xlane.f32.xlu0 %v2275_v29  ;;  %v13576_v28 = vpop.eup %11827  ;;  %v2245_v62 = vsel %vm17811_vm15, %v13572_v49, 0.0  ;;  %v17945_v29 = vld [vmem:[#allocation46_spill] sm:$0xff] }
 0x3c5   :  { %v2593_v12 = vpack.c.b16 %v2592_v50, %v2591_v0  ;;  %2267 = vadd.xlane.f32.xlu2 %v2266_v32  ;;  %v2302_v0 = vsel %vm17811_vm15, %v13576_v28, 0.0  ;;  %v2103_v50 = vmul.f32 1.442695, %v2001_v7 }
 0x3c7   :  { %10298 = vmatmul.msk.bf16.vlgmr.msrb.gmra.mxu1 %vm17811_vm15, %v2593_v12  ;;  %v13553_v5 = vpop.xlane.xlu2 %1928  ;;  %v13586_v41 = vpop.eup %11829 }
 0x3c8   :  { %v13555_v35 = vpop.xlane.xlu0 %1922  ;;  %2807 = vmatpush.bf16.msrb.mxu1 %v12904_v52  ;;  %v2281_v2 = vsel %vm17811_vm15, %v13586_v41, 0.0 }
 0x3c9   :  { %v2190_v23 = vpop.xlane.xlu1 %2189 }
 0x3ca   :  { %11831 = vrcp.f32 %v2190_v23 }
 0x3cc   :  { %2261 = vadd.xlane.f32.xlu0 %v2260_v48  ;;  %v2105_v48 = vmul.f32 1.442695, %v2002_v46 }
 0x3cd   :  { %2285 = vadd.xlane.f32.xlu2 %v2284_v9  ;;  %v17946_v9 = vld [vmem:[#allocation40_spill] sm:$0xff] }
 0x3cf   :  { %v13568_v42 = vpop.xlane.xlu2 %1931 }
 0x3d0   :  { %v13570_v52 = vpop.xlane.xlu0 %1925  ;;  %v11832_v61 = vpop.eup %11831 }
 0x3d1   :  { %v13574_v11 = vpop.xlane.xlu1 %2207  ;;  %v2422_v23 = vmul.f32 %v11832_v61, %v13305_v25  ;;  %v2007_v25 = vsub.f32 %v13213_v53, %v13537_v4 }
 0x3d3   :  { %v2486_v39 = vpack.c.bf16 %v2422_v23, %v2422_v23 }
 0x3d4   :  { %2246 = vadd.xlane.f32.xlu0 %v2245_v62 }
 0x3d5   :  { %2303 = vadd.xlane.f32.xlu2 %v2302_v0 }
 0x3d6   :  { %2919 = vrot.lane.b32.xlu1 %v17945_v29, %s12153_s29 }
 0x3d7   :  { %v2187_v12 = vpop.xlane.xlu2 %2186 }
 0x3d8   :  { %v2175_v32 = vpop.xlane.xlu0 %2174  ;;  %11833 = vrcp.f32 %v2187_v12 }
 0x3d9   :  { %v13589_v51 = vpop.xlane.xlu1 %2192  ;;  %11835 = vpow2.f32 %v2103_v50 }
 0x3da   :  { %11837 = vrcp.f32 %v2175_v32  ;;  %v2667_v32 = vunpack.c.l.b16 %v2486_v39  ;;  %v2014_v39 = vsub.f32 %v13320_v37, %v13570_v52  ;;  %v17948_v37 = vld [vmem:[#allocation57_spill] sm:$0xff] }
 0x3db   :  { %11839 = vpow2.f32 %v2105_v48 }
 0x3dc   :  { %2282 = vadd.xlane.f32.xlu0 %v2281_v2 }
 0x3de   :  { %v11834_v36 = vpop.eup %11833  ;;  %2994 = vrot.lane.b32.xlu1 %v17946_v9, %s12156_s16 }
 0x3df   :  { %v2421_v7 = vmul.f32 %v11834_v36, %v13340_v10  ;;  %v2211_v14 = vpop.xlane.xlu2 %2210  ;;  %v13597_v62 = vpop.eup %11835  ;;  %v2115_v10 = vmul.f32 1.442695, %v2007_v25 }
 0x3e0   :  { %v2178_v30 = vpop.xlane.xlu0 %2177  ;;  %11841 = vrcp.f32 %v2211_v14  ;;  %v11838_v12 = vpop.eup %11837  ;;  %v2269_v46 = vsel %vm17811_vm15, %v13597_v62, 0.0  ;;  %v17947_v14 = vld [vmem:[#allocation51_spill] sm:$0xff] }
 0x3e1   :  { %v13599_v0 = vpop.xlane.xlu1 %2231  ;;  %v2485_v50 = vpack.c.bf16 %v2421_v7, %v2421_v7  ;;  %11843 = vrcp.f32 %v2178_v30  ;;  %v2417_v2 = vmul.f32 %v11838_v12, %v13336_v21  ;;  %v13607_v48 = vpop.eup %11839 }
 0x3e2   :  { %11845 = vrcp.f32 %v13508_v27 }
 0x3e3   :  { %v2666_v61 = vunpack.c.l.b16 %v2485_v50  ;;  %v2481_v30 = vpack.c.bf16 %v2417_v2, %v2417_v2 }
 0x3e4   :  { %2270 = vadd.xlane.f32.xlu0 %v2269_v46 }
 0x3e5   :  { %v2668_v23 = vpack.c.b16 %v2667_v32, %v2666_v61  ;;  %v2272_v32 = vsel %vm17811_vm15, %v13607_v48, 0.0  ;;  %v2129_v61 = vmul.f32 1.442695, %v2014_v39  ;;  %v2616_v46 = vunpack.c.l.b16 %v2481_v30 }
 0x3e6   :  { %v11842_v36 = vpop.eup %11841 }
 0x3e7   :  { %v2214_v53 = vpop.xlane.xlu2 %2213  ;;  %10301 = vmatmul.msk.bf16.vlgmr.msra.gmra.mxu0 %vm17811_vm15, %v2668_v23  ;;  %v11844_v7 = vpop.eup %11843  ;;  %v2429_v50 = vmul.f32 %v11842_v36, %v13363_v38 }
 0x3e8   :  { %v2184_v4 = vpop.xlane.xlu0 %2183  ;;  %11847 = vrcp.f32 %v2214_v53  ;;  %2882 = vmatpush.bf16.msra.mxu0 %v17947_v14  ;;  %v2418_v21 = vmul.f32 %v11844_v7, %v13357_v13  ;;  %v11846_v25 = vpop.eup %11845 }
 0x3e9   :  { %v13613_v27 = vpop.xlane.xlu1 %2216  ;;  %11849 = vpow2.f32 %v2115_v10  ;;  %v2419_v52 = vmul.f32 %v11846_v25, %v17948_v37  ;;  %v17949_v10 = vld [vmem:[#allocation38_spill] sm:$0xff]  ;;  %v2493_v38 = vpack.c.bf16 %v2429_v50, %v2429_v50 }
 0x3ea   :  { %11851 = vrcp.f32 %v2184_v4  ;;  %v2482_v12 = vpack.c.bf16 %v2418_v21, %v2418_v21 }
 0x3eb   :  { %11853 = vrcp.f32 %v13574_v11  ;;  %v2483_v30 = vpack.c.bf16 %v2419_v52, %v2419_v52  ;;  %v2766_v11 = vunpack.c.l.b16 %v2493_v38 }
 0x3ec   :  { %2273 = vadd.xlane.f32.xlu0 %v2272_v32  ;;  %v2617_v23 = vunpack.c.l.b16 %v2482_v12  ;;  %11855 = vpow2.f32 %v2129_v61  ;;  %v17950_v12 = vld [vmem:[#allocation48_spill] sm:$0xff] }
 0x3ed   :  { %3144 = vrot.lane.b32.xlu2 %v17949_v10, %s12157_s17  ;;  %v2641_v37 = vunpack.c.l.b16 %v2483_v30  ;;  %v17952_v10 = vld [vmem:[#allocation43_spill] sm:$0xff] }
 0x3ee   :  { %v11848_v53 = vpop.eup %11847  ;;  %v2618_v2 = vpack.c.b16 %v2617_v23, %v2616_v46  ;;  %v17951_v23 = vld [vmem:[#allocation54_spill] sm:$0xff] }
 0x3ef   :  { %v13622_v13 = vpop.eup %11849  ;;  %v2430_v36 = vmul.f32 %v11848_v53, %v13378_v60  ;;  %v2238_v14 = vpop.xlane.xlu2 %2237  ;;  %v2008_v53 = vsub.f32 %v17951_v23, %v13458_v16  ;;  %v17954_v16 = vld [vmem:[#allocation50_spill] sm:$0xff] }
 0x3f0   :  { %v13626_v4 = vpop.xlane.xlu0 %1937  ;;  %v11852_v7 = vpop.eup %11851  ;;  %10299 = vmatmul.msk.bf16.vlgmr.msrb.gmra.mxu2 %vm17811_vm15, %v2618_v2  ;;  %v2287_v60 = vsel %vm17811_vm15, %v13622_v13, 0.0 }
 0x3f1   :  { %v2235_v39 = vpop.xlane.xlu1 %2234  ;;  %v2494_v21 = vpack.c.bf16 %v2430_v36, %v2430_v36  ;;  %v2420_v25 = vmul.f32 %v11852_v7, %v13374_v54  ;;  %2832 = vmatpush.bf16.msrb.mxu2 %v17950_v12  ;;  %v11854_v61 = vpop.eup %11853 }
 0x3f2   :  { %11857 = vrcp.f32 %v2235_v39  ;;  %v13634_v54 = vpop.eup %11855 }
 0x3f3   :  { %11859 = vrcp.f32 %v2238_v14  ;;  %v2767_v50 = vunpack.c.l.b16 %v2494_v21  ;;  %v2484_v32 = vpack.c.bf16 %v2420_v25, %v2420_v25  ;;  %v2117_v21 = vmul.f32 1.442695, %v2008_v53  ;;  %v17956_v53 = vld [vmem:[#allocation63_spill] sm:$0xff] }
 0x3f4   :  { %11861 = vrcp.f32 %v13541_v15  ;;  %2288 = vadd.xlane.f32.xlu0 %v2287_v60  ;;  %v17953_v15 = vld [vmem:[#allocation47_spill] sm:$0xff]  ;;  %v2428_v25 = vmul.f32 %v11854_v61, %v13324_v18  ;;  %v2308_v12 = vsel %vm17811_vm15, %v13634_v54, 0.0 }
 0x3f5   :  { %v2768_v52 = vpack.c.b16 %v2767_v50, %v2766_v11  ;;  %v2642_v46 = vunpack.c.l.b16 %v2484_v32  ;;  %3069 = vrot.lane.b32.xlu2 %v17952_v10, %s12156_s16  ;;  %11863 = vrcp.f32 %v13589_v51  ;;  %v17955_v11 = vld [vmem:[#allocation59_spill] sm:$0xff] }
 0x3f6   :  { %11865 = vpow2.f32 %v2117_v21 }
 0x3f7   :  { %v2643_v2 = vpack.c.b16 %v2642_v46, %v2641_v37  ;;  %10305 = vmatmul.msk.bf16.vlgmr.msrb.gmra.mxu0 %vm17811_vm15, %v2768_v52 }
 0x3f8   :  { %v11858_v38 = vpop.eup %11857  ;;  %v2229_v36 = vpop.xlane.xlu0 %2228  ;;  %2982 = vmatpush.bf16.msrb.mxu0 %v17953_v15 }
 0x3f9   :  { %v11860_v7 = vpop.eup %11859  ;;  %v2437_v39 = vmul.f32 %v11858_v38, %v13397_v31  ;;  %10300 = vmatmul.msk.bf16.vlgmr.msra.gmra.mxu3 %vm17811_vm15, %v2643_v2 }
 0x3fa   :  { %v2438_v14 = vmul.f32 %v11860_v7, %v13402_v6  ;;  %v11862_v30 = vpop.eup %11861  ;;  %2857 = vmatpush.bf16.msra.mxu3 %v17954_v16  ;;  %v2492_v6 = vpack.c.bf16 %v2428_v25, %v2428_v25  ;;  %v2256_v16 = vpop.xlane.xlu2 %2255 }
 0x3fb   :  { %v2427_v50 = vmul.f32 %v11862_v30, %v17955_v11  ;;  %v2501_v32 = vpack.c.bf16 %v2437_v39, %v2437_v39  ;;  %v11864_v37 = vpop.eup %11863 }
 0x3fc   :  { %2309 = vadd.xlane.f32.xlu0 %v2308_v12  ;;  %v2502_v31 = vpack.c.bf16 %v2438_v14, %v2438_v14  ;;  %v2742_v23 = vunpack.c.l.b16 %v2492_v6  ;;  %v2423_v18 = vmul.f32 %v11864_v37, %v17956_v53  ;;  %v13652_v61 = vpop.eup %11865  ;;  %v17957_v12 = vld [vmem:[#allocation45_spill] sm:$0xff]  ;;  %v17959_v6 = vld [vmem:[#allocation60_spill] sm:$0xff] }
 0x3fd   :  { %v2491_v52 = vpack.c.bf16 %v2427_v50, %v2427_v50  ;;  %v2866_v46 = vunpack.c.l.b16 %v2501_v32  ;;  %v2290_v30 = vsel %vm17811_vm15, %v13652_v61, 0.0  ;;  %v17958_v50 = vld [vmem:[#allocation67_spill] sm:$0xff]  ;;  %v17960_v37 = vld [vmem:[#allocation64_spill] sm:$0xff] }
 0x3fe   :  { %v2867_v51 = vunpack.c.l.b16 %v2502_v31  ;;  %v2487_v39 = vpack.c.bf16 %v2423_v18, %v2423_v18  ;;  %v17961_v18 = vld [vmem:[#allocation52_spill] sm:$0xff] }
 0x3ff   :  { %v2741_v38 = vunpack.c.l.b16 %v2491_v52 }
 0x400   :  { %v2196_v60 = vpop.xlane.xlu0 %2195  ;;  %v2868_v2 = vpack.c.b16 %v2867_v51, %v2866_v46  ;;  %v2691_v11 = vunpack.c.l.b16 %v2487_v39  ;;  %v17963_v39 = vld [vmem:[#allocation56_spill] sm:$0xff] }
 0x401   :  { %11867 = vrcp.f32 %v2196_v60  ;;  %v2743_v15 = vpack.c.b16 %v2742_v23, %v2741_v38  ;;  %v2013_v60 = vsub.f32 %v17959_v6, %v13555_v35  ;;  %v17962_v35 = vld [vmem:[#allocation41_spill] sm:$0xff] }
 0x402   :  { %11869 = vrcp.f32 %v2229_v36 }
 0x403   :  { %11871 = vrcp.f32 %v13599_v0  ;;  %v2127_v38 = vmul.f32 1.442695, %v2013_v60  ;;  %v17966_v60 = vld [vmem:[#allocation69_spill] sm:$0xff] }
 0x404   :  { %11873 = vrcp.f32 %v13613_v27 }
 0x407   :  { %v11868_v7 = vpop.eup %11867  ;;  %10309 = vmatmul.msk.bf16.vlgmr.msra.gmra.mxu0 %vm17811_vm15, %v2868_v2 }
 0x408   :  { %v2424_v14 = vmul.f32 %v11868_v7, %v13427_v1  ;;  %v2199_v36 = vpop.xlane.xlu0 %2198  ;;  %v11870_v21 = vpop.eup %11869  ;;  %2291 = vadd.xlane.f32.xlu1 %v2290_v30 }
 0x409   :  { %10304 = vmatmul.msk.bf16.vlgmr.msrb.gmra.mxu3 %vm17811_vm15, %v2743_v15  ;;  %v11872_v0 = vpop.eup %11871  ;;  %v2435_v32 = vmul.f32 %v11870_v21, %v17958_v50  ;;  %v13662_v1 = vpop.f32.mrf.mxu0 }
 0x40a   :  { %v2488_v25 = vpack.c.bf16 %v2424_v14, %v2424_v14  ;;  %2957 = vmatpush.bf16.msrb.mxu3 %v17957_v12  ;;  %v2436_v52 = vmul.f32 %v11872_v0, %v17960_v37  ;;  %v1945_v23 = vsel %vm17811_vm15, %v13662_v1, -inf  ;;  %v2223_v7 = vpop.xlane.xlu2 %2222  ;;  %v2010_v14 = vsub.f32 %v17963_v39, %v13488_v24  ;;  %v11874_v21 = vpop.eup %11873 }
 0x40b   :  { %v2499_v51 = vpack.c.bf16 %v2435_v32, %v2435_v32  ;;  %v17964_v32 = vld [vmem:[#allocation49_spill] sm:$0xff] }
 0x40c   :  { %v2692_v31 = vunpack.c.l.b16 %v2488_v25  ;;  %v2500_v2 = vpack.c.bf16 %v2436_v52, %v2436_v52 }
 0x40d   :  { %v2841_v15 = vunpack.c.l.b16 %v2499_v51 }
 0x40e   :  { %v2693_v46 = vpack.c.b16 %v2692_v31, %v2691_v11  ;;  %v2842_v30 = vunpack.c.l.b16 %v2500_v2  ;;  %v2121_v11 = vmul.f32 1.442695, %v2010_v14 }
 0x410   :  { %10302 = vmatmul.msk.bf16.vlgmr.msra.gmra.mxu1 %vm17811_vm15, %v2693_v46  ;;  %v2253_v53 = vpop.xlane.xlu0 %2252  ;;  %1946 = vmax.xlane.f32.xlu1 %v1945_v23  ;;  %v2843_v25 = vpack.c.b16 %v2842_v30, %v2841_v15 }
 0x411   :  { %2907 = vmatpush.bf16.msra.mxu1 %v17961_v18  ;;  %3019 = vrot.lane.b32.xlu0 %v17962_v35, %s12156_s16  ;;  %11875 = vrcp.f32 %v2253_v53 }
 0x412   :  { %11877 = vrcp.f32 %v2256_v16  ;;  %v17965_v16 = vld [vmem:[#allocation65_spill] sm:$0xff] }
 0x413   :  { %11879 = vpow2.f32 %v2127_v38  ;;  %v2431_v6 = vmul.f32 %v11874_v21, %v17965_v16 }
 0x415   :  { %v2495_v51 = vpack.c.bf16 %v2431_v6, %v2431_v6 }
 0x417   :  { %v11876_v12 = vpop.eup %11875 }
 0x418   :  { %v2220_v0 = vpop.xlane.xlu0 %2219  ;;  %v2244_v50 = vpop.xlane.xlu2 %2243  ;;  %v2443_v24 = vmul.f32 %v11876_v12, %v13455_v57 }
 0x419   :  { %11881 = vrcp.f32 %v2220_v0  ;;  %10308 = vmatmul.msk.bf16.vlgmr.msra.gmra.mxu3 %vm17811_vm15, %v2843_v25  ;;  %v11878_v27 = vpop.eup %11877 }
 0x41a   :  { %3057 = vmatpush.bf16.msra.mxu3 %v17964_v32  ;;  %v13678_v31 = vpop.eup %11879  ;;  %11883 = vrcp.f32 %v2199_v36  ;;  %v2444_v37 = vmul.f32 %v11878_v27, %v17966_v60  ;;  %v2507_v23 = vpack.c.bf16 %v2443_v24, %v2443_v24  ;;  %v2791_v36 = vunpack.c.l.b16 %v2495_v51  ;;  %v17967_v24 = vld [vmem:[#allocation55_spill] sm:$0xff] }
 0x41b   :  { %11885 = vpow2.f32 %v2121_v11  ;;  %v2305_v46 = vsel %vm17811_vm15, %v13678_v31, 0.0  ;;  %v2226_v11 = vpop.xlane.xlu1 %2225 }
 0x41c   :  { %v2508_v2 = vpack.c.bf16 %v2444_v37, %v2444_v37  ;;  %v2941_v14 = vunpack.c.l.b16 %v2507_v23  ;;  %v17968_v37 = vld [vmem:[#allocation44_spill] sm:$0xff] }
 0x41e   :  { %2306 = vadd.xlane.f32.xlu2 %v2305_v46  ;;  %v2942_v25 = vunpack.c.l.b16 %v2508_v2  ;;  %v13700_v46 = vpop.f32.mrf.mxu0 }
 0x41f   :  { %v11882_v52 = vpop.eup %11881 }
 0x420   :  { %v2432_v53 = vmul.f32 %v11882_v52, %v13471_v59  ;;  %v2202_v18 = vpop.xlane.xlu0 %2201  ;;  %v11884_v38 = vpop.eup %11883  ;;  %v2943_v27 = vpack.c.b16 %v2942_v25, %v2941_v14 }
 0x421   :  { %v2280_v39 = vpop.xlane.xlu2 %2279  ;;  %11887 = vrcp.f32 %v2202_v18  ;;  %v13686_v57 = vpop.eup %11885  ;;  %v2425_v21 = vmul.f32 %v11884_v38, %v13439_v19  ;;  %v2009_v19 = vsub.f32 %v17967_v24, %v13473_v22  ;;  %v1948_v22 = vsel %vm17811_vm15, %v13700_v46, -inf }
 0x422   :  { %v2496_v15 = vpack.c.bf16 %v2432_v53, %v2432_v53  ;;  %11889 = vrcp.f32 %v2244_v50  ;;  %v2296_v59 = vsel %vm17811_vm15, %v13686_v57, 0.0 }
 0x423   :  { %v2489_v16 = vpack.c.bf16 %v2425_v21, %v2425_v21  ;;  %v2119_v53 = vmul.f32 1.442695, %v2009_v19  ;;  %v2265_v2 = vpop.xlane.xlu1 %2264 }
 0x424   :  { %v2792_v30 = vunpack.c.l.b16 %v2496_v15 }
 0x425   :  { %v2716_v23 = vunpack.c.l.b16 %v2489_v16 }
 0x426   :  { %v2793_v0 = vpack.c.b16 %v2792_v30, %v2791_v36  ;;  %2297 = vadd.xlane.f32.xlu2 %v2296_v59 }
 0x427   :  { %v11888_v12 = vpop.eup %11887 }
 0x428   :  { %10306 = vmatmul.msk.bf16.vlgmr.msrb.gmra.mxu1 %vm17811_vm15, %v2793_v0  ;;  %v2241_v32 = vpop.xlane.xlu0 %2240  ;;  %v11890_v50 = vpop.eup %11889  ;;  %v2426_v6 = vmul.f32 %v11888_v12, %v13486_v44 }
 0x429   :  { %11891 = vrcp.f32 %v2241_v32  ;;  %v13695_v60 = vpop.xlane.xlu2 %1940  ;;  %10312 = vmatmul.msk.bf16.vlgmr.msrb.gmra.mxu3 %vm17811_vm15, %v2943_v27  ;;  %3094 = vrot.lane.b32.xlu1 %v17968_v37, %s12156_s16  ;;  %v2440_v51 = vmul.f32 %v11890_v50, %v13482_v8  ;;  %v17969_v8 = vld [vmem:[#allocation61_spill] sm:$0xff]  ;;  %v17970_v27 = vld [vmem:[#allocation68_spill] sm:$0xff] }
 0x42a   :  { %11893 = vrcp.f32 %v2223_v7  ;;  %v2490_v52 = vpack.c.bf16 %v2426_v6, %v2426_v6  ;;  %v2015_v21 = vsub.f32 %v17969_v8, %v13553_v5 }
 0x42b   :  { %11895 = vrcp.f32 %v2226_v11  ;;  %v2504_v15 = vpack.c.bf16 %v2440_v51, %v2440_v51  ;;  %v2301_v24 = vpop.xlane.xlu1 %2300  ;;  %v17971_v51 = vld [vmem:[#allocation58_spill] sm:$0xff] }
 0x42c   :  { %v2717_v44 = vunpack.c.l.b16 %v2490_v52  ;;  %11897 = vpow2.f32 %v2119_v53 }
 0x42d   :  { %11899 = vrcp.f32 %v2280_v39  ;;  %v2892_v12 = vunpack.c.l.b16 %v2504_v15 }
 0x42e   :  { %v2718_v38 = vpack.c.b16 %v2717_v44, %v2716_v23  ;;  %1949 = vmax.xlane.f32.xlu2 %v1948_v22 }
 0x42f   :  { %v11892_v18 = vpop.eup %11891 }
 0x430   :  { %v11894_v7 = vpop.eup %11893  ;;  %v2439_v36 = vmul.f32 %v11892_v18, %v13504_v26  ;;  %v2259_v14 = vpop.xlane.xlu0 %2258  ;;  %10303 = vmatmul.msk.bf16.vlgmr.msra.gmra.mxu2 %vm17811_vm15, %v2718_v38  ;;  %v2131_v26 = vmul.f32 1.442695, %v2015_v21 }
 0x431   :  { %v11896_v30 = vpop.eup %11895  ;;  %v13709_v0 = vpop.xlane.xlu2 %1943  ;;  %v2433_v59 = vmul.f32 %v11894_v7, %v13444_v33  ;;  %v2017_v33 = vsub.f32 %v17971_v51, %v13520_v45  ;;  %v17973_v51 = vld [vmem:[#allocation39_spill] sm:$0xff] }
 0x432   :  { %v2503_v25 = vpack.c.bf16 %v2439_v36, %v2439_v36  ;;  %v2434_v32 = vmul.f32 %v11896_v30, %v17970_v27  ;;  %v13713_v6 = vpop.eup %11897  ;;  %v17972_v36 = vld [vmem:[#allocation62_spill] sm:$0xff] }
 0x433   :  { %v2497_v16 = vpack.c.bf16 %v2433_v59, %v2433_v59  ;;  %v11900_v5 = vpop.eup %11899  ;;  %v2293_v44 = vsel %vm17811_vm15, %v13713_v6, 0.0  ;;  %v2135_v38 = vmul.f32 1.442695, %v2017_v33  ;;  %v2016_v45 = vsub.f32 %v17972_v36, %v13568_v42  ;;  %v2250_v8 = vpop.xlane.xlu1 %2249 }
 0x434   :  { %v2891_v11 = vunpack.c.l.b16 %v2503_v25  ;;  %v2498_v52 = vpack.c.bf16 %v2434_v32, %v2434_v32  ;;  %v2452_v53 = vmul.f32 %v11900_v5, %v13490_v55 }
 0x435   :  { %v2816_v23 = vunpack.c.l.b16 %v2497_v16  ;;  %v2133_v27 = vmul.f32 1.442695, %v2016_v45 }
 0x436   :  { %v2893_v50 = vpack.c.b16 %v2892_v12, %v2891_v11  ;;  %v2817_v18 = vunpack.c.l.b16 %v2498_v52  ;;  %v2516_v30 = vpack.c.bf16 %v2452_v53, %v2452_v53 }
 0x438   :  { %10310 = vmatmul.msk.bf16.vlgmr.msra.gmra.mxu1 %vm17811_vm15, %v2893_v50  ;;  %v2277_v19 = vpop.xlane.xlu0 %2276  ;;  %v2818_v7 = vpack.c.b16 %v2817_v18, %v2816_v23  ;;  %v3042_v42 = vunpack.c.l.b16 %v2516_v30 }
 0x439   :  { %11901 = vrcp.f32 %v2277_v19  ;;  %v2268_v39 = vpop.xlane.xlu2 %2267 }
 0x43a   :  { %11903 = vpow2.f32 %v2131_v26 }
 0x43b   :  { %11905 = vrcp.f32 %v2259_v14  ;;  %2294 = vadd.xlane.f32.xlu0 %v2293_v44 }
 0x43c   :  { %11907 = vrcp.f32 %v2268_v39 }
 0x43d   :  { %11909 = vrcp.f32 %v2265_v2 }
 0x43f   :  { %v11902_v22 = vpop.eup %11901 }
 0x440   :  { %v13721_v15 = vpop.eup %11903  ;;  %v2451_v14 = vmul.f32 %v11902_v22, %v13539_v56  ;;  %v2262_v21 = vpop.xlane.xlu0 %2261  ;;  %10307 = vmatmul.msk.bf16.vlgmr.msrb.gmra.mxu2 %vm17811_vm15, %v2818_v7 }
 0x441   :  { %v11906_v25 = vpop.eup %11905  ;;  %11911 = vrcp.f32 %v2262_v21  ;;  %v2286_v59 = vpop.xlane.xlu2 %2285  ;;  %v2311_v12 = vsel %vm17811_vm15, %v13721_v15, 0.0 }
 0x442   :  { %11913 = vpow2.f32 %v2135_v38  ;;  %v2515_v55 = vpack.c.bf16 %v2451_v14, %v2451_v14  ;;  %v11908_v11 = vpop.eup %11907  ;;  %v2445_v2 = vmul.f32 %v11906_v25, %v13518_v3 }
 0x443   :  { %11915 = vrcp.f32 %v2250_v8  ;;  %2312 = vadd.xlane.f32.xlu0 %v2311_v12  ;;  %v11910_v56 = vpop.eup %11909  ;;  %v2448_v16 = vmul.f32 %v11908_v11, %v13543_v58 }
 0x444   :  { %v3041_v32 = vunpack.c.l.b16 %v2515_v55  ;;  %11917 = vrcp.f32 %v2301_v24  ;;  %v2509_v5 = vpack.c.bf16 %v2445_v2, %v2445_v2  ;;  %v2447_v24 = vmul.f32 %v11910_v56, %v13461_v17  ;;  %v13743_v17 = vpop.f32.mrf.mxu1 }
 0x445   :  { %11919 = vpow2.f32 %v2133_v27  ;;  %v2512_v53 = vpack.c.bf16 %v2448_v16, %v2448_v16  ;;  %v1951_v56 = vsel %vm17811_vm15, %v13743_v17, -inf }
 0x446   :  { %v3043_v26 = vpack.c.b16 %v3042_v42, %v3041_v32  ;;  %3169 = vrot.lane.b32.xlu2 %v17973_v51, %s12157_s17  ;;  %v2966_v38 = vunpack.c.l.b16 %v2509_v5  ;;  %v2511_v7 = vpack.c.bf16 %v2447_v24, %v2447_v24 }
 0x447   :  { %v11912_v50 = vpop.eup %11911  ;;  %v2992_v14 = vunpack.c.l.b16 %v2512_v53 }
 0x448   :  { %v13731_v19 = vpop.eup %11913  ;;  %v2446_v52 = vmul.f32 %v11912_v50, %v13557_v34  ;;  %10316 = vmatmul.msk.bf16.vlgmr.msra.gmra.mxu3 %vm17811_vm15, %v3043_v26  ;;  %v2247_v3 = vpop.xlane.xlu0 %2246  ;;  %v2991_v12 = vunpack.c.l.b16 %v2511_v7 }
 0x449   :  { %v11916_v33 = vpop.eup %11915  ;;  %v2920_v39 = vpop.permute.xlu1 %2919  ;;  %11921 = vrcp.f32 %v2247_v3  ;;  %v2317_v34 = vsel %vm17811_vm15, %v13731_v19, 0.0 }
 0x44a   :  { %11923 = vrcp.f32 %v2286_v59  ;;  %v2510_v23 = vpack.c.bf16 %v2446_v52, %v2446_v52  ;;  %v2304_v58 = vpop.xlane.xlu2 %2303  ;;  %2932 = vmatpush.bf16.msra.mxu2 %v2920_v39  ;;  %v11918_v44 = vpop.eup %11917  ;;  %v2442_v18 = vmul.f32 %v11916_v33, %v13526_v43  ;;  %v2993_v32 = vpack.c.b16 %v2992_v14, %v2991_v12 }
 0x44b   :  { %11925 = vrcp.f32 %v2304_v58  ;;  %2318 = vadd.xlane.f32.xlu0 %v2317_v34  ;;  %v13741_v36 = vpop.eup %11919  ;;  %v2459_v45 = vmul.f32 %v11918_v44, %v13494_v20 }
 0x44c   :  { %v2967_v22 = vunpack.c.l.b16 %v2510_v23  ;;  %v2506_v25 = vpack.c.bf16 %v2442_v18, %v2442_v18  ;;  %v13759_v24 = vpop.f32.mrf.mxu1 }
 0x44d   :  { %v2523_v27 = vpack.c.bf16 %v2459_v45, %v2459_v45  ;;  %v1954_v18 = vsel %vm17811_vm15, %v13759_v24, -inf }
 0x44e   :  { %v2968_v30 = vpack.c.b16 %v2967_v22, %v2966_v38  ;;  %3119 = vrot.lane.b32.xlu2 %v17945_v29, %s12156_s16  ;;  %v2917_v26 = vunpack.c.l.b16 %v2506_v25 }
 0x44f   :  { %v11922_v8 = vpop.eup %11921  ;;  %v3141_v52 = vunpack.c.l.b16 %v2523_v27 }
 0x450   :  { %v11924_v21 = vpop.eup %11923  ;;  %v2441_v55 = vmul.f32 %v11922_v8, %v13572_v49  ;;  %10313 = vmatmul.msk.bf16.vlgmr.msrb.gmra.mxu0 %vm17811_vm15, %v2968_v30  ;;  %v2283_v43 = vpop.xlane.xlu0 %2282  ;;  %v2314_v49 = vsel %vm17811_vm15, %v13741_v36, 0.0 }
 0x451   :  { %v11926_v59 = vpop.eup %11925  ;;  %v2995_v11 = vpop.permute.xlu1 %2994  ;;  %11927 = vrcp.f32 %v2283_v43  ;;  %v2454_v50 = vmul.f32 %v11924_v21, %v13562_v63  ;;  %v2020_v63 = vsub.f32 %v13522_v47, %v13709_v0  ;;  %v17974_v0 = vld [vmem:[#allocation66_spill] sm:$0xff]  ;;  %v2019_v43 = vsub.f32 %v13506_v40, %v13695_v60 }
 0x452   :  { %v2460_v20 = vmul.f32 %v11926_v59, %v13576_v28  ;;  %v2505_v42 = vpack.c.bf16 %v2441_v55, %v2441_v55  ;;  %v3145_v2 = vpop.permute.xlu2 %3144  ;;  %3007 = vmatpush.bf16.msrb.mxu1 %v2995_v11  ;;  %v13757_v28 = vpop.f32.mrf.mxu2  ;;  %v2018_v8 = vsub.f32 %v17974_v0, %v13626_v4 }
 0x453   :  { %3157 = vmatpush.bf16.msrb.mxu3 %v3145_v2  ;;  %2315 = vadd.xlane.f32.xlu1 %v2314_v49  ;;  %v2518_v39 = vpack.c.bf16 %v2454_v50, %v2454_v50  ;;  %v1957_v34 = vsel %vm17811_vm15, %v13757_v28, -inf  ;;  %v2139_v12 = vmul.f32 1.442695, %v2019_v43 }
 0x454   :  { %v2524_v16 = vpack.c.bf16 %v2460_v20, %v2460_v20  ;;  %v2916_v5 = vunpack.c.l.b16 %v2505_v42  ;;  %1952 = vmax.xlane.f32.xlu0 %v1951_v56  ;;  %v2137_v25 = vmul.f32 1.442695, %v2018_v8  ;;  %v17975_v56 = vld [vmem:[#allocation42_spill] sm:$0xff] }
 0x455   :  { %10314 = vmatmul.msk.bf16.vlgmr.msrb.gmra.mxu1 %vm17811_vm15, %v2993_v32  ;;  %v3067_v38 = vunpack.c.l.b16 %v2518_v39 }
 0x456   :  { %v3142_v51 = vunpack.c.l.b16 %v2524_v16  ;;  %v2918_v3 = vpack.c.b16 %v2917_v26, %v2916_v5  ;;  %v13799_v26 = vpop.f32.mrf.mxu3 }
 0x457   :  { %v11928_v33 = vpop.eup %11927 }
 0x458   :  { %v3143_v23 = vpack.c.b16 %v3142_v51, %v3141_v52  ;;  %v2453_v58 = vmul.f32 %v11928_v33, %v13586_v41  ;;  %10311 = vmatmul.msk.bf16.vlgmr.msra.gmra.mxu2 %vm17811_vm15, %v2918_v3  ;;  %v2141_v41 = vmul.f32 1.442695, %v2020_v63  ;;  %v2271_v45 = vpop.xlane.xlu0 %2270 }
 0x45a   :  { %v2517_v44 = vpack.c.bf16 %v2453_v58, %v2453_v58  ;;  %v3070_v53 = vpop.permute.xlu2 %3069  ;;  %10320 = vmatmul.msk.bf16.vlgmr.msrb.gmra.mxu3 %vm17811_vm15, %v3143_v23  ;;  %v13770_v30 = vpop.f32.mrf.mxu2  ;;  %11929 = vpow2.f32 %v2141_v41 }
 0x45b   :  { %3082 = vmatpush.bf16.msra.mxu0 %v3070_v53  ;;  %1958 = vmax.xlane.f32.xlu1 %v1957_v34  ;;  %v1960_v47 = vsel %vm17811_vm15, %v13770_v30, -inf  ;;  %11931 = vpow2.f32 %v2137_v25 }
 0x45c   :  { %v3066_v22 = vunpack.c.l.b16 %v2517_v44  ;;  %1955 = vmax.xlane.f32.xlu0 %v1954_v18 }
 0x45e   :  { %v3068_v7 = vpack.c.b16 %v3067_v38, %v3066_v22  ;;  %v13805_v3 = vpop.f32.mrf.mxu3 }
 0x460   :  { %10317 = vmatmul.msk.bf16.vlgmr.msra.gmra.mxu0 %vm17811_vm15, %v3068_v7  ;;  %v13777_v14 = vpop.eup %11929  ;;  %v2274_v21 = vpop.xlane.xlu0 %2273 }
 0x461   :  { %v2326_v55 = vsel %vm17811_vm15, %v13777_v14, 0.0  ;;  %11933 = vrcp.f32 %v2274_v21  ;;  %v13785_v4 = vpop.eup %11931 }
 0x462   :  { %11935 = vrcp.f32 %v2271_v45  ;;  %v2320_v27 = vsel %vm17811_vm15, %v13785_v4, 0.0 }
 0x463   :  { %1961 = vmax.xlane.f32.xlu1 %v1960_v47  ;;  %11937 = vpow2.f32 %v2139_v12 }
 0x467   :  { %v11934_v11 = vpop.eup %11933 }
 0x468   :  { %v2289_v59 = vpop.xlane.xlu0 %2288  ;;  %v11936_v20 = vpop.eup %11935  ;;  %v2450_v40 = vmul.f32 %v11934_v11, %v13607_v48 }
 0x469   :  { %v13793_v2 = vpop.eup %11937 }
 0x46a   :  { %v2514_v32 = vpack.c.bf16 %v2450_v40, %v2450_v40 }
 0x46b   :  { %2327 = vadd.xlane.f32.xlu1 %v2326_v55 }
 0x46c   :  { %v3017_v50 = vunpack.c.l.b16 %v2514_v32 }
 0x470   :  { %3194 = vrot.lane.b32.xlu0 %v17946_v9, %s12157_s17  ;;  %v2449_v9 = vmul.f32 %v11936_v20, %v13597_v62  ;;  %v2310_v60 = vpop.xlane.xlu0 %2309 }
 0x472   :  { %v2513_v49 = vpack.c.bf16 %v2449_v9, %v2449_v9  ;;  %v13828_v9 = vpop.f32.mrf.mxu0 }
 0x474   :  { %v3016_v16 = vunpack.c.l.b16 %v2513_v49 }
 0x476   :  { %v3018_v52 = vpack.c.b16 %v3017_v50, %v3016_v16 }
 0x477   :  { %2321 = vadd.xlane.f32.xlu2 %v2320_v27 }
 0x478   :  { %3219 = vrot.lane.b32.xlu0 %v17962_v35, %s12157_s17  ;;  %v2323_v35 = vsel %vm17811_vm15, %v13793_v2, 0.0 }
 0x47b   :  { %v2292_v42 = vpop.xlane.xlu1 %2291 }
 0x47c   :  { %11939 = vrcp.f32 %v2292_v42 }
 0x47f   :  { %2324 = vadd.xlane.f32.xlu2 %v2323_v35 }
 0x480   :  { %3244 = vrot.lane.b32.xlu0 %v17975_v56, %s12157_s17 }
 0x482   :  { %v11940_v33 = vpop.eup %11939 }
 0x483   :  { %v1947_v48 = vpop.xlane.xlu1 %1946  ;;  %v3020_v5 = vpop.permute.xlu0 %3019  ;;  %v2456_v58 = vmul.f32 %v11940_v33, %v13652_v61 }
 0x484   :  { %v2021_v62 = vsub.f32 %v13662_v1, %v1947_v48  ;;  %3032 = vmatpush.bf16.msrb.mxu2 %v3020_v5  ;;  %v13834_v48 = vpop.f32.mrf.mxu0 }
 0x485   :  { %v2520_v53 = vpack.c.bf16 %v2456_v58, %v2456_v58 }
 0x486   :  { %v2143_v51 = vmul.f32 1.442695, %v2021_v62 }
 0x487   :  { %10315 = vmatmul.msk.bf16.vlgmr.msrb.gmra.mxu2 %vm17811_vm15, %v3018_v52  ;;  %v3092_v18 = vunpack.c.l.b16 %v2520_v53 }
 0x488   :  { %3269 = vrot.lane.b32.xlu0 %v17952_v10, %s12157_s17  ;;  %11941 = vpow2.f32 %v2143_v51  ;;  %v13813_v10 = vpop.f32.mrf.mxu3 }
 0x489   :  { %11943 = vrcp.f32 %v2289_v59 }
 0x48e   :  { %v13807_v39 = vpop.eup %11941 }
 0x48f   :  { %v2329_v23 = vsel %vm17811_vm15, %v13807_v39, 0.0  ;;  %v11944_v1 = vpop.eup %11943 }
 0x490   :  { %2330 = vadd.xlane.f32.xlu2 %v2329_v23  ;;  %v2455_v44 = vmul.f32 %v11944_v1, %v13622_v13  ;;  %v13815_v47 = vpop.f32.mrf.mxu3  ;;  %v13839_v23 = vpop.f32.mrf.mxu0 }
 0x491   :  { %v2307_v63 = vpop.xlane.xlu2 %2306 }
 0x492   :  { %v2519_v34 = vpack.c.bf16 %v2455_v44, %v2455_v44  ;;  %11945 = vrcp.f32 %v2307_v63  ;;  %v13846_v44 = vpop.f32.mrf.mxu1 }
 0x493   :  { %11947 = vrcp.f32 %v2310_v60 }
 0x494   :  { %v3091_v22 = vunpack.c.l.b16 %v2519_v34 }
 0x496   :  { %v3093_v45 = vpack.c.b16 %v3092_v18, %v3091_v22 }
 0x498   :  { %v11946_v7 = vpop.eup %11945  ;;  %v13821_v59 = vpop.f32.mrf.mxu3 }
 0x499   :  { %v2298_v38 = vpop.xlane.xlu2 %2297  ;;  %v11948_v0 = vpop.eup %11947  ;;  %v2461_v13 = vmul.f32 %v11946_v7, %v13678_v31 }
 0x49a   :  { %v2462_v61 = vmul.f32 %v11948_v0, %v13634_v54  ;;  %v13848_v34 = vpop.f32.mrf.mxu0 }
 0x49b   :  { %v3095_v41 = vpop.permute.xlu1 %3094  ;;  %v2525_v25 = vpack.c.bf16 %v2461_v13, %v2461_v13 }
 0x49c   :  { %3107 = vmatpush.bf16.msra.mxu1 %v3095_v41  ;;  %v2526_v43 = vpack.c.bf16 %v2462_v61, %v2462_v61  ;;  %v13858_v61 = vpop.f32.mrf.mxu1 }
 0x49d   :  { %v3166_v12 = vunpack.c.l.b16 %v2525_v25 }
 0x49e   :  { %v3167_v11 = vunpack.c.l.b16 %v2526_v43 }
 0x49f   :  { %10318 = vmatmul.msk.bf16.vlgmr.msra.gmra.mxu1 %vm17811_vm15, %v3093_v45 }
 0x4a0   :  { %v3168_v20 = vpack.c.b16 %v3167_v11, %v3166_v12  ;;  %v13830_v60 = vpop.f32.mrf.mxu3 }
 0x4a1   :  { %v1950_v8 = vpop.xlane.xlu2 %1949 }
 0x4a2   :  { %v2022_v21 = vsub.f32 %v13700_v46, %v1950_v8 }
 0x4a4   :  { %v2145_v55 = vmul.f32 1.442695, %v2022_v21 }
 0x4a6   :  { %11949 = vpow2.f32 %v2145_v55 }
 0x4a7   :  { %11951 = vrcp.f32 %v2298_v38 }
 0x4a8   :  { %v13836_v52 = vpop.f32.mrf.mxu3 }
 0x4a9   :  { %v3170_v27 = vpop.permute.xlu2 %3169 }
 0x4aa   :  { %3182 = vmatpush.bf16.msrb.mxu0 %v3170_v27 }
 0x4ac   :  { %v13823_v40 = vpop.eup %11949 }
 0x4ad   :  { %10321 = vmatmul.msk.bf16.vlgmr.msrb.gmra.mxu0 %vm17811_vm15, %v3168_v20  ;;  %v2332_v54 = vsel %vm17811_vm15, %v13823_v40, 0.0  ;;  %v11952_v46 = vpop.eup %11951 }
 0x4ae   :  { %v2295_v31 = vpop.xlane.xlu0 %2294  ;;  %2333 = vadd.xlane.f32.xlu1 %v2332_v54  ;;  %v2458_v42 = vmul.f32 %v11952_v46, %v13686_v57  ;;  %v13841_v57 = vpop.f32.mrf.mxu2 }
 0x4af   :  { %11953 = vrcp.f32 %v2295_v31  ;;  %v13871_v31 = vpop.f32.mrf.mxu1 }
 0x4b0   :  { %v2522_v56 = vpack.c.bf16 %v2458_v42, %v2458_v42  ;;  %v13843_v1 = vpop.f32.mrf.mxu3 }
 0x4b1   :  { %v3120_v32 = vpop.permute.xlu2 %3119 }
 0x4b2   :  { %3132 = vmatpush.bf16.msra.mxu2 %v3120_v32  ;;  %v3117_v5 = vunpack.c.l.b16 %v2522_v56 }
 0x4b5   :  { %v11954_v49 = vpop.eup %11953 }
 0x4b6   :  { %v2457_v35 = vmul.f32 %v11954_v49, %v13713_v6  ;;  %v2313_v50 = vpop.xlane.xlu0 %2312  ;;  %v13850_v18 = vpop.f32.mrf.mxu2 }
 0x4b8   :  { %v2521_v16 = vpack.c.bf16 %v2457_v35, %v2457_v35  ;;  %v13854_v45 = vpop.f32.mrf.mxu3 }
 0x4ba   :  { %v3116_v62 = vunpack.c.l.b16 %v2521_v16 }
 0x4bc   :  { %v3118_v51 = vpack.c.b16 %v3117_v5, %v3116_v62 }
 0x4be   :  { %10319 = vmatmul.msk.bf16.vlgmr.msra.gmra.mxu2 %vm17811_vm15, %v3118_v51  ;;  %v2319_v33 = vpop.xlane.xlu0 %2318  ;;  %v13862_v25 = vpop.f32.mrf.mxu2 }
 0x4c0   :  { %v13873_v46 = vpop.f32.mrf.mxu3 }
 0x4c6   :  { %v2316_v58 = vpop.xlane.xlu1 %2315  ;;  %v13879_v49 = vpop.f32.mrf.mxu2 }
 0x4c7   :  { %v1953_v6 = vpop.xlane.xlu0 %1952 }
 0x4c8   :  { %v2023_v63 = vsub.f32 %v13743_v17, %v1953_v6 }
 0x4ca   :  { %v2147_v53 = vmul.f32 1.442695, %v2023_v63 }
 0x4cb   :  { %v13883_v5 = vpop.f32.mrf.mxu3 }
 0x4cc   :  { %11955 = vpow2.f32 %v2147_v53 }
 0x4cd   :  { %11957 = vrcp.f32 %v2316_v58  ;;  %v13887_v58 = vpop.f32.mrf.mxu1 }
 0x4ce   :  { %v1959_v38 = vpop.xlane.xlu1 %1958  ;;  %11959 = vrcp.f32 %v2313_v50  ;;  %v2834_v6 = vpop.f32.mrf.mxu2 }
 0x4cf   :  { %v1956_v22 = vpop.xlane.xlu0 %1955  ;;  %v2025_v41 = vsub.f32 %v13757_v28, %v1959_v38 }
 0x4d0   :  { %v2024_v7 = vsub.f32 %v13759_v24, %v1956_v22  ;;  %v2784_v24 = vpop.f32.mrf.mxu0 }
 0x4d1   :  { %v2151_v17 = vmul.f32 1.442695, %v2025_v41 }
 0x4d2   :  { %v13856_v0 = vpop.eup %11955  ;;  %v2149_v13 = vmul.f32 1.442695, %v2024_v7 }
 0x4d3   :  { %v2335_v8 = vsel %vm17811_vm15, %v13856_v0, 0.0  ;;  %11961 = vpow2.f32 %v2151_v17  ;;  %v11958_v21 = vpop.eup %11957  ;;  %v13892_v17 = vpop.f32.mrf.mxu3 }
 0x4d4   :  { %2336 = vadd.xlane.f32.xlu2 %v2335_v8  ;;  %11963 = vpow2.f32 %v2149_v13  ;;  %v11960_v28 = vpop.eup %11959  ;;  %v2464_v43 = vmul.f32 %v11958_v21, %v13741_v36 }
 0x4d5   :  { %v2463_v27 = vmul.f32 %v11960_v28, %v13721_v15  ;;  %v13890_v7 = vpop.f32.mrf.mxu1 }
 0x4d6   :  { %v1962_v55 = vpop.xlane.xlu1 %1961  ;;  %v2528_v32 = vpack.c.bf16 %v2464_v43, %v2464_v43  ;;  %v2836_v28 = vpop.f32.mrf.mxu2 }
 0x4d7   :  { %v2026_v12 = vsub.f32 %v13770_v30, %v1962_v55  ;;  %v2527_v30 = vpack.c.bf16 %v2463_v27, %v2463_v27 }
 0x4d8   :  { %v3192_v15 = vunpack.c.l.b16 %v2528_v32  ;;  %v2786_v56 = vpop.f32.mrf.mxu0 }
 0x4d9   :  { %v13866_v11 = vpop.eup %11961  ;;  %v2153_v20 = vmul.f32 1.442695, %v2026_v12  ;;  %v3191_v50 = vunpack.c.l.b16 %v2527_v30  ;;  %v11625_v13 = vpack.i.bf16 %v2786_v56, %v2784_v24 }
 0x4da   :  { %v13869_v54 = vpop.eup %11963  ;;  %v2341_v42 = vsel %vm17811_vm15, %v13866_v11, 0.0 }
 0x4db   :  { %11965 = vpow2.f32 %v2153_v20  ;;  %2342 = vadd.xlane.f32.xlu0 %v2341_v42  ;;  %v2338_v36 = vsel %vm17811_vm15, %v13869_v54, 0.0  ;;  %v3193_v51 = vpack.c.b16 %v3192_v15, %v3191_v50  ;;  %v11655_v42 = vpack.i.bf16 %v2836_v28, %v2834_v6 }
 0x4dc   :  { %2339 = vadd.xlane.f32.xlu1 %v2338_v36  ;;  %11967 = vrcp.f32 %v2319_v33 }
 0x4dd   :  { %v3159_v24 = vpop.f32.mrf.mxu3 }
 0x4de   :  { %v2328_v38 = vpop.xlane.xlu1 %2327 }
 0x4e0   :  { %v2884_v53 = vpop.f32.mrf.mxu0 }
 0x4e1   :  { %v13881_v35 = vpop.eup %11965 }
 0x4e2   :  { %v3195_v16 = vpop.permute.xlu0 %3194  ;;  %v2344_v62 = vsel %vm17811_vm15, %v13881_v35, 0.0  ;;  %v11968_v41 = vpop.eup %11967 }
 0x4e3   :  { %3207 = vmatpush.bf16.msrb.mxu1 %v3195_v16  ;;  %2345 = vadd.xlane.f32.xlu2 %v2344_v62  ;;  %v2465_v8 = vmul.f32 %v11968_v41, %v13731_v19  ;;  %v2811_v19 = vpop.f32.mrf.mxu1  ;;  %v11610_v16 = vpack.i.bf16 %v13830_v60, %v13821_v59 }
 0x4e5   :  { %v2529_v55 = vpack.c.bf16 %v2465_v8, %v2465_v8  ;;  %v3161_v60 = vpop.f32.mrf.mxu3 }
 0x4e6   :  { %10322 = vmatmul.msk.bf16.vlgmr.msrb.gmra.mxu1 %vm17811_vm15, %v3193_v51  ;;  %v11620_v41 = vpack.i.bf16 %v3161_v60, %v3159_v24 }
 0x4e7   :  { %v3216_v36 = vunpack.c.l.b16 %v2529_v55 }
 0x4e8   :  { %v2886_v20 = vpop.f32.mrf.mxu0 }
 0x4ea   :  { %v3220_v63 = vpop.permute.xlu0 %3219  ;;  %v2322_v22 = vpop.xlane.xlu2 %2321 }
 0x4eb   :  { %3232 = vmatpush.bf16.msrb.mxu2 %v3220_v63  ;;  %11969 = vrcp.f32 %v2322_v22  ;;  %v2909_v59 = vpop.f32.mrf.mxu1 }
 0x4ec   :  { %11971 = vrcp.f32 %v2328_v38 }
 0x4ef   :  { %11626 = vrot.lane.b32.xlu0 %v11625_v13, %s12158_s18 }
 0x4f1   :  { %v11970_v21 = vpop.eup %11969 }
 0x4f2   :  { %v3245_v33 = vpop.permute.xlu0 %3244  ;;  %v2466_v43 = vmul.f32 %v11970_v21, %v13785_v4  ;;  %v2325_v12 = vpop.xlane.xlu2 %2324 }
 0x4f3   :  { %3257 = vmatpush.bf16.msra.mxu3 %v3245_v33  ;;  %v11972_v27 = vpop.eup %11971  ;;  %11973 = vrcp.f32 %v2325_v12  ;;  %v2911_v8 = vpop.f32.mrf.mxu1 }
 0x4f4   :  { %v2530_v32 = vpack.c.bf16 %v2466_v43, %v2466_v43  ;;  %v2468_v30 = vmul.f32 %v11972_v27, %v13777_v14  ;;  %v11670_v14 = vpack.i.bf16 %v13843_v1, %v13836_v52  ;;  %v2934_v1 = vpop.f32.mrf.mxu2 }
 0x4f5   :  { %3294 = vrot.lane.b32.xlu1 %v17968_v37, %s12157_s17  ;;  %v2984_v37 = vpop.f32.mrf.mxu0 }
 0x4f6   :  { %v3217_v15 = vunpack.c.l.b16 %v2530_v32  ;;  %v2532_v62 = vpack.c.bf16 %v2468_v30, %v2468_v30 }
 0x4f7   :  { %11656 = vrot.lane.b32.xlu0 %v11655_v42, %s12158_s18 }
 0x4f8   :  { %v3218_v56 = vpack.c.b16 %v3217_v15, %v3216_v36  ;;  %v3242_v63 = vunpack.c.l.b16 %v2532_v62 }
 0x4f9   :  { %v11974_v4 = vpop.eup %11973 }
 0x4fa   :  { %v3270_v50 = vpop.permute.xlu0 %3269  ;;  %v2467_v51 = vmul.f32 %v11974_v4, %v13793_v2  ;;  %10323 = vmatmul.msk.bf16.vlgmr.msrb.gmra.mxu2 %vm17811_vm15, %v3218_v56  ;;  %v11615_v2 = vpack.i.bf16 %v13873_v46, %v13854_v45  ;;  %v11700_v45 = vpack.i.bf16 %v2911_v8, %v2909_v59  ;;  %v11640_v46 = vpack.i.bf16 %v2811_v19, %v13890_v7  ;;  %v11403_v59 = vld [vmem:[%s17692_s4 + $0x8] sm:$0xff] }
 0x4fb   :  { %3282 = vmatpush.bf16.msra.mxu0 %v3270_v50  ;;  %3319 = vrot.lane.b32.xlu2 %v17945_v29, %s12157_s17  ;;  %v11685_v29 = vpack.i.bf16 %v2886_v20, %v2884_v53  ;;  %v3009_v30 = vpop.f32.mrf.mxu1 }
 0x4fc   :  { %v2531_v6 = vpack.c.bf16 %v2467_v51, %v2467_v51  ;;  %v2936_v33 = vpop.f32.mrf.mxu2  ;;  %3635 = vmatpush.bf16.msrb.mxu3 %v11403_v59 }
 0x4fd   :  { %11611 = vrot.lane.b32.xlu1 %v11610_v16, %s12158_s18  ;;  %v2986_v52 = vpop.f32.mrf.mxu0  ;;  %v11715_v53 = vpack.i.bf16 %v2936_v33, %v2934_v1 }
 0x4fe   :  { %v3241_v38 = vunpack.c.l.b16 %v2531_v6  ;;  %v11630_v13 = vpack.i.bf16 %v2986_v52, %v2984_v37 }
 0x4ff   :  { %11671 = vrot.lane.b32.xlu0 %v11670_v14, %s12158_s18 }
 0x500   :  { %v3243_v22 = vpack.c.b16 %v3242_v63, %v3241_v38 }
 0x502   :  { %10324 = vmatmul.msk.bf16.vlgmr.msra.gmra.mxu3 %vm17811_vm15, %v3243_v22  ;;  %v11402_v22 = vld [vmem:[%s17692_s4] sm:$0xff] }
 0x503   :  { %11616 = vrot.lane.b32.xlu2 %v11615_v2, %s12159_s0  ;;  %v2331_v28 = vpop.xlane.xlu2 %2330  ;;  %v3011_v16 = vpop.f32.mrf.mxu1  ;;  %3636 = vmatpush.bf16.msrb.mxu3 %v11402_v22 }
 0x504   :  { %11975 = vrcp.f32 %v2331_v28  ;;  %v11645_v62 = vpack.i.bf16 %v3011_v16, %v3009_v30 }
 0x505   :  { %11621 = vrot.lane.b32.xlu1 %v11620_v41, %s12160_s19  ;;  %v3084_v21 = vpop.f32.mrf.mxu0 }
 0x507   :  { %11686 = vrot.lane.b32.xlu0 %v11685_v29, %s12158_s18 }
 0x50a   :  { %v11976_v43 = vpop.eup %11975  ;;  %v3034_v4 = vpop.f32.mrf.mxu2 }
 0x50b   :  { %11631 = vrot.lane.b32.xlu2 %v11630_v13, %s12159_s0  ;;  %v2469_v27 = vmul.f32 %v11976_v43, %v13807_v39 }
 0x50d   :  { %v3086_v12 = vpop.f32.mrf.mxu0  ;;  %v2533_v42 = vpack.c.bf16 %v2469_v27, %v2469_v27 }
 0x50e   :  { %v11690_v38 = vpack.i.bf16 %v3086_v12, %v3084_v21 }
 0x50f   :  { %11701 = vrot.lane.b32.xlu0 %v11700_v45, %s12158_s18  ;;  %v3266_v24 = vunpack.c.l.b16 %v2533_v42 }
 0x512   :  { %v3036_v39 = vpop.f32.mrf.mxu2 }
 0x513   :  { %11641 = vrot.lane.b32.xlu2 %v11640_v46, %s12158_s18  ;;  %v11660_v51 = vpack.i.bf16 %v3036_v39, %v3034_v4 }
 0x517   :  { %11716 = vrot.lane.b32.xlu0 %v11715_v53, %s12158_s18 }
 0x51c   :  { %v3109_v6 = vpop.f32.mrf.mxu1 }
 0x521   :  { %v2334_v55 = vpop.xlane.xlu1 %2333 }
 0x522   :  { %11977 = vrcp.f32 %v2334_v55 }
 0x528   :  { %v11978_v20 = vpop.eup %11977 }
 0x529   :  { %v2470_v32 = vmul.f32 %v11978_v20, %v13823_v40  ;;  %v11675_v40 = vpack.i.bf16 %v13892_v17, %v13883_v5  ;;  %v3111_v17 = vpop.f32.mrf.mxu1 }
 0x52a   :  { %v3184_v7 = vpop.f32.mrf.mxu0  ;;  %v11705_v1 = vpack.i.bf16 %v3111_v17, %v3109_v6 }
 0x52b   :  { %v2534_v19 = vpack.c.bf16 %v2470_v32, %v2470_v32 }
 0x52d   :  { %v3267_v36 = vunpack.c.l.b16 %v2534_v19 }
 0x52f   :  { %v3268_v15 = vpack.c.b16 %v3267_v36, %v3266_v24 }
 0x531   :  { %10325 = vmatmul.msk.bf16.vlgmr.msra.gmra.mxu0 %vm17811_vm15, %v3268_v15 }
 0x532   :  { %v3186_v56 = vpop.f32.mrf.mxu0 }
 0x533   :  { %v11635_v50 = vpack.i.bf16 %v3186_v56, %v3184_v7 }
 0x535   :  { %11636 = vrot.lane.b32.xlu1 %v11635_v50, %s12160_s19 }
 0x53d   :  { %11646 = vrot.lane.b32.xlu1 %v11645_v62, %s12159_s0 }
 0x541   :  { %v3134_v5 = vpop.f32.mrf.mxu2 }
 0x545   :  { %11661 = vrot.lane.b32.xlu1 %v11660_v51, %s12159_s0 }
 0x547   :  { %v2337_v37 = vpop.xlane.xlu2 %2336 }
 0x549   :  { %v3136_v28 = vpop.f32.mrf.mxu2 }
 0x54a   :  { %v11720_v20 = vpack.i.bf16 %v3136_v28, %v3134_v5 }
 0x54d   :  { %11676 = vrot.lane.b32.xlu1 %v11675_v40, %s12159_s0 }
 0x54e   :  { %v2343_v14 = vpop.xlane.xlu0 %2342 }
 0x54f   :  { %v2340_v63 = vpop.xlane.xlu1 %2339  ;;  %11979 = vrcp.f32 %v2343_v14 }
 0x550   :  { %11981 = vrcp.f32 %v2340_v63 }
 0x551   :  { %11983 = vrcp.f32 %v2337_v37 }
 0x555   :  { %11691 = vrot.lane.b32.xlu1 %v11690_v38, %s12159_s0  ;;  %v11980_v2 = vpop.eup %11979 }
 0x556   :  { %v2346_v60 = vpop.xlane.xlu2 %2345  ;;  %v11982_v41 = vpop.eup %11981  ;;  %v2473_v29 = vmul.f32 %v11980_v2, %v13866_v11 }
 0x557   :  { %11985 = vrcp.f32 %v2346_v60  ;;  %v11984_v52 = vpop.eup %11983  ;;  %v2472_v8 = vmul.f32 %v11982_v41, %v13869_v54 }
 0x558   :  { %v2537_v45 = vpack.c.bf16 %v2473_v29, %v2473_v29  ;;  %v2471_v53 = vmul.f32 %v11984_v52, %v13856_v0 }
 0x559   :  { %v2536_v55 = vpack.c.bf16 %v2472_v8, %v2472_v8 }
 0x55a   :  { %v3316_v43 = vunpack.c.l.b16 %v2537_v45  ;;  %v2535_v27 = vpack.c.bf16 %v2471_v53, %v2471_v53 }
 0x55b   :  { %v3292_v32 = vunpack.c.l.b16 %v2536_v55 }
 0x55c   :  { %v3291_v54 = vunpack.c.l.b16 %v2535_v27 }
 0x55d   :  { %v11986_v13 = vpop.eup %11985  ;;  %11706 = vrot.lane.b32.xlu1 %v11705_v1, %s12159_s0 }
 0x55e   :  { %v2474_v46 = vmul.f32 %v11986_v13, %v13881_v35  ;;  %v3320_v33 = vpop.permute.xlu2 %3319  ;;  %v3293_v7 = vpack.c.b16 %v3292_v32, %v3291_v54 }
 0x55f   :  { %3332 = vmatpush.bf16.msra.mxu2 %v3320_v33 }
 0x560   :  { %v2538_v21 = vpack.c.bf16 %v2474_v46, %v2474_v46 }
 0x561   :  { %v11627_v5 = vpop.permute.xlu0 %11626 }
 0x562   :  { %v3317_v11 = vunpack.c.l.b16 %v2538_v21  ;;  %v11629_v22 = vunpack.i.h.bf16 %v11627_v5  ;;  %v11628_v41 = vunpack.i.l.bf16 %v11627_v5 }
 0x563   :  { %v3209_v12 = vpop.f32.mrf.mxu1 }
 0x564   :  { %v3318_v42 = vpack.c.b16 %v3317_v11, %v3316_v43  ;;  %v3534_v13 = vsel %vm17810_vm4, %v13834_v48, %v11629_v22  ;;  %v3533_v8 = vsel %vm17810_vm4, %v13828_v9, %v11628_v41 }
 0x565   :  { %11721 = vrot.lane.b32.xlu1 %v11720_v20, %s12159_s0 }
 0x566   :  { %10327 = vmatmul.msk.bf16.vlgmr.msra.gmra.mxu2 %vm17811_vm15, %v3318_v42  ;;  %v11617_v15 = vpop.permute.xlu2 %11616 }
 0x567   :  { %v3295_v35 = vpop.permute.xlu1 %3294  ;;  %v11619_v4 = vunpack.i.h.bf16 %v11617_v15  ;;  %v11618_v16 = vunpack.i.l.bf16 %v11617_v15 }
 0x568   :  { %3307 = vmatpush.bf16.msra.mxu1 %v3295_v35 }
 0x56b   :  { %v3211_v0 = vpop.f32.mrf.mxu1  ;;  %10326 = vmatmul.msk.bf16.vlgmr.msra.gmra.mxu1 %vm17811_vm15, %v3293_v7 }
 0x56c   :  { %v11650_v19 = vpack.i.bf16 %v3211_v0, %v3209_v12 }
 0x56e   :  { %11651 = vrot.lane.b32.xlu2 %v11650_v19, %s12160_s19  ;;  %v11632_v17 = vpop.permute.xlu2 %11631 }
 0x56f   :  { %v11612_v24 = vpop.permute.xlu1 %11611  ;;  %v11634_v29 = vunpack.i.h.bf16 %v11632_v17  ;;  %v11633_v52 = vunpack.i.l.bf16 %v11632_v17 }
 0x570   :  { %v11614_v36 = vunpack.i.h.bf16 %v11612_v24  ;;  %v11613_v30 = vunpack.i.l.bf16 %v11612_v24 }
 0x571   :  { %v3549_v33 = vsel %vm17811_vm15, %v3533_v8, %v11633_v52  ;;  %v3550_v53 = vsel %vm17811_vm15, %v3534_v13, %v11634_v29 }
 0x572   :  { %v3532_v56 = vsel %vm17810_vm4, %v13805_v3, %v11614_v36  ;;  %v3531_v50 = vsel %vm17810_vm4, %v13799_v26, %v11613_v30 }
 0x573   :  { %v3547_v40 = vsel %vm17811_vm15, %v3531_v50, %v11618_v16  ;;  %v3548_v37 = vsel %vm17811_vm15, %v3532_v56, %v11619_v4  ;;  %v11657_v50 = vpop.permute.xlu0 %11656 }
 0x574   :  { %v11659_v16 = vunpack.i.h.bf16 %v11657_v50 }
 0x576   :  { %v11642_v48 = vpop.permute.xlu2 %11641 }
 0x577   :  { %v11622_v62 = vpop.permute.xlu1 %11621  ;;  %v11644_v27 = vunpack.i.h.bf16 %v11642_v48  ;;  %v11643_v20 = vunpack.i.l.bf16 %v11642_v48  ;;  %v17976_v48 = vld [vmem:[#allocation22_spill] sm:$0xff] }
 0x578   :  { %v11624_v39 = vunpack.i.h.bf16 %v11622_v62  ;;  %v11623_v51 = vunpack.i.l.bf16 %v11622_v62 }
 0x579   :  { %v3536_v35 = vsel %vm17810_vm4, %v13858_v61, %v11644_v27  ;;  %v3535_v7 = vsel %vm17810_vm4, %v13846_v44, %v11643_v20  ;;  %v11658_v61 = vunpack.i.l.bf16 %v11657_v50 }
 0x57a   :  { %v3564_v14 = vsel %vm17809_vm1, %v3547_v40, %v11623_v51  ;;  %v3565_v6 = vsel %vm17809_vm1, %v3548_v37, %v11624_v39  ;;  %v3538_v51 = vsel %vm17810_vm4, %v13850_v18, %v11659_v16 }
 0x57b   :  { %v3580_v63 = vpack.c.bf16 %v3565_v6, %v3564_v14  ;;  %v3537_v40 = vsel %vm17810_vm4, %v13841_v57, %v11658_v61 }
 0x57d   :  { %10336 = vmatmul.msk.bf16.vlgmr.msrb.gmra.mxu3 %vm17836_vm0, %v3580_v63  ;;  %v3234_v3 = vpop.f32.mrf.mxu2 }
 0x585   :  { %v3236_v38 = vpop.f32.mrf.mxu2  ;;  %v3259_v26 = vpop.f32.mrf.mxu3 }
 0x586   :  { %v11665_v59 = vpack.i.bf16 %v3236_v38, %v3234_v3 }
 0x588   :  { %11666 = vrot.lane.b32.xlu2 %v11665_v59, %s12160_s19 }
 0x58d   :  { %v3261_v60 = vpop.f32.mrf.mxu3 }
 0x58e   :  { %v11680_v2 = vpack.i.bf16 %v3261_v60, %v3259_v26  ;;  %v11672_v60 = vpop.permute.xlu0 %11671 }
 0x58f   :  { %v11674_v17 = vunpack.i.h.bf16 %v11672_v60  ;;  %v11673_v57 = vunpack.i.l.bf16 %v11672_v60 }
 0x590   :  { %11681 = vrot.lane.b32.xlu2 %v11680_v2, %s12160_s19 }
 0x591   :  { %v3540_v8 = vsel %vm17810_vm4, %v13815_v47, %v11674_v17 }
 0x5a7   :  { %v11637_v1 = vpop.permute.xlu1 %11636 }
 0x5a8   :  { %v11639_v45 = vunpack.i.h.bf16 %v11637_v1  ;;  %v11638_v46 = vunpack.i.l.bf16 %v11637_v1 }
 0x5aa   :  { %v3566_v21 = vsel %vm17809_vm1, %v3549_v33, %v11638_v46  ;;  %v3567_v28 = vsel %vm17809_vm1, %v3550_v53, %v11639_v45  ;;  %v3539_v45 = vsel %vm17810_vm4, %v13813_v10, %v11673_v57  ;;  %v14000_v10 = vld [vmem:[%s17701_s13] sm:$0xff] }
 0x5ab   :  { %v3581_v55 = vpack.c.bf16 %v3567_v28, %v3566_v21  ;;  %v14003_v47 = vperm.slane %v14000_v10, 1 }
 0x5ad   :  { %10337 = vmatmul.msk.bf16.gmra.mxu3 %vm17836_vm0, %v3581_v55 }
 0x5ae   :  { %v3284_v43 = vpop.f32.mrf.mxu0 }
 0x5af   :  { %v11647_v9 = vpop.permute.xlu1 %11646 }
 0x5b0   :  { %v11649_v42 = vunpack.i.h.bf16 %v11647_v9  ;;  %v11648_v32 = vunpack.i.l.bf16 %v11647_v9  ;;  %v17977_v9 = vmax.f32 %v17976_v48, 0.0 }
 0x5b2   :  { %v3552_v24 = vsel %vm17811_vm15, %v3536_v35, %v11649_v42  ;;  %v3551_v36 = vsel %vm17811_vm15, %v3535_v7, %v11648_v32 }
 0x5b6   :  { %v3286_v11 = vpop.f32.mrf.mxu0 }
 0x5b7   :  { %v11695_v12 = vpack.i.bf16 %v3286_v11, %v3284_v43  ;;  %v11662_v4 = vpop.permute.xlu1 %11661 }
 0x5b8   :  { %v11664_v62 = vunpack.i.h.bf16 %v11662_v4  ;;  %v11663_v39 = vunpack.i.l.bf16 %v11662_v4 }
 0x5b9   :  { %11696 = vrot.lane.b32.xlu2 %v11695_v12, %s12160_s19 }
 0x5ba   :  { %v3553_v6 = vsel %vm17811_vm15, %v3537_v40, %v11663_v39  ;;  %v3554_v63 = vsel %vm17811_vm15, %v3538_v51, %v11664_v62 }
 0x5bf   :  { %v11677_v2 = vpop.permute.xlu1 %11676 }
 0x5c0   :  { %v11679_v22 = vunpack.i.h.bf16 %v11677_v2  ;;  %v11678_v41 = vunpack.i.l.bf16 %v11677_v2 }
 0x5c2   :  { %v3555_v46 = vsel %vm17811_vm15, %v3539_v45, %v11678_v41  ;;  %v3556_v33 = vsel %vm17811_vm15, %v3540_v8, %v11679_v22 }
 0x5c8   :  { %v11652_v54 = vpop.permute.xlu2 %11651 }
 0x5c9   :  { %v11654_v0 = vunpack.i.h.bf16 %v11652_v54  ;;  %v11653_v19 = vunpack.i.l.bf16 %v11652_v54  ;;  %v17978_v54 = vld [vmem:[#allocation23_spill] sm:$0xff] }
 0x5ca   :  { %v17979_v35 = vmax.f32 %v17978_v54, 0.0 }
 0x5cb   :  { %v3569_v30 = vsel %vm17809_vm1, %v3552_v24, %v11654_v0  ;;  %v3568_v15 = vsel %vm17809_vm1, %v3551_v36, %v11653_v19  ;;  %v11687_v19 = vpop.permute.xlu0 %11686  ;;  %v11692_v24 = vpop.permute.xlu1 %11691 }
 0x5cc   :  { %v3582_v56 = vpack.c.bf16 %v3569_v30, %v3568_v15  ;;  %v11689_v36 = vunpack.i.h.bf16 %v11687_v19  ;;  %v11688_v30 = vunpack.i.l.bf16 %v11687_v19  ;;  %v11694_v15 = vunpack.i.h.bf16 %v11692_v24 }
 0x5ce   :  { %10338 = vmatmul.msk.bf16.gmra.mxu3 %vm17836_vm0, %v3582_v56  ;;  %v11693_v56 = vunpack.i.l.bf16 %v11692_v24  ;;  %v3542_v4 = vsel %vm17810_vm4, %v13848_v34, %v11689_v36  ;;  %v3541_v16 = vsel %vm17810_vm4, %v13839_v23, %v11688_v30  ;;  %v17980_v34 = vld [vmem:[#allocation24_spill] sm:$0xff]  ;;  %v17986_v30 = vld [vmem:[#allocation27_spill] sm:$0xff] }
 0x5d0   :  { %v3557_v39 = vsel %vm17811_vm15, %v3541_v16, %v11693_v56 }
 0x5d3   :  { %v11707_v17 = vpop.permute.xlu1 %11706 }
 0x5d4   :  { %v11709_v41 = vunpack.i.h.bf16 %v11707_v17 }
 0x5e2   :  { %v11667_v44 = vpop.permute.xlu2 %11666 }
 0x5e3   :  { %v11669_v37 = vunpack.i.h.bf16 %v11667_v44  ;;  %v11668_v14 = vunpack.i.l.bf16 %v11667_v44  ;;  %v3558_v44 = vsel %vm17811_vm15, %v3542_v4, %v11694_v15  ;;  %v17987_v15 = vmax.f32 %v17986_v30, 0.0 }
 0x5e5   :  { %v3570_v3 = vsel %vm17809_vm1, %v3553_v6, %v11668_v14  ;;  %v3571_v38 = vsel %vm17809_vm1, %v3554_v63, %v11669_v37  ;;  %v17981_v63 = vmax.f32 %v17980_v34, 0.0  ;;  %v17988_v34 = vld [vmem:[#allocation28_spill] sm:$0xff] }
 0x5e6   :  { %v3583_v26 = vpack.c.bf16 %v3571_v38, %v3570_v3 }
 0x5e8   :  { %v3309_v59 = vpop.f32.mrf.mxu1  ;;  %10339 = vmatmul.msk.bf16.gmra.mxu3 %vm17836_vm0, %v3583_v26 }
 0x5e9   :  { %v3334_v18 = vpop.f32.mrf.mxu2 }
 0x5ea   :  { %v11682_v5 = vpop.permute.xlu2 %11681 }
 0x5eb   :  { %v11684_v29 = vunpack.i.h.bf16 %v11682_v5  ;;  %v11683_v52 = vunpack.i.l.bf16 %v11682_v5  ;;  %v11702_v5 = vpop.permute.xlu0 %11701 }
 0x5ec   :  { %v11704_v57 = vunpack.i.h.bf16 %v11702_v5  ;;  %v11703_v22 = vunpack.i.l.bf16 %v11702_v5 }
 0x5ed   :  { %v3572_v53 = vsel %vm17809_vm1, %v3555_v46, %v11683_v52  ;;  %v3573_v21 = vsel %vm17809_vm1, %v3556_v33, %v11684_v29  ;;  %v11708_v29 = vunpack.i.l.bf16 %v11707_v17 }
 0x5ee   :  { %v3584_v55 = vpack.c.bf16 %v3573_v21, %v3572_v53 }
 0x5f0   :  { %v3311_v1 = vpop.f32.mrf.mxu1 }
 0x5f1   :  { %v11710_v13 = vpack.i.bf16 %v3311_v1, %v3309_v59  ;;  %v3336_v28 = vpop.f32.mrf.mxu2  ;;  %v17982_v59 = vld [vmem:[#allocation25_spill] sm:$0xff]  ;;  %v3544_v1 = vsel %vm17810_vm4, %v13887_v58, %v11704_v57 }
 0x5f2   :  { %v11725_v43 = vpack.i.bf16 %v3336_v28, %v3334_v18  ;;  %v17983_v60 = vmax.f32 %v17982_v59, 0.0  ;;  %v3560_v33 = vsel %vm17811_vm15, %v3544_v1, %v11709_v41 }
 0x5f3   :  { %11711 = vrot.lane.b32.xlu2 %v11710_v13, %s12160_s19  ;;  %v3543_v13 = vsel %vm17810_vm4, %v13871_v31, %v11703_v22  ;;  %v11717_v31 = vpop.permute.xlu0 %11716 }
 0x5f4   :  { %v3559_v46 = vsel %vm17811_vm15, %v3543_v13, %v11708_v29 }
 0x5f8   :  { %10340 = vmatmul.msk.bf16.gmra.mxu3 %vm17836_vm0, %v3584_v55 }
 0x5fb   :  { %11726 = vrot.lane.b32.xlu2 %v11725_v43, %s12160_s19  ;;  %s10164_s19 = sshll.u32 %s17702_s14, 4  ;;  %s10165_s19 = int_to_ptr.hbm [resolvable:$true] %s10164_s19 }
 0x600   :  { %v3638_v11 = vpop.f32.mrf.mxu3 }
 0x601   :  { %v3639_v12 = vadd.f32 %v3638_v11, %v14003_v47  ;;  %v17984_v11 = vld [vmem:[#allocation26_spill] sm:$0xff] }
 0x603   :  { %v14008_v27 = vadd.f32 %v3639_v12, %v17977_v9  ;;  %v17985_v12 = vmax.f32 %v17984_v11, 0.0  ;;  %v11722_v9 = vpop.permute.xlu1 %11721 }
 0x605   :  { %v3694_v20 = vsel %vm17836_vm0, %v14008_v27, 0.0 }
 0x606   :  { %3695 = vadd.xlane.f32.xlu0 %v3694_v20 }
 0x608   :  { %v3640_v42 = vpop.f32.mrf.mxu3 }
 0x609   :  { %v3641_v32 = vadd.f32 %v3640_v42, %v14003_v47  ;;  %v11719_v42 = vunpack.i.h.bf16 %v11717_v31 }
 0x60b   :  { %v14015_v7 = vadd.f32 %v3641_v32, %v17979_v35  ;;  %v11718_v32 = vunpack.i.l.bf16 %v11717_v31  ;;  %v11724_v35 = vunpack.i.h.bf16 %v11722_v9 }
 0x60d   :  { %v3697_v0 = vsel %vm17836_vm0, %v14015_v7, 0.0  ;;  %v3545_v4 = vsel %vm17810_vm4, %v13862_v25, %v11718_v32 }
 0x60e   :  { %3698 = vadd.xlane.f32.xlu1 %v3697_v0  ;;  %v11723_v0 = vunpack.i.l.bf16 %v11722_v9 }
 0x610   :  { %v3561_v16 = vsel %vm17811_vm15, %v3545_v4, %v11723_v0 }
 0x613   :  { %v11697_v50 = vpop.permute.xlu2 %11696 }
 0x614   :  { %v11699_v61 = vunpack.i.h.bf16 %v11697_v50  ;;  %v11698_v62 = vunpack.i.l.bf16 %v11697_v50  ;;  %v3546_v50 = vsel %vm17810_vm4, %v13879_v49, %v11719_v42 }
 0x616   :  { %v3574_v51 = vsel %vm17809_vm1, %v3557_v39, %v11698_v62  ;;  %v3575_v40 = vsel %vm17809_vm1, %v3558_v44, %v11699_v61  ;;  %v3562_v61 = vsel %vm17811_vm15, %v3546_v50, %v11724_v35 }
 0x617   :  { %v3585_v37 = vpack.c.bf16 %v3575_v40, %v3574_v51  ;;  %v12161_v51 = vmov 32.0  }
 0x618   :  { %11987 = vrcp.f32 %v12161_v51 }
 0x619   :  { %10341 = vmatmul.msk.bf16.gmra.mxu3 %vm17836_vm0, %v3585_v37 }
 0x61e   :  { %v11988_v49 = vpop.eup %11987 }
 0x61f   :  { %v3743_v37 = vmul.f32 32.0, %v11988_v49 }
 0x621   :  { %v3744_v25 = vsub.f32 1.0, %v3743_v37 }
 0x630   :  { %v3643_v14 = vpop.f32.mrf.mxu3 }
 0x631   :  { %v3644_v6 = vadd.f32 %v3643_v14, %v14003_v47 }
 0x633   :  { %v14031_v3 = vadd.f32 %v3644_v6, %v17981_v63  ;;  %v17989_v63 = vmax.f32 %v17988_v34, 0.0 }
 0x635   :  { %v3700_v23 = vsel %vm17836_vm0, %v14031_v3, 0.0 }
 0x636   :  { %3701 = vadd.xlane.f32.xlu2 %v3700_v23 }
 0x638   :  { %v3645_v38 = vpop.f32.mrf.mxu3 }
 0x639   :  { %v3646_v26 = vadd.f32 %v3645_v38, %v14003_v47  ;;  %v3745_v38 = vmul.f32 %v11988_v49, %v3744_v25 }
 0x63b   :  { %v14038_v2 = vadd.f32 %v3646_v26, %v17983_v60  ;;  %v3746_v59 = vadd.f32 %v11988_v49, %v3745_v38 }
 0x63d   :  { %v3703_v18 = vsel %vm17836_vm0, %v14038_v2, 0.0 }
 0x63e   :  { %3704 = vadd.xlane.f32.xlu0 %v3703_v18 }
 0x64d   :  { %v11712_v52 = vpop.permute.xlu2 %11711 }
 0x64e   :  { %v11714_v8 = vunpack.i.h.bf16 %v11712_v52  ;;  %v11713_v45 = vunpack.i.l.bf16 %v11712_v52 }
 0x650   :  { %v3576_v53 = vsel %vm17809_vm1, %v3559_v46, %v11713_v45  ;;  %v3577_v21 = vsel %vm17809_vm1, %v3560_v33, %v11714_v8  ;;  %v17991_v8 = vld [vmem:[#allocation29_spill] sm:$0xff] }
 0x651   :  { %v3648_v28 = vpop.f32.mrf.mxu3  ;;  %v3586_v55 = vpack.c.bf16 %v3577_v21, %v3576_v53  ;;  %v17992_v45 = vmax.f32 %v17991_v8, 0.0 }
 0x652   :  { %v3649_v43 = vadd.f32 %v3648_v28, %v14003_v47 }
 0x653   :  { %10342 = vmatmul.msk.bf16.gmra.mxu3 %vm17836_vm0, %v3586_v55  ;;  %v17993_v55 = vld [vmem:[#allocation30_spill] sm:$0xff] }
 0x654   :  { %v14053_v58 = vadd.f32 %v3649_v43, %v17985_v12 }
 0x655   :  { %v11727_v20 = vpop.permute.xlu2 %11726 }
 0x656   :  { %v3706_v48 = vsel %vm17836_vm0, %v14053_v58, 0.0  ;;  %v11729_v24 = vunpack.i.h.bf16 %v11727_v20  ;;  %v11728_v36 = vunpack.i.l.bf16 %v11727_v20 }
 0x657   :  { %3707 = vadd.xlane.f32.xlu1 %v3706_v48 }
 0x658   :  { %v3578_v39 = vsel %vm17809_vm1, %v3561_v16, %v11728_v36  ;;  %v3579_v44 = vsel %vm17809_vm1, %v3562_v61, %v11729_v24  ;;  %vm3747_vm1 = vweird.f32 %v11988_v49  ;;  %v17997_v16 = vld [vmem:[#allocation32_spill] sm:$0xff] }
 0x659   :  { %v3650_v54 = vpop.f32.mrf.mxu3  ;;  %v3587_v40 = vpack.c.bf16 %v3579_v44, %v3578_v39  ;;  %v14081_v60 = vsel %vm3747_vm1, %v11988_v49, %v3746_v59 }
 0x65a   :  { %v3651_v19 = vadd.f32 %v3650_v54, %v14003_v47  ;;  %17990 = vst [vmem:[#allocation53_spill] sm:$0xff] %v14081_v60 }
 0x65c   :  { %v14061_v56 = vadd.f32 %v3651_v19, %v17987_v15  ;;  %v17995_v19 = vld [vmem:[#allocation31_spill] sm:$0xff] }
 0x65d   :  { %v17996_v24 = vmax.f32 %v17995_v19, 0.0 }
 0x65e   :  { %v3709_v62 = vsel %vm17836_vm0, %v14061_v56, 0.0 }
 0x65f   :  { %3710 = vadd.xlane.f32.xlu2 %v3709_v62 }
 0x663   :  { %10343 = vmatmul.msk.bf16.gmra.mxu3 %vm17836_vm0, %v3587_v40 }
 0x66b   :  { %v3653_v14 = vpop.f32.mrf.mxu3 }
 0x66c   :  { %v3654_v6 = vadd.f32 %v3653_v14, %v14003_v47 }
 0x66e   :  { %v14077_v23 = vadd.f32 %v3654_v6, %v17989_v63  ;;  %v17999_v63 = vld [vmem:[#allocation33_spill] sm:$0xff] }
 0x66f   :  { %v18000_v38 = vmax.f32 %v17999_v63, 0.0  ;;  %v11405_v63 = vld [vmem:[%s17693_s5 + $0xc] sm:$0xf] }
 0x670   :  { %v3712_v26 = vsel %vm17836_vm0, %v14077_v23, 0.0 }
 0x671   :  { %3713 = vadd.xlane.f32.xlu2 %v3712_v26 }
 0x673   :  { %v3655_v17 = vpop.f32.mrf.mxu3 }
 0x674   :  { %v3656_v41 = vadd.f32 %v3655_v17, %v14003_v47 }
 0x676   :  { %v14097_v46 = vadd.f32 %v3656_v41, %v17992_v45 }
 0x678   :  { %v3715_v28 = vsel %vm17836_vm0, %v14097_v46, 0.0 }
 0x679   :  { %v3696_v18 = vpop.xlane.xlu0 %3695 }
 0x67a   :  { %v3749_v5 = vmul.f32 %v14081_v60, %v3696_v18 }
 0x67c   :  { %v14085_v57 = vsub.f32 %v14008_v27, %v3749_v5  ;;  %v3658_v27 = vpop.f32.mrf.mxu3 }
 0x67d   :  { %v3659_v53 = vadd.f32 %v3658_v27, %v14003_v47 }
 0x67e   :  { %v3781_v22 = vmul.f32 %v14085_v57, %v14085_v57 }
 0x680   :  { %v3797_v29 = vsel %vm17836_vm0, %v3781_v22, 0.0  ;;  %v18001_v22 = vld [vmem:[#allocation34_spill] sm:$0xff] }
 0x681   :  { %v3699_v52 = vpop.xlane.xlu1 %3698  ;;  %3798 = vadd.xlane.f32.xlu0 %v3797_v29 }
 0x682   :  { %v3750_v1 = vmul.f32 %v14081_v60, %v3699_v52 }
 0x684   :  { %v14093_v13 = vsub.f32 %v14015_v7, %v3750_v1  ;;  %v17994_v7 = vmax.f32 %v17993_v55, 0.0  ;;  %v3660_v9 = vpop.f32.mrf.mxu3 }
 0x685   :  { %v3661_v42 = vadd.f32 %v3660_v9, %v14003_v47  ;;  %v10412_v9 = vld [vmem:[%s17693_s5 + $0xc0] sm:$0xf0] }
 0x686   :  { %v3782_v33 = vmul.f32 %v14093_v13, %v14093_v13  ;;  %v14107_v43 = vadd.f32 %v3659_v53, %v17994_v7 }
 0x687   :  { %v14125_v36 = vadd.f32 %v3661_v42, %v17996_v24  ;;  %v11429_v42 = vld [vmem:[%s17693_s5 + $0xc4] sm:$0xf0] }
 0x688   :  { %v3800_v21 = vsel %vm17836_vm0, %v3782_v33, 0.0  ;;  %v3718_v11 = vsel %vm17836_vm0, %v14107_v43, 0.0 }
 0x689   :  { %3801 = vadd.xlane.f32.xlu1 %v3800_v21  ;;  %3716 = vadd.xlane.f32.xlu0 %v3715_v28  ;;  %v3721_v4 = vsel %vm17836_vm0, %v14125_v36, 0.0  ;;  %v18003_v21 = vld [vmem:[#allocation35_spill] sm:$0xff] }
 0x68a   :  { %v18004_v28 = vmax.f32 %v18003_v21, 0.0 }
 0x691   :  { %3719 = vadd.xlane.f32.xlu0 %v3718_v11  ;;  %v10410_v11 = vld [vmem:[%s17693_s5 + $0x80] sm:$0xf] }
 0x6a9   :  { %v3702_v12 = vpop.xlane.xlu2 %3701 }
 0x6aa   :  { %v3751_v31 = vmul.f32 %v14081_v60, %v3702_v12  ;;  %v11420_v12 = vld [vmem:[%s17693_s5 + $0x84] sm:$0xf] }
 0x6ab   :  { %v10415_v19 = vor.u32 %v11420_v12, %v10412_v9 }
 0x6ac   :  { %v14113_v48 = vsub.f32 %v14031_v3, %v3751_v31  ;;  %v3663_v3 = vpop.f32.mrf.mxu3 }
 0x6ad   :  { %v3664_v15 = vadd.f32 %v3663_v3, %v14003_v47  ;;  %v11421_v3 = vld [vmem:[%s17693_s5 + $0x8c] sm:$0xf]  ;;  %4402 = vmatpush.bf16.msrb.mxu1 %v10415_v19 }
 0x6ae   :  { %v3783_v20 = vmul.f32 %v14113_v48, %v14113_v48 }
 0x6b0   :  { %v3803_v32 = vsel %vm17836_vm0, %v3783_v20, 0.0  ;;  %v10418_v20 = vld [vmem:[%s17693_s5 + $0x88] sm:$0xf] }
 0x6b1   :  { %v3705_v54 = vpop.xlane.xlu0 %3704  ;;  %3804 = vadd.xlane.f32.xlu1 %v3803_v32  ;;  %v10419_v24 = vor.u32 %v11429_v42, %v10418_v20 }
 0x6b2   :  { %v3752_v35 = vmul.f32 %v14081_v60, %v3705_v54 }
 0x6b3   :  { %4451 = vmatpush.bf16.msrb.mxu2 %v10419_v24 }
 0x6b4   :  { %v14121_v0 = vsub.f32 %v14038_v2, %v3752_v35  ;;  %v17998_v2 = vmax.f32 %v17997_v16, 0.0  ;;  %v3665_v40 = vpop.f32.mrf.mxu3  ;;  %v11412_v16 = vld [vmem:[%s17693_s5 + $0x3c] sm:$0xf0] }
 0x6b5   :  { %v3666_v37 = vadd.f32 %v3665_v40, %v14003_v47  ;;  %v10354_v40 = vld [vmem:[%s17693_s5 + $0x8] sm:$0xf] }
 0x6b6   :  { %v3784_v30 = vmul.f32 %v14121_v0, %v14121_v0  ;;  %v14135_v61 = vadd.f32 %v3664_v15, %v17998_v2  ;;  %v11404_v2 = vld [vmem:[%s17693_s5 + $0x4] sm:$0xf] }
 0x6b7   :  { %v14153_v26 = vadd.f32 %v3666_v37, %v18000_v38  ;;  %v10356_v38 = vld [vmem:[%s17693_s5 + $0x48] sm:$0xf0] }
 0x6b8   :  { %v3806_v50 = vsel %vm17836_vm0, %v3784_v30, 0.0  ;;  %v3724_v62 = vsel %vm17836_vm0, %v14135_v61, 0.0  ;;  %v10420_v30 = vld [vmem:[%s17693_s5 + $0xc8] sm:$0xf0] }
 0x6b9   :  { %3807 = vadd.xlane.f32.xlu2 %v3806_v50  ;;  %3722 = vadd.xlane.f32.xlu1 %v3721_v4  ;;  %v3727_v5 = vsel %vm17836_vm0, %v14153_v26, 0.0  ;;  %v10423_v50 = vor.u32 %v11421_v3, %v10420_v30  ;;  %v10346_v4 = vld [vmem:[%s17693_s5] sm:$0xf] }
 0x6ba   :  { %v18007_v30 = vld [vmem:[#allocation37_spill] sm:$0xff] }
 0x6bb   :  { %4500 = vmatpush.bf16.msra.mxu3 %v10423_v50 }
 0x6c1   :  { %3725 = vadd.xlane.f32.xlu1 %v3724_v62 }
 0x6ca   :  { %v3708_v39 = vpop.xlane.xlu1 %3707 }
 0x6cb   :  { %v3753_v44 = vmul.f32 %v14081_v60, %v3708_v39  ;;  %v10347_v39 = vor.u32 %v11412_v16, %v10346_v4  ;;  %v14262_v16 = vperm.slane %v14000_v10, 3 }
 0x6cd   :  { %v14141_v51 = vsub.f32 %v14053_v58, %v3753_v44  ;;  %v10348_v44 = vld [vmem:[%s17693_s5 + $0x40] sm:$0xf0] }
 0x6cf   :  { %v3785_v49 = vmul.f32 %v14141_v51, %v14141_v51 }
 0x6d1   :  { %v3809_v25 = vsel %vm17836_vm0, %v3785_v49, 0.0  ;;  %v18005_v49 = vld [vmem:[#allocation36_spill] sm:$0xff] }
 0x6d2   :  { %3810 = vadd.xlane.f32.xlu2 %v3809_v25  ;;  %v3711_v14 = vpop.xlane.xlu2 %3710  ;;  %v18006_v37 = vmax.f32 %v18005_v49, 0.0 }
 0x6d3   :  { %v3754_v6 = vmul.f32 %v14081_v60, %v3711_v14  ;;  %v10351_v14 = vor.u32 %v11404_v2, %v10348_v44 }
 0x6d5   :  { %v14149_v34 = vsub.f32 %v14061_v56, %v3754_v6  ;;  %v18002_v56 = vmax.f32 %v18001_v22, 0.0  ;;  %v11413_v6 = vld [vmem:[%s17693_s5 + $0x44] sm:$0xf0]  ;;  %4403 = vmatpush.bf16.msrb.mxu1 %v10351_v14 }
 0x6d6   :  { %v3668_v58 = vpop.f32.mrf.mxu3 }
 0x6d7   :  { %v3786_v59 = vmul.f32 %v14149_v34, %v14149_v34  ;;  %v3669_v18 = vadd.f32 %v3668_v58, %v14003_v47  ;;  %v10355_v58 = vor.u32 %v11413_v6, %v10354_v40 }
 0x6d9   :  { %v3812_v17 = vsel %vm17836_vm0, %v3786_v59, 0.0  ;;  %v14163_v41 = vadd.f32 %v3669_v18, %v18002_v56  ;;  %v10359_v59 = vor.u32 %v11405_v63, %v10356_v38  ;;  %4452 = vmatpush.bf16.msrb.mxu2 %v10355_v58 }
 0x6da   :  { %3728 = vadd.xlane.f32.xlu2 %v3727_v5  ;;  %3813 = vadd.xlane.f32.xlu0 %v3812_v17 }
 0x6db   :  { %v3730_v29 = vsel %vm17836_vm0, %v14163_v41, 0.0  ;;  %4501 = vmatpush.bf16.msra.mxu3 %v10359_v59 }
 0x6de   :  { %v3670_v8 = vpop.f32.mrf.mxu3 }
 0x6df   :  { %v3671_v33 = vadd.f32 %v3670_v8, %v14003_v47 }
 0x6e1   :  { %v14177_v55 = vadd.f32 %v3671_v33, %v18004_v28 }
 0x6e2   :  { %3731 = vadd.xlane.f32.xlu2 %v3730_v29 }
 0x6e3   :  { %v3733_v35 = vsel %vm17836_vm0, %v14177_v55, 0.0 }
 0x6e4   :  { %v3714_v52 = vpop.xlane.xlu2 %3713 }
 0x6e5   :  { %v3755_v1 = vmul.f32 %v14081_v60, %v3714_v52 }
 0x6e6   :  { %v3673_v7 = vpop.f32.mrf.mxu3 }
 0x6e7   :  { %v14169_v45 = vsub.f32 %v14077_v23, %v3755_v1  ;;  %v11428_v23 = vld [vmem:[%s17693_s5 + $0xbc] sm:$0xf0]  ;;  %v3674_v32 = vadd.f32 %v3673_v7, %v14003_v47 }
 0x6e8   :  { %v10411_v31 = vor.u32 %v11428_v23, %v10410_v11 }
 0x6e9   :  { %v3787_v27 = vmul.f32 %v14169_v45, %v14169_v45  ;;  %v14224_v25 = vadd.f32 %v3674_v32, %v18006_v37 }
 0x6ea   :  { %4353 = vmatpush.bf16.msrb.mxu0 %v10411_v31 }
 0x6eb   :  { %v3815_v53 = vsel %vm17836_vm0, %v3787_v27, 0.0  ;;  %v3736_v17 = vsel %vm17836_vm0, %v14224_v25, 0.0 }
 0x6ec   :  { %3816 = vadd.xlane.f32.xlu0 %v3815_v53 }
 0x6ee   :  { %4354 = vmatpush.bf16.msrb.mxu0 %v10347_v39 }
 0x6f4   :  { %v3799_v54 = vpop.xlane.xlu0 %3798  ;;  %3734 = vadd.xlane.f32.xlu0 %v3733_v35 }
 0x6f5   :  { %v3845_v15 = vmul.f32 %v3799_v54, %v14081_v60 }
 0x6f7   :  { %v3861_v62 = vadd.f32 1e-05, %v3845_v15  ;;  %v18008_v15 = vmax.f32 %v18007_v30, 0.0 }
 0x6f9   :  { %11989 = vrsqrt.f32 %v3861_v62  ;;  %vm3883_vm4 = vweird.f32 %v3861_v62 }
 0x6fc   :  { %v3802_v18 = vpop.xlane.xlu1 %3801  ;;  %v3717_v5 = vpop.xlane.xlu0 %3716  ;;  %3737 = vadd.xlane.f32.xlu0 %v3736_v17 }
 0x6fd   :  { %v3846_v22 = vmul.f32 %v3802_v18, %v14081_v60  ;;  %v3756_v56 = vmul.f32 %v14081_v60, %v3717_v5 }
 0x6ff   :  { %v11990_v29 = vpop.eup %11989  ;;  %v3862_v52 = vadd.f32 1e-05, %v3846_v22  ;;  %v14240_v1 = vsub.f32 %v14097_v46, %v3756_v56  ;;  %v3675_v46 = vpop.f32.mrf.mxu3 }
 0x700   :  { %v3878_v8 = vmul.f32 %v11990_v29, %v3861_v62  ;;  %vm3884_vm1 = vweird.f32 %v11990_v29  ;;  %v3676_v32 = vadd.f32 %v3675_v46, %v14003_v47 }
 0x701   :  { %11991 = vrsqrt.f32 %v3862_v52  ;;  %v3788_v27 = vmul.f32 %v14240_v1, %v14240_v1  ;;  %vm3885_vm15 = vmor %vm3883_vm4, %vm3884_vm1  ;;  %vm3893_vm14 = vweird.f32 %v3862_v52 }
 0x702   :  { %v3879_v33 = vmul.f32 %v11990_v29, %v3878_v8  ;;  %v14259_v50 = vadd.f32 %v3676_v32, %v18008_v15 }
 0x703   :  { %v3818_v53 = vsel %vm17836_vm0, %v3788_v27, 0.0 }
 0x704   :  { %v3880_v21 = vmul.f32 0.5, %v3879_v33  ;;  %v3720_v28 = vpop.xlane.xlu0 %3719  ;;  %3819 = vadd.xlane.f32.xlu1 %v3818_v53  ;;  %v3739_v39 = vsel %vm17836_vm0, %v14259_v50, 0.0 }
 0x705   :  { %v3757_v7 = vmul.f32 %v14081_v60, %v3720_v28 }
 0x706   :  { %v3881_v11 = vsub.f32 1.5, %v3880_v21 }
 0x707   :  { %v11992_v23 = vpop.eup %11991  ;;  %v14247_v12 = vsub.f32 %v14107_v43, %v3757_v7  ;;  %v14254_v43 = vperm.slane %v14000_v10, 2 }
 0x708   :  { %v3882_v31 = vmul.f32 %v11990_v29, %v3881_v11  ;;  %v3888_v9 = vmul.f32 %v11992_v23, %v3862_v52  ;;  %vm3894_vm2 = vweird.f32 %v11992_v23 }
 0x709   :  { %v3789_v20 = vmul.f32 %v14247_v12, %v14247_v12  ;;  %vm3895_vm13 = vmor %vm3893_vm14, %vm3894_vm2 }
 0x70a   :  { %v3889_v42 = vmul.f32 %v11992_v23, %v3888_v9  ;;  %v3886_v35 = vsel %vm3885_vm15, %v11990_v29, %v3882_v31 }
 0x70b   :  { %v3821_v54 = vsel %vm17836_vm0, %v3789_v20, 0.0  ;;  %v4037_v3 = vmul.f32 %v3886_v35, %v14085_v57 }
 0x70c   :  { %v3890_v19 = vmul.f32 0.5, %v3889_v42  ;;  %3822 = vadd.xlane.f32.xlu1 %v3821_v54 }
 0x70d   :  { %v4054_v2 = vmul.f32 %v14254_v43, %v4037_v3 }
 0x70e   :  { %v3891_v24 = vsub.f32 1.5, %v3890_v19 }
 0x70f   :  { %v14270_v44 = vadd.f32 %v14262_v16, %v4054_v2 }
 0x710   :  { %v3892_v4 = vmul.f32 %v11992_v23, %v3891_v24 }
 0x711   :  { %18009 = vst [vmem:[#allocation46_spill] sm:$0xff] %v14270_v44 }
 0x712   :  { %v3896_v47 = vsel %vm3895_vm13, %v11992_v23, %v3892_v4 }
 0x713   :  { %v4038_v62 = vmul.f32 %v3896_v47, %v14093_v13 }
 0x714   :  { %3740 = vadd.xlane.f32.xlu1 %v3739_v39 }
 0x715   :  { %v4055_v57 = vmul.f32 %v14254_v43, %v4038_v62 }
 0x717   :  { %v14273_v40 = vadd.f32 %v14262_v16, %v4055_v57 }
 0x719   :  { %18010 = vst [vmem:[#allocation40_spill] sm:$0xff] %v14273_v40  ;;  %v14277_v10 = vpack.c.bf16 %v14273_v40, %v14270_v44  ;;  %v10380_v40 = vld [vmem:[%s17693_s5 + $0x60] sm:$0xf0]  ;;  %v10386_v44 = vld [vmem:[%s17693_s5 + $0x28] sm:$0xf] }
 0x71b   :  { %10472 = vmatmul.msk.bf16.vlgmr.msrb.gmra.mxu0 %vm17836_vm0, %v14277_v10  ;;  %10480 = vmatmul.msk.bf16.vlgmr.msrb.gmra.mxu1 %vm17836_vm0, %v14277_v10 }
 0x71c   :  { %10488 = vmatmul.msk.bf16.vlgmr.msrb.gmra.mxu2 %vm17836_vm0, %v14277_v10  ;;  %10496 = vmatmul.msk.bf16.vlgmr.msra.gmra.mxu3 %vm17836_vm0, %v14277_v10 }
 0x724   :  { %v3805_v13 = vpop.xlane.xlu1 %3804 }
 0x725   :  { %v3847_v49 = vmul.f32 %v3805_v13, %v14081_v60 }
 0x727   :  { %v3863_v37 = vadd.f32 1e-05, %v3847_v49 }
 0x729   :  { %11993 = vrsqrt.f32 %v3863_v37  ;;  %vm3903_vm2 = vweird.f32 %v3863_v37 }
 0x72c   :  { %v3723_v14 = vpop.xlane.xlu1 %3722  ;;  %v3808_v6 = vpop.xlane.xlu2 %3807 }
 0x72d   :  { %v3758_v63 = vmul.f32 %v14081_v60, %v3723_v14  ;;  %v3848_v38 = vmul.f32 %v3808_v6, %v14081_v60 }
 0x72f   :  { %v11994_v58 = vpop.eup %11993  ;;  %v14291_v59 = vsub.f32 %v14125_v36, %v3758_v63  ;;  %v3864_v18 = vadd.f32 1e-05, %v3848_v38 }
 0x730   :  { %v3898_v5 = vmul.f32 %v11994_v58, %v3863_v37  ;;  %vm3904_vm13 = vweird.f32 %v11994_v58 }
 0x731   :  { %11995 = vrsqrt.f32 %v3864_v18  ;;  %v3790_v17 = vmul.f32 %v14291_v59, %v14291_v59  ;;  %vm3905_vm14 = vmor %vm3903_vm2, %vm3904_vm13  ;;  %vm3913_vm15 = vweird.f32 %v3864_v18 }
 0x732   :  { %v3899_v22 = vmul.f32 %v11994_v58, %v3898_v5 }
 0x733   :  { %v3824_v56 = vsel %vm17836_vm0, %v3790_v17, 0.0 }
 0x734   :  { %v3900_v29 = vmul.f32 0.5, %v3899_v22  ;;  %3825 = vadd.xlane.f32.xlu2 %v3824_v56  ;;  %v3726_v52 = vpop.xlane.xlu1 %3725 }
 0x735   :  { %v3759_v8 = vmul.f32 %v14081_v60, %v3726_v52 }
 0x736   :  { %v3901_v27 = vsub.f32 1.5, %v3900_v29 }
 0x737   :  { %v11996_v33 = vpop.eup %11995  ;;  %v14298_v53 = vsub.f32 %v14135_v61, %v3759_v8 }
 0x738   :  { %v3902_v36 = vmul.f32 %v11994_v58, %v3901_v27  ;;  %v3908_v21 = vmul.f32 %v11996_v33, %v3864_v18  ;;  %vm3914_vm4 = vweird.f32 %v11996_v33 }
 0x739   :  { %v3791_v28 = vmul.f32 %v14298_v53, %v14298_v53  ;;  %vm3915_vm1 = vmor %vm3913_vm15, %vm3914_vm4 }
 0x73a   :  { %v3909_v7 = vmul.f32 %v11996_v33, %v3908_v21  ;;  %v3906_v23 = vsel %vm3905_vm14, %v11994_v58, %v3902_v36 }
 0x73b   :  { %v3827_v11 = vsel %vm17836_vm0, %v3791_v28, 0.0  ;;  %v4039_v9 = vmul.f32 %v3906_v23, %v14113_v48 }
 0x73c   :  { %v3910_v46 = vmul.f32 0.5, %v3909_v7  ;;  %3828 = vadd.xlane.f32.xlu2 %v3827_v11 }
 0x73d   :  { %v4056_v42 = vmul.f32 %v14254_v43, %v4039_v9 }
 0x73e   :  { %v3911_v31 = vsub.f32 1.5, %v3910_v46 }
 0x73f   :  { %v14309_v3 = vadd.f32 %v14262_v16, %v4056_v42 }
 0x740   :  { %v3912_v61 = vmul.f32 %v11996_v33, %v3911_v31 }
 0x741   :  { %18011 = vst [vmem:[#allocation51_spill] sm:$0xff] %v14309_v3 }
 0x742   :  { %v3916_v20 = vsel %vm3915_vm1, %v11996_v33, %v3912_v61 }
 0x743   :  { %v4040_v32 = vmul.f32 %v3916_v20, %v14121_v0 }
 0x745   :  { %v3811_v54 = vpop.xlane.xlu2 %3810  ;;  %v4057_v19 = vmul.f32 %v14254_v43, %v4040_v32 }
 0x746   :  { %v3849_v35 = vmul.f32 %v3811_v54, %v14081_v60 }
 0x747   :  { %v14312_v30 = vadd.f32 %v14262_v16, %v4057_v19 }
 0x748   :  { %v3865_v24 = vadd.f32 1e-05, %v3849_v35 }
 0x749   :  { %18012 = vst [vmem:[#allocation57_spill] sm:$0xff] %v14312_v30  ;;  %v14316_v48 = vpack.c.bf16 %v14312_v30, %v14309_v3  ;;  %v11408_v30 = vld [vmem:[%s17693_s5 + $0x24] sm:$0xf] }
 0x74a   :  { %11997 = vrsqrt.f32 %v3865_v24  ;;  %vm3923_vm2 = vweird.f32 %v3865_v24 }
 0x74b   :  { %10473 = vmatmul.msk.bf16.gmra.mxu0 %vm17836_vm0, %v14316_v48  ;;  %10481 = vmatmul.msk.bf16.gmra.mxu1 %vm17836_vm0, %v14316_v48 }
 0x74c   :  { %10489 = vmatmul.msk.bf16.gmra.mxu2 %vm17836_vm0, %v14316_v48  ;;  %10497 = vmatmul.msk.bf16.gmra.mxu3 %vm17836_vm0, %v14316_v48 }
 0x74d   :  { %v3814_v0 = vpop.xlane.xlu0 %3813  ;;  %v3729_v15 = vpop.xlane.xlu2 %3728 }
 0x74e   :  { %v3850_v4 = vmul.f32 %v3814_v0, %v14081_v60  ;;  %v3760_v47 = vmul.f32 %v14081_v60, %v3729_v15 }
 0x750   :  { %v11998_v2 = vpop.eup %11997  ;;  %v3866_v62 = vadd.f32 1e-05, %v3850_v4  ;;  %v14329_v39 = vsub.f32 %v14153_v26, %v3760_v47 }
 0x751   :  { %v3918_v57 = vmul.f32 %v11998_v2, %v3865_v24  ;;  %vm3924_vm13 = vweird.f32 %v11998_v2 }
 0x752   :  { %11999 = vrsqrt.f32 %v3866_v62  ;;  %v3792_v13 = vmul.f32 %v14329_v39, %v14329_v39  ;;  %vm3925_vm14 = vmor %vm3923_vm2, %vm3924_vm13  ;;  %vm3933_vm15 = vweird.f32 %v3866_v62 }
 0x753   :  { %v3919_v49 = vmul.f32 %v11998_v2, %v3918_v57 }
 0x754   :  { %v3830_v37 = vsel %vm17836_vm0, %v3792_v13, 0.0 }
 0x755   :  { %v3920_v14 = vmul.f32 0.5, %v3919_v49  ;;  %3831 = vadd.xlane.f32.xlu0 %v3830_v37  ;;  %v3732_v6 = vpop.xlane.xlu2 %3731 }
 0x756   :  { %v3761_v63 = vmul.f32 %v14081_v60, %v3732_v6 }
 0x757   :  { %v3921_v38 = vsub.f32 1.5, %v3920_v14 }
 0x758   :  { %v12000_v58 = vpop.eup %11999  ;;  %v14336_v18 = vsub.f32 %v14163_v41, %v3761_v63 }
 0x759   :  { %v3922_v26 = vmul.f32 %v11998_v2, %v3921_v38  ;;  %v3928_v5 = vmul.f32 %v12000_v58, %v3866_v62  ;;  %vm3934_vm4 = vweird.f32 %v12000_v58 }
 0x75a   :  { %v3793_v17 = vmul.f32 %v14336_v18, %v14336_v18  ;;  %vm3935_vm1 = vmor %vm3933_vm15, %vm3934_vm4 }
 0x75b   :  { %v3929_v22 = vmul.f32 %v12000_v58, %v3928_v5  ;;  %v3926_v29 = vsel %vm3925_vm14, %v11998_v2, %v3922_v26 }
 0x75c   :  { %v3833_v56 = vsel %vm17836_vm0, %v3793_v17, 0.0  ;;  %v4041_v27 = vmul.f32 %v3926_v29, %v14141_v51 }
 0x75d   :  { %v3930_v52 = vmul.f32 0.5, %v3929_v22  ;;  %3834 = vadd.xlane.f32.xlu1 %v3833_v56 }
 0x75e   :  { %v4058_v28 = vmul.f32 %v14254_v43, %v4041_v27 }
 0x75f   :  { %v3931_v8 = vsub.f32 1.5, %v3930_v52  ;;  %v3817_v33 = vpop.xlane.xlu0 %3816 }
 0x760   :  { %v3851_v21 = vmul.f32 %v3817_v33, %v14081_v60  ;;  %v14347_v46 = vadd.f32 %v14262_v16, %v4058_v28 }
 0x761   :  { %v3932_v41 = vmul.f32 %v12000_v58, %v3931_v8 }
 0x762   :  { %v3867_v23 = vadd.f32 1e-05, %v3851_v21  ;;  %18013 = vst [vmem:[#allocation38_spill] sm:$0xff] %v14347_v46 }
 0x763   :  { %v3936_v36 = vsel %vm3935_vm1, %v12000_v58, %v3932_v41 }
 0x764   :  { %v4042_v7 = vmul.f32 %v3936_v36, %v14149_v34  ;;  %12001 = vrsqrt.f32 %v3867_v23  ;;  %vm3943_vm2 = vweird.f32 %v3867_v23 }
 0x766   :  { %v4059_v11 = vmul.f32 %v14254_v43, %v4042_v7 }
 0x767   :  { %v3735_v51 = vpop.xlane.xlu0 %3734 }
 0x768   :  { %v14350_v31 = vadd.f32 %v14262_v16, %v4059_v11  ;;  %v3762_v61 = vmul.f32 %v14081_v60, %v3735_v51 }
 0x76a   :  { %18014 = vst [vmem:[#allocation48_spill] sm:$0xff] %v14350_v31  ;;  %v14354_v9 = vpack.c.bf16 %v14350_v31, %v14347_v46  ;;  %v14358_v20 = vsub.f32 %v14177_v55, %v3762_v61  ;;  %v12002_v32 = vpop.eup %12001  ;;  %v10378_v31 = vld [vmem:[%s17693_s5 + $0x20] sm:$0xf] }
 0x76b   :  { %v3938_v35 = vmul.f32 %v12002_v32, %v3867_v23  ;;  %vm3944_vm13 = vweird.f32 %v12002_v32  ;;  %v11416_v46 = vld [vmem:[%s17693_s5 + $0x5c] sm:$0xf0] }
 0x76c   :  { %10474 = vmatmul.msk.bf16.gmra.mxu0 %vm17836_vm0, %v14354_v9  ;;  %10482 = vmatmul.msk.bf16.gmra.mxu1 %vm17836_vm0, %v14354_v9  ;;  %v3794_v34 = vmul.f32 %v14358_v20, %v14358_v20  ;;  %vm3945_vm14 = vmor %vm3943_vm2, %vm3944_vm13  ;;  %v10379_v3 = vor.u32 %v11416_v46, %v10378_v31  ;;  %v10388_v46 = vld [vmem:[%s17693_s5 + $0x68] sm:$0xf0]  ;;  %v10383_v31 = vor.u32 %v11408_v30, %v10380_v40 }
 0x76d   :  { %10490 = vmatmul.msk.bf16.gmra.mxu2 %vm17836_vm0, %v14354_v9  ;;  %10498 = vmatmul.msk.bf16.gmra.mxu3 %vm17836_vm0, %v14354_v9  ;;  %v3939_v0 = vmul.f32 %v12002_v32, %v3938_v35 }
 0x76e   :  { %v3836_v42 = vsel %vm17836_vm0, %v3794_v34, 0.0 }
 0x76f   :  { %3837 = vadd.xlane.f32.xlu2 %v3836_v42  ;;  %v3738_v55 = vpop.xlane.xlu0 %3737  ;;  %v3940_v62 = vmul.f32 0.5, %v3939_v0 }
 0x770   :  { %v3763_v54 = vmul.f32 %v14081_v60, %v3738_v55 }
 0x771   :  { %v3941_v57 = vsub.f32 1.5, %v3940_v62 }
 0x772   :  { %v14373_v19 = vsub.f32 %v14224_v25, %v3763_v54 }
 0x773   :  { %v3942_v37 = vmul.f32 %v12002_v32, %v3941_v57 }
 0x774   :  { %v3795_v24 = vmul.f32 %v14373_v19, %v14373_v19 }
 0x775   :  { %v3946_v6 = vsel %vm3945_vm14, %v12002_v32, %v3942_v37 }
 0x776   :  { %v3839_v4 = vsel %vm17836_vm0, %v3795_v24, 0.0  ;;  %v4043_v5 = vmul.f32 %v3946_v6, %v14169_v45 }
 0x777   :  { %v3820_v15 = vpop.xlane.xlu1 %3819  ;;  %3840 = vadd.xlane.f32.xlu0 %v3839_v4 }
 0x778   :  { %v3852_v47 = vmul.f32 %v3820_v15, %v14081_v60  ;;  %v4060_v52 = vmul.f32 %v14254_v43, %v4043_v5 }
 0x77a   :  { %v3868_v2 = vadd.f32 1e-05, %v3852_v47  ;;  %v14391_v45 = vadd.f32 %v14262_v16, %v4060_v52 }
 0x77c   :  { %12003 = vrsqrt.f32 %v3868_v2  ;;  %vm3953_vm15 = vweird.f32 %v3868_v2  ;;  %18015 = vst [vmem:[#allocation54_spill] sm:$0xff] %v14391_v45 }
 0x77f   :  { %v3823_v13 = vpop.xlane.xlu1 %3822 }
 0x780   :  { %v3853_v33 = vmul.f32 %v3823_v13, %v14081_v60 }
 0x782   :  { %v12004_v49 = vpop.eup %12003 }
 0x783   :  { %v3948_v25 = vmul.f32 %v12004_v49, %v3868_v2  ;;  %vm3954_vm4 = vweird.f32 %v12004_v49 }
 0x784   :  { %vm3955_vm1 = vmor %vm3953_vm15, %vm3954_vm4 }
 0x785   :  { %v3949_v14 = vmul.f32 %v12004_v49, %v3948_v25 }
 0x787   :  { %v3950_v63 = vmul.f32 0.5, %v3949_v14  ;;  %v3741_v38 = vpop.xlane.xlu1 %3740 }
 0x788   :  { %v3764_v58 = vmul.f32 %v14081_v60, %v3741_v38 }
 0x789   :  { %v3951_v26 = vsub.f32 1.5, %v3950_v63 }
 0x78a   :  { %v14382_v17 = vsub.f32 %v14259_v50, %v3764_v58 }
 0x78b   :  { %v3952_v22 = vmul.f32 %v12004_v49, %v3951_v26 }
 0x78c   :  { %v3796_v56 = vmul.f32 %v14382_v17, %v14382_v17 }
 0x78d   :  { %v3956_v29 = vsel %vm3955_vm1, %v12004_v49, %v3952_v22 }
 0x78e   :  { %v4044_v8 = vmul.f32 %v3956_v29, %v14240_v1  ;;  %v3842_v27 = vsel %vm17836_vm0, %v3796_v56, 0.0  ;;  %v3869_v1 = vadd.f32 1e-05, %v3853_v33 }
 0x78f   :  { %3843 = vadd.xlane.f32.xlu1 %v3842_v27 }
 0x790   :  { %v4061_v41 = vmul.f32 %v14254_v43, %v4044_v8  ;;  %12005 = vrsqrt.f32 %v3869_v1  ;;  %vm3963_vm2 = vweird.f32 %v3869_v1 }
 0x792   :  { %v14394_v50 = vadd.f32 %v14262_v16, %v4061_v41 }
 0x794   :  { %18016 = vst [vmem:[#allocation43_spill] sm:$0xff] %v14394_v50  ;;  %v14399_v36 = vpack.c.bf16 %v14394_v50, %v14391_v45 }
 0x796   :  { %10475 = vmatmul.msk.bf16.gmra.mxu0 %vm17836_vm0, %v14399_v36  ;;  %10483 = vmatmul.msk.bf16.gmra.mxu1 %vm17836_vm0, %v14399_v36  ;;  %v12006_v21 = vpop.eup %12005 }
 0x797   :  { %10491 = vmatmul.msk.bf16.gmra.mxu2 %vm17836_vm0, %v14399_v36  ;;  %10499 = vmatmul.msk.bf16.gmra.mxu3 %vm17836_vm0, %v14399_v36  ;;  %v3958_v28 = vmul.f32 %v12006_v21, %v3869_v1  ;;  %vm3964_vm13 = vweird.f32 %v12006_v21 }
 0x798   :  { %vm3965_vm14 = vmor %vm3963_vm2, %vm3964_vm13 }
 0x799   :  { %v3959_v7 = vmul.f32 %v12006_v21, %v3958_v28 }
 0x79b   :  { %v3960_v61 = vmul.f32 0.5, %v3959_v7 }
 0x79d   :  { %v3961_v34 = vsub.f32 1.5, %v3960_v61 }
 0x79f   :  { %v3962_v54 = vmul.f32 %v12006_v21, %v3961_v34 }
 0x7a1   :  { %v3966_v15 = vsel %vm3965_vm14, %v12006_v21, %v3962_v54 }
 0x7a2   :  { %v4045_v2 = vmul.f32 %v3966_v15, %v14247_v12 }
 0x7a4   :  { %v4062_v13 = vmul.f32 %v14254_v43, %v4045_v2 }
 0x7a6   :  { %v14416_v14 = vadd.f32 %v14262_v16, %v4062_v13  ;;  %v11423_v13 = vld [vmem:[%s17693_s5 + $0x9c] sm:$0xf] }
 0x7a7   :  { %v3826_v11 = vpop.xlane.xlu2 %3825 }
 0x7a8   :  { %v3854_v23 = vmul.f32 %v3826_v11, %v14081_v60  ;;  %18017 = vst [vmem:[#allocation47_spill] sm:$0xff] %v14416_v14 }
 0x7aa   :  { %v3870_v51 = vadd.f32 1e-05, %v3854_v23 }
 0x7ac   :  { %12007 = vrsqrt.f32 %v3870_v51  ;;  %vm3973_vm15 = vweird.f32 %v3870_v51 }
 0x7af   :  { %v3829_v42 = vpop.xlane.xlu2 %3828 }
 0x7b0   :  { %v3855_v32 = vmul.f32 %v3829_v42, %v14081_v60 }
 0x7b2   :  { %v12008_v55 = vpop.eup %12007  ;;  %v3871_v0 = vadd.f32 1e-05, %v3855_v32 }
 0x7b3   :  { %v3968_v35 = vmul.f32 %v12008_v55, %v3870_v51  ;;  %vm3974_vm4 = vweird.f32 %v12008_v55 }
 0x7b4   :  { %12009 = vrsqrt.f32 %v3871_v0  ;;  %vm3975_vm1 = vmor %vm3973_vm15, %vm3974_vm4  ;;  %vm3983_vm2 = vweird.f32 %v3871_v0 }
 0x7b5   :  { %v3969_v24 = vmul.f32 %v12008_v55, %v3968_v35 }
 0x7b7   :  { %v3970_v4 = vmul.f32 0.5, %v3969_v24 }
 0x7b9   :  { %v3971_v47 = vsub.f32 1.5, %v3970_v4 }
 0x7ba   :  { %v12010_v37 = vpop.eup %12009 }
 0x7bb   :  { %v3972_v62 = vmul.f32 %v12008_v55, %v3971_v47  ;;  %v3978_v63 = vmul.f32 %v12010_v37, %v3871_v0  ;;  %vm3984_vm13 = vweird.f32 %v12010_v37  ;;  %v11431_v47 = vld [vmem:[%s17693_s5 + $0xd4] sm:$0xf0] }
 0x7bc   :  { %vm3985_vm14 = vmor %vm3983_vm2, %vm3984_vm13 }
 0x7bd   :  { %v3976_v57 = vsel %vm3975_vm1, %v12008_v55, %v3972_v62  ;;  %v3979_v38 = vmul.f32 %v12010_v37, %v3978_v63  ;;  %v10426_v62 = vld [vmem:[%s17693_s5 + $0x90] sm:$0xf]  ;;  %v10428_v63 = vld [vmem:[%s17693_s5 + $0xd0] sm:$0xf0] }
 0x7be   :  { %v4046_v49 = vmul.f32 %v3976_v57, %v14291_v59  ;;  %v11430_v57 = vld [vmem:[%s17693_s5 + $0xcc] sm:$0xf0] }
 0x7bf   :  { %v3980_v5 = vmul.f32 0.5, %v3979_v38 }
 0x7c0   :  { %v4063_v25 = vmul.f32 %v14254_v43, %v4046_v49  ;;  %v10427_v49 = vor.u32 %v11430_v57, %v10426_v62  ;;  %v10370_v62 = vld [vmem:[%s17693_s5 + $0x18] sm:$0xf] }
 0x7c1   :  { %v3981_v22 = vsub.f32 1.5, %v3980_v5 }
 0x7c2   :  { %v14419_v6 = vadd.f32 %v14262_v16, %v4063_v25  ;;  %v11422_v25 = vld [vmem:[%s17693_s5 + $0x94] sm:$0xf]  ;;  %4549 = vmatpush.bf16.msra.mxu0 %v10427_v49  ;;  %v11407_v49 = vld [vmem:[%s17693_s5 + $0x1c] sm:$0xf] }
 0x7c3   :  { %v3982_v27 = vmul.f32 %v12010_v37, %v3981_v22 }
 0x7c4   :  { %18018 = vst [vmem:[#allocation50_spill] sm:$0xff] %v14419_v6  ;;  %v14423_v12 = vpack.c.bf16 %v14419_v6, %v14416_v14 }
 0x7c5   :  { %v3986_v1 = vsel %vm3985_vm14, %v12010_v37, %v3982_v27  ;;  %v10436_v37 = vld [vmem:[%s17693_s5 + $0xd8] sm:$0xf0] }
 0x7c6   :  { %10476 = vmatmul.msk.bf16.gmra.mxu0 %vm17836_vm0, %v14423_v12  ;;  %10484 = vmatmul.msk.bf16.gmra.mxu1 %vm17836_vm0, %v14423_v12  ;;  %v4047_v11 = vmul.f32 %v3986_v1, %v14298_v53  ;;  %v10439_v38 = vor.u32 %v11423_v13, %v10436_v37  ;;  %v11415_v13 = vld [vmem:[%s17693_s5 + $0x54] sm:$0xf0]  ;;  %v10372_v37 = vld [vmem:[%s17693_s5 + $0x58] sm:$0xf0] }
 0x7c7   :  { %10492 = vmatmul.msk.bf16.gmra.mxu2 %vm17836_vm0, %v14423_v12  ;;  %10500 = vmatmul.msk.bf16.gmra.mxu3 %vm17836_vm0, %v14423_v12 }
 0x7c8   :  { %v3832_v59 = vpop.xlane.xlu0 %3831  ;;  %v4064_v34 = vmul.f32 %v14254_v43, %v4047_v11  ;;  %4696 = vmatpush.bf16.msrb.mxu3 %v10439_v38 }
 0x7c9   :  { %v3856_v58 = vmul.f32 %v3832_v59, %v14081_v60  ;;  %v10431_v59 = vor.u32 %v11422_v25, %v10428_v63  ;;  %v10371_v25 = vor.u32 %v11415_v13, %v10370_v62  ;;  %v10375_v63 = vor.u32 %v11407_v49, %v10372_v37 }
 0x7ca   :  { %v14440_v54 = vadd.f32 %v14262_v16, %v4064_v34 }
 0x7cb   :  { %v3872_v26 = vadd.f32 1e-05, %v3856_v58  ;;  %4598 = vmatpush.bf16.msra.mxu1 %v10431_v59 }
 0x7cc   :  { %18019 = vst [vmem:[#allocation59_spill] sm:$0xff] %v14440_v54  ;;  %4697 = vmatpush.bf16.msrb.mxu3 %v10375_v63  ;;  %v10450_v63 = vld [vmem:[%s17693_s5 + $0xa8] sm:$0xf] }
 0x7cd   :  { %12011 = vrsqrt.f32 %v3872_v26  ;;  %vm3993_vm15 = vweird.f32 %v3872_v26 }
 0x7d0   :  { %v3835_v56 = vpop.xlane.xlu1 %3834 }
 0x7d1   :  { %v3857_v29 = vmul.f32 %v3835_v56, %v14081_v60 }
 0x7d3   :  { %v12012_v52 = vpop.eup %12011  ;;  %v3873_v8 = vadd.f32 1e-05, %v3857_v29 }
 0x7d4   :  { %v3988_v41 = vmul.f32 %v12012_v52, %v3872_v26  ;;  %vm3994_vm4 = vweird.f32 %v12012_v52 }
 0x7d5   :  { %12013 = vrsqrt.f32 %v3873_v8  ;;  %vm3995_vm1 = vmor %vm3993_vm15, %vm3994_vm4  ;;  %vm4003_vm2 = vweird.f32 %v3873_v8 }
 0x7d6   :  { %v3989_v33 = vmul.f32 %v12012_v52, %v3988_v41 }
 0x7d8   :  { %v3990_v21 = vmul.f32 0.5, %v3989_v33 }
 0x7da   :  { %v3991_v28 = vsub.f32 1.5, %v3990_v21 }
 0x7db   :  { %v12014_v7 = vpop.eup %12013 }
 0x7dc   :  { %v3992_v23 = vmul.f32 %v12012_v52, %v3991_v28  ;;  %v3998_v61 = vmul.f32 %v12014_v7, %v3873_v8  ;;  %vm4004_vm13 = vweird.f32 %v12014_v7 }
 0x7dd   :  { %vm4005_vm14 = vmor %vm4003_vm2, %vm4004_vm13 }
 0x7de   :  { %v3996_v51 = vsel %vm3995_vm1, %v12012_v52, %v3992_v23  ;;  %v3999_v55 = vmul.f32 %v12014_v7, %v3998_v61 }
 0x7df   :  { %v4048_v42 = vmul.f32 %v3996_v51, %v14329_v39  ;;  %v10434_v39 = vld [vmem:[%s17693_s5 + $0x98] sm:$0xf] }
 0x7e0   :  { %v4000_v15 = vmul.f32 0.5, %v3999_v55  ;;  %v10435_v2 = vor.u32 %v11431_v47, %v10434_v39  ;;  %v11406_v47 = vld [vmem:[%s17693_s5 + $0x14] sm:$0xf] }
 0x7e1   :  { %v4065_v32 = vmul.f32 %v14254_v43, %v4048_v42 }
 0x7e2   :  { %v3838_v24 = vpop.xlane.xlu2 %3837  ;;  %4647 = vmatpush.bf16.msra.mxu2 %v10435_v2  ;;  %v4001_v58 = vsub.f32 1.5, %v4000_v15  ;;  %v10362_v15 = vld [vmem:[%s17693_s5 + $0x10] sm:$0xf]  ;;  %v10364_v2 = vld [vmem:[%s17693_s5 + $0x50] sm:$0xf0] }
 0x7e3   :  { %v14443_v35 = vadd.f32 %v14262_v16, %v4065_v32  ;;  %v3858_v0 = vmul.f32 %v3838_v24, %v14081_v60  ;;  %v10367_v57 = vor.u32 %v11406_v47, %v10364_v2 }
 0x7e4   :  { %v4002_v56 = vmul.f32 %v12014_v7, %v4001_v58 }
 0x7e5   :  { %18020 = vst [vmem:[#allocation63_spill] sm:$0xff] %v14443_v35  ;;  %v14447_v53 = vpack.c.bf16 %v14443_v35, %v14440_v54  ;;  %v3874_v4 = vadd.f32 1e-05, %v3858_v0  ;;  %4599 = vmatpush.bf16.msra.mxu1 %v10367_v57 }
 0x7e6   :  { %v4006_v41 = vsel %vm4005_vm14, %v12014_v7, %v4002_v56  ;;  %4648 = vmatpush.bf16.msra.mxu2 %v10371_v25 }
 0x7e7   :  { %10477 = vmatmul.msk.bf16.gmra.mxu0 %vm17836_vm0, %v14447_v53  ;;  %10485 = vmatmul.msk.bf16.gmra.mxu1 %vm17836_vm0, %v14447_v53  ;;  %12015 = vrsqrt.f32 %v3874_v4  ;;  %v4049_v21 = vmul.f32 %v4006_v41, %v14336_v18  ;;  %vm4013_vm15 = vweird.f32 %v3874_v4 }
 0x7e8   :  { %10493 = vmatmul.msk.bf16.gmra.mxu2 %vm17836_vm0, %v14447_v53  ;;  %10501 = vmatmul.msk.bf16.gmra.mxu3 %vm17836_vm0, %v14447_v53 }
 0x7e9   :  { %v4066_v51 = vmul.f32 %v14254_v43, %v4049_v21 }
 0x7ea   :  { %v3841_v26 = vpop.xlane.xlu0 %3840 }
 0x7eb   :  { %v3859_v5 = vmul.f32 %v3841_v26, %v14081_v60  ;;  %v14488_v7 = vadd.f32 %v14262_v16, %v4066_v51  ;;  %v14546_v51 = vpop.f32.mrf.mxu1 }
 0x7ed   :  { %v12016_v22 = vpop.eup %12015  ;;  %v3875_v52 = vadd.f32 1e-05, %v3859_v5  ;;  %18021 = vst [vmem:[#allocation45_spill] sm:$0xff] %v14488_v7 }
 0x7ee   :  { %v4008_v29 = vmul.f32 %v12016_v22, %v3874_v4  ;;  %vm4014_vm4 = vweird.f32 %v12016_v22  ;;  %v11414_v4 = vld [vmem:[%s17693_s5 + $0x4c] sm:$0xf0] }
 0x7ef   :  { %12017 = vrsqrt.f32 %v3875_v52  ;;  %vm4015_vm1 = vmor %vm4013_vm15, %vm4014_vm4  ;;  %v10363_v39 = vor.u32 %v11414_v4, %v10362_v15  ;;  %vm4023_vm2 = vweird.f32 %v3875_v52 }
 0x7f0   :  { %v4009_v27 = vmul.f32 %v12016_v22, %v4008_v29 }
 0x7f1   :  { %4550 = vmatpush.bf16.msra.mxu0 %v10363_v39 }
 0x7f2   :  { %v4010_v33 = vmul.f32 0.5, %v4009_v27 }
 0x7f4   :  { %v4011_v1 = vsub.f32 1.5, %v4010_v33 }
 0x7f5   :  { %v12018_v11 = vpop.eup %12017 }
 0x7f6   :  { %v4012_v28 = vmul.f32 %v12016_v22, %v4011_v1  ;;  %v4018_v34 = vmul.f32 %v12018_v11, %v3875_v52  ;;  %vm4024_vm13 = vweird.f32 %v12018_v11 }
 0x7f7   :  { %vm4025_vm14 = vmor %vm4023_vm2, %vm4024_vm13 }
 0x7f8   :  { %v4016_v23 = vsel %vm4015_vm1, %v12016_v22, %v4012_v28  ;;  %v4019_v32 = vmul.f32 %v12018_v11, %v4018_v34 }
 0x7f9   :  { %v4050_v61 = vmul.f32 %v4016_v23, %v14358_v20 }
 0x7fa   :  { %v4020_v24 = vmul.f32 0.5, %v4019_v32 }
 0x7fb   :  { %v4067_v8 = vmul.f32 %v14254_v43, %v4050_v61  ;;  %v14562_v61 = vpop.f32.mrf.mxu1 }
 0x7fc   :  { %v4021_v38 = vsub.f32 1.5, %v4020_v24 }
 0x7fd   :  { %v14491_v42 = vadd.f32 %v14262_v16, %v4067_v8 }
 0x7fe   :  { %v4022_v58 = vmul.f32 %v12018_v11, %v4021_v38  ;;  %v11433_v38 = vld [vmem:[%s17693_s5 + $0xe4] sm:$0xf0] }
 0x7ff   :  { %18022 = vst [vmem:[#allocation67_spill] sm:$0xff] %v14491_v42  ;;  %v14495_v18 = vpack.c.bf16 %v14491_v42, %v14488_v7 }
 0x800   :  { %v4026_v22 = vsel %vm4025_vm14, %v12018_v11, %v4022_v58 }
 0x801   :  { %10478 = vmatmul.msk.bf16.gmra.mxu0 %vm17836_vm0, %v14495_v18  ;;  %10486 = vmatmul.msk.bf16.gmra.mxu1 %vm17836_vm0, %v14495_v18  ;;  %v4051_v27 = vmul.f32 %v4026_v22, %v14373_v19  ;;  %v14544_v19 = vpop.f32.mrf.mxu0  ;;  %v11432_v22 = vld [vmem:[%s17693_s5 + $0xdc] sm:$0xf0] }
 0x802   :  { %v3844_v55 = vpop.xlane.xlu1 %3843  ;;  %10494 = vmatmul.msk.bf16.gmra.mxu2 %vm17836_vm0, %v14495_v18  ;;  %10502 = vmatmul.msk.bf16.gmra.mxu3 %vm17836_vm0, %v14495_v18 }
 0x803   :  { %v3860_v20 = vmul.f32 %v3844_v55, %v14081_v60  ;;  %v4068_v1 = vmul.f32 %v14254_v43, %v4051_v27  ;;  %v14574_v55 = vpop.f32.mrf.mxu1  ;;  %v10452_v27 = vld [vmem:[%s17693_s5 + $0xe8] sm:$0xf0] }
 0x805   :  { %v3876_v0 = vadd.f32 1e-05, %v3860_v20  ;;  %v14535_v52 = vadd.f32 %v14262_v16, %v4068_v1 }
 0x807   :  { %12019 = vrsqrt.f32 %v3876_v0  ;;  %vm4033_vm15 = vweird.f32 %v3876_v0  ;;  %18023 = vst [vmem:[#allocation60_spill] sm:$0xff] %v14535_v52 }
 0x80b   :  { %v14586_v15 = vpop.f32.mrf.mxu1 }
 0x80d   :  { %v12020_v59 = vpop.eup %12019 }
 0x80e   :  { %v4028_v26 = vmul.f32 %v12020_v59, %v3876_v0  ;;  %vm4034_vm4 = vweird.f32 %v12020_v59 }
 0x80f   :  { %vm4035_vm1 = vmor %vm4033_vm15, %vm4034_vm4 }
 0x810   :  { %v4029_v5 = vmul.f32 %v12020_v59, %v4028_v26 }
 0x812   :  { %v4030_v56 = vmul.f32 0.5, %v4029_v5  ;;  %v10451_v5 = vor.u32 %v11433_v38, %v10450_v63 }
 0x813   :  { %v14602_v2 = vpop.f32.mrf.mxu1 }
 0x814   :  { %v4031_v29 = vsub.f32 1.5, %v4030_v56  ;;  %v11425_v56 = vld [vmem:[%s17693_s5 + $0xac] sm:$0xf]  ;;  %4843 = vmatpush.bf16.msrb.mxu2 %v10451_v5 }
 0x815   :  { %v10455_v1 = vor.u32 %v11425_v56, %v10452_v27 }
 0x816   :  { %v4032_v41 = vmul.f32 %v12020_v59, %v4031_v29 }
 0x817   :  { %4892 = vmatpush.bf16.msra.mxu3 %v10455_v1 }
 0x818   :  { %v4036_v33 = vsel %vm4035_vm1, %v12020_v59, %v4032_v41  ;;  %v10442_v59 = vld [vmem:[%s17693_s5 + $0xa0] sm:$0xf]  ;;  %v11424_v41 = vld [vmem:[%s17693_s5 + $0xa4] sm:$0xf] }
 0x819   :  { %v4052_v21 = vmul.f32 %v4036_v33, %v14382_v17  ;;  %v14560_v17 = vpop.f32.mrf.mxu0  ;;  %v10443_v29 = vor.u32 %v11432_v22, %v10442_v59  ;;  %v10444_v33 = vld [vmem:[%s17693_s5 + $0xe0] sm:$0xf0] }
 0x81b   :  { %v4069_v28 = vmul.f32 %v14254_v43, %v4052_v21  ;;  %v14556_v43 = vpop.f32.mrf.mxu2  ;;  %v14610_v49 = vpop.f32.mrf.mxu1  ;;  %v10447_v21 = vor.u32 %v11424_v41, %v10444_v33  ;;  %4745 = vmatpush.bf16.msrb.mxu0 %v10443_v29 }
 0x81d   :  { %v14538_v11 = vadd.f32 %v14262_v16, %v4069_v28  ;;  %v14558_v16 = vpop.f32.mrf.mxu3  ;;  %4794 = vmatpush.bf16.msrb.mxu1 %v10447_v21 }
 0x81f   :  { %18024 = vst [vmem:[#allocation64_spill] sm:$0xff] %v14538_v11  ;;  %v14542_v23 = vpack.c.bf16 %v14538_v11, %v14535_v52  ;;  %4746 = vmatpush.bf16.msrb.mxu0 %v10379_v3 }
 0x821   :  { %10479 = vmatmul.msk.bf16.gmra.mxu0 %vm17836_vm0, %v14542_v23  ;;  %10487 = vmatmul.msk.bf16.gmra.mxu1 %vm17836_vm0, %v14542_v23  ;;  %v14572_v32 = vpop.f32.mrf.mxu0 }
 0x822   :  { %10495 = vmatmul.msk.bf16.gmra.mxu2 %vm17836_vm0, %v14542_v23  ;;  %10503 = vmatmul.msk.bf16.gmra.mxu3 %vm17836_vm0, %v14542_v23 }
 0x823   :  { %v14564_v8 = vpop.f32.mrf.mxu2  ;;  %v14635_v26 = vpop.f32.mrf.mxu1  ;;  %4795 = vmatpush.bf16.msrb.mxu1 %v10383_v31 }
 0x824   :  { %18026 = vst [vmem:[#allocation41_spill] sm:$0xff] %v14635_v26 }
 0x825   :  { %v14566_v34 = vpop.f32.mrf.mxu3 }
 0x829   :  { %v14584_v0 = vpop.f32.mrf.mxu0 }
 0x82b   :  { %v14580_v20 = vpop.f32.mrf.mxu2  ;;  %v14658_v59 = vpop.f32.mrf.mxu1 }
 0x82d   :  { %v14582_v24 = vpop.f32.mrf.mxu3 }
 0x831   :  { %10504 = vmatmul.msk.bf16.vlgmr.msra.gmra.mxu0 %vm17836_vm0, %v14277_v10  ;;  %10512 = vmatmul.msk.bf16.vlgmr.msra.gmra.mxu1 %vm17836_vm0, %v14277_v10  ;;  %v14600_v47 = vpop.f32.mrf.mxu0 }
 0x832   :  { %10520 = vmatmul.msk.bf16.vlgmr.msra.gmra.mxu2 %vm17836_vm0, %v14277_v10  ;;  %10528 = vmatmul.msk.bf16.vlgmr.msrb.gmra.mxu3 %vm17836_vm0, %v14277_v10 }
 0x833   :  { %v14596_v4 = vpop.f32.mrf.mxu2 }
 0x835   :  { %v14598_v39 = vpop.f32.mrf.mxu3 }
 0x839   :  { %v14608_v13 = vpop.f32.mrf.mxu0 }
 0x83b   :  { %v14604_v62 = vpop.f32.mrf.mxu2 }
 0x83d   :  { %v14606_v57 = vpop.f32.mrf.mxu3 }
 0x841   :  { %10505 = vmatmul.msk.bf16.gmra.mxu0 %vm17836_vm0, %v14316_v48  ;;  %10513 = vmatmul.msk.bf16.gmra.mxu1 %vm17836_vm0, %v14316_v48  ;;  %v14633_v58 = vpop.f32.mrf.mxu0 }
 0x842   :  { %10521 = vmatmul.msk.bf16.gmra.mxu2 %vm17836_vm0, %v14316_v48  ;;  %10529 = vmatmul.msk.bf16.gmra.mxu3 %vm17836_vm0, %v14316_v48  ;;  %18025 = vst [vmem:[#allocation52_spill] sm:$0xff] %v14633_v58 }
 0x843   :  { %v14620_v37 = vpop.f32.mrf.mxu2  ;;  %v14674_v29 = vpop.f32.mrf.mxu1 }
 0x844   :  { %18031 = vst [vmem:[#allocation55_spill] sm:$0xff] %v14674_v29 }
 0x845   :  { %v14622_v25 = vpop.f32.mrf.mxu3 }
 0x849   :  { %v14656_v38 = vpop.f32.mrf.mxu0 }
 0x84b   :  { %v14652_v28 = vpop.f32.mrf.mxu2  ;;  %v14686_v1 = vpop.f32.mrf.mxu1 }
 0x84c   :  { %18027 = vst [vmem:[#allocation56_spill] sm:$0xff] %v14652_v28 }
 0x84d   :  { %v14654_v63 = vpop.f32.mrf.mxu3  ;;  %18035 = vst [vmem:[#allocation58_spill] sm:$0xff] %v14686_v1 }
 0x84e   :  { %18028 = vst [vmem:[#allocation49_spill] sm:$0xff] %v14654_v63 }
 0x851   :  { %10506 = vmatmul.msk.bf16.gmra.mxu0 %vm17836_vm0, %v14354_v9  ;;  %10514 = vmatmul.msk.bf16.gmra.mxu1 %vm17836_vm0, %v14354_v9  ;;  %v14672_v56 = vpop.f32.mrf.mxu0 }
 0x852   :  { %10522 = vmatmul.msk.bf16.gmra.mxu2 %vm17836_vm0, %v14354_v9  ;;  %10530 = vmatmul.msk.bf16.gmra.mxu3 %vm17836_vm0, %v14354_v9  ;;  %18030 = vst [vmem:[#allocation69_spill] sm:$0xff] %v14672_v56 }
 0x853   :  { %v14668_v5 = vpop.f32.mrf.mxu2 }
 0x855   :  { %v14670_v22 = vpop.f32.mrf.mxu3 }
 0x856   :  { %18029 = vst [vmem:[#allocation65_spill] sm:$0xff] %v14670_v22 }
 0x859   :  { %v14684_v33 = vpop.f32.mrf.mxu0 }
 0x85a   :  { %18034 = vst [vmem:[#allocation68_spill] sm:$0xff] %v14684_v33 }
 0x85b   :  { %v14676_v27 = vpop.f32.mrf.mxu2 }
 0x85c   :  { %18032 = vst [vmem:[#allocation44_spill] sm:$0xff] %v14676_v27 }
 0x85d   :  { %v14678_v41 = vpop.f32.mrf.mxu3 }
 0x85e   :  { %18033 = vst [vmem:[#allocation61_spill] sm:$0xff] %v14678_v41 }
 0x861   :  { %10507 = vmatmul.msk.bf16.gmra.mxu0 %vm17836_vm0, %v14399_v36  ;;  %10515 = vmatmul.msk.bf16.gmra.mxu1 %vm17836_vm0, %v14399_v36 }
 0x862   :  { %10523 = vmatmul.msk.bf16.gmra.mxu2 %vm17836_vm0, %v14399_v36  ;;  %10531 = vmatmul.msk.bf16.gmra.mxu3 %vm17836_vm0, %v14399_v36 }
 0x863   :  { %v14692_v21 = vpop.f32.mrf.mxu2 }
 0x864   :  { %18036 = vst [vmem:[#allocation62_spill] sm:$0xff] %v14692_v21  ;;  %v14696_v52 = vpop.f32.mrf.mxu0  ;;  %v14698_v42 = vpop.f32.mrf.mxu1 }
 0x865   :  { %v14694_v11 = vpop.f32.mrf.mxu3  ;;  %18038 = vst [vmem:[#allocation66_spill] sm:$0xff] %v14696_v52 }
 0x866   :  { %18037 = vst [vmem:[#allocation39_spill] sm:$0xff] %v14694_v11 }
 0x867   :  { %18039 = vst [vmem:[#allocation42_spill] sm:$0xff] %v14698_v42 }
 0x86b   :  { %v14700_v7 = vpop.f32.mrf.mxu2 }
 0x86c   :  { %18040 = vst [vmem:[#allocation22_spill] sm:$0xff] %v14700_v7  ;;  %v14712_v54 = vpop.f32.mrf.mxu0  ;;  %v14714_v6 = vpop.f32.mrf.mxu1 }
 0x86d   :  { %v14702_v35 = vpop.f32.mrf.mxu3  ;;  %18042 = vst [vmem:[#allocation24_spill] sm:$0xff] %v14712_v54 }
 0x86e   :  { %18041 = vst [vmem:[#allocation23_spill] sm:$0xff] %v14702_v35 }
 0x86f   :  { %18043 = vst [vmem:[#allocation25_spill] sm:$0xff] %v14714_v6 }
 0x871   :  { %10508 = vmatmul.msk.bf16.gmra.mxu0 %vm17836_vm0, %v14423_v12  ;;  %10516 = vmatmul.msk.bf16.gmra.mxu1 %vm17836_vm0, %v14423_v12 }
 0x872   :  { %10524 = vmatmul.msk.bf16.gmra.mxu2 %vm17836_vm0, %v14423_v12  ;;  %10532 = vmatmul.msk.bf16.gmra.mxu3 %vm17836_vm0, %v14423_v12 }
 0x873   :  { %v14716_v14 = vpop.f32.mrf.mxu2 }
 0x874   :  { %18044 = vst [vmem:[#allocation26_spill] sm:$0xff] %v14716_v14 }
 0x875   :  { %v14718_v50 = vpop.f32.mrf.mxu3 }
 0x876   :  { %18045 = vst [vmem:[#allocation27_spill] sm:$0xff] %v14718_v50 }
 0x87e   :  { %v14720_v60 = vpop.f32.mrf.mxu0  ;;  %v14722_v45 = vpop.f32.mrf.mxu1 }
 0x87f   :  { %18046 = vst [vmem:[#allocation28_spill] sm:$0xff] %v14720_v60  ;;  %v11409_v60 = vld [vmem:[%s17693_s5 + $0x2c] sm:$0xf] }
 0x880   :  { %18047 = vst [vmem:[#allocation29_spill] sm:$0xff] %v14722_v45  ;;  %v11417_v45 = vld [vmem:[%s17693_s5 + $0x64] sm:$0xf0]  ;;  %v10391_v7 = vor.u32 %v11409_v60, %v10388_v46  ;;  %v4127_v46 = vld [vmem:[%s17694_s6] sm:$0xff] }
 0x881   :  { %10509 = vmatmul.msk.bf16.gmra.mxu0 %vm17836_vm0, %v14447_v53  ;;  %10517 = vmatmul.msk.bf16.gmra.mxu1 %vm17836_vm0, %v14447_v53  ;;  %v10387_v35 = vor.u32 %v11417_v45, %v10386_v44  ;;  %v14787_v27 = vperm.slane %v4127_v46, 2  ;;  %v14789_v29 = vperm.slane %v4127_v46, 3 }
 0x882   :  { %10525 = vmatmul.msk.bf16.gmra.mxu2 %vm17836_vm0, %v14447_v53  ;;  %10533 = vmatmul.msk.bf16.gmra.mxu3 %vm17836_vm0, %v14447_v53 }
 0x883   :  { %4844 = vmatpush.bf16.msrb.mxu2 %v10387_v35  ;;  %4893 = vmatpush.bf16.msra.mxu3 %v10391_v7  ;;  %v14779_v35 = vperm.slane %v4127_v46, 0  ;;  %v14781_v7 = vperm.slane %v4127_v46, 1 }
 0x885   :  { %v14756_v42 = vpop.f32.mrf.mxu2  ;;  %v14758_v52 = vpop.f32.mrf.mxu3 }
 0x886   :  { %18048 = vst [vmem:[#allocation30_spill] sm:$0xff] %v14756_v42  ;;  %v14760_v60 = vpop.f32.mrf.mxu0  ;;  %v14762_v44 = vpop.f32.mrf.mxu1 }
 0x887   :  { %18049 = vst [vmem:[#allocation31_spill] sm:$0xff] %v14758_v52 }
 0x888   :  { %18050 = vst [vmem:[#allocation32_spill] sm:$0xff] %v14760_v60 }
 0x889   :  { %18051 = vst [vmem:[#allocation33_spill] sm:$0xff] %v14762_v44 }
 0x88d   :  { %v14764_v40 = vpop.f32.mrf.mxu2  ;;  %v14766_v3 = vpop.f32.mrf.mxu3 }
 0x88e   :  { %18052 = vst [vmem:[#allocation34_spill] sm:$0xff] %v14764_v40 }
 0x88f   :  { %18053 = vst [vmem:[#allocation35_spill] sm:$0xff] %v14766_v3 }
 0x891   :  { %10510 = vmatmul.msk.bf16.gmra.mxu0 %vm17836_vm0, %v14495_v18  ;;  %10518 = vmatmul.msk.bf16.gmra.mxu1 %vm17836_vm0, %v14495_v18 }
 0x892   :  { %10526 = vmatmul.msk.bf16.gmra.mxu2 %vm17836_vm0, %v14495_v18  ;;  %10534 = vmatmul.msk.bf16.gmra.mxu3 %vm17836_vm0, %v14495_v18 }
 0x89e   :  { %v4391_v30 = vpop.f32.mrf.mxu0  ;;  %v4440_v45 = vpop.f32.mrf.mxu1 }
 0x89f   :  { %v4392_v31 = vadd.f32 %v4391_v30, %v14779_v35  ;;  %v4441_v52 = vadd.f32 %v4440_v45, %v14781_v7 }
 0x8a1   :  { %10511 = vmatmul.msk.bf16.gmra.mxu0 %vm17836_vm0, %v14542_v23  ;;  %10519 = vmatmul.msk.bf16.gmra.mxu1 %vm17836_vm0, %v14542_v23  ;;  %v5355_v14 = vmax.f32 %v4392_v31, 0.0  ;;  %v5356_v6 = vmax.f32 %v4441_v52, 0.0 }
 0x8a2   :  { %10527 = vmatmul.msk.bf16.gmra.mxu2 %vm17836_vm0, %v14542_v23  ;;  %10535 = vmatmul.msk.bf16.gmra.mxu3 %vm17836_vm0, %v14542_v23 }
 0x8a5   :  { %v4489_v42 = vpop.f32.mrf.mxu2  ;;  %v4538_v3 = vpop.f32.mrf.mxu3 }
 0x8a6   :  { %v4393_v40 = vpop.f32.mrf.mxu0  ;;  %v4442_v44 = vpop.f32.mrf.mxu1  ;;  %v4490_v45 = vadd.f32 %v4489_v42, %v14787_v27  ;;  %v4539_v11 = vadd.f32 %v4538_v3, %v14789_v29 }
 0x8a7   :  { %v4394_v60 = vadd.f32 %v4393_v40, %v14779_v35  ;;  %v4443_v50 = vadd.f32 %v4442_v44, %v14781_v7 }
 0x8a8   :  { %v5357_v31 = vmax.f32 %v4490_v45, 0.0  ;;  %v5358_v1 = vmax.f32 %v4539_v11, 0.0 }
 0x8a9   :  { %v5371_v54 = vmax.f32 %v4394_v60, 0.0  ;;  %v5372_v41 = vmax.f32 %v4443_v50, 0.0 }
 0x8ab   :  { %v14791_v56 = vpack.c.bf16 %v5371_v54, %v5355_v14  ;;  %v14793_v30 = vpack.c.bf16 %v5372_v41, %v5356_v6  ;;  %v14799_v14 = vperm.slane %v4127_v46, 4  ;;  %v14801_v6 = vperm.slane %v4127_v46, 5 }
 0x8ad   :  { %18054 = vst [vmem:[#allocation36_spill] sm:$0xff] %v14791_v56  ;;  %v4491_v21 = vpop.f32.mrf.mxu2  ;;  %v4540_v40 = vpop.f32.mrf.mxu3  ;;  %v14821_v56 = vperm.slane %v4127_v46, 7 }
 0x8ae   :  { %18055 = vst [vmem:[#allocation37_spill] sm:$0xff] %v14793_v30  ;;  %v4492_v44 = vadd.f32 %v4491_v21, %v14787_v27  ;;  %v4541_v52 = vadd.f32 %v4540_v40, %v14789_v29  ;;  %v4552_v60 = vpop.f32.mrf.mxu0  ;;  %v4601_v50 = vpop.f32.mrf.mxu1  ;;  %v14819_v30 = vperm.slane %v4127_v46, 6 }
 0x8af   :  { %v4553_v11 = vadd.f32 %v4552_v60, %v14799_v14  ;;  %v4602_v41 = vadd.f32 %v4601_v50, %v14801_v6 }
 0x8b0   :  { %v5373_v33 = vmax.f32 %v4492_v44, 0.0  ;;  %v5374_v63 = vmax.f32 %v4541_v52, 0.0 }
 0x8b1   :  { %10536 = vmatmul.msk.bf16.vlgmr.msrb.gmra.mxu0 %vm17836_vm0, %v14277_v10  ;;  %10544 = vmatmul.msk.bf16.vlgmr.msrb.gmra.mxu1 %vm17836_vm0, %v14277_v10 }
 0x8b2   :  { %10552 = vmatmul.msk.bf16.vlgmr.msrb.gmra.mxu2 %vm17836_vm0, %v14277_v10  ;;  %10560 = vmatmul.msk.bf16.vlgmr.msra.gmra.mxu3 %vm17836_vm0, %v14277_v10  ;;  %v14811_v54 = vpack.c.bf16 %v5373_v33, %v5357_v31  ;;  %v14813_v42 = vpack.c.bf16 %v5374_v63, %v5358_v1  ;;  %v5135_v33 = vmax.f32 %v4553_v11, 0.0  ;;  %v5136_v31 = vmax.f32 %v4602_v41, 0.0 }
 0x8b4   :  { %18056 = vst [vmem:[#allocation70_spill] sm:$0xff] %v14811_v54 }
 0x8b5   :  { %18057 = vst [vmem:[#allocation71_spill] sm:$0xff] %v14813_v42  ;;  %v4650_v21 = vpop.f32.mrf.mxu2  ;;  %v4699_v3 = vpop.f32.mrf.mxu3 }
 0x8b6   :  { %v4554_v45 = vpop.f32.mrf.mxu0  ;;  %v4603_v40 = vpop.f32.mrf.mxu1  ;;  %v4651_v50 = vadd.f32 %v4650_v21, %v14819_v30  ;;  %v4700_v54 = vadd.f32 %v4699_v3, %v14821_v56 }
 0x8b7   :  { %v4555_v44 = vadd.f32 %v4554_v45, %v14799_v14  ;;  %v4604_v52 = vadd.f32 %v4603_v40, %v14801_v6 }
 0x8b8   :  { %v5137_v11 = vmax.f32 %v4651_v50, 0.0  ;;  %v5138_v41 = vmax.f32 %v4700_v54, 0.0 }
 0x8b9   :  { %v5151_v63 = vmax.f32 %v4555_v44, 0.0  ;;  %v5152_v1 = vmax.f32 %v4604_v52, 0.0 }
 0x8bb   :  { %v14823_v42 = vpack.c.bf16 %v5151_v63, %v5135_v33  ;;  %v14825_v60 = vpack.c.bf16 %v5152_v1, %v5136_v31 }
 0x8bd   :  { %18058 = vst [vmem:[#allocation72_spill] sm:$0xff] %v14823_v42  ;;  %v4652_v28 = vpop.f32.mrf.mxu2  ;;  %v4701_v45 = vpop.f32.mrf.mxu3 }
 0x8be   :  { %18059 = vst [vmem:[#allocation73_spill] sm:$0xff] %v14825_v60  ;;  %v4653_v40 = vadd.f32 %v4652_v28, %v14819_v30  ;;  %v4702_v26 = vadd.f32 %v4701_v45, %v14821_v56  ;;  %v4557_v46 = vpop.f32.mrf.mxu0  ;;  %v4606_v58 = vpop.f32.mrf.mxu1 }
 0x8bf   :  { %v4558_v28 = vadd.f32 %v4557_v46, %v14799_v14 }
 0x8c0   :  { %v5153_v44 = vmax.f32 %v4653_v40, 0.0  ;;  %v5154_v52 = vmax.f32 %v4702_v26, 0.0  ;;  %v4607_v26 = vadd.f32 %v4606_v58, %v14801_v6 }
 0x8c1   :  { %10537 = vmatmul.msk.bf16.gmra.mxu0 %vm17836_vm0, %v14316_v48  ;;  %10545 = vmatmul.msk.bf16.gmra.mxu1 %vm17836_vm0, %v14316_v48  ;;  %v5167_v45 = vmax.f32 %v4558_v28, 0.0 }
 0x8c2   :  { %v14835_v21 = vpack.c.bf16 %v5153_v44, %v5137_v11  ;;  %v14837_v3 = vpack.c.bf16 %v5154_v52, %v5138_v41  ;;  %10553 = vmatmul.msk.bf16.gmra.mxu2 %vm17836_vm0, %v14316_v48  ;;  %10561 = vmatmul.msk.bf16.gmra.mxu3 %vm17836_vm0, %v14316_v48  ;;  %v5168_v40 = vmax.f32 %v4607_v26, 0.0 }
 0x8c4   :  { %18060 = vst [vmem:[#allocation74_spill] sm:$0xff] %v14835_v21 }
 0x8c5   :  { %18061 = vst [vmem:[#allocation75_spill] sm:$0xff] %v14837_v3  ;;  %v4655_v54 = vpop.f32.mrf.mxu2  ;;  %v4704_v33 = vpop.f32.mrf.mxu3 }
 0x8c6   :  { %v4559_v31 = vpop.f32.mrf.mxu0  ;;  %v4608_v63 = vpop.f32.mrf.mxu1  ;;  %v4656_v46 = vadd.f32 %v4655_v54, %v14819_v30  ;;  %v4705_v58 = vadd.f32 %v4704_v33, %v14821_v56 }
 0x8c7   :  { %v4560_v1 = vadd.f32 %v4559_v31, %v14799_v14  ;;  %v4609_v50 = vadd.f32 %v4608_v63, %v14801_v6 }
 0x8c8   :  { %v5169_v28 = vmax.f32 %v4656_v46, 0.0  ;;  %v5170_v26 = vmax.f32 %v4705_v58, 0.0 }
 0x8c9   :  { %v5183_v11 = vmax.f32 %v4560_v1, 0.0  ;;  %v5184_v41 = vmax.f32 %v4609_v50, 0.0 }
 0x8cb   :  { %v14847_v44 = vpack.c.bf16 %v5183_v11, %v5167_v45  ;;  %v14849_v52 = vpack.c.bf16 %v5184_v41, %v5168_v40 }
 0x8cd   :  { %18062 = vst [vmem:[#allocation76_spill] sm:$0xff] %v14847_v44  ;;  %v4657_v3 = vpop.f32.mrf.mxu2  ;;  %v4706_v21 = vpop.f32.mrf.mxu3 }
 0x8ce   :  { %18063 = vst [vmem:[#allocation77_spill] sm:$0xff] %v14849_v52  ;;  %v4658_v60 = vadd.f32 %v4657_v3, %v14819_v30  ;;  %v4707_v31 = vadd.f32 %v4706_v21, %v14821_v56  ;;  %v4562_v42 = vpop.f32.mrf.mxu0  ;;  %v4611_v63 = vpop.f32.mrf.mxu1  ;;  %v10466_v21 = vld [vmem:[%s17693_s5 + $0xb8] sm:$0xf] }
 0x8cf   :  { %v4563_v45 = vadd.f32 %v4562_v42, %v14799_v14  ;;  %v4612_v40 = vadd.f32 %v4611_v63, %v14801_v6  ;;  %v11434_v42 = vld [vmem:[%s17693_s5 + $0xec] sm:$0xf0] }
 0x8d0   :  { %v5185_v1 = vmax.f32 %v4658_v60, 0.0  ;;  %v5186_v50 = vmax.f32 %v4707_v31, 0.0  ;;  %v11435_v60 = vld [vmem:[%s17693_s5 + $0xf4] sm:$0xf0] }
 0x8d1   :  { %10538 = vmatmul.msk.bf16.gmra.mxu0 %vm17836_vm0, %v14354_v9  ;;  %10546 = vmatmul.msk.bf16.gmra.mxu1 %vm17836_vm0, %v14354_v9  ;;  %v10467_v33 = vor.u32 %v11435_v60, %v10466_v21  ;;  %v5199_v44 = vmax.f32 %v4563_v45, 0.0  ;;  %v5200_v22 = vmax.f32 %v4612_v40, 0.0  ;;  %v10468_v21 = vld [vmem:[%s17693_s5 + $0xf8] sm:$0xf0]  ;;  %v10460_v45 = vld [vmem:[%s17693_s5 + $0xf0] sm:$0xf0] }
 0x8d2   :  { %10554 = vmatmul.msk.bf16.gmra.mxu2 %vm17836_vm0, %v14354_v9  ;;  %10562 = vmatmul.msk.bf16.gmra.mxu3 %vm17836_vm0, %v14354_v9  ;;  %v14869_v3 = vpack.c.bf16 %v5185_v1, %v5169_v28  ;;  %v14871_v54 = vpack.c.bf16 %v5186_v50, %v5170_v26  ;;  %v10458_v28 = vld [vmem:[%s17693_s5 + $0xb0] sm:$0xf]  ;;  %v11427_v50 = vld [vmem:[%s17693_s5 + $0xbc] sm:$0xf] }
 0x8d3   :  { %5039 = vmatpush.bf16.msra.mxu2 %v10467_v33  ;;  %v10459_v1 = vor.u32 %v11434_v42, %v10458_v28  ;;  %v10471_v60 = vor.u32 %v11427_v50, %v10468_v21  ;;  %v11426_v33 = vld [vmem:[%s17693_s5 + $0xb4] sm:$0xf] }
 0x8d4   :  { %18064 = vst [vmem:[#allocation78_spill] sm:$0xff] %v14869_v3 }
 0x8d5   :  { %18065 = vst [vmem:[#allocation79_spill] sm:$0xff] %v14871_v54  ;;  %v4660_v11 = vpop.f32.mrf.mxu2  ;;  %v4709_v41 = vpop.f32.mrf.mxu3  ;;  %4941 = vmatpush.bf16.msra.mxu0 %v10459_v1  ;;  %5088 = vmatpush.bf16.msrb.mxu3 %v10471_v60 }
 0x8d6   :  { %v4564_v46 = vpop.f32.mrf.mxu0  ;;  %v4613_v58 = vpop.f32.mrf.mxu1 }
 0x8d7   :  { %v4565_v31 = vadd.f32 %v4564_v46, %v14799_v14  ;;  %v4614_v52 = vadd.f32 %v4613_v58, %v14801_v6  ;;  %v4661_v58 = vadd.f32 %v4660_v11, %v14819_v30 }
 0x8d9   :  { %v5215_v63 = vmax.f32 %v4565_v31, 0.0  ;;  %v5216_v26 = vmax.f32 %v4614_v52, 0.0  ;;  %v10463_v52 = vor.u32 %v11426_v33, %v10460_v45  ;;  %v4710_v31 = vadd.f32 %v4709_v41, %v14821_v56 }
 0x8da   :  { %v5201_v1 = vmax.f32 %v4661_v58, 0.0 }
 0x8db   :  { %v14895_v40 = vpack.c.bf16 %v5215_v63, %v5199_v44  ;;  %v14897_v46 = vpack.c.bf16 %v5216_v26, %v5200_v22  ;;  %4990 = vmatpush.bf16.msra.mxu1 %v10463_v52  ;;  %v5202_v33 = vmax.f32 %v4710_v31, 0.0 }
 0x8dd   :  { %18066 = vst [vmem:[#allocation80_spill] sm:$0xff] %v14897_v46  ;;  %v4662_v28 = vpop.f32.mrf.mxu2  ;;  %v4711_v42 = vpop.f32.mrf.mxu3 }
 0x8de   :  { %v4663_v50 = vadd.f32 %v4662_v28, %v14819_v30  ;;  %v4712_v21 = vadd.f32 %v4711_v42, %v14821_v56  ;;  %v4567_v54 = vpop.f32.mrf.mxu0  ;;  %v4616_v3 = vpop.f32.mrf.mxu1 }
 0x8df   :  { %v4568_v41 = vadd.f32 %v4567_v54, %v14799_v14  ;;  %v4617_v26 = vadd.f32 %v4616_v3, %v14801_v6 }
 0x8e0   :  { %v5217_v44 = vmax.f32 %v4663_v50, 0.0  ;;  %v5218_v63 = vmax.f32 %v4712_v21, 0.0 }
 0x8e1   :  { %10539 = vmatmul.msk.bf16.gmra.mxu0 %vm17836_vm0, %v14399_v36  ;;  %10547 = vmatmul.msk.bf16.gmra.mxu1 %vm17836_vm0, %v14399_v36  ;;  %v5231_v42 = vmax.f32 %v4568_v41, 0.0  ;;  %v5232_v50 = vmax.f32 %v4617_v26, 0.0 }
 0x8e2   :  { %10555 = vmatmul.msk.bf16.gmra.mxu2 %vm17836_vm0, %v14399_v36  ;;  %10563 = vmatmul.msk.bf16.gmra.mxu3 %vm17836_vm0, %v14399_v36  ;;  %v14911_v22 = vpack.c.bf16 %v5217_v44, %v5201_v1  ;;  %v14913_v11 = vpack.c.bf16 %v5218_v63, %v5202_v33 }
 0x8e4   :  { %18067 = vst [vmem:[#allocation81_spill] sm:$0xff] %v14911_v22 }
 0x8e5   :  { %18068 = vst [vmem:[#allocation82_spill] sm:$0xff] %v14913_v11  ;;  %v4665_v60 = vpop.f32.mrf.mxu2  ;;  %v4714_v45 = vpop.f32.mrf.mxu3 }
 0x8e6   :  { %v4569_v52 = vpop.f32.mrf.mxu0  ;;  %v4618_v58 = vpop.f32.mrf.mxu1  ;;  %v4666_v54 = vadd.f32 %v4665_v60, %v14819_v30  ;;  %v4715_v3 = vadd.f32 %v4714_v45, %v14821_v56 }
 0x8e7   :  { %v4570_v31 = vadd.f32 %v4569_v52, %v14799_v14  ;;  %v4619_v28 = vadd.f32 %v4618_v58, %v14801_v6 }
 0x8e8   :  { %v5233_v41 = vmax.f32 %v4666_v54, 0.0  ;;  %v5234_v26 = vmax.f32 %v4715_v3, 0.0 }
 0x8e9   :  { %v5247_v21 = vmax.f32 %v4570_v31, 0.0  ;;  %v5248_v46 = vmax.f32 %v4619_v28, 0.0 }
 0x8eb   :  { %v14919_v1 = vpack.c.bf16 %v5247_v21, %v5231_v42  ;;  %v14921_v33 = vpack.c.bf16 %v5248_v46, %v5232_v50 }
 0x8ed   :  { %18069 = vst [vmem:[#allocation83_spill] sm:$0xff] %v14919_v1  ;;  %v4667_v44 = vpop.f32.mrf.mxu2  ;;  %v4716_v63 = vpop.f32.mrf.mxu3 }
 0x8ee   :  { %18070 = vst [vmem:[#allocation84_spill] sm:$0xff] %v14921_v33  ;;  %v4668_v11 = vadd.f32 %v4667_v44, %v14819_v30  ;;  %v4717_v52 = vadd.f32 %v4716_v63, %v14821_v56  ;;  %v4572_v22 = vpop.f32.mrf.mxu0  ;;  %v4621_v58 = vpop.f32.mrf.mxu1 }
 0x8ef   :  { %v4573_v45 = vadd.f32 %v4572_v22, %v14799_v14 }
 0x8f0   :  { %v5249_v31 = vmax.f32 %v4668_v11, 0.0  ;;  %v5250_v28 = vmax.f32 %v4717_v52, 0.0  ;;  %v4622_v11 = vadd.f32 %v4621_v58, %v14801_v6 }
 0x8f1   :  { %10540 = vmatmul.msk.bf16.gmra.mxu0 %vm17836_vm0, %v14423_v12  ;;  %10548 = vmatmul.msk.bf16.gmra.mxu1 %vm17836_vm0, %v14423_v12  ;;  %v5263_v63 = vmax.f32 %v4573_v45, 0.0 }
 0x8f2   :  { %10556 = vmatmul.msk.bf16.gmra.mxu2 %vm17836_vm0, %v14423_v12  ;;  %10564 = vmatmul.msk.bf16.gmra.mxu3 %vm17836_vm0, %v14423_v12  ;;  %v14935_v46 = vpack.c.bf16 %v5249_v31, %v5233_v41  ;;  %v14937_v60 = vpack.c.bf16 %v5250_v28, %v5234_v26  ;;  %v5264_v52 = vmax.f32 %v4622_v11, 0.0 }
 0x8f4   :  { %18071 = vst [vmem:[#allocation85_spill] sm:$0xff] %v14935_v46 }
 0x8f5   :  { %18072 = vst [vmem:[#allocation86_spill] sm:$0xff] %v14937_v60  ;;  %v4670_v42 = vpop.f32.mrf.mxu2  ;;  %v4719_v50 = vpop.f32.mrf.mxu3 }
 0x8f6   :  { %v4574_v21 = vpop.f32.mrf.mxu0  ;;  %v4623_v54 = vpop.f32.mrf.mxu1  ;;  %v4671_v22 = vadd.f32 %v4670_v42, %v14819_v30  ;;  %v4720_v58 = vadd.f32 %v4719_v50, %v14821_v56 }
 0x8f7   :  { %v4575_v3 = vadd.f32 %v4574_v21, %v14799_v14  ;;  %v4624_v44 = vadd.f32 %v4623_v54, %v14801_v6 }
 0x8f8   :  { %v5265_v45 = vmax.f32 %v4671_v22, 0.0  ;;  %v5266_v11 = vmax.f32 %v4720_v58, 0.0 }
 0x8f9   :  { %v5279_v33 = vmax.f32 %v4575_v3, 0.0  ;;  %v5280_v1 = vmax.f32 %v4624_v44, 0.0 }
 0x8fb   :  { %v14943_v41 = vpack.c.bf16 %v5279_v33, %v5263_v63  ;;  %v14945_v26 = vpack.c.bf16 %v5280_v1, %v5264_v52 }
 0x8fd   :  { %18073 = vst [vmem:[#allocation87_spill] sm:$0xff] %v14943_v41  ;;  %v4672_v31 = vpop.f32.mrf.mxu2  ;;  %v4721_v28 = vpop.f32.mrf.mxu3 }
 0x8fe   :  { %18074 = vst [vmem:[#allocation88_spill] sm:$0xff] %v14945_v26  ;;  %v4673_v60 = vadd.f32 %v4672_v31, %v14819_v30  ;;  %v4722_v21 = vadd.f32 %v4721_v28, %v14821_v56  ;;  %v4577_v46 = vpop.f32.mrf.mxu0  ;;  %v4626_v54 = vpop.f32.mrf.mxu1 }
 0x8ff   :  { %v4578_v42 = vadd.f32 %v4577_v46, %v14799_v14 }
 0x900   :  { %v5281_v3 = vmax.f32 %v4673_v60, 0.0  ;;  %v5282_v44 = vmax.f32 %v4722_v21, 0.0  ;;  %v4627_v60 = vadd.f32 %v4626_v54, %v14801_v6 }
 0x901   :  { %10541 = vmatmul.msk.bf16.gmra.mxu0 %vm17836_vm0, %v14447_v53  ;;  %10549 = vmatmul.msk.bf16.gmra.mxu1 %vm17836_vm0, %v14447_v53  ;;  %v5295_v28 = vmax.f32 %v4578_v42, 0.0  ;;  %v11418_v42 = vld [vmem:[%s17693_s5 + $0x6c] sm:$0xf0] }
 0x902   :  { %10557 = vmatmul.msk.bf16.gmra.mxu2 %vm17836_vm0, %v14447_v53  ;;  %10565 = vmatmul.msk.bf16.gmra.mxu3 %vm17836_vm0, %v14447_v53  ;;  %v14959_v1 = vpack.c.bf16 %v5281_v3, %v5265_v45  ;;  %v14961_v33 = vpack.c.bf16 %v5282_v44, %v5266_v11  ;;  %v5296_v21 = vmax.f32 %v4627_v60, 0.0  ;;  %v11410_v60 = vld [vmem:[%s17693_s5 + $0x34] sm:$0xf] }
 0x904   :  { %18075 = vst [vmem:[#allocation89_spill] sm:$0xff] %v14959_v1 }
 0x905   :  { %18076 = vst [vmem:[#allocation90_spill] sm:$0xff] %v14961_v33  ;;  %v4675_v50 = vpop.f32.mrf.mxu2  ;;  %v4724_v63 = vpop.f32.mrf.mxu3  ;;  %v10404_v33 = vld [vmem:[%s17693_s5 + $0x78] sm:$0xf0] }
 0x906   :  { %v4579_v52 = vpop.f32.mrf.mxu0  ;;  %v4628_v22 = vpop.f32.mrf.mxu1  ;;  %v4676_v45 = vadd.f32 %v4675_v50, %v14819_v30  ;;  %v4725_v11 = vadd.f32 %v4724_v63, %v14821_v56 }
 0x907   :  { %v4580_v58 = vadd.f32 %v4579_v52, %v14799_v14  ;;  %v4629_v31 = vadd.f32 %v4628_v22, %v14801_v6  ;;  %v10394_v52 = vld [vmem:[%s17693_s5 + $0x30] sm:$0xf] }
 0x908   :  { %v10395_v22 = vor.u32 %v11418_v42, %v10394_v52 }
 0x909   :  { %v5311_v26 = vmax.f32 %v4580_v58, 0.0  ;;  %v5312_v41 = vmax.f32 %v4629_v31, 0.0  ;;  %v10396_v58 = vld [vmem:[%s17693_s5 + $0x70] sm:$0xf0]  ;;  %v10402_v31 = vld [vmem:[%s17693_s5 + $0x38] sm:$0xf] }
 0x90a   :  { %4942 = vmatpush.bf16.msra.mxu0 %v10395_v22  ;;  %v10399_v42 = vor.u32 %v11410_v60, %v10396_v58 }
 0x90b   :  { %v14969_v3 = vpack.c.bf16 %v5311_v26, %v5295_v28  ;;  %v14971_v46 = vpack.c.bf16 %v5312_v41, %v5296_v21  ;;  %v5297_v28 = vmax.f32 %v4676_v45, 0.0  ;;  %v5298_v21 = vmax.f32 %v4725_v11, 0.0 }
 0x90c   :  { %4991 = vmatpush.bf16.msra.mxu1 %v10399_v42 }
 0x90d   :  { %18077 = vst [vmem:[#allocation91_spill] sm:$0xff] %v14969_v3  ;;  %v4677_v54 = vpop.f32.mrf.mxu2  ;;  %v4726_v44 = vpop.f32.mrf.mxu3 }
 0x90e   :  { %18078 = vst [vmem:[#allocation92_spill] sm:$0xff] %v14971_v46  ;;  %v4678_v50 = vadd.f32 %v4677_v54, %v14819_v30  ;;  %v4727_v26 = vadd.f32 %v4726_v44, %v14821_v56  ;;  %v4582_v41 = vpop.f32.mrf.mxu0  ;;  %v4631_v63 = vpop.f32.mrf.mxu1  ;;  %v11419_v46 = vld [vmem:[%s17693_s5 + $0x74] sm:$0xf0]  ;;  %v11411_v54 = vld [vmem:[%s17693_s5 + $0x3c] sm:$0xf] }
 0x90f   :  { %v10403_v3 = vor.u32 %v11419_v46, %v10402_v31  ;;  %v10407_v45 = vor.u32 %v11411_v54, %v10404_v33  ;;  %v4583_v60 = vadd.f32 %v4582_v41, %v14799_v14 }
 0x910   :  { %v5313_v44 = vmax.f32 %v4678_v50, 0.0  ;;  %v5314_v52 = vmax.f32 %v4727_v26, 0.0  ;;  %v4632_v50 = vadd.f32 %v4631_v63, %v14801_v6 }
 0x911   :  { %10542 = vmatmul.msk.bf16.gmra.mxu0 %vm17836_vm0, %v14495_v18  ;;  %10550 = vmatmul.msk.bf16.gmra.mxu1 %vm17836_vm0, %v14495_v18  ;;  %v5327_v1 = vmax.f32 %v4583_v60, 0.0 }
 0x912   :  { %10558 = vmatmul.msk.bf16.gmra.mxu2 %vm17836_vm0, %v14495_v18  ;;  %10566 = vmatmul.msk.bf16.gmra.mxu3 %vm17836_vm0, %v14495_v18  ;;  %v15007_v11 = vpack.c.bf16 %v5313_v44, %v5297_v28  ;;  %v15009_v46 = vpack.c.bf16 %v5314_v52, %v5298_v21  ;;  %v5328_v28 = vmax.f32 %v4632_v50, 0.0 }
 0x913   :  { %5040 = vmatpush.bf16.msra.mxu2 %v10403_v3  ;;  %5089 = vmatpush.bf16.msrb.mxu3 %v10407_v45 }
 0x914   :  { %18079 = vst [vmem:[#allocation93_spill] sm:$0xff] %v15007_v11 }
 0x915   :  { %18080 = vst [vmem:[#allocation94_spill] sm:$0xff] %v15009_v46  ;;  %v4680_v26 = vpop.f32.mrf.mxu2  ;;  %v4729_v22 = vpop.f32.mrf.mxu3 }
 0x916   :  { %v4584_v33 = vpop.f32.mrf.mxu0  ;;  %v4633_v58 = vpop.f32.mrf.mxu1  ;;  %v4681_v41 = vadd.f32 %v4680_v26, %v14819_v30  ;;  %v4730_v63 = vadd.f32 %v4729_v22, %v14821_v56 }
 0x917   :  { %v4585_v31 = vadd.f32 %v4584_v33, %v14799_v14  ;;  %v4634_v54 = vadd.f32 %v4633_v58, %v14801_v6 }
 0x918   :  { %v5329_v60 = vmax.f32 %v4681_v41, 0.0  ;;  %v5330_v50 = vmax.f32 %v4730_v63, 0.0 }
 0x919   :  { %v5343_v44 = vmax.f32 %v4585_v31, 0.0  ;;  %v5344_v21 = vmax.f32 %v4634_v54, 0.0 }
 0x91b   :  { %v15015_v52 = vpack.c.bf16 %v5343_v44, %v5327_v1  ;;  %v15017_v3 = vpack.c.bf16 %v5344_v21, %v5328_v28 }
 0x91d   :  { %18081 = vst [vmem:[#allocation95_spill] sm:$0xff] %v15015_v52  ;;  %v4682_v42 = vpop.f32.mrf.mxu2  ;;  %v4731_v45 = vpop.f32.mrf.mxu3 }
 0x91e   :  { %18082 = vst [vmem:[#allocation96_spill] sm:$0xff] %v15017_v3  ;;  %v4683_v46 = vadd.f32 %v4682_v42, %v14819_v30  ;;  %v4732_v33 = vadd.f32 %v4731_v45, %v14821_v56  ;;  %v4587_v11 = vpop.f32.mrf.mxu0  ;;  %v4636_v58 = vpop.f32.mrf.mxu1 }
 0x91f   :  { %v4588_v22 = vadd.f32 %v4587_v11, %v14799_v14 }
 0x920   :  { %v5345_v31 = vmax.f32 %v4683_v46, 0.0  ;;  %v5346_v54 = vmax.f32 %v4732_v33, 0.0  ;;  %v4637_v46 = vadd.f32 %v4636_v58, %v14801_v6 }
 0x921   :  { %10543 = vmatmul.msk.bf16.gmra.mxu0 %vm17836_vm0, %v14542_v23  ;;  %10551 = vmatmul.msk.bf16.gmra.mxu1 %vm17836_vm0, %v14542_v23  ;;  %v5359_v45 = vmax.f32 %v4588_v22, 0.0 }
 0x922   :  { %10559 = vmatmul.msk.bf16.gmra.mxu2 %vm17836_vm0, %v14542_v23  ;;  %10567 = vmatmul.msk.bf16.gmra.mxu3 %vm17836_vm0, %v14542_v23  ;;  %v15031_v1 = vpack.c.bf16 %v5345_v31, %v5329_v60  ;;  %v15033_v26 = vpack.c.bf16 %v5346_v54, %v5330_v50  ;;  %v5360_v33 = vmax.f32 %v4637_v46, 0.0 }
 0x924   :  { %18083 = vst [vmem:[#allocation97_spill] sm:$0xff] %v15031_v1 }
 0x925   :  { %18084 = vst [vmem:[#allocation98_spill] sm:$0xff] %v15033_v26  ;;  %v4685_v28 = vpop.f32.mrf.mxu2  ;;  %v4734_v44 = vpop.f32.mrf.mxu3 }
 0x926   :  { %v4589_v21 = vpop.f32.mrf.mxu0  ;;  %v4638_v41 = vpop.f32.mrf.mxu1  ;;  %v4686_v11 = vadd.f32 %v4685_v28, %v14819_v30  ;;  %v4735_v58 = vadd.f32 %v4734_v44, %v14821_v56 }
 0x927   :  { %v4590_v63 = vadd.f32 %v4589_v21, %v14799_v14  ;;  %v4639_v42 = vadd.f32 %v4638_v41, %v14801_v6  ;;  %v15050_v6 = vld [vmem:[%s17694_s6 + $0x8] sm:$0xff] }
 0x928   :  { %v5361_v46 = vmax.f32 %v4686_v11, 0.0  ;;  %v15053_v28 = vperm.slane %v15050_v6, 0  ;;  %v15056_v44 = vperm.slane %v15050_v6, 1 }
 0x929   :  { %v5375_v3 = vmax.f32 %v4590_v63, 0.0  ;;  %v5376_v52 = vmax.f32 %v4639_v42, 0.0 }
 0x92b   :  { %v15039_v60 = vpack.c.bf16 %v5375_v3, %v5359_v45  ;;  %v15041_v50 = vpack.c.bf16 %v5376_v52, %v5360_v33  ;;  %v5362_v52 = vmax.f32 %v4735_v58, 0.0 }
 0x92d   :  { %18085 = vst [vmem:[#allocation99_spill] sm:$0xff] %v15039_v60  ;;  %v4687_v31 = vpop.f32.mrf.mxu2  ;;  %v4736_v54 = vpop.f32.mrf.mxu3 }
 0x92e   :  { %18086 = vst [vmem:[#allocation100_spill] sm:$0xff] %v15041_v50  ;;  %v4688_v26 = vadd.f32 %v4687_v31, %v14819_v30  ;;  %v4737_v14 = vadd.f32 %v4736_v54, %v14821_v56  ;;  %v4748_v22 = vpop.f32.mrf.mxu0  ;;  %v4797_v3 = vpop.f32.mrf.mxu1  ;;  %v15075_v54 = vperm.slane %v15050_v6, 2 }
 0x92f   :  { %v4798_v63 = vadd.f32 %v4797_v3, %v15056_v44 }
 0x930   :  { %v5377_v21 = vmax.f32 %v4688_v26, 0.0  ;;  %v5378_v41 = vmax.f32 %v4737_v14, 0.0  ;;  %v4749_v26 = vadd.f32 %v4748_v22, %v15053_v28 }
 0x931   :  { %10568 = vmatmul.msk.bf16.vlgmr.msra.gmra.mxu0 %vm17836_vm0, %v14277_v10  ;;  %10576 = vmatmul.msk.bf16.vlgmr.msra.gmra.mxu1 %vm17836_vm0, %v14277_v10 }
 0x932   :  { %10584 = vmatmul.msk.bf16.vlgmr.msra.gmra.mxu2 %vm17836_vm0, %v14277_v10  ;;  %10592 = vmatmul.msk.bf16.vlgmr.msrb.gmra.mxu3 %vm17836_vm0, %v14277_v10  ;;  %v15066_v56 = vpack.c.bf16 %v5377_v21, %v5361_v46  ;;  %v15068_v30 = vpack.c.bf16 %v5378_v41, %v5362_v52  ;;  %v15078_v10 = vperm.slane %v15050_v6, 3  ;;  %v5139_v14 = vmax.f32 %v4749_v26, 0.0 }
 0x933   :  { %v5140_v46 = vmax.f32 %v4798_v63, 0.0 }
 0x934   :  { %18087 = vst [vmem:[#allocation101_spill] sm:$0xff] %v15066_v56 }
 0x935   :  { %18088 = vst [vmem:[#allocation102_spill] sm:$0xff] %v15068_v30  ;;  %v4846_v42 = vpop.f32.mrf.mxu2  ;;  %v4895_v45 = vpop.f32.mrf.mxu3 }
 0x936   :  { %v4750_v33 = vpop.f32.mrf.mxu0  ;;  %v4799_v11 = vpop.f32.mrf.mxu1  ;;  %v4847_v41 = vadd.f32 %v4846_v42, %v15075_v54 }
 0x937   :  { %v4751_v58 = vadd.f32 %v4750_v33, %v15053_v28  ;;  %v4800_v31 = vadd.f32 %v4799_v11, %v15056_v44  ;;  %v4896_v33 = vadd.f32 %v4895_v45, %v15078_v10 }
 0x938   :  { %v5141_v26 = vmax.f32 %v4847_v41, 0.0 }
 0x939   :  { %v5155_v52 = vmax.f32 %v4751_v58, 0.0  ;;  %v5156_v22 = vmax.f32 %v4800_v31, 0.0  ;;  %v5142_v63 = vmax.f32 %v4896_v33, 0.0 }
 0x93b   :  { %v15080_v21 = vpack.c.bf16 %v5155_v52, %v5139_v14  ;;  %v15082_v3 = vpack.c.bf16 %v5156_v22, %v5140_v46 }
 0x93d   :  { %18089 = vst [vmem:[#allocation103_spill] sm:$0xff] %v15082_v3  ;;  %v4848_v30 = vpop.f32.mrf.mxu2  ;;  %v4897_v11 = vpop.f32.mrf.mxu3 }
 0x93e   :  { %v4849_v56 = vadd.f32 %v4848_v30, %v15075_v54  ;;  %v4898_v50 = vadd.f32 %v4897_v11, %v15078_v10  ;;  %v4753_v60 = vpop.f32.mrf.mxu0  ;;  %v4802_v1 = vpop.f32.mrf.mxu1 }
 0x93f   :  { %v4754_v30 = vadd.f32 %v4753_v60, %v15053_v28 }
 0x940   :  { %v5157_v58 = vmax.f32 %v4849_v56, 0.0  ;;  %v5158_v31 = vmax.f32 %v4898_v50, 0.0  ;;  %v4803_v50 = vadd.f32 %v4802_v1, %v15056_v44 }
 0x941   :  { %10569 = vmatmul.msk.bf16.gmra.mxu0 %vm17836_vm0, %v14316_v48  ;;  %10577 = vmatmul.msk.bf16.gmra.mxu1 %vm17836_vm0, %v14316_v48  ;;  %v5171_v33 = vmax.f32 %v4754_v30, 0.0 }
 0x942   :  { %v15092_v42 = vpack.c.bf16 %v5157_v58, %v5141_v26  ;;  %v15094_v45 = vpack.c.bf16 %v5158_v31, %v5142_v63  ;;  %10585 = vmatmul.msk.bf16.gmra.mxu2 %vm17836_vm0, %v14316_v48  ;;  %10593 = vmatmul.msk.bf16.gmra.mxu3 %vm17836_vm0, %v14316_v48  ;;  %v5172_v11 = vmax.f32 %v4803_v50, 0.0 }
 0x944   :  { %18090 = vst [vmem:[#allocation104_spill] sm:$0xff] %v15092_v42 }
 0x945   :  { %18091 = vst [vmem:[#allocation105_spill] sm:$0xff] %v15094_v45  ;;  %v4851_v56 = vpop.f32.mrf.mxu2  ;;  %v4900_v14 = vpop.f32.mrf.mxu3 }
 0x946   :  { %v4755_v46 = vpop.f32.mrf.mxu0  ;;  %v4804_v52 = vpop.f32.mrf.mxu1  ;;  %v4852_v48 = vadd.f32 %v4851_v56, %v15075_v54  ;;  %v4901_v1 = vadd.f32 %v4900_v14, %v15078_v10 }
 0x947   :  { %v4756_v22 = vadd.f32 %v4755_v46, %v15053_v28  ;;  %v4805_v41 = vadd.f32 %v4804_v52, %v15056_v44 }
 0x948   :  { %v5173_v30 = vmax.f32 %v4852_v48, 0.0  ;;  %v5174_v50 = vmax.f32 %v4901_v1, 0.0 }
 0x949   :  { %v5187_v26 = vmax.f32 %v4756_v22, 0.0  ;;  %v5188_v63 = vmax.f32 %v4805_v41, 0.0 }
 0x94b   :  { %v15104_v58 = vpack.c.bf16 %v5187_v26, %v5171_v33  ;;  %v15106_v31 = vpack.c.bf16 %v5188_v63, %v5172_v11 }
 0x94d   :  { %18092 = vst [vmem:[#allocation106_spill] sm:$0xff] %v15106_v31  ;;  %v4853_v60 = vpop.f32.mrf.mxu2  ;;  %v4902_v45 = vpop.f32.mrf.mxu3 }
 0x94e   :  { %v4854_v42 = vadd.f32 %v4853_v60, %v15075_v54  ;;  %v4903_v46 = vadd.f32 %v4902_v45, %v15078_v10  ;;  %v4758_v3 = vpop.f32.mrf.mxu0  ;;  %v4807_v52 = vpop.f32.mrf.mxu1  ;;  %v11459_v45 = vld [vmem:[%s17695_s7 + $0xb8] sm:$0xff] }
 0x94f   :  { %6638 = vmatpush.bf16.msrb.mxu2 %v11459_v45  ;;  %v4759_v14 = vadd.f32 %v4758_v3, %v15053_v28  ;;  %v4808_v33 = vadd.f32 %v4807_v52, %v15056_v44  ;;  %v11443_v60 = vld [vmem:[%s17695_s7 + $0x38] sm:$0xff] }
 0x950   :  { %v5189_v22 = vmax.f32 %v4854_v42, 0.0  ;;  %v5190_v41 = vmax.f32 %v4903_v46, 0.0  ;;  %v11467_v46 = vld [vmem:[%s17695_s7 + $0xf8] sm:$0xff]  ;;  %6540 = vmatpush.bf16.msrb.mxu0 %v11443_v60 }
 0x951   :  { %10570 = vmatmul.msk.bf16.gmra.mxu0 %vm17836_vm0, %v14354_v9  ;;  %10578 = vmatmul.msk.bf16.gmra.mxu1 %vm17836_vm0, %v14354_v9  ;;  %v5204_v3 = vmax.f32 %v4808_v33, 0.0 }
 0x952   :  { %10586 = vmatmul.msk.bf16.gmra.mxu2 %vm17836_vm0, %v14354_v9  ;;  %10594 = vmatmul.msk.bf16.gmra.mxu3 %vm17836_vm0, %v14354_v9  ;;  %v15123_v56 = vpack.c.bf16 %v5189_v22, %v5173_v30  ;;  %v15125_v42 = vpack.c.bf16 %v5190_v41, %v5174_v50  ;;  %v5203_v30 = vmax.f32 %v4759_v14, 0.0  ;;  %v11451_v22 = vld [vmem:[%s17695_s7 + $0x78] sm:$0xff] }
 0x953   :  { %6687 = vmatpush.bf16.msra.mxu3 %v11467_v46  ;;  %6589 = vmatpush.bf16.msrb.mxu1 %v11451_v22 }
 0x954   :  { %18093 = vst [vmem:[#allocation107_spill] sm:$0xff] %v15123_v56 }
 0x955   :  { %18094 = vst [vmem:[#allocation108_spill] sm:$0xff] %v15125_v42  ;;  %v4856_v11 = vpop.f32.mrf.mxu2  ;;  %v4905_v26 = vpop.f32.mrf.mxu3 }
 0x956   :  { %v4760_v63 = vpop.f32.mrf.mxu0  ;;  %v4809_v48 = vpop.f32.mrf.mxu1 }
 0x957   :  { %v4761_v1 = vadd.f32 %v4760_v63, %v15053_v28  ;;  %v4810_v9 = vadd.f32 %v4809_v48, %v15056_v44  ;;  %v4857_v63 = vadd.f32 %v4856_v11, %v15075_v54  ;;  %v4906_v48 = vadd.f32 %v4905_v26, %v15078_v10 }
 0x959   :  { %v5219_v50 = vmax.f32 %v4761_v1, 0.0  ;;  %v5220_v52 = vmax.f32 %v4810_v9, 0.0  ;;  %v5205_v31 = vmax.f32 %v4857_v63, 0.0  ;;  %v5206_v60 = vmax.f32 %v4906_v48, 0.0 }
 0x95b   :  { %v15140_v41 = vpack.c.bf16 %v5219_v50, %v5203_v30  ;;  %v15142_v45 = vpack.c.bf16 %v5220_v52, %v5204_v3 }
 0x95d   :  { %18095 = vst [vmem:[#allocation109_spill] sm:$0xff] %v15142_v45  ;;  %v4858_v42 = vpop.f32.mrf.mxu2  ;;  %v4907_v14 = vpop.f32.mrf.mxu3 }
 0x95e   :  { %v4859_v33 = vadd.f32 %v4858_v42, %v15075_v54  ;;  %v4908_v1 = vadd.f32 %v4907_v14, %v15078_v10  ;;  %v4763_v9 = vpop.f32.mrf.mxu0  ;;  %v4812_v56 = vpop.f32.mrf.mxu1  ;;  %v11458_v42 = vld [vmem:[%s17695_s7 + $0xb0] sm:$0xff] }
 0x95f   :  { %6639 = vmatpush.bf16.msrb.mxu2 %v11458_v42  ;;  %v4764_v30 = vadd.f32 %v4763_v9, %v15053_v28  ;;  %v4813_v3 = vadd.f32 %v4812_v56, %v15056_v44 }
 0x960   :  { %v5221_v46 = vmax.f32 %v4859_v33, 0.0  ;;  %v5222_v22 = vmax.f32 %v4908_v1, 0.0  ;;  %v11466_v33 = vld [vmem:[%s17695_s7 + $0xf0] sm:$0xff] }
 0x961   :  { %10571 = vmatmul.msk.bf16.gmra.mxu0 %vm17836_vm0, %v14399_v36  ;;  %10579 = vmatmul.msk.bf16.gmra.mxu1 %vm17836_vm0, %v14399_v36  ;;  %v5235_v1 = vmax.f32 %v4764_v30, 0.0  ;;  %v5236_v9 = vmax.f32 %v4813_v3, 0.0 }
 0x962   :  { %10587 = vmatmul.msk.bf16.gmra.mxu2 %vm17836_vm0, %v14399_v36  ;;  %10595 = vmatmul.msk.bf16.gmra.mxu3 %vm17836_vm0, %v14399_v36  ;;  %v15159_v11 = vpack.c.bf16 %v5221_v46, %v5205_v31  ;;  %v15161_v26 = vpack.c.bf16 %v5222_v22, %v5206_v60  ;;  %v11442_v31 = vld [vmem:[%s17695_s7 + $0x30] sm:$0xff] }
 0x963   :  { %v11450_v46 = vld [vmem:[%s17695_s7 + $0x70] sm:$0xff]  ;;  %6541 = vmatpush.bf16.msrb.mxu0 %v11442_v31  ;;  %6688 = vmatpush.bf16.msra.mxu3 %v11466_v33 }
 0x964   :  { %18096 = vst [vmem:[#allocation110_spill] sm:$0xff] %v15159_v11  ;;  %6590 = vmatpush.bf16.msrb.mxu1 %v11450_v46 }
 0x965   :  { %18097 = vst [vmem:[#allocation111_spill] sm:$0xff] %v15161_v26  ;;  %v4861_v50 = vpop.f32.mrf.mxu2  ;;  %v4910_v52 = vpop.f32.mrf.mxu3 }
 0x966   :  { %v4765_v63 = vpop.f32.mrf.mxu0  ;;  %v4814_v48 = vpop.f32.mrf.mxu1 }
 0x967   :  { %v4766_v14 = vadd.f32 %v4765_v63, %v15053_v28  ;;  %v4815_v36 = vadd.f32 %v4814_v48, %v15056_v44  ;;  %v4862_v63 = vadd.f32 %v4861_v50, %v15075_v54  ;;  %v4911_v48 = vadd.f32 %v4910_v52, %v15078_v10 }
 0x969   :  { %v5251_v60 = vmax.f32 %v4766_v14, 0.0  ;;  %v5252_v56 = vmax.f32 %v4815_v36, 0.0  ;;  %v5237_v45 = vmax.f32 %v4862_v63, 0.0  ;;  %v5238_v31 = vmax.f32 %v4911_v48, 0.0 }
 0x96b   :  { %v15176_v22 = vpack.c.bf16 %v5251_v60, %v5235_v1  ;;  %v15178_v42 = vpack.c.bf16 %v5252_v56, %v5236_v9 }
 0x96d   :  { %v4863_v26 = vpop.f32.mrf.mxu2  ;;  %v4912_v30 = vpop.f32.mrf.mxu3 }
 0x96e   :  { %v4864_v3 = vadd.f32 %v4863_v26, %v15075_v54  ;;  %v4913_v14 = vadd.f32 %v4912_v30, %v15078_v10  ;;  %v4768_v36 = vpop.f32.mrf.mxu0  ;;  %v4817_v11 = vpop.f32.mrf.mxu1  ;;  %v11457_v26 = vld [vmem:[%s17695_s7 + $0xa8] sm:$0xff] }
 0x96f   :  { %6640 = vmatpush.bf16.msrb.mxu2 %v11457_v26  ;;  %v4769_v1 = vadd.f32 %v4768_v36, %v15053_v28  ;;  %v4818_v9 = vadd.f32 %v4817_v11, %v15056_v44 }
 0x970   :  { %v5253_v33 = vmax.f32 %v4864_v3, 0.0  ;;  %v5254_v46 = vmax.f32 %v4913_v14, 0.0  ;;  %v11465_v3 = vld [vmem:[%s17695_s7 + $0xe8] sm:$0xff] }
 0x971   :  { %10572 = vmatmul.msk.bf16.gmra.mxu0 %vm17836_vm0, %v14423_v12  ;;  %10580 = vmatmul.msk.bf16.gmra.mxu1 %vm17836_vm0, %v14423_v12  ;;  %v5267_v14 = vmax.f32 %v4769_v1, 0.0  ;;  %v5268_v36 = vmax.f32 %v4818_v9, 0.0 }
 0x972   :  { %10588 = vmatmul.msk.bf16.gmra.mxu2 %vm17836_vm0, %v14423_v12  ;;  %10596 = vmatmul.msk.bf16.gmra.mxu3 %vm17836_vm0, %v14423_v12  ;;  %v15195_v50 = vpack.c.bf16 %v5253_v33, %v5237_v45  ;;  %v15197_v52 = vpack.c.bf16 %v5254_v46, %v5238_v31  ;;  %v11441_v45 = vld [vmem:[%s17695_s7 + $0x28] sm:$0xff] }
 0x973   :  { %v11449_v33 = vld [vmem:[%s17695_s7 + $0x68] sm:$0xff]  ;;  %6542 = vmatpush.bf16.msrb.mxu0 %v11441_v45  ;;  %6689 = vmatpush.bf16.msra.mxu3 %v11465_v3  ;;  %v11440_v45 = vld [vmem:[%s17695_s7 + $0x20] sm:$0xff] }
 0x974   :  { %18098 = vst [vmem:[#allocation112_spill] sm:$0xff] %v15195_v50  ;;  %6591 = vmatpush.bf16.msrb.mxu1 %v11449_v33  ;;  %v11448_v3 = vld [vmem:[%s17695_s7 + $0x60] sm:$0xff]  ;;  %v11447_v33 = vld [vmem:[%s17695_s7 + $0x58] sm:$0xff] }
 0x975   :  { %18099 = vst [vmem:[#allocation113_spill] sm:$0xff] %v15197_v52  ;;  %v4866_v60 = vpop.f32.mrf.mxu2  ;;  %v4915_v56 = vpop.f32.mrf.mxu3 }
 0x976   :  { %v4770_v63 = vpop.f32.mrf.mxu0  ;;  %v4819_v48 = vpop.f32.mrf.mxu1 }
 0x977   :  { %v4771_v30 = vadd.f32 %v4770_v63, %v15053_v28  ;;  %v4820_v12 = vadd.f32 %v4819_v48, %v15056_v44  ;;  %v4867_v63 = vadd.f32 %v4866_v60, %v15075_v54  ;;  %v4916_v48 = vadd.f32 %v4915_v56, %v15078_v10  ;;  %v11456_v60 = vld [vmem:[%s17695_s7 + $0xa0] sm:$0xff]  ;;  %6543 = vmatpush.bf16.msrb.mxu0 %v11440_v45 }
 0x978   :  { %6592 = vmatpush.bf16.msrb.mxu1 %v11448_v3  ;;  %6641 = vmatpush.bf16.msrb.mxu2 %v11456_v60  ;;  %v11438_v60 = vld [vmem:[%s17695_s7 + $0x10] sm:$0xff] }
 0x979   :  { %v5283_v31 = vmax.f32 %v4771_v30, 0.0  ;;  %v5284_v11 = vmax.f32 %v4820_v12, 0.0  ;;  %v5269_v56 = vmax.f32 %v4867_v63, 0.0 }
 0x97b   :  { %v15212_v46 = vpack.c.bf16 %v5283_v31, %v5267_v14  ;;  %v15214_v26 = vpack.c.bf16 %v5284_v11, %v5268_v36  ;;  %v5270_v14 = vmax.f32 %v4916_v48, 0.0  ;;  %v11439_v11 = vld [vmem:[%s17695_s7 + $0x18] sm:$0xff] }
 0x97c   :  { %6544 = vmatpush.bf16.msrb.mxu0 %v11439_v11  ;;  %6593 = vmatpush.bf16.msrb.mxu1 %v11447_v33 }
 0x97d   :  { %18100 = vst [vmem:[#allocation114_spill] sm:$0xff] %v15212_v46  ;;  %v4868_v52 = vpop.f32.mrf.mxu2  ;;  %v4917_v1 = vpop.f32.mrf.mxu3 }
 0x97e   :  { %18101 = vst [vmem:[#allocation115_spill] sm:$0xff] %v15214_v26  ;;  %v4869_v9 = vadd.f32 %v4868_v52, %v15075_v54  ;;  %v4918_v30 = vadd.f32 %v4917_v1, %v15078_v10  ;;  %v4773_v12 = vpop.f32.mrf.mxu0  ;;  %v4822_v50 = vpop.f32.mrf.mxu1  ;;  %v11464_v52 = vld [vmem:[%s17695_s7 + $0xe0] sm:$0xff]  ;;  %v11455_v1 = vld [vmem:[%s17695_s7 + $0x98] sm:$0xff] }
 0x97f   :  { %6690 = vmatpush.bf16.msra.mxu3 %v11464_v52  ;;  %v11446_v52 = vld [vmem:[%s17695_s7 + $0x50] sm:$0xff]  ;;  %6642 = vmatpush.bf16.msrb.mxu2 %v11455_v1  ;;  %v11445_v1 = vld [vmem:[%s17695_s7 + $0x48] sm:$0xff] }
 0x980   :  { %v5285_v36 = vmax.f32 %v4869_v9, 0.0  ;;  %v5286_v31 = vmax.f32 %v4918_v30, 0.0  ;;  %v4774_v9 = vadd.f32 %v4773_v12, %v15053_v28  ;;  %v4823_v30 = vadd.f32 %v4822_v50, %v15056_v44  ;;  %v11454_v50 = vld [vmem:[%s17695_s7 + $0x90] sm:$0xff]  ;;  %6545 = vmatpush.bf16.msrb.mxu0 %v11438_v60  ;;  %6594 = vmatpush.bf16.msrb.mxu1 %v11446_v52 }
 0x981   :  { %10573 = vmatmul.msk.bf16.gmra.mxu0 %vm17836_vm0, %v14447_v53  ;;  %10581 = vmatmul.msk.bf16.gmra.mxu1 %vm17836_vm0, %v14447_v53  ;;  %v11462_v12 = vld [vmem:[%s17695_s7 + $0xd0] sm:$0xff] }
 0x982   :  { %10589 = vmatmul.msk.bf16.gmra.mxu2 %vm17836_vm0, %v14447_v53  ;;  %10597 = vmatmul.msk.bf16.gmra.mxu3 %vm17836_vm0, %v14447_v53  ;;  %v15246_v63 = vpack.c.bf16 %v5285_v36, %v5269_v56  ;;  %v15248_v48 = vpack.c.bf16 %v5286_v31, %v5270_v14  ;;  %v11463_v53 = vld [vmem:[%s17695_s7 + $0xd8] sm:$0xff]  ;;  %v5299_v11 = vmax.f32 %v4774_v9, 0.0  ;;  %v5300_v33 = vmax.f32 %v4823_v30, 0.0  ;;  %v11461_v9 = vld [vmem:[%s17695_s7 + $0xc8] sm:$0xff] }
 0x983   :  { %6691 = vmatpush.bf16.msra.mxu3 %v11463_v53  ;;  %6643 = vmatpush.bf16.msrb.mxu2 %v11454_v50  ;;  %v11453_v53 = vld [vmem:[%s17695_s7 + $0x88] sm:$0xff] }
 0x984   :  { %18102 = vst [vmem:[#allocation116_spill] sm:$0xff] %v15246_v63  ;;  %6595 = vmatpush.bf16.msrb.mxu1 %v11445_v1 }
 0x985   :  { %18103 = vst [vmem:[#allocation117_spill] sm:$0xff] %v15248_v48  ;;  %v4871_v45 = vpop.f32.mrf.mxu2  ;;  %v4920_v3 = vpop.f32.mrf.mxu3 }
 0x986   :  { %v4775_v56 = vpop.f32.mrf.mxu0  ;;  %v4824_v14 = vpop.f32.mrf.mxu1  ;;  %v4872_v60 = vadd.f32 %v4871_v45, %v15075_v54  ;;  %v4921_v52 = vadd.f32 %v4920_v3, %v15078_v10  ;;  %v11452_v45 = vld [vmem:[%s17695_s7 + $0x80] sm:$0xff] }
 0x987   :  { %v4776_v36 = vadd.f32 %v4775_v56, %v15053_v28  ;;  %v4825_v31 = vadd.f32 %v4824_v14, %v15056_v44  ;;  %v11437_v56 = vld [vmem:[%s17695_s7 + $0x8] sm:$0xff]  ;;  %6692 = vmatpush.bf16.msra.mxu3 %v11462_v12  ;;  %6644 = vmatpush.bf16.msrb.mxu2 %v11453_v53  ;;  %v11460_v3 = vld [vmem:[%s17695_s7 + $0xc0] sm:$0xff] }
 0x988   :  { %6546 = vmatpush.bf16.msrb.mxu0 %v11437_v56 }
 0x989   :  { %v5315_v48 = vmax.f32 %v4776_v36, 0.0  ;;  %v5316_v63 = vmax.f32 %v4825_v31, 0.0 }
 0x98b   :  { %v15284_v30 = vpack.c.bf16 %v5315_v48, %v5299_v11  ;;  %v15286_v14 = vpack.c.bf16 %v5316_v63, %v5300_v33  ;;  %v11436_v48 = vld [vmem:[%s17695_s7] sm:$0xff]  ;;  %6693 = vmatpush.bf16.msra.mxu3 %v11461_v9  ;;  %v5301_v11 = vmax.f32 %v4872_v60, 0.0  ;;  %v5302_v33 = vmax.f32 %v4921_v52, 0.0  ;;  %6645 = vmatpush.bf16.msrb.mxu2 %v11452_v45 }
 0x98c   :  { %v11444_v63 = vld [vmem:[%s17695_s7 + $0x40] sm:$0xff]  ;;  %6547 = vmatpush.bf16.msrb.mxu0 %v11436_v48 }
 0x98d   :  { %18104 = vst [vmem:[#allocation118_spill] sm:$0xff] %v15286_v14  ;;  %v4873_v36 = vpop.f32.mrf.mxu2  ;;  %v4922_v31 = vpop.f32.mrf.mxu3  ;;  %6596 = vmatpush.bf16.msrb.mxu1 %v11444_v63 }
 0x98e   :  { %v4874_v50 = vadd.f32 %v4873_v36, %v15075_v54  ;;  %v4923_v12 = vadd.f32 %v4922_v31, %v15078_v10  ;;  %v4778_v26 = vpop.f32.mrf.mxu0  ;;  %v4827_v46 = vpop.f32.mrf.mxu1 }
 0x98f   :  { %6694 = vmatpush.bf16.msra.mxu3 %v11460_v3  ;;  %v4779_v60 = vadd.f32 %v4778_v26, %v15053_v28  ;;  %v4828_v52 = vadd.f32 %v4827_v46, %v15056_v44 }
 0x990   :  { %v5317_v56 = vmax.f32 %v4874_v50, 0.0  ;;  %v5318_v1 = vmax.f32 %v4923_v12, 0.0 }
 0x991   :  { %10574 = vmatmul.msk.bf16.gmra.mxu0 %vm17836_vm0, %v14495_v18  ;;  %10582 = vmatmul.msk.bf16.gmra.mxu1 %vm17836_vm0, %v14495_v18  ;;  %v5331_v14 = vmax.f32 %v4779_v60, 0.0 }
 0x992   :  { %10590 = vmatmul.msk.bf16.gmra.mxu2 %vm17836_vm0, %v14495_v18  ;;  %10598 = vmatmul.msk.bf16.gmra.mxu3 %vm17836_vm0, %v14495_v18  ;;  %v15312_v53 = vpack.c.bf16 %v5317_v56, %v5301_v11  ;;  %v15314_v9 = vpack.c.bf16 %v5318_v1, %v5302_v33  ;;  %v5332_v18 = vmax.f32 %v4828_v52, 0.0 }
 0x994   :  { %18105 = vst [vmem:[#allocation119_spill] sm:$0xff] %v15312_v53 }
 0x995   :  { %18106 = vst [vmem:[#allocation120_spill] sm:$0xff] %v15314_v9  ;;  %v4876_v36 = vpop.f32.mrf.mxu2  ;;  %v4925_v31 = vpop.f32.mrf.mxu3 }
 0x996   :  { %v4780_v50 = vpop.f32.mrf.mxu0  ;;  %v4829_v12 = vpop.f32.mrf.mxu1  ;;  %v4877_v26 = vadd.f32 %v4876_v36, %v15075_v54  ;;  %v4926_v46 = vadd.f32 %v4925_v31, %v15078_v10 }
 0x997   :  { %v4781_v48 = vadd.f32 %v4780_v50, %v15053_v28  ;;  %v4830_v63 = vadd.f32 %v4829_v12, %v15056_v44 }
 0x998   :  { %v5333_v60 = vmax.f32 %v4877_v26, 0.0  ;;  %v5334_v52 = vmax.f32 %v4926_v46, 0.0  ;;  %v4408_v26 = vadd.f32 %v14562_v61, %v14781_v7  ;;  %v4455_v61 = vadd.f32 %v14556_v43, %v14787_v27 }
 0x999   :  { %v5347_v11 = vmax.f32 %v4781_v48, 0.0  ;;  %v5348_v56 = vmax.f32 %v4830_v63, 0.0 }
 0x99b   :  { %v15320_v33 = vpack.c.bf16 %v5347_v11, %v5331_v14  ;;  %v15322_v45 = vpack.c.bf16 %v5348_v56, %v5332_v18  ;;  %v4359_v56 = vadd.f32 %v14560_v17, %v14779_v35  ;;  %v4406_v17 = vadd.f32 %v14546_v51, %v14781_v7 }
 0x99d   :  { %18107 = vst [vmem:[#allocation121_spill] sm:$0xff] %v15322_v45  ;;  %v4878_v3 = vpop.f32.mrf.mxu2  ;;  %v4927_v1 = vpop.f32.mrf.mxu3  ;;  %v5133_v45 = vmax.f32 %v4455_v61, 0.0 }
 0x99e   :  { %v4879_v9 = vadd.f32 %v4878_v3, %v15075_v54  ;;  %v4928_v50 = vadd.f32 %v4927_v1, %v15078_v10  ;;  %v4783_v53 = vpop.f32.mrf.mxu0  ;;  %v4832_v12 = vpop.f32.mrf.mxu1  ;;  %v4506_v1 = vadd.f32 %v14566_v34, %v14789_v29 }
 0x99f   :  { %v4784_v31 = vadd.f32 %v4783_v53, %v15053_v28 }
 0x9a0   :  { %v5349_v48 = vmax.f32 %v4879_v9, 0.0  ;;  %v5350_v63 = vmax.f32 %v4928_v50, 0.0  ;;  %v4833_v9 = vadd.f32 %v4832_v12, %v15056_v44  ;;  %v4357_v12 = vadd.f32 %v14544_v19, %v14779_v35 }
 0x9a1   :  { %10575 = vmatmul.msk.bf16.gmra.mxu0 %vm17836_vm0, %v14542_v23  ;;  %10583 = vmatmul.msk.bf16.gmra.mxu1 %vm17836_vm0, %v14542_v23 }
 0x9a2   :  { %10591 = vmatmul.msk.bf16.gmra.mxu2 %vm17836_vm0, %v14542_v23  ;;  %10599 = vmatmul.msk.bf16.gmra.mxu3 %vm17836_vm0, %v14542_v23  ;;  %v15336_v14 = vpack.c.bf16 %v5349_v48, %v5333_v60  ;;  %v15338_v36 = vpack.c.bf16 %v5350_v63, %v5334_v52  ;;  %v4457_v23 = vadd.f32 %v14564_v8, %v14787_v27  ;;  %v5363_v8 = vmax.f32 %v4784_v31, 0.0 }
 0x9a3   :  { %v4504_v60 = vadd.f32 %v14558_v16, %v14789_v29  ;;  %v5364_v52 = vmax.f32 %v4833_v9, 0.0  ;;  %v5147_v63 = vmax.f32 %v4359_v56, 0.0  ;;  %v5131_v43 = vmax.f32 %v4357_v12, 0.0 }
 0x9a4   :  { %18108 = vst [vmem:[#allocation122_spill] sm:$0xff] %v15336_v14  ;;  %v5132_v14 = vmax.f32 %v4406_v17, 0.0  ;;  %v15369_v12 = vperm.slane %v15050_v6, 4  ;;  %v15372_v17 = vperm.slane %v15050_v6, 5 }
 0x9a5   :  { %18109 = vst [vmem:[#allocation123_spill] sm:$0xff] %v15338_v36  ;;  %v4881_v18 = vpop.f32.mrf.mxu2  ;;  %v4930_v11 = vpop.f32.mrf.mxu3  ;;  %v5134_v16 = vmax.f32 %v4504_v60, 0.0  ;;  %v4362_v60 = vadd.f32 %v14572_v32, %v14779_v35 }
 0x9a6   :  { %v4785_v46 = vpop.f32.mrf.mxu0  ;;  %v4834_v3 = vpop.f32.mrf.mxu1  ;;  %v4882_v51 = vadd.f32 %v4881_v18, %v15075_v54  ;;  %v4931_v36 = vadd.f32 %v4930_v11, %v15078_v10 }
 0x9a7   :  { %v4786_v53 = vadd.f32 %v4785_v46, %v15053_v28  ;;  %v4835_v50 = vadd.f32 %v4834_v3, %v15056_v44  ;;  %v5148_v28 = vmax.f32 %v4408_v26, 0.0  ;;  %v5149_v46 = vmax.f32 %v4457_v23, 0.0 }
 0x9a8   :  { %v5150_v44 = vmax.f32 %v4506_v1, 0.0  ;;  %v5387_v1 = vpack.c.bf16 %v5147_v63, %v5131_v43  ;;  %v5366_v18 = vmax.f32 %v4931_v36, 0.0  ;;  %v4411_v63 = vadd.f32 %v14574_v55, %v14781_v7 }
 0x9a9   :  { %v5379_v48 = vmax.f32 %v4786_v53, 0.0  ;;  %v5380_v34 = vmax.f32 %v4835_v50, 0.0  ;;  %v5388_v50 = vpack.c.bf16 %v5148_v28, %v5132_v14  ;;  %v4364_v28 = vadd.f32 %v14584_v0, %v14779_v35 }
 0x9aa   :  { %v4462_v43 = vadd.f32 %v14596_v4, %v14787_v27  ;;  %v4460_v55 = vadd.f32 %v14580_v20, %v14787_v27  ;;  %v4509_v0 = vadd.f32 %v14582_v24, %v14789_v29 }
 0x9ab   :  { %v15360_v3 = vpack.c.bf16 %v5379_v48, %v5363_v8  ;;  %v15362_v19 = vpack.c.bf16 %v5380_v34, %v5364_v52  ;;  %v5389_v8 = vpack.c.bf16 %v5149_v46, %v5133_v45  ;;  %v5390_v52 = vpack.c.bf16 %v5150_v44, %v5134_v16 }
 0x9ac   :  { %v5365_v48 = vmax.f32 %v4882_v51, 0.0  ;;  %v4413_v46 = vadd.f32 %v14586_v15, %v14781_v7  ;;  %v4511_v16 = vadd.f32 %v14598_v39, %v14789_v29  ;;  %v15399_v15 = vperm.slane %v15050_v6, 6 }
 0x9ad   :  { %v4883_v31 = vpop.f32.mrf.mxu2  ;;  %v4932_v9 = vpop.f32.mrf.mxu3 }
 0x9ae   :  { %v4884_v53 = vadd.f32 %v4883_v31, %v15075_v54  ;;  %v4933_v56 = vadd.f32 %v4932_v9, %v15078_v10  ;;  %v4944_v26 = vpop.f32.mrf.mxu0  ;;  %v4993_v23 = vpop.f32.mrf.mxu1  ;;  %v15402_v9 = vperm.slane %v15050_v6, 7  ;;  %v5165_v6 = vmax.f32 %v4460_v55, 0.0 }
 0x9af   :  { %v4945_v45 = vadd.f32 %v4944_v26, %v15369_v12  ;;  %v4994_v14 = vadd.f32 %v4993_v23, %v15372_v17  ;;  %v5179_v26 = vmax.f32 %v4364_v28, 0.0  ;;  %v5180_v23 = vmax.f32 %v4413_v46, 0.0 }
 0x9b0   :  { %v5381_v34 = vmax.f32 %v4884_v53, 0.0  ;;  %v5382_v11 = vmax.f32 %v4933_v56, 0.0 }
 0x9b1   :  { %6548 = vmatmul.bf16.vlgmr.msrb.gmra.mxu0 %v5387_v1  ;;  %6597 = vmatmul.bf16.vlgmr.msrb.gmra.mxu1 %v5388_v50  ;;  %v5143_v4 = vmax.f32 %v4945_v45, 0.0  ;;  %v5144_v53 = vmax.f32 %v4994_v14, 0.0  ;;  %v5181_v1 = vmax.f32 %v4462_v43, 0.0  ;;  %v5182_v50 = vmax.f32 %v4511_v16, 0.0 }
 0x9b2   :  { %6646 = vmatmul.bf16.vlgmr.msrb.gmra.mxu2 %v5389_v8  ;;  %6695 = vmatmul.bf16.vlgmr.msra.gmra.mxu3 %v5390_v52  ;;  %v15374_v54 = vpack.c.bf16 %v5381_v34, %v5365_v48  ;;  %v15376_v10 = vpack.c.bf16 %v5382_v11, %v5366_v18  ;;  %v5163_v48 = vmax.f32 %v4362_v60, 0.0  ;;  %v5164_v18 = vmax.f32 %v4411_v63, 0.0 }
 0x9b3   :  { %v5166_v34 = vmax.f32 %v4509_v0, 0.0  ;;  %v5405_v16 = vpack.c.bf16 %v5181_v1, %v5165_v6  ;;  %v4514_v6 = vadd.f32 %v14606_v57, %v14789_v29 }
 0x9b4   :  { %v5404_v43 = vpack.c.bf16 %v5180_v23, %v5164_v18  ;;  %v4367_v18 = vadd.f32 %v14600_v47, %v14779_v35 }
 0x9b5   :  { %v5042_v36 = vpop.f32.mrf.mxu2  ;;  %v5091_v61 = vpop.f32.mrf.mxu3  ;;  %v5198_v57 = vmax.f32 %v4514_v6, 0.0 }
 0x9b6   :  { %v4946_v44 = vpop.f32.mrf.mxu0  ;;  %v4995_v51 = vpop.f32.mrf.mxu1  ;;  %v5043_v24 = vadd.f32 %v5042_v36, %v15399_v15  ;;  %v5092_v52 = vadd.f32 %v5091_v61, %v15402_v9 }
 0x9b7   :  { %v4947_v31 = vadd.f32 %v4946_v44, %v15369_v12  ;;  %v4996_v32 = vadd.f32 %v4995_v51, %v15372_v17  ;;  %v5403_v51 = vpack.c.bf16 %v5179_v26, %v5163_v48  ;;  %v4418_v26 = vadd.f32 %v14610_v49, %v14781_v7 }
 0x9b8   :  { %v5146_v36 = vmax.f32 %v5092_v52, 0.0  ;;  %v4465_v49 = vadd.f32 %v14604_v62, %v14787_v27  ;;  %v5195_v62 = vmax.f32 %v4367_v18, 0.0 }
 0x9b9   :  { %v5159_v56 = vmax.f32 %v4947_v31, 0.0  ;;  %v5160_v39 = vmax.f32 %v4996_v32, 0.0  ;;  %v5406_v31 = vpack.c.bf16 %v5182_v50, %v5166_v34  ;;  %v5145_v32 = vmax.f32 %v5043_v24, 0.0 }
 0x9ba   :  { %v4467_v50 = vadd.f32 %v14620_v37, %v14787_v27  ;;  %v4516_v24 = vadd.f32 %v14622_v25, %v14789_v29 }
 0x9bb   :  { %v15404_v8 = vpack.c.bf16 %v5159_v56, %v5143_v4  ;;  %v15406_v20 = vpack.c.bf16 %v5160_v39, %v5144_v53  ;;  %v4369_v39 = vadd.f32 %v14608_v13, %v14779_v35  ;;  %v4416_v13 = vadd.f32 %v14602_v2, %v14781_v7 }
 0x9bd   :  { %v5044_v11 = vpop.f32.mrf.mxu2  ;;  %v5093_v45 = vpop.f32.mrf.mxu3 }
 0x9be   :  { %v5045_v14 = vadd.f32 %v5044_v11, %v15399_v15  ;;  %v5094_v28 = vadd.f32 %v5093_v45, %v15402_v9  ;;  %v4949_v46 = vpop.f32.mrf.mxu0  ;;  %v4998_v44 = vpop.f32.mrf.mxu1  ;;  %v5211_v45 = vmax.f32 %v4369_v39, 0.0 }
 0x9bf   :  { %v4950_v55 = vadd.f32 %v4949_v46, %v15369_v12  ;;  %v4999_v0 = vadd.f32 %v4998_v44, %v15372_v17  ;;  %v5214_v46 = vmax.f32 %v4516_v24, 0.0  ;;  %v11491_v24 = vld [vmem:[%s17695_s7 + $0x1b8] sm:$0xff] }
 0x9c0   :  { %v5161_v4 = vmax.f32 %v5045_v14, 0.0  ;;  %v5162_v61 = vmax.f32 %v5094_v28, 0.0  ;;  %v5212_v14 = vmax.f32 %v4418_v26, 0.0  ;;  %v5213_v28 = vmax.f32 %v4467_v50, 0.0  ;;  %6834 = vmatpush.bf16.msra.mxu2 %v11491_v24 }
 0x9c1   :  { %6553 = vmatmul.bf16.gmra.mxu0 %v5403_v51  ;;  %6602 = vmatmul.bf16.gmra.mxu1 %v5404_v43  ;;  %v5175_v37 = vmax.f32 %v4950_v55, 0.0  ;;  %v5176_v34 = vmax.f32 %v4999_v0, 0.0  ;;  %v5196_v43 = vmax.f32 %v4416_v13, 0.0  ;;  %v5419_v0 = vpack.c.bf16 %v5211_v45, %v5195_v62 }
 0x9c2   :  { %v15412_v60 = vpack.c.bf16 %v5161_v4, %v5145_v32  ;;  %v15414_v63 = vpack.c.bf16 %v5162_v61, %v5146_v36  ;;  %6651 = vmatmul.bf16.gmra.mxu2 %v5405_v16  ;;  %6700 = vmatmul.bf16.gmra.mxu3 %v5406_v31  ;;  %v5197_v16 = vmax.f32 %v4465_v49, 0.0  ;;  %v4472_v45 = vadd.f32 %v14668_v5, %v14787_v27  ;;  %v11475_v5 = vld [vmem:[%s17695_s7 + $0x138] sm:$0xff] }
 0x9c3   :  { %v5420_v39 = vpack.c.bf16 %v5212_v14, %v5196_v43  ;;  %v18110_v14 = vld [vmem:[#allocation65_spill] sm:$0xff]  ;;  %6736 = vmatpush.bf16.msra.mxu0 %v11475_v5 }
 0x9c4   :  { %v5421_v26 = vpack.c.bf16 %v5213_v28, %v5197_v16  ;;  %v4521_v28 = vadd.f32 %v18110_v14, %v14789_v29 }
 0x9c5   :  { %v5047_v53 = vpop.f32.mrf.mxu2  ;;  %v5096_v56 = vpop.f32.mrf.mxu3 }
 0x9c6   :  { %v4951_v23 = vpop.f32.mrf.mxu0  ;;  %v5000_v1 = vpop.f32.mrf.mxu1  ;;  %v5048_v2 = vadd.f32 %v5047_v53, %v15399_v15  ;;  %v5097_v51 = vadd.f32 %v5096_v56, %v15402_v9 }
 0x9c7   :  { %v4952_v52 = vadd.f32 %v4951_v23, %v15369_v12  ;;  %v5001_v48 = vadd.f32 %v5000_v1, %v15372_v17  ;;  %v5422_v23 = vpack.c.bf16 %v5214_v46, %v5198_v57  ;;  %v18114_v57 = vld [vmem:[#allocation49_spill] sm:$0xff] }
 0x9c8   :  { %v5177_v1 = vmax.f32 %v5048_v2, 0.0  ;;  %v5178_v53 = vmax.f32 %v5097_v51, 0.0  ;;  %v18111_v51 = vld [vmem:[#allocation52_spill] sm:$0xff] }
 0x9c9   :  { %v5191_v11 = vmax.f32 %v4952_v52, 0.0  ;;  %v5192_v25 = vmax.f32 %v5001_v48, 0.0  ;;  %v4372_v62 = vadd.f32 %v18111_v51, %v14779_v35 }
 0x9cb   :  { %v15436_v44 = vpack.c.bf16 %v5191_v11, %v5175_v37  ;;  %v15438_v47 = vpack.c.bf16 %v5192_v25, %v5176_v34  ;;  %v4374_v37 = vadd.f32 %v14656_v38, %v14779_v35  ;;  %v4423_v34 = vadd.f32 %v14658_v59, %v14781_v7  ;;  %v18112_v38 = vld [vmem:[#allocation41_spill] sm:$0xff]  ;;  %v18113_v59 = vld [vmem:[#allocation56_spill] sm:$0xff] }
 0x9cc   :  { %v4421_v43 = vadd.f32 %v18112_v38, %v14781_v7  ;;  %v4470_v16 = vadd.f32 %v18113_v59, %v14787_v27 }
 0x9cd   :  { %v5049_v31 = vpop.f32.mrf.mxu2  ;;  %v5098_v32 = vpop.f32.mrf.mxu3 }
 0x9ce   :  { %v5050_v36 = vadd.f32 %v5049_v31, %v15399_v15  ;;  %v5099_v4 = vadd.f32 %v5098_v32, %v15402_v9  ;;  %v4954_v61 = vpop.f32.mrf.mxu0  ;;  %v5003_v55 = vpop.f32.mrf.mxu1  ;;  %v4519_v31 = vadd.f32 %v18114_v57, %v14789_v29  ;;  %v11499_v32 = vld [vmem:[%s17695_s7 + $0x1f8] sm:$0xff] }
 0x9cf   :  { %v4955_v18 = vadd.f32 %v4954_v61, %v15369_v12  ;;  %v5004_v13 = vadd.f32 %v5003_v55, %v15372_v17  ;;  %6883 = vmatpush.bf16.msrb.mxu3 %v11499_v32 }
 0x9d0   :  { %v5193_v50 = vmax.f32 %v5050_v36, 0.0  ;;  %v5194_v56 = vmax.f32 %v5099_v4, 0.0 }
 0x9d1   :  { %6558 = vmatmul.bf16.gmra.mxu0 %v5419_v0  ;;  %6607 = vmatmul.bf16.gmra.mxu1 %v5420_v39  ;;  %v5207_v36 = vmax.f32 %v4955_v18, 0.0  ;;  %v5208_v4 = vmax.f32 %v5004_v13, 0.0  ;;  %v11483_v0 = vld [vmem:[%s17695_s7 + $0x178] sm:$0xff]  ;;  %v5243_v39 = vmax.f32 %v4374_v37, 0.0  ;;  %v5227_v18 = vmax.f32 %v4372_v62, 0.0  ;;  %v11490_v62 = vld [vmem:[%s17695_s7 + $0x1b0] sm:$0xff] }
 0x9d2   :  { %6656 = vmatmul.bf16.gmra.mxu2 %v5421_v26  ;;  %6705 = vmatmul.bf16.gmra.mxu3 %v5422_v23  ;;  %v15447_v52 = vpack.c.bf16 %v5193_v50, %v5177_v1  ;;  %v15449_v48 = vpack.c.bf16 %v5194_v56, %v5178_v53  ;;  %v5244_v26 = vmax.f32 %v4423_v34, 0.0  ;;  %v5245_v23 = vmax.f32 %v4472_v45, 0.0 }
 0x9d3   :  { %v5246_v1 = vmax.f32 %v4521_v28, 0.0  ;;  %6785 = vmatpush.bf16.msra.mxu1 %v11483_v0  ;;  %v5228_v13 = vmax.f32 %v4421_v43, 0.0  ;;  %6835 = vmatpush.bf16.msra.mxu2 %v11490_v62  ;;  %v18116_v0 = vld [vmem:[#allocation58_spill] sm:$0xff] }
 0x9d5   :  { %v5052_v49 = vpop.f32.mrf.mxu2  ;;  %v5101_v6 = vpop.f32.mrf.mxu3  ;;  %v5436_v51 = vpack.c.bf16 %v5244_v26, %v5228_v13 }
 0x9d6   :  { %v4956_v11 = vpop.f32.mrf.mxu0  ;;  %v5005_v25 = vpop.f32.mrf.mxu1  ;;  %v5053_v56 = vadd.f32 %v5052_v49, %v15399_v15  ;;  %v5102_v24 = vadd.f32 %v5101_v6, %v15402_v9 }
 0x9d7   :  { %v4957_v46 = vadd.f32 %v4956_v11, %v15369_v12  ;;  %v5006_v2 = vadd.f32 %v5005_v25, %v15372_v17  ;;  %v5229_v11 = vmax.f32 %v4470_v16, 0.0  ;;  %v5230_v25 = vmax.f32 %v4519_v31, 0.0 }
 0x9d8   :  { %v5209_v57 = vmax.f32 %v5053_v56, 0.0  ;;  %v5210_v49 = vmax.f32 %v5102_v24, 0.0  ;;  %v18118_v24 = vld [vmem:[#allocation39_spill] sm:$0xff] }
 0x9d9   :  { %v5223_v61 = vmax.f32 %v4957_v46, 0.0  ;;  %v5224_v55 = vmax.f32 %v5006_v2, 0.0  ;;  %v5435_v2 = vpack.c.bf16 %v5243_v39, %v5227_v18  ;;  %v5437_v38 = vpack.c.bf16 %v5245_v23, %v5229_v11 }
 0x9da   :  { %v5438_v59 = vpack.c.bf16 %v5246_v1, %v5230_v25  ;;  %v4428_v39 = vadd.f32 %v18116_v0, %v14781_v7  ;;  %v18117_v1 = vld [vmem:[#allocation62_spill] sm:$0xff]  ;;  %v4526_v18 = vadd.f32 %v18118_v24, %v14789_v29  ;;  %v18119_v25 = vld [vmem:[#allocation69_spill] sm:$0xff] }
 0x9db   :  { %v15480_v53 = vpack.c.bf16 %v5223_v61, %v5207_v36  ;;  %v15482_v50 = vpack.c.bf16 %v5224_v55, %v5208_v4  ;;  %v18115_v61 = vld [vmem:[#allocation68_spill] sm:$0xff]  ;;  %v4477_v56 = vadd.f32 %v18117_v1, %v14787_v27 }
 0x9dc   :  { %v4379_v55 = vadd.f32 %v18115_v61, %v14779_v35  ;;  %v5276_v61 = vmax.f32 %v4428_v39, 0.0 }
 0x9dd   :  { %v5054_v14 = vpop.f32.mrf.mxu2  ;;  %v5103_v37 = vpop.f32.mrf.mxu3  ;;  %v5277_v0 = vmax.f32 %v4477_v56, 0.0 }
 0x9de   :  { %v5055_v34 = vadd.f32 %v5054_v14, %v15399_v15  ;;  %v5104_v45 = vadd.f32 %v5103_v37, %v15402_v9  ;;  %v4959_v28 = vpop.f32.mrf.mxu0  ;;  %v5008_v46 = vpop.f32.mrf.mxu1  ;;  %v4377_v14 = vadd.f32 %v18119_v25, %v14779_v35  ;;  %v18120_v37 = vld [vmem:[#allocation55_spill] sm:$0xff]  ;;  %v5275_v62 = vmax.f32 %v4379_v55, 0.0 }
 0x9df   :  { %v4960_v31 = vadd.f32 %v4959_v28, %v15369_v12  ;;  %v5009_v32 = vadd.f32 %v5008_v46, %v15372_v17  ;;  %v18122_v46 = vld [vmem:[#allocation61_spill] sm:$0xff] }
 0x9e0   :  { %v5225_v5 = vmax.f32 %v5055_v34, 0.0  ;;  %v5226_v6 = vmax.f32 %v5104_v45, 0.0  ;;  %v4426_v34 = vadd.f32 %v18120_v37, %v14781_v7  ;;  %v18121_v45 = vld [vmem:[#allocation44_spill] sm:$0xff]  ;;  %v5259_v24 = vmax.f32 %v4377_v14, 0.0  ;;  %v11489_v14 = vld [vmem:[%s17695_s7 + $0x1a8] sm:$0xff] }
 0x9e1   :  { %6563 = vmatmul.bf16.gmra.mxu0 %v5435_v2  ;;  %6612 = vmatmul.bf16.gmra.mxu1 %v5436_v51  ;;  %v4475_v28 = vadd.f32 %v18121_v45, %v14787_v27  ;;  %v4524_v2 = vadd.f32 %v18122_v46, %v14789_v29  ;;  %v11474_v51 = vld [vmem:[%s17695_s7 + $0x130] sm:$0xff] }
 0x9e2   :  { %6661 = vmatmul.bf16.gmra.mxu2 %v5437_v38  ;;  %6710 = vmatmul.bf16.gmra.mxu3 %v5438_v59  ;;  %v15491_v43 = vpack.c.bf16 %v5225_v5, %v5209_v57  ;;  %v15493_v16 = vpack.c.bf16 %v5226_v6, %v5210_v49  ;;  %v11498_v38 = vld [vmem:[%s17695_s7 + $0x1f0] sm:$0xff]  ;;  %v5239_v59 = vmax.f32 %v4960_v31, 0.0  ;;  %v5240_v57 = vmax.f32 %v5009_v32, 0.0 }
 0x9e3   :  { %v11482_v6 = vld [vmem:[%s17695_s7 + $0x170] sm:$0xff]  ;;  %6737 = vmatpush.bf16.msra.mxu0 %v11474_v51  ;;  %6884 = vmatpush.bf16.msrb.mxu3 %v11498_v38  ;;  %v5262_v25 = vmax.f32 %v4524_v2, 0.0  ;;  %v5451_v46 = vpack.c.bf16 %v5275_v62, %v5259_v24 }
 0x9e4   :  { %6786 = vmatpush.bf16.msra.mxu1 %v11482_v6  ;;  %6836 = vmatpush.bf16.msra.mxu2 %v11489_v14 }
 0x9e5   :  { %v5057_v36 = vpop.f32.mrf.mxu2  ;;  %v5106_v4 = vpop.f32.mrf.mxu3 }
 0x9e6   :  { %v4961_v26 = vpop.f32.mrf.mxu0  ;;  %v5010_v23 = vpop.f32.mrf.mxu1  ;;  %v5058_v31 = vadd.f32 %v5057_v36, %v15399_v15  ;;  %v5107_v32 = vadd.f32 %v5106_v4, %v15402_v9 }
 0x9e7   :  { %v4962_v13 = vadd.f32 %v4961_v26, %v15369_v12  ;;  %v5011_v11 = vadd.f32 %v5010_v23, %v15372_v17  ;;  %v5278_v26 = vmax.f32 %v4526_v18, 0.0 }
 0x9e8   :  { %v5242_v36 = vmax.f32 %v5107_v32, 0.0 }
 0x9e9   :  { %v5255_v49 = vmax.f32 %v4962_v13, 0.0  ;;  %v5256_v5 = vmax.f32 %v5011_v11, 0.0  ;;  %v5260_v13 = vmax.f32 %v4426_v34, 0.0  ;;  %v5261_v11 = vmax.f32 %v4475_v28, 0.0 }
 0x9eb   :  { %v15524_v23 = vpack.c.bf16 %v5255_v49, %v5239_v59  ;;  %v15526_v1 = vpack.c.bf16 %v5256_v5, %v5240_v57  ;;  %v5452_v51 = vpack.c.bf16 %v5276_v61, %v5260_v13  ;;  %v5453_v38 = vpack.c.bf16 %v5277_v0, %v5261_v11  ;;  %v18125_v61 = vld [vmem:[#allocation24_spill] sm:$0xff]  ;;  %v18127_v13 = vld [vmem:[#allocation26_spill] sm:$0xff] }
 0x9ec   :  { %v5454_v59 = vpack.c.bf16 %v5278_v26, %v5262_v25  ;;  %v5241_v57 = vmax.f32 %v5058_v31, 0.0  ;;  %v4384_v0 = vadd.f32 %v18125_v61, %v14779_v35  ;;  %v18126_v26 = vld [vmem:[#allocation25_spill] sm:$0xff]  ;;  %v4482_v11 = vadd.f32 %v18127_v13, %v14787_v27  ;;  %v18128_v25 = vld [vmem:[#allocation27_spill] sm:$0xff] }
 0x9ed   :  { %v5059_v37 = vpop.f32.mrf.mxu2  ;;  %v5108_v55 = vpop.f32.mrf.mxu3  ;;  %v4433_v31 = vadd.f32 %v18126_v26, %v14781_v7 }
 0x9ee   :  { %v5060_v39 = vadd.f32 %v5059_v37, %v15399_v15  ;;  %v5109_v56 = vadd.f32 %v5108_v55, %v15402_v9  ;;  %v4964_v18 = vpop.f32.mrf.mxu0  ;;  %v5013_v45 = vpop.f32.mrf.mxu1  ;;  %v4531_v37 = vadd.f32 %v18128_v25, %v14789_v29  ;;  %v5309_v25 = vmax.f32 %v4482_v11, 0.0 }
 0x9ef   :  { %v4965_v2 = vadd.f32 %v4964_v18, %v15369_v12  ;;  %v5014_v5 = vadd.f32 %v5013_v45, %v15372_v17  ;;  %v18130_v45 = vld [vmem:[#allocation42_spill] sm:$0xff]  ;;  %v5308_v13 = vmax.f32 %v4433_v31, 0.0 }
 0x9f0   :  { %v5257_v49 = vmax.f32 %v5060_v39, 0.0  ;;  %v5258_v4 = vmax.f32 %v5109_v56, 0.0  ;;  %v18129_v56 = vld [vmem:[#allocation66_spill] sm:$0xff] }
 0x9f1   :  { %6568 = vmatmul.bf16.gmra.mxu0 %v5451_v46  ;;  %6617 = vmatmul.bf16.gmra.mxu1 %v5452_v51  ;;  %v4382_v18 = vadd.f32 %v18129_v56, %v14779_v35  ;;  %v4431_v46 = vadd.f32 %v18130_v45, %v14781_v7  ;;  %v18131_v51 = vld [vmem:[#allocation22_spill] sm:$0xff]  ;;  %v5272_v14 = vmax.f32 %v5014_v5, 0.0  ;;  %v5310_v56 = vmax.f32 %v4531_v37, 0.0 }
 0x9f2   :  { %6666 = vmatmul.bf16.gmra.mxu2 %v5453_v38  ;;  %6715 = vmatmul.bf16.gmra.mxu3 %v5454_v59  ;;  %v15535_v34 = vpack.c.bf16 %v5257_v49, %v5241_v57  ;;  %v15537_v28 = vpack.c.bf16 %v5258_v4, %v5242_v36  ;;  %v4480_v38 = vadd.f32 %v18131_v51, %v14787_v27  ;;  %v18132_v59 = vld [vmem:[#allocation23_spill] sm:$0xff]  ;;  %v11473_v36 = vld [vmem:[%s17695_s7 + $0x128] sm:$0xff]  ;;  %v5271_v4 = vmax.f32 %v4965_v2, 0.0 }
 0x9f3   :  { %v4529_v57 = vadd.f32 %v18132_v59, %v14789_v29  ;;  %v11497_v49 = vld [vmem:[%s17695_s7 + $0x1e8] sm:$0xff]  ;;  %6738 = vmatpush.bf16.msra.mxu0 %v11473_v36 }
 0x9f4   :  { %18123 = vst [vmem:[#allocation65_spill] sm:$0xff] %v15535_v34  ;;  %6885 = vmatpush.bf16.msrb.mxu3 %v11497_v49  ;;  %v5293_v59 = vmax.f32 %v4480_v38, 0.0  ;;  %v11472_v49 = vld [vmem:[%s17695_s7 + $0x120] sm:$0xff] }
 0x9f5   :  { %18124 = vst [vmem:[#allocation52_spill] sm:$0xff] %v15537_v28  ;;  %v5062_v6 = vpop.f32.mrf.mxu2  ;;  %v5111_v62 = vpop.f32.mrf.mxu3  ;;  %v5294_v28 = vmax.f32 %v4529_v57, 0.0  ;;  %v11496_v57 = vld [vmem:[%s17695_s7 + $0x1e0] sm:$0xff] }
 0x9f6   :  { %v4966_v32 = vpop.f32.mrf.mxu0  ;;  %v5015_v24 = vpop.f32.mrf.mxu1  ;;  %v5063_v2 = vadd.f32 %v5062_v6, %v15399_v15  ;;  %v5112_v5 = vadd.f32 %v5111_v62, %v15402_v9  ;;  %v11480_v6 = vld [vmem:[%s17695_s7 + $0x160] sm:$0xff] }
 0x9f7   :  { %v4967_v55 = vadd.f32 %v4966_v32, %v15369_v12  ;;  %v5016_v39 = vadd.f32 %v5015_v24, %v15372_v17  ;;  %v11481_v32 = vld [vmem:[%s17695_s7 + $0x168] sm:$0xff]  ;;  %v5307_v24 = vmax.f32 %v4384_v0, 0.0  ;;  %v5470_v38 = vpack.c.bf16 %v5310_v56, %v5294_v28  ;;  %6739 = vmatpush.bf16.msra.mxu0 %v11472_v49  ;;  %v11471_v28 = vld [vmem:[%s17695_s7 + $0x118] sm:$0xff]  ;;  %v18135_v49 = vld [vmem:[#allocation33_spill] sm:$0xff] }
 0x9f8   :  { %6787 = vmatpush.bf16.msra.mxu1 %v11481_v32  ;;  %v11479_v32 = vld [vmem:[%s17695_s7 + $0x158] sm:$0xff]  ;;  %6886 = vmatpush.bf16.msrb.mxu3 %v11496_v57 }
 0x9f9   :  { %v5287_v61 = vmax.f32 %v4967_v55, 0.0  ;;  %v5288_v26 = vmax.f32 %v5016_v39, 0.0  ;;  %v5291_v55 = vmax.f32 %v4382_v18, 0.0  ;;  %v5292_v39 = vmax.f32 %v4431_v46, 0.0  ;;  %v11495_v56 = vld [vmem:[%s17695_s7 + $0x1d8] sm:$0xff] }
 0x9fa   :  { %v5469_v46 = vpack.c.bf16 %v5309_v25, %v5293_v59  ;;  %v11487_v25 = vld [vmem:[%s17695_s7 + $0x198] sm:$0xff] }
 0x9fb   :  { %v15568_v45 = vpack.c.bf16 %v5287_v61, %v5271_v4  ;;  %v15570_v51 = vpack.c.bf16 %v5288_v26, %v5272_v14  ;;  %v5467_v62 = vpack.c.bf16 %v5307_v24, %v5291_v55  ;;  %v5468_v18 = vpack.c.bf16 %v5308_v13, %v5292_v39  ;;  %6740 = vmatpush.bf16.msra.mxu0 %v11471_v28  ;;  %v18133_v59 = vld [vmem:[#allocation28_spill] sm:$0xff] }
 0x9fc   :  { %v5273_v4 = vmax.f32 %v5063_v2, 0.0  ;;  %v5274_v14 = vmax.f32 %v5112_v5, 0.0  ;;  %6788 = vmatpush.bf16.msra.mxu1 %v11480_v6  ;;  %v4438_v6 = vadd.f32 %v18135_v49, %v14781_v7  ;;  %6887 = vmatpush.bf16.msrb.mxu3 %v11495_v56 }
 0x9fd   :  { %v5064_v34 = vpop.f32.mrf.mxu2  ;;  %v5113_v0 = vpop.f32.mrf.mxu3 }
 0x9fe   :  { %v5065_v31 = vadd.f32 %v5064_v34, %v15399_v15  ;;  %v5114_v11 = vadd.f32 %v5113_v0, %v15402_v9  ;;  %v4969_v37 = vpop.f32.mrf.mxu0  ;;  %v5018_v36 = vpop.f32.mrf.mxu1  ;;  %v11488_v34 = vld [vmem:[%s17695_s7 + $0x1a0] sm:$0xff]  ;;  %v4387_v0 = vadd.f32 %v18133_v59, %v14779_v35 }
 0x9ff   :  { %6837 = vmatpush.bf16.msra.mxu2 %v11488_v34  ;;  %v4970_v2 = vadd.f32 %v4969_v37, %v15369_v12  ;;  %v5019_v5 = vadd.f32 %v5018_v36, %v15372_v17  ;;  %v11470_v37 = vld [vmem:[%s17695_s7 + $0x110] sm:$0xff] }
 0xa00   :  { %v5289_v61 = vmax.f32 %v5065_v31, 0.0  ;;  %v5290_v26 = vmax.f32 %v5114_v11, 0.0  ;;  %6789 = vmatpush.bf16.msra.mxu1 %v11479_v32  ;;  %v18134_v31 = vld [vmem:[#allocation32_spill] sm:$0xff]  ;;  %v11478_v36 = vld [vmem:[%s17695_s7 + $0x150] sm:$0xff]  ;;  %v18139_v32 = vld [vmem:[#allocation30_spill] sm:$0xff]  ;;  %6741 = vmatpush.bf16.msra.mxu0 %v11470_v37 }
 0xa01   :  { %6573 = vmatmul.bf16.gmra.mxu0 %v5467_v62  ;;  %6622 = vmatmul.bf16.gmra.mxu1 %v5468_v18  ;;  %v4389_v11 = vadd.f32 %v18134_v31, %v14779_v35  ;;  %v18136_v62 = vld [vmem:[#allocation34_spill] sm:$0xff]  ;;  %v18137_v34 = vld [vmem:[#allocation35_spill] sm:$0xff]  ;;  %v4485_v59 = vadd.f32 %v18139_v32, %v14787_v27  ;;  %v5304_v56 = vmax.f32 %v5019_v5, 0.0 }
 0xa02   :  { %6671 = vmatmul.bf16.gmra.mxu2 %v5469_v46  ;;  %6720 = vmatmul.bf16.gmra.mxu3 %v5470_v38  ;;  %v15594_v24 = vpack.c.bf16 %v5289_v61, %v5273_v4  ;;  %v15596_v13 = vpack.c.bf16 %v5290_v26, %v5274_v14  ;;  %v4487_v18 = vadd.f32 %v18136_v62, %v14787_v27  ;;  %v11486_v14 = vld [vmem:[%s17695_s7 + $0x190] sm:$0xff]  ;;  %v18138_v26 = vld [vmem:[#allocation29_spill] sm:$0xff] }
 0xa03   :  { %v4536_v57 = vadd.f32 %v18137_v34, %v14789_v29  ;;  %6838 = vmatpush.bf16.msra.mxu2 %v11487_v25  ;;  %v11494_v61 = vld [vmem:[%s17695_s7 + $0x1d0] sm:$0xff]  ;;  %v4436_v28 = vadd.f32 %v18138_v26, %v14781_v7  ;;  %v5303_v25 = vmax.f32 %v4970_v2, 0.0  ;;  %v11477_v7 = vld [vmem:[%s17695_s7 + $0x148] sm:$0xff]  ;;  %v5339_v34 = vmax.f32 %v4389_v11, 0.0 }
 0xa04   :  { %v18140_v31 = vld [vmem:[#allocation31_spill] sm:$0xff]  ;;  %6790 = vmatpush.bf16.msra.mxu1 %v11478_v36  ;;  %v5340_v26 = vmax.f32 %v4438_v6, 0.0  ;;  %v5341_v27 = vmax.f32 %v4487_v18, 0.0  ;;  %6888 = vmatpush.bf16.msrb.mxu3 %v11494_v61  ;;  %v11493_v2 = vld [vmem:[%s17695_s7 + $0x1c8] sm:$0xff]  ;;  %v5323_v36 = vmax.f32 %v4387_v0, 0.0 }
 0xa05   :  { %v5067_v55 = vpop.f32.mrf.mxu2  ;;  %v5116_v39 = vpop.f32.mrf.mxu3  ;;  %v4534_v49 = vadd.f32 %v18140_v31, %v14789_v29  ;;  %v5342_v32 = vmax.f32 %v4536_v57, 0.0  ;;  %v11485_v29 = vld [vmem:[%s17695_s7 + $0x188] sm:$0xff]  ;;  %v5324_v18 = vmax.f32 %v4436_v28, 0.0  ;;  %v5325_v57 = vmax.f32 %v4485_v59, 0.0 }
 0xa06   :  { %v4971_v46 = vpop.f32.mrf.mxu0  ;;  %v5020_v38 = vpop.f32.mrf.mxu1  ;;  %v5068_v11 = vadd.f32 %v5067_v55, %v15399_v15  ;;  %v5117_v6 = vadd.f32 %v5116_v39, %v15402_v9  ;;  %v11468_v55 = vld [vmem:[%s17695_s7 + $0x100] sm:$0xff] }
 0xa07   :  { %v4972_v35 = vadd.f32 %v4971_v46, %v15369_v12  ;;  %v5021_v4 = vadd.f32 %v5020_v38, %v15372_v17  ;;  %v11469_v38 = vld [vmem:[%s17695_s7 + $0x108] sm:$0xff]  ;;  %6839 = vmatpush.bf16.msra.mxu2 %v11486_v14  ;;  %v11476_v39 = vld [vmem:[%s17695_s7 + $0x140] sm:$0xff]  ;;  %v5484_v0 = vpack.c.bf16 %v5340_v26, %v5324_v18  ;;  %v5485_v28 = vpack.c.bf16 %v5341_v27, %v5325_v57 }
 0xa08   :  { %6742 = vmatpush.bf16.msra.mxu0 %v11469_v38  ;;  %6791 = vmatpush.bf16.msra.mxu1 %v11477_v7  ;;  %v5305_v38 = vmax.f32 %v5068_v11, 0.0  ;;  %v5306_v7 = vmax.f32 %v5117_v6, 0.0 }
 0xa09   :  { %v5319_v62 = vmax.f32 %v4972_v35, 0.0  ;;  %v5320_v46 = vmax.f32 %v5021_v4, 0.0  ;;  %v5326_v35 = vmax.f32 %v4534_v49, 0.0  ;;  %6889 = vmatpush.bf16.msrb.mxu3 %v11493_v2  ;;  %v11484_v49 = vld [vmem:[%s17695_s7 + $0x180] sm:$0xff] }
 0xa0b   :  { %v15648_v5 = vpack.c.bf16 %v5319_v62, %v5303_v25  ;;  %v15650_v37 = vpack.c.bf16 %v5320_v46, %v5304_v56  ;;  %v5483_v56 = vpack.c.bf16 %v5339_v34, %v5323_v36  ;;  %v5486_v59 = vpack.c.bf16 %v5342_v32, %v5326_v35  ;;  %6840 = vmatpush.bf16.msra.mxu2 %v11485_v29  ;;  %v11492_v46 = vld [vmem:[%s17695_s7 + $0x1c0] sm:$0xff] }
 0xa0c   :  { %6743 = vmatpush.bf16.msra.mxu0 %v11468_v55  ;;  %6792 = vmatpush.bf16.msra.mxu1 %v11476_v39 }
 0xa0d   :  { %v5069_v4 = vpop.f32.mrf.mxu2  ;;  %v5118_v14 = vpop.f32.mrf.mxu3  ;;  %6890 = vmatpush.bf16.msrb.mxu3 %v11492_v46 }
 0xa0e   :  { %v5070_v61 = vadd.f32 %v5069_v4, %v15399_v15  ;;  %v5119_v31 = vadd.f32 %v5118_v14, %v15402_v9  ;;  %v4974_v25 = vpop.f32.mrf.mxu0  ;;  %v5023_v62 = vpop.f32.mrf.mxu1 }
 0xa0f   :  { %6841 = vmatpush.bf16.msra.mxu2 %v11484_v49  ;;  %v4975_v32 = vadd.f32 %v4974_v25, %v15369_v12  ;;  %v5024_v29 = vadd.f32 %v5023_v62, %v15372_v17 }
 0xa10   :  { %v5321_v34 = vmax.f32 %v5070_v61, 0.0  ;;  %v5322_v36 = vmax.f32 %v5119_v31, 0.0 }
 0xa11   :  { %6578 = vmatmul.bf16.gmra.mxu0 %v5483_v56  ;;  %6627 = vmatmul.bf16.gmra.mxu1 %v5484_v0  ;;  %v5335_v4 = vmax.f32 %v4975_v32, 0.0  ;;  %v5336_v14 = vmax.f32 %v5024_v29, 0.0  ;;  %v18144_v32 = vld [vmem:[#allocation36_spill] sm:$0xff]  ;;  %v18145_v29 = vld [vmem:[#allocation37_spill] sm:$0xff] }
 0xa12   :  { %6676 = vmatmul.bf16.gmra.mxu2 %v5485_v28  ;;  %6725 = vmatmul.bf16.gmra.mxu3 %v5486_v59  ;;  %v15668_v26 = vpack.c.bf16 %v5321_v34, %v5305_v38  ;;  %v15670_v27 = vpack.c.bf16 %v5322_v36, %v5306_v7 }
 0xa14   :  { %18141 = vst [vmem:[#allocation41_spill] sm:$0xff] %v15670_v27 }
 0xa15   :  { %v5072_v2 = vpop.f32.mrf.mxu2  ;;  %v5121_v11 = vpop.f32.mrf.mxu3 }
 0xa16   :  { %v4976_v6 = vpop.f32.mrf.mxu0  ;;  %v5025_v18 = vpop.f32.mrf.mxu1  ;;  %v5073_v25 = vadd.f32 %v5072_v2, %v15399_v15  ;;  %v5122_v62 = vadd.f32 %v5121_v11, %v15402_v9  ;;  %v18147_v2 = vld [vmem:[#allocation71_spill] sm:$0xff] }
 0xa17   :  { %v4977_v57 = vadd.f32 %v4976_v6, %v15369_v12  ;;  %v5026_v35 = vadd.f32 %v5025_v18, %v15372_v17  ;;  %v18146_v6 = vld [vmem:[#allocation70_spill] sm:$0xff] }
 0xa18   :  { %v5337_v38 = vmax.f32 %v5073_v25, 0.0  ;;  %v5338_v7 = vmax.f32 %v5122_v62, 0.0 }
 0xa19   :  { %v5351_v61 = vmax.f32 %v4977_v57, 0.0  ;;  %v5352_v31 = vmax.f32 %v5026_v35, 0.0 }
 0xa1b   :  { %v15676_v56 = vpack.c.bf16 %v5351_v61, %v5335_v4  ;;  %v15678_v55 = vpack.c.bf16 %v5352_v31, %v5336_v14 }
 0xa1d   :  { %18142 = vst [vmem:[#allocation56_spill] sm:$0xff] %v15676_v56  ;;  %v5074_v39 = vpop.f32.mrf.mxu2  ;;  %v5123_v0 = vpop.f32.mrf.mxu3 }
 0xa1e   :  { %18143 = vst [vmem:[#allocation49_spill] sm:$0xff] %v15678_v55  ;;  %v5075_v28 = vadd.f32 %v5074_v39, %v15399_v15  ;;  %v5124_v59 = vadd.f32 %v5123_v0, %v15402_v9  ;;  %v4979_v49 = vpop.f32.mrf.mxu0  ;;  %v5028_v46 = vpop.f32.mrf.mxu1 }
 0xa1f   :  { %v4980_v57 = vadd.f32 %v4979_v49, %v15369_v12  ;;  %v5029_v35 = vadd.f32 %v5028_v46, %v15372_v17 }
 0xa20   :  { %v5353_v34 = vmax.f32 %v5075_v28, 0.0  ;;  %v5354_v36 = vmax.f32 %v5124_v59, 0.0 }
 0xa21   :  { %6583 = vmatmul.bf16.gmra.mxu0 %v18144_v32  ;;  %6632 = vmatmul.bf16.gmra.mxu1 %v18145_v29  ;;  %v5367_v39 = vmax.f32 %v4980_v57, 0.0  ;;  %v5368_v0 = vmax.f32 %v5029_v35, 0.0 }
 0xa22   :  { %6681 = vmatmul.bf16.gmra.mxu2 %v18146_v6  ;;  %6730 = vmatmul.bf16.gmra.mxu3 %v18147_v2  ;;  %v15688_v11 = vpack.c.bf16 %v5353_v34, %v5337_v38  ;;  %v15690_v18 = vpack.c.bf16 %v5354_v36, %v5338_v7  ;;  %v12118_v38 = vld [vmem:[%s17701_s13] sm:$0xff] }
 0xa23   :  { %v15699_v7 = vperm.slane %v12118_v38, 4 }
 0xa24   :  { %18148 = vst [vmem:[#allocation68_spill] sm:$0xff] %v15688_v11 }
 0xa25   :  { %18149 = vst [vmem:[#allocation58_spill] sm:$0xff] %v15690_v18  ;;  %v5077_v4 = vpop.f32.mrf.mxu2  ;;  %v5126_v14 = vpop.f32.mrf.mxu3 }
 0xa26   :  { %v4981_v61 = vpop.f32.mrf.mxu0  ;;  %v5030_v31 = vpop.f32.mrf.mxu1  ;;  %v5078_v34 = vadd.f32 %v5077_v4, %v15399_v15  ;;  %v18153_v4 = vld [vmem:[#allocation73_spill] sm:$0xff] }
 0xa27   :  { %v4982_v25 = vadd.f32 %v4981_v61, %v15369_v12  ;;  %v5031_v62 = vadd.f32 %v5030_v31, %v15372_v17  ;;  %v5127_v12 = vadd.f32 %v5126_v14, %v15402_v9  ;;  %v18154_v14 = vld [vmem:[#allocation74_spill] sm:$0xff] }
 0xa28   :  { %v5369_v35 = vmax.f32 %v5078_v34, 0.0 }
 0xa29   :  { %v5383_v28 = vmax.f32 %v4982_v25, 0.0  ;;  %v5384_v59 = vmax.f32 %v5031_v62, 0.0  ;;  %v5370_v61 = vmax.f32 %v5127_v12, 0.0 }
 0xa2b   :  { %v15701_v49 = vpack.c.bf16 %v5383_v28, %v5367_v39  ;;  %v15703_v46 = vpack.c.bf16 %v5384_v59, %v5368_v0  ;;  %v18152_v39 = vld [vmem:[#allocation72_spill] sm:$0xff]  ;;  %v18155_v0 = vld [vmem:[#allocation75_spill] sm:$0xff] }
 0xa2d   :  { %18150 = vst [vmem:[#allocation62_spill] sm:$0xff] %v15701_v49  ;;  %v5079_v36 = vpop.f32.mrf.mxu2  ;;  %v5128_v17 = vpop.f32.mrf.mxu3  ;;  %v18178_v49 = vld [vmem:[#allocation96_spill] sm:$0xff] }
 0xa2e   :  { %18151 = vst [vmem:[#allocation39_spill] sm:$0xff] %v15703_v46  ;;  %v5080_v32 = vadd.f32 %v5079_v36, %v15399_v15  ;;  %v5129_v29 = vadd.f32 %v5128_v17, %v15402_v9  ;;  %v6549_v6 = vpop.f32.mrf.mxu0  ;;  %v6598_v2 = vpop.f32.mrf.mxu1  ;;  %v18177_v46 = vld [vmem:[#allocation95_spill] sm:$0xff] }
 0xa2f   :  { %v6550_v57 = vadd.f32 %v6549_v6, %v15699_v7 }
 0xa30   :  { %v5385_v31 = vmax.f32 %v5080_v32, 0.0  ;;  %v5386_v25 = vmax.f32 %v5129_v29, 0.0 }
 0xa31   :  { %v6599_v62 = vadd.f32 %v6598_v2, %v6550_v57  ;;  %6744 = vmatmul.bf16.vlgmr.msra.gmra.mxu0 %v18152_v39  ;;  %6793 = vmatmul.bf16.vlgmr.msra.gmra.mxu1 %v18153_v4  ;;  %v18160_v4 = vld [vmem:[#allocation78_spill] sm:$0xff] }
 0xa32   :  { %6842 = vmatmul.bf16.vlgmr.msra.gmra.mxu2 %v18154_v14  ;;  %6891 = vmatmul.bf16.vlgmr.msrb.gmra.mxu3 %v18155_v0  ;;  %v15714_v15 = vpack.c.bf16 %v5385_v31, %v5369_v35  ;;  %v15716_v9 = vpack.c.bf16 %v5386_v25, %v5370_v61  ;;  %v18158_v25 = vld [vmem:[#allocation76_spill] sm:$0xff]  ;;  %v18161_v14 = vld [vmem:[#allocation79_spill] sm:$0xff] }
 0xa34   :  { %18156 = vst [vmem:[#allocation69_spill] sm:$0xff] %v15714_v15  ;;  %v11503_v15 = vld [vmem:[%s17695_s7 + $0x218] sm:$0xff] }
 0xa35   :  { %18157 = vst [vmem:[#allocation55_spill] sm:$0xff] %v15716_v9  ;;  %v6647_v28 = vpop.f32.mrf.mxu2  ;;  %v6696_v59 = vpop.f32.mrf.mxu3  ;;  %v18172_v9 = vld [vmem:[#allocation90_spill] sm:$0xff] }
 0xa36   :  { %v6648_v38 = vadd.f32 %v6647_v28, %v6599_v62  ;;  %v6551_v34 = vpop.f32.mrf.mxu0  ;;  %v6600_v12 = vpop.f32.mrf.mxu1  ;;  %v18159_v62 = vld [vmem:[#allocation77_spill] sm:$0xff] }
 0xa37   :  { %v6552_v36 = vadd.f32 %v6551_v34, %v15699_v7 }
 0xa38   :  { %v15719_v17 = vadd.f32 %v6696_v59, %v6648_v38 }
 0xa39   :  { %v6601_v32 = vadd.f32 %v6600_v12, %v6552_v36 }
 0xa3d   :  { %v6649_v29 = vpop.f32.mrf.mxu2  ;;  %v6698_v6 = vpop.f32.mrf.mxu3 }
 0xa3e   :  { %v6650_v2 = vadd.f32 %v6649_v29, %v6601_v32  ;;  %v6554_v57 = vpop.f32.mrf.mxu0  ;;  %v6603_v39 = vpop.f32.mrf.mxu1 }
 0xa3f   :  { %v6555_v35 = vadd.f32 %v6554_v57, %v15699_v7 }
 0xa40   :  { %v15722_v31 = vadd.f32 %v6698_v6, %v6650_v2 }
 0xa41   :  { %v6604_v61 = vadd.f32 %v6603_v39, %v6555_v35  ;;  %6749 = vmatmul.bf16.gmra.mxu0 %v18158_v25  ;;  %6798 = vmatmul.bf16.gmra.mxu1 %v18159_v62 }
 0xa42   :  { %6847 = vmatmul.bf16.gmra.mxu2 %v18160_v4  ;;  %6896 = vmatmul.bf16.gmra.mxu3 %v18161_v14  ;;  %v18163_v4 = vld [vmem:[#allocation81_spill] sm:$0xff]  ;;  %v18164_v14 = vld [vmem:[#allocation82_spill] sm:$0xff] }
 0xa45   :  { %v6652_v0 = vpop.f32.mrf.mxu2  ;;  %v6701_v28 = vpop.f32.mrf.mxu3 }
 0xa46   :  { %v6653_v59 = vadd.f32 %v6652_v0, %v6604_v61  ;;  %v6556_v38 = vpop.f32.mrf.mxu0  ;;  %v6605_v34 = vpop.f32.mrf.mxu1  ;;  %v18162_v61 = vld [vmem:[#allocation80_spill] sm:$0xff] }
 0xa47   :  { %v6557_v12 = vadd.f32 %v6556_v38, %v15699_v7  ;;  %v11523_v0 = vld [vmem:[%s17695_s7 + $0x2b8] sm:$0xff] }
 0xa48   :  { %v15729_v36 = vadd.f32 %v6701_v28, %v6653_v59  ;;  %7030 = vmatpush.bf16.msrb.mxu2 %v11523_v0 }
 0xa49   :  { %v6606_v32 = vadd.f32 %v6605_v34, %v6557_v12 }
 0xa4d   :  { %v6654_v29 = vpop.f32.mrf.mxu2  ;;  %v6703_v6 = vpop.f32.mrf.mxu3 }
 0xa4e   :  { %v6655_v2 = vadd.f32 %v6654_v29, %v6606_v32  ;;  %v6559_v57 = vpop.f32.mrf.mxu0  ;;  %v6608_v39 = vpop.f32.mrf.mxu1 }
 0xa4f   :  { %v6560_v35 = vadd.f32 %v6559_v57, %v15699_v7  ;;  %v11515_v57 = vld [vmem:[%s17695_s7 + $0x278] sm:$0xff] }
 0xa50   :  { %v15732_v25 = vadd.f32 %v6703_v6, %v6655_v2  ;;  %v11531_v6 = vld [vmem:[%s17695_s7 + $0x2f8] sm:$0xff]  ;;  %6981 = vmatpush.bf16.msrb.mxu1 %v11515_v57 }
 0xa51   :  { %v6609_v62 = vadd.f32 %v6608_v39, %v6560_v35  ;;  %6754 = vmatmul.bf16.gmra.mxu0 %v14895_v40  ;;  %6803 = vmatmul.bf16.gmra.mxu1 %v18162_v61  ;;  %v11507_v40 = vld [vmem:[%s17695_s7 + $0x238] sm:$0xff] }
 0xa52   :  { %6852 = vmatmul.bf16.gmra.mxu2 %v18163_v4  ;;  %6901 = vmatmul.bf16.gmra.mxu3 %v18164_v14 }
 0xa53   :  { %6932 = vmatpush.bf16.msrb.mxu0 %v11507_v40  ;;  %7079 = vmatpush.bf16.msra.mxu3 %v11531_v6 }
 0xa55   :  { %v6657_v28 = vpop.f32.mrf.mxu2  ;;  %v6706_v59 = vpop.f32.mrf.mxu3 }
 0xa56   :  { %v6658_v38 = vadd.f32 %v6657_v28, %v6609_v62  ;;  %v6561_v34 = vpop.f32.mrf.mxu0  ;;  %v6610_v12 = vpop.f32.mrf.mxu1 }
 0xa57   :  { %v6562_v32 = vadd.f32 %v6561_v34, %v15699_v7  ;;  %v18167_v34 = vld [vmem:[#allocation85_spill] sm:$0xff] }
 0xa58   :  { %v15742_v29 = vadd.f32 %v6706_v59, %v6658_v38  ;;  %v18165_v59 = vld [vmem:[#allocation83_spill] sm:$0xff]  ;;  %v18166_v38 = vld [vmem:[#allocation84_spill] sm:$0xff] }
 0xa59   :  { %v6611_v2 = vadd.f32 %v6610_v12, %v6562_v32  ;;  %v18168_v12 = vld [vmem:[#allocation86_spill] sm:$0xff]  ;;  %v11522_v32 = vld [vmem:[%s17695_s7 + $0x2b0] sm:$0xff] }
 0xa5a   :  { %7031 = vmatpush.bf16.msrb.mxu2 %v11522_v32 }
 0xa5d   :  { %v6659_v39 = vpop.f32.mrf.mxu2  ;;  %v6708_v35 = vpop.f32.mrf.mxu3 }
 0xa5e   :  { %v6660_v62 = vadd.f32 %v6659_v39, %v6611_v2  ;;  %v6564_v61 = vpop.f32.mrf.mxu0  ;;  %v6613_v4 = vpop.f32.mrf.mxu1 }
 0xa5f   :  { %v6565_v14 = vadd.f32 %v6564_v61, %v15699_v7  ;;  %v11506_v61 = vld [vmem:[%s17695_s7 + $0x230] sm:$0xff] }
 0xa60   :  { %v15754_v0 = vadd.f32 %v6708_v35, %v6660_v62  ;;  %6933 = vmatpush.bf16.msrb.mxu0 %v11506_v61  ;;  %v11521_v61 = vld [vmem:[%s17695_s7 + $0x2a8] sm:$0xff] }
 0xa61   :  { %v6614_v28 = vadd.f32 %v6613_v4, %v6565_v14  ;;  %6759 = vmatmul.bf16.gmra.mxu0 %v18165_v59  ;;  %6808 = vmatmul.bf16.gmra.mxu1 %v18166_v38  ;;  %v11530_v4 = vld [vmem:[%s17695_s7 + $0x2f0] sm:$0xff] }
 0xa62   :  { %6857 = vmatmul.bf16.gmra.mxu2 %v18167_v34  ;;  %6906 = vmatmul.bf16.gmra.mxu3 %v18168_v12  ;;  %v11514_v59 = vld [vmem:[%s17695_s7 + $0x270] sm:$0xff] }
 0xa63   :  { %7080 = vmatpush.bf16.msra.mxu3 %v11530_v4  ;;  %6982 = vmatpush.bf16.msrb.mxu1 %v11514_v59 }
 0xa64   :  { %7032 = vmatpush.bf16.msrb.mxu2 %v11521_v61 }
 0xa65   :  { %v6662_v40 = vpop.f32.mrf.mxu2  ;;  %v6711_v6 = vpop.f32.mrf.mxu3 }
 0xa66   :  { %v6663_v2 = vadd.f32 %v6662_v40, %v6614_v28  ;;  %v6566_v57 = vpop.f32.mrf.mxu0  ;;  %v6615_v39 = vpop.f32.mrf.mxu1 }
 0xa67   :  { %v6567_v35 = vadd.f32 %v6566_v57, %v15699_v7  ;;  %v18169_v57 = vld [vmem:[#allocation87_spill] sm:$0xff] }
 0xa68   :  { %v15764_v62 = vadd.f32 %v6711_v6, %v6663_v2 }
 0xa69   :  { %v6616_v14 = vadd.f32 %v6615_v39, %v6567_v35  ;;  %v18170_v39 = vld [vmem:[#allocation88_spill] sm:$0xff]  ;;  %v18171_v35 = vld [vmem:[#allocation89_spill] sm:$0xff] }
 0xa6d   :  { %v6664_v28 = vpop.f32.mrf.mxu2  ;;  %v6713_v38 = vpop.f32.mrf.mxu3 }
 0xa6e   :  { %v6665_v34 = vadd.f32 %v6664_v28, %v6616_v14  ;;  %v6569_v12 = vpop.f32.mrf.mxu0  ;;  %v6618_v32 = vpop.f32.mrf.mxu1 }
 0xa6f   :  { %v6570_v40 = vadd.f32 %v6569_v12, %v15699_v7 }
 0xa70   :  { %v15776_v6 = vadd.f32 %v6713_v38, %v6665_v34 }
 0xa71   :  { %v6619_v2 = vadd.f32 %v6618_v32, %v6570_v40  ;;  %6764 = vmatmul.bf16.gmra.mxu0 %v18169_v57  ;;  %6813 = vmatmul.bf16.gmra.mxu1 %v18170_v39  ;;  %v11505_v32 = vld [vmem:[%s17695_s7 + $0x228] sm:$0xff] }
 0xa72   :  { %6862 = vmatmul.bf16.gmra.mxu2 %v18171_v35  ;;  %6911 = vmatmul.bf16.gmra.mxu3 %v18172_v9  ;;  %v11529_v9 = vld [vmem:[%s17695_s7 + $0x2e8] sm:$0xff] }
 0xa73   :  { %v11513_v57 = vld [vmem:[%s17695_s7 + $0x268] sm:$0xff]  ;;  %6934 = vmatpush.bf16.msrb.mxu0 %v11505_v32  ;;  %7081 = vmatpush.bf16.msra.mxu3 %v11529_v9 }
 0xa74   :  { %6983 = vmatpush.bf16.msrb.mxu1 %v11513_v57  ;;  %v18174_v57 = vld [vmem:[#allocation92_spill] sm:$0xff] }
 0xa75   :  { %v6667_v4 = vpop.f32.mrf.mxu2  ;;  %v6716_v14 = vpop.f32.mrf.mxu3 }
 0xa76   :  { %v6668_v59 = vadd.f32 %v6667_v4, %v6619_v2  ;;  %v6571_v28 = vpop.f32.mrf.mxu0  ;;  %v6620_v38 = vpop.f32.mrf.mxu1 }
 0xa77   :  { %v6572_v34 = vadd.f32 %v6571_v28, %v15699_v7 }
 0xa78   :  { %v15786_v12 = vadd.f32 %v6716_v14, %v6668_v59  ;;  %v11504_v14 = vld [vmem:[%s17695_s7 + $0x220] sm:$0xff] }
 0xa79   :  { %v6621_v40 = vadd.f32 %v6620_v38, %v6572_v34  ;;  %v11512_v59 = vld [vmem:[%s17695_s7 + $0x260] sm:$0xff]  ;;  %6935 = vmatpush.bf16.msrb.mxu0 %v11504_v14 }
 0xa7a   :  { %v11520_v38 = vld [vmem:[%s17695_s7 + $0x2a0] sm:$0xff]  ;;  %6984 = vmatpush.bf16.msrb.mxu1 %v11512_v59 }
 0xa7b   :  { %v11528_v34 = vld [vmem:[%s17695_s7 + $0x2e0] sm:$0xff]  ;;  %7033 = vmatpush.bf16.msrb.mxu2 %v11520_v38  ;;  %v11502_v38 = vld [vmem:[%s17695_s7 + $0x210] sm:$0xff] }
 0xa7c   :  { %7082 = vmatpush.bf16.msra.mxu3 %v11528_v34  ;;  %v11510_v34 = vld [vmem:[%s17695_s7 + $0x250] sm:$0xff] }
 0xa7d   :  { %v6669_v2 = vpop.f32.mrf.mxu2  ;;  %v6718_v39 = vpop.f32.mrf.mxu3  ;;  %6936 = vmatpush.bf16.msrb.mxu0 %v11503_v15  ;;  %v11518_v15 = vld [vmem:[%s17695_s7 + $0x290] sm:$0xff] }
 0xa7e   :  { %v6670_v35 = vadd.f32 %v6669_v2, %v6621_v40  ;;  %v6574_v61 = vpop.f32.mrf.mxu0  ;;  %v6623_v4 = vpop.f32.mrf.mxu1  ;;  %v18173_v40 = vld [vmem:[#allocation91_spill] sm:$0xff]  ;;  %v18175_v2 = vld [vmem:[#allocation93_spill] sm:$0xff] }
 0xa7f   :  { %v6575_v28 = vadd.f32 %v6574_v61, %v15699_v7  ;;  %v18176_v61 = vld [vmem:[#allocation94_spill] sm:$0xff] }
 0xa80   :  { %v15810_v32 = vadd.f32 %v6718_v39, %v6670_v35  ;;  %v11511_v39 = vld [vmem:[%s17695_s7 + $0x258] sm:$0xff] }
 0xa81   :  { %v6624_v9 = vadd.f32 %v6623_v4, %v6575_v28  ;;  %6769 = vmatmul.bf16.gmra.mxu0 %v18173_v40  ;;  %6818 = vmatmul.bf16.gmra.mxu1 %v18174_v57  ;;  %v11519_v35 = vld [vmem:[%s17695_s7 + $0x298] sm:$0xff] }
 0xa82   :  { %6867 = vmatmul.bf16.gmra.mxu2 %v18175_v2  ;;  %6916 = vmatmul.bf16.gmra.mxu3 %v18176_v61  ;;  %v11527_v4 = vld [vmem:[%s17695_s7 + $0x2d8] sm:$0xff] }
 0xa83   :  { %6985 = vmatpush.bf16.msrb.mxu1 %v11511_v39  ;;  %7034 = vmatpush.bf16.msrb.mxu2 %v11519_v35  ;;  %v11509_v35 = vld [vmem:[%s17695_s7 + $0x248] sm:$0xff] }
 0xa84   :  { %7083 = vmatpush.bf16.msra.mxu3 %v11527_v4  ;;  %6937 = vmatpush.bf16.msrb.mxu0 %v11502_v38  ;;  %v11517_v4 = vld [vmem:[%s17695_s7 + $0x288] sm:$0xff] }
 0xa85   :  { %v6672_v14 = vpop.f32.mrf.mxu2  ;;  %v6721_v59 = vpop.f32.mrf.mxu3 }
 0xa86   :  { %v6673_v28 = vadd.f32 %v6672_v14, %v6624_v9  ;;  %v6576_v40 = vpop.f32.mrf.mxu0  ;;  %v6625_v57 = vpop.f32.mrf.mxu1  ;;  %v11526_v9 = vld [vmem:[%s17695_s7 + $0x2d0] sm:$0xff]  ;;  %v11501_v14 = vld [vmem:[%s17695_s7 + $0x208] sm:$0xff] }
 0xa87   :  { %v6577_v2 = vadd.f32 %v6576_v40, %v15699_v7  ;;  %6986 = vmatpush.bf16.msrb.mxu1 %v11510_v34  ;;  %7035 = vmatpush.bf16.msrb.mxu2 %v11518_v15  ;;  %v11508_v15 = vld [vmem:[%s17695_s7 + $0x240] sm:$0xff] }
 0xa88   :  { %v15841_v61 = vadd.f32 %v6721_v59, %v6673_v28  ;;  %7084 = vmatpush.bf16.msra.mxu3 %v11526_v9  ;;  %v11525_v59 = vld [vmem:[%s17695_s7 + $0x2c8] sm:$0xff]  ;;  %6938 = vmatpush.bf16.msrb.mxu0 %v11501_v14  ;;  %v11516_v14 = vld [vmem:[%s17695_s7 + $0x280] sm:$0xff] }
 0xa89   :  { %v6626_v39 = vadd.f32 %v6625_v57, %v6577_v2  ;;  %v11500_v2 = vld [vmem:[%s17695_s7 + $0x200] sm:$0xff] }
 0xa8b   :  { %6987 = vmatpush.bf16.msrb.mxu1 %v11509_v35  ;;  %7036 = vmatpush.bf16.msrb.mxu2 %v11517_v4  ;;  %v18180_v4 = vld [vmem:[#allocation98_spill] sm:$0xff] }
 0xa8c   :  { %7085 = vmatpush.bf16.msra.mxu3 %v11525_v59  ;;  %6939 = vmatpush.bf16.msrb.mxu0 %v11500_v2 }
 0xa8d   :  { %v6674_v28 = vpop.f32.mrf.mxu2  ;;  %v6723_v40 = vpop.f32.mrf.mxu3 }
 0xa8e   :  { %v6675_v57 = vadd.f32 %v6674_v28, %v6626_v39  ;;  %v6579_v38 = vpop.f32.mrf.mxu0  ;;  %v6628_v34 = vpop.f32.mrf.mxu1  ;;  %v11524_v39 = vld [vmem:[%s17695_s7 + $0x2c0] sm:$0xff] }
 0xa8f   :  { %v6580_v9 = vadd.f32 %v6579_v38, %v15699_v7  ;;  %6988 = vmatpush.bf16.msrb.mxu1 %v11508_v15  ;;  %v18179_v38 = vld [vmem:[#allocation97_spill] sm:$0xff]  ;;  %7037 = vmatpush.bf16.msrb.mxu2 %v11516_v14 }
 0xa90   :  { %v15868_v35 = vadd.f32 %v6723_v40, %v6675_v57  ;;  %7086 = vmatpush.bf16.msra.mxu3 %v11524_v39  ;;  %v18181_v39 = vld [vmem:[#allocation99_spill] sm:$0xff] }
 0xa91   :  { %v6629_v28 = vadd.f32 %v6628_v34, %v6580_v9  ;;  %6774 = vmatmul.bf16.gmra.mxu0 %v18177_v46  ;;  %6823 = vmatmul.bf16.gmra.mxu1 %v18178_v49 }
 0xa92   :  { %6872 = vmatmul.bf16.gmra.mxu2 %v18179_v38  ;;  %6921 = vmatmul.bf16.gmra.mxu3 %v18180_v4 }
 0xa95   :  { %v6677_v59 = vpop.f32.mrf.mxu2  ;;  %v6726_v18 = vpop.f32.mrf.mxu3 }
 0xa96   :  { %v6678_v11 = vadd.f32 %v6677_v59, %v6629_v28  ;;  %v6581_v55 = vpop.f32.mrf.mxu0  ;;  %v6630_v56 = vpop.f32.mrf.mxu1  ;;  %v18182_v28 = vld [vmem:[#allocation100_spill] sm:$0xff]  ;;  %v18183_v59 = vld [vmem:[#allocation101_spill] sm:$0xff] }
 0xa97   :  { %v6582_v40 = vadd.f32 %v6581_v55, %v15699_v7  ;;  %v18184_v55 = vld [vmem:[#allocation102_spill] sm:$0xff] }
 0xa98   :  { %v15875_v57 = vadd.f32 %v6726_v18, %v6678_v11 }
 0xa99   :  { %v6631_v34 = vadd.f32 %v6630_v56, %v6582_v40 }
 0xa9d   :  { %v6679_v2 = vpop.f32.mrf.mxu2  ;;  %v6728_v46 = vpop.f32.mrf.mxu3 }
 0xa9e   :  { %v6680_v15 = vadd.f32 %v6679_v2, %v6631_v34  ;;  %v6584_v49 = vpop.f32.mrf.mxu0  ;;  %v6633_v9 = vpop.f32.mrf.mxu1 }
 0xa9f   :  { %v6585_v38 = vadd.f32 %v6584_v49, %v15699_v7 }
 0xaa0   :  { %v15878_v4 = vadd.f32 %v6728_v46, %v6680_v15 }
 0xaa1   :  { %v6634_v14 = vadd.f32 %v6633_v9, %v6585_v38  ;;  %6779 = vmatmul.bf16.gmra.mxu0 %v18181_v39  ;;  %6828 = vmatmul.bf16.gmra.mxu1 %v18182_v28 }
 0xaa2   :  { %6877 = vmatmul.bf16.gmra.mxu2 %v18183_v59  ;;  %6926 = vmatmul.bf16.gmra.mxu3 %v18184_v55 }
 0xaa5   :  { %v6682_v11 = vpop.f32.mrf.mxu2  ;;  %v6731_v56 = vpop.f32.mrf.mxu3 }
 0xaa6   :  { %v6683_v18 = vadd.f32 %v6682_v11, %v6634_v14  ;;  %v6586_v40 = vpop.f32.mrf.mxu0  ;;  %v6635_v34 = vpop.f32.mrf.mxu1  ;;  %v18185_v14 = vld [vmem:[#allocation103_spill] sm:$0xff]  ;;  %v18186_v11 = vld [vmem:[#allocation104_spill] sm:$0xff] }
 0xaa7   :  { %v6587_v2 = vadd.f32 %v6586_v40, %v15699_v7  ;;  %v18187_v7 = vld [vmem:[#allocation105_spill] sm:$0xff] }
 0xaa8   :  { %v15885_v27 = vadd.f32 %v6731_v56, %v6683_v18 }
 0xaa9   :  { %v6636_v46 = vadd.f32 %v6635_v34, %v6587_v2 }
 0xaad   :  { %v6684_v15 = vpop.f32.mrf.mxu2  ;;  %v6733_v49 = vpop.f32.mrf.mxu3 }
 0xaae   :  { %v6685_v9 = vadd.f32 %v6684_v15, %v6636_v46  ;;  %v6745_v38 = vpop.f32.mrf.mxu0  ;;  %v6794_v39 = vpop.f32.mrf.mxu1 }
 0xaaf   :  { %v6746_v28 = vadd.f32 %v6745_v38, %v15719_v17 }
 0xab0   :  { %v15888_v59 = vadd.f32 %v6733_v49, %v6685_v9 }
 0xab1   :  { %v6795_v55 = vadd.f32 %v6794_v39, %v6746_v28  ;;  %6940 = vmatmul.bf16.vlgmr.msrb.gmra.mxu0 %v15080_v21  ;;  %6989 = vmatmul.bf16.vlgmr.msrb.gmra.mxu1 %v18185_v14 }
 0xab2   :  { %7038 = vmatmul.bf16.vlgmr.msrb.gmra.mxu2 %v18186_v11  ;;  %7087 = vmatmul.bf16.vlgmr.msra.gmra.mxu3 %v18187_v7  ;;  %v18189_v7 = vld [vmem:[#allocation107_spill] sm:$0xff] }
 0xab5   :  { %v6843_v56 = vpop.f32.mrf.mxu2  ;;  %v6892_v18 = vpop.f32.mrf.mxu3 }
 0xab6   :  { %v6844_v40 = vadd.f32 %v6843_v56, %v6795_v55  ;;  %v6747_v34 = vpop.f32.mrf.mxu0  ;;  %v6796_v2 = vpop.f32.mrf.mxu1  ;;  %v18188_v55 = vld [vmem:[#allocation106_spill] sm:$0xff] }
 0xab7   :  { %v6748_v46 = vadd.f32 %v6747_v34, %v15722_v31  ;;  %v18190_v31 = vld [vmem:[#allocation108_spill] sm:$0xff] }
 0xab8   :  { %v15895_v15 = vadd.f32 %v6892_v18, %v6844_v40 }
 0xab9   :  { %v6797_v17 = vadd.f32 %v6796_v2, %v6748_v46 }
 0xabd   :  { %v6845_v49 = vpop.f32.mrf.mxu2  ;;  %v6894_v9 = vpop.f32.mrf.mxu3 }
 0xabe   :  { %v6846_v38 = vadd.f32 %v6845_v49, %v6797_v17  ;;  %v6750_v21 = vpop.f32.mrf.mxu0  ;;  %v6799_v39 = vpop.f32.mrf.mxu1 }
 0xabf   :  { %v6751_v28 = vadd.f32 %v6750_v21, %v15729_v36 }
 0xac0   :  { %v15898_v14 = vadd.f32 %v6894_v9, %v6846_v38 }
 0xac1   :  { %v6800_v11 = vadd.f32 %v6799_v39, %v6751_v28  ;;  %6945 = vmatmul.bf16.gmra.mxu0 %v15104_v58  ;;  %6994 = vmatmul.bf16.gmra.mxu1 %v18188_v55 }
 0xac2   :  { %7043 = vmatmul.bf16.gmra.mxu2 %v18189_v7  ;;  %7092 = vmatmul.bf16.gmra.mxu3 %v18190_v31  ;;  %v18192_v7 = vld [vmem:[#allocation110_spill] sm:$0xff]  ;;  %v11555_v31 = vld [vmem:[%s17695_s7 + $0x3b8] sm:$0xff] }
 0xac3   :  { %7226 = vmatpush.bf16.msra.mxu2 %v11555_v31  ;;  %v18195_v31 = vld [vmem:[#allocation113_spill] sm:$0xff] }
 0xac5   :  { %v6848_v56 = vpop.f32.mrf.mxu2  ;;  %v6897_v18 = vpop.f32.mrf.mxu3 }
 0xac6   :  { %v6849_v40 = vadd.f32 %v6848_v56, %v6800_v11  ;;  %v6752_v34 = vpop.f32.mrf.mxu0  ;;  %v6801_v2 = vpop.f32.mrf.mxu1  ;;  %v18191_v11 = vld [vmem:[#allocation109_spill] sm:$0xff] }
 0xac7   :  { %v6753_v46 = vadd.f32 %v6752_v34, %v15732_v25  ;;  %v18193_v25 = vld [vmem:[#allocation111_spill] sm:$0xff] }
 0xac8   :  { %v15905_v17 = vadd.f32 %v6897_v18, %v6849_v40 }
 0xac9   :  { %v6802_v36 = vadd.f32 %v6801_v2, %v6753_v46 }
 0xacd   :  { %v6850_v49 = vpop.f32.mrf.mxu2  ;;  %v6899_v9 = vpop.f32.mrf.mxu3 }
 0xace   :  { %v6851_v38 = vadd.f32 %v6850_v49, %v6802_v36  ;;  %v6755_v58 = vpop.f32.mrf.mxu0  ;;  %v6804_v21 = vpop.f32.mrf.mxu1  ;;  %v11563_v36 = vld [vmem:[%s17695_s7 + $0x3f8] sm:$0xff] }
 0xacf   :  { %v6756_v39 = vadd.f32 %v6755_v58, %v15742_v29  ;;  %7275 = vmatpush.bf16.msrb.mxu3 %v11563_v36 }
 0xad0   :  { %v15908_v28 = vadd.f32 %v6899_v9, %v6851_v38  ;;  %v11547_v9 = vld [vmem:[%s17695_s7 + $0x378] sm:$0xff] }
 0xad1   :  { %v6805_v55 = vadd.f32 %v6804_v21, %v6756_v39  ;;  %6950 = vmatmul.bf16.gmra.mxu0 %v15140_v41  ;;  %6999 = vmatmul.bf16.gmra.mxu1 %v18191_v11  ;;  %v11539_v41 = vld [vmem:[%s17695_s7 + $0x338] sm:$0xff] }
 0xad2   :  { %7048 = vmatmul.bf16.gmra.mxu2 %v18192_v7  ;;  %7097 = vmatmul.bf16.gmra.mxu3 %v18193_v25  ;;  %v18194_v25 = vld [vmem:[#allocation112_spill] sm:$0xff] }
 0xad3   :  { %7128 = vmatpush.bf16.msra.mxu0 %v11539_v41  ;;  %7177 = vmatpush.bf16.msra.mxu1 %v11547_v9 }
 0xad5   :  { %v6853_v56 = vpop.f32.mrf.mxu2  ;;  %v6902_v18 = vpop.f32.mrf.mxu3 }
 0xad6   :  { %v6854_v40 = vadd.f32 %v6853_v56, %v6805_v55  ;;  %v6757_v29 = vpop.f32.mrf.mxu0  ;;  %v6806_v34 = vpop.f32.mrf.mxu1  ;;  %v11554_v56 = vld [vmem:[%s17695_s7 + $0x3b0] sm:$0xff] }
 0xad7   :  { %v6758_v2 = vadd.f32 %v6757_v29, %v15754_v0  ;;  %7227 = vmatpush.bf16.msra.mxu2 %v11554_v56  ;;  %v18199_v56 = vld [vmem:[#allocation117_spill] sm:$0xff] }
 0xad8   :  { %v15918_v46 = vadd.f32 %v6902_v18, %v6854_v40 }
 0xad9   :  { %v6807_v49 = vadd.f32 %v6806_v34, %v6758_v2 }
 0xadd   :  { %v6855_v38 = vpop.f32.mrf.mxu2  ;;  %v6904_v0 = vpop.f32.mrf.mxu3 }
 0xade   :  { %v6856_v58 = vadd.f32 %v6855_v38, %v6807_v49  ;;  %v6760_v21 = vpop.f32.mrf.mxu0  ;;  %v6809_v39 = vpop.f32.mrf.mxu1  ;;  %v11546_v49 = vld [vmem:[%s17695_s7 + $0x370] sm:$0xff] }
 0xadf   :  { %v6761_v55 = vadd.f32 %v6760_v21, %v15764_v62  ;;  %7178 = vmatpush.bf16.msra.mxu1 %v11546_v49 }
 0xae0   :  { %v15930_v11 = vadd.f32 %v6904_v0, %v6856_v58 }
 0xae1   :  { %v6810_v7 = vadd.f32 %v6809_v39, %v6761_v55  ;;  %6955 = vmatmul.bf16.gmra.mxu0 %v15176_v22  ;;  %7004 = vmatmul.bf16.gmra.mxu1 %v15178_v42  ;;  %v11538_v22 = vld [vmem:[%s17695_s7 + $0x330] sm:$0xff] }
 0xae2   :  { %7053 = vmatmul.bf16.gmra.mxu2 %v18194_v25  ;;  %7102 = vmatmul.bf16.gmra.mxu3 %v18195_v31  ;;  %v11562_v42 = vld [vmem:[%s17695_s7 + $0x3f0] sm:$0xff]  ;;  %v18198_v31 = vld [vmem:[#allocation116_spill] sm:$0xff] }
 0xae3   :  { %7129 = vmatpush.bf16.msra.mxu0 %v11538_v22  ;;  %7276 = vmatpush.bf16.msrb.mxu3 %v11562_v42  ;;  %v18197_v25 = vld [vmem:[#allocation115_spill] sm:$0xff]  ;;  %v11537_v42 = vld [vmem:[%s17695_s7 + $0x328] sm:$0xff] }
 0xae5   :  { %v6858_v18 = vpop.f32.mrf.mxu2  ;;  %v6907_v40 = vpop.f32.mrf.mxu3 }
 0xae6   :  { %v6859_v29 = vadd.f32 %v6858_v18, %v6810_v7  ;;  %v6762_v62 = vpop.f32.mrf.mxu0  ;;  %v6811_v34 = vpop.f32.mrf.mxu1  ;;  %v18196_v7 = vld [vmem:[#allocation114_spill] sm:$0xff] }
 0xae7   :  { %v6763_v2 = vadd.f32 %v6762_v62, %v15776_v6  ;;  %v11553_v18 = vld [vmem:[%s17695_s7 + $0x3a8] sm:$0xff]  ;;  %7130 = vmatpush.bf16.msra.mxu0 %v11537_v42 }
 0xae8   :  { %v15940_v41 = vadd.f32 %v6907_v40, %v6859_v29  ;;  %7228 = vmatpush.bf16.msra.mxu2 %v11553_v18 }
 0xae9   :  { %v6812_v36 = vadd.f32 %v6811_v34, %v6763_v2 }
 0xaed   :  { %v6860_v9 = vpop.f32.mrf.mxu2  ;;  %v6909_v6 = vpop.f32.mrf.mxu3 }
 0xaee   :  { %v6861_v38 = vadd.f32 %v6860_v9, %v6812_v36  ;;  %v6765_v0 = vpop.f32.mrf.mxu0  ;;  %v6814_v58 = vpop.f32.mrf.mxu1  ;;  %v11561_v36 = vld [vmem:[%s17695_s7 + $0x3e8] sm:$0xff] }
 0xaef   :  { %v6766_v21 = vadd.f32 %v6765_v0, %v15786_v12  ;;  %v11545_v9 = vld [vmem:[%s17695_s7 + $0x368] sm:$0xff]  ;;  %7277 = vmatpush.bf16.msrb.mxu3 %v11561_v36 }
 0xaf0   :  { %v15952_v39 = vadd.f32 %v6909_v6, %v6861_v38  ;;  %7179 = vmatpush.bf16.msra.mxu1 %v11545_v9 }
 0xaf1   :  { %v6815_v55 = vadd.f32 %v6814_v58, %v6766_v21  ;;  %6960 = vmatmul.bf16.gmra.mxu0 %v18196_v7  ;;  %7009 = vmatmul.bf16.gmra.mxu1 %v18197_v25  ;;  %v11536_v21 = vld [vmem:[%s17695_s7 + $0x320] sm:$0xff] }
 0xaf2   :  { %7058 = vmatmul.bf16.gmra.mxu2 %v18198_v31  ;;  %7107 = vmatmul.bf16.gmra.mxu3 %v18199_v56  ;;  %v11552_v25 = vld [vmem:[%s17695_s7 + $0x3a0] sm:$0xff] }
 0xaf3   :  { %v11560_v31 = vld [vmem:[%s17695_s7 + $0x3e0] sm:$0xff]  ;;  %7131 = vmatpush.bf16.msra.mxu0 %v11536_v21  ;;  %7229 = vmatpush.bf16.msra.mxu2 %v11552_v25  ;;  %v11549_v25 = vld [vmem:[%s17695_s7 + $0x388] sm:$0xff] }
 0xaf4   :  { %7278 = vmatpush.bf16.msrb.mxu3 %v11560_v31  ;;  %v11557_v31 = vld [vmem:[%s17695_s7 + $0x3c8] sm:$0xff] }
 0xaf5   :  { %v6863_v40 = vpop.f32.mrf.mxu2  ;;  %v6912_v29 = vpop.f32.mrf.mxu3 }
 0xaf6   :  { %v6864_v62 = vadd.f32 %v6863_v40, %v6815_v55  ;;  %v6767_v12 = vpop.f32.mrf.mxu0  ;;  %v6816_v34 = vpop.f32.mrf.mxu1  ;;  %v11544_v55 = vld [vmem:[%s17695_s7 + $0x360] sm:$0xff]  ;;  %v18200_v40 = vld [vmem:[#allocation118_spill] sm:$0xff] }
 0xaf7   :  { %v6768_v2 = vadd.f32 %v6767_v12, %v15810_v32  ;;  %7180 = vmatpush.bf16.msra.mxu1 %v11544_v55  ;;  %v11543_v12 = vld [vmem:[%s17695_s7 + $0x358] sm:$0xff] }
 0xaf8   :  { %v15962_v22 = vadd.f32 %v6912_v29, %v6864_v62  ;;  %v18201_v29 = vld [vmem:[#allocation119_spill] sm:$0xff]  ;;  %v11535_v62 = vld [vmem:[%s17695_s7 + $0x318] sm:$0xff] }
 0xaf9   :  { %v6817_v49 = vadd.f32 %v6816_v34, %v6768_v2  ;;  %v11559_v34 = vld [vmem:[%s17695_s7 + $0x3d8] sm:$0xff]  ;;  %7132 = vmatpush.bf16.msra.mxu0 %v11535_v62 }
 0xafa   :  { %7279 = vmatpush.bf16.msrb.mxu3 %v11559_v34 }
 0xafb   :  { %7181 = vmatpush.bf16.msra.mxu1 %v11543_v12  ;;  %v11532_v12 = vld [vmem:[%s17695_s7 + $0x300] sm:$0xff] }
 0xafd   :  { %v6865_v6 = vpop.f32.mrf.mxu2  ;;  %v6914_v32 = vpop.f32.mrf.mxu3 }
 0xafe   :  { %v6866_v38 = vadd.f32 %v6865_v6, %v6817_v49  ;;  %v6770_v0 = vpop.f32.mrf.mxu0  ;;  %v6819_v58 = vpop.f32.mrf.mxu1  ;;  %v11534_v6 = vld [vmem:[%s17695_s7 + $0x310] sm:$0xff] }
 0xaff   :  { %v6771_v7 = vadd.f32 %v6770_v0, %v15841_v61  ;;  %v18202_v61 = vld [vmem:[#allocation120_spill] sm:$0xff]  ;;  %v11550_v0 = vld [vmem:[%s17695_s7 + $0x390] sm:$0xff]  ;;  %7133 = vmatpush.bf16.msra.mxu0 %v11534_v6 }
 0xb00   :  { %v15986_v56 = vadd.f32 %v6914_v32, %v6866_v38  ;;  %v11542_v32 = vld [vmem:[%s17695_s7 + $0x350] sm:$0xff] }
 0xb01   :  { %v6820_v18 = vadd.f32 %v6819_v58, %v6771_v7  ;;  %6965 = vmatmul.bf16.gmra.mxu0 %v15284_v30  ;;  %7014 = vmatmul.bf16.gmra.mxu1 %v18200_v40  ;;  %v11551_v30 = vld [vmem:[%s17695_s7 + $0x398] sm:$0xff]  ;;  %v11558_v58 = vld [vmem:[%s17695_s7 + $0x3d0] sm:$0xff]  ;;  %v11533_v7 = vld [vmem:[%s17695_s7 + $0x308] sm:$0xff] }
 0xb02   :  { %7063 = vmatmul.bf16.gmra.mxu2 %v18201_v29  ;;  %7112 = vmatmul.bf16.gmra.mxu3 %v18202_v61  ;;  %v18205_v6 = vld [vmem:[#allocation123_spill] sm:$0xff] }
 0xb03   :  { %7230 = vmatpush.bf16.msra.mxu2 %v11551_v30  ;;  %7182 = vmatpush.bf16.msra.mxu1 %v11542_v32  ;;  %v11540_v30 = vld [vmem:[%s17695_s7 + $0x340] sm:$0xff] }
 0xb04   :  { %7280 = vmatpush.bf16.msrb.mxu3 %v11558_v58  ;;  %7134 = vmatpush.bf16.msra.mxu0 %v11533_v7 }
 0xb05   :  { %v6868_v2 = vpop.f32.mrf.mxu2  ;;  %v6917_v42 = vpop.f32.mrf.mxu3 }
 0xb06   :  { %v6869_v36 = vadd.f32 %v6868_v2, %v6820_v18  ;;  %v6772_v49 = vpop.f32.mrf.mxu0  ;;  %v6821_v9 = vpop.f32.mrf.mxu1  ;;  %v11548_v2 = vld [vmem:[%s17695_s7 + $0x380] sm:$0xff] }
 0xb07   :  { %v6773_v38 = vadd.f32 %v6772_v49, %v15868_v35  ;;  %v11541_v35 = vld [vmem:[%s17695_s7 + $0x348] sm:$0xff]  ;;  %7231 = vmatpush.bf16.msra.mxu2 %v11550_v0 }
 0xb08   :  { %v16017_v21 = vadd.f32 %v6917_v42, %v6869_v36  ;;  %7183 = vmatpush.bf16.msra.mxu1 %v11541_v35  ;;  %7281 = vmatpush.bf16.msrb.mxu3 %v11557_v31  ;;  %v11556_v42 = vld [vmem:[%s17695_s7 + $0x3c0] sm:$0xff] }
 0xb09   :  { %v6822_v55 = vadd.f32 %v6821_v9, %v6773_v38  ;;  %7135 = vmatpush.bf16.msra.mxu0 %v11532_v12  ;;  %v18203_v9 = vld [vmem:[#allocation121_spill] sm:$0xff] }
 0xb0b   :  { %7232 = vmatpush.bf16.msra.mxu2 %v11549_v25 }
 0xb0c   :  { %7184 = vmatpush.bf16.msra.mxu1 %v11540_v30  ;;  %7282 = vmatpush.bf16.msrb.mxu3 %v11556_v42 }
 0xb0d   :  { %v6870_v18 = vpop.f32.mrf.mxu2  ;;  %v6919_v40 = vpop.f32.mrf.mxu3 }
 0xb0e   :  { %v6871_v29 = vadd.f32 %v6870_v18, %v6822_v55  ;;  %v6775_v61 = vpop.f32.mrf.mxu0  ;;  %v6824_v62 = vpop.f32.mrf.mxu1 }
 0xb0f   :  { %v6776_v34 = vadd.f32 %v6775_v61, %v15875_v57  ;;  %v18204_v57 = vld [vmem:[#allocation122_spill] sm:$0xff]  ;;  %7233 = vmatpush.bf16.msra.mxu2 %v11548_v2 }
 0xb10   :  { %v16044_v36 = vadd.f32 %v6919_v40, %v6871_v29 }
 0xb11   :  { %v6825_v49 = vadd.f32 %v6824_v62, %v6776_v34  ;;  %6970 = vmatmul.bf16.gmra.mxu0 %v15320_v33  ;;  %7019 = vmatmul.bf16.gmra.mxu1 %v18203_v9 }
 0xb12   :  { %7068 = vmatmul.bf16.gmra.mxu2 %v18204_v57  ;;  %7117 = vmatmul.bf16.gmra.mxu3 %v18205_v6 }
 0xb15   :  { %v6873_v32 = vpop.f32.mrf.mxu2  ;;  %v6922_v38 = vpop.f32.mrf.mxu3 }
 0xb16   :  { %v6874_v0 = vadd.f32 %v6873_v32, %v6825_v49  ;;  %v6777_v58 = vpop.f32.mrf.mxu0  ;;  %v6826_v55 = vpop.f32.mrf.mxu1 }
 0xb17   :  { %v6778_v7 = vadd.f32 %v6777_v58, %v15878_v4 }
 0xb18   :  { %v16051_v35 = vadd.f32 %v6922_v38, %v6874_v0 }
 0xb19   :  { %v6827_v25 = vadd.f32 %v6826_v55, %v6778_v7 }
 0xb1d   :  { %v6875_v31 = vpop.f32.mrf.mxu2  ;;  %v6924_v33 = vpop.f32.mrf.mxu3 }
 0xb1e   :  { %v6876_v18 = vadd.f32 %v6875_v31, %v6827_v25  ;;  %v6780_v40 = vpop.f32.mrf.mxu0  ;;  %v6829_v29 = vpop.f32.mrf.mxu1 }
 0xb1f   :  { %v6781_v61 = vadd.f32 %v6780_v40, %v15885_v27 }
 0xb20   :  { %v16054_v62 = vadd.f32 %v6924_v33, %v6876_v18 }
 0xb21   :  { %v6830_v12 = vadd.f32 %v6829_v29, %v6781_v61  ;;  %6975 = vmatmul.bf16.gmra.mxu0 %v15360_v3  ;;  %7024 = vmatmul.bf16.gmra.mxu1 %v15362_v19 }
 0xb22   :  { %7073 = vmatmul.bf16.gmra.mxu2 %v15374_v54  ;;  %7122 = vmatmul.bf16.gmra.mxu3 %v15376_v10 }
 0xb25   :  { %v6878_v4 = vpop.f32.mrf.mxu2  ;;  %v6927_v30 = vpop.f32.mrf.mxu3 }
 0xb26   :  { %v6879_v34 = vadd.f32 %v6878_v4, %v6830_v12  ;;  %v6782_v2 = vpop.f32.mrf.mxu0  ;;  %v6831_v42 = vpop.f32.mrf.mxu1 }
 0xb27   :  { %v6783_v49 = vadd.f32 %v6782_v2, %v15888_v59 }
 0xb28   :  { %v16061_v9 = vadd.f32 %v6927_v30, %v6879_v34 }
 0xb29   :  { %v6832_v27 = vadd.f32 %v6831_v42, %v6783_v49 }
 0xb2d   :  { %v6880_v57 = vpop.f32.mrf.mxu2  ;;  %v6929_v6 = vpop.f32.mrf.mxu3 }
 0xb2e   :  { %v6881_v32 = vadd.f32 %v6880_v57, %v6832_v27  ;;  %v6941_v3 = vpop.f32.mrf.mxu0  ;;  %v6990_v38 = vpop.f32.mrf.mxu1 }
 0xb2f   :  { %v6942_v19 = vadd.f32 %v6941_v3, %v15895_v15 }
 0xb30   :  { %v16064_v54 = vadd.f32 %v6929_v6, %v6881_v32 }
 0xb31   :  { %v6991_v10 = vadd.f32 %v6990_v38, %v6942_v19  ;;  %7136 = vmatmul.bf16.vlgmr.msra.gmra.mxu0 %v15404_v8  ;;  %7185 = vmatmul.bf16.vlgmr.msra.gmra.mxu1 %v15406_v20 }
 0xb32   :  { %7234 = vmatmul.bf16.vlgmr.msra.gmra.mxu2 %v15412_v60  ;;  %7283 = vmatmul.bf16.vlgmr.msrb.gmra.mxu3 %v15414_v63 }
 0xb35   :  { %v7039_v59 = vpop.f32.mrf.mxu2  ;;  %v7088_v0 = vpop.f32.mrf.mxu3 }
 0xb36   :  { %v7040_v58 = vadd.f32 %v7039_v59, %v6991_v10  ;;  %v6943_v55 = vpop.f32.mrf.mxu0  ;;  %v6992_v7 = vpop.f32.mrf.mxu1 }
 0xb37   :  { %v6944_v25 = vadd.f32 %v6943_v55, %v15898_v14 }
 0xb38   :  { %v16071_v31 = vadd.f32 %v7088_v0, %v7040_v58 }
 0xb39   :  { %v6993_v15 = vadd.f32 %v6992_v7, %v6944_v25  ;;  %v18206_v7 = vld [vmem:[#allocation65_spill] sm:$0xff] }
 0xb3d   :  { %v7041_v33 = vpop.f32.mrf.mxu2  ;;  %v7090_v18 = vpop.f32.mrf.mxu3 }
 0xb3e   :  { %v7042_v40 = vadd.f32 %v7041_v33, %v6993_v15  ;;  %v6946_v8 = vpop.f32.mrf.mxu0  ;;  %v6995_v29 = vpop.f32.mrf.mxu1 }
 0xb3f   :  { %v6947_v20 = vadd.f32 %v6946_v8, %v15905_v17 }
 0xb40   :  { %v16074_v60 = vadd.f32 %v7090_v18, %v7042_v40 }
 0xb41   :  { %v6996_v63 = vadd.f32 %v6995_v29, %v6947_v20  ;;  %7141 = vmatmul.bf16.gmra.mxu0 %v15436_v44  ;;  %7190 = vmatmul.bf16.gmra.mxu1 %v15438_v47 }
 0xb42   :  { %7239 = vmatmul.bf16.gmra.mxu2 %v15447_v52  ;;  %7288 = vmatmul.bf16.gmra.mxu3 %v15449_v48 }
 0xb45   :  { %v7044_v14 = vpop.f32.mrf.mxu2  ;;  %v7093_v61 = vpop.f32.mrf.mxu3 }
 0xb46   :  { %v7045_v12 = vadd.f32 %v7044_v14, %v6996_v63  ;;  %v6948_v4 = vpop.f32.mrf.mxu0  ;;  %v6997_v30 = vpop.f32.mrf.mxu1 }
 0xb47   :  { %v6949_v34 = vadd.f32 %v6948_v4, %v15908_v28 }
 0xb48   :  { %v16081_v2 = vadd.f32 %v7093_v61, %v7045_v12 }
 0xb49   :  { %v6998_v17 = vadd.f32 %v6997_v30, %v6949_v34 }
 0xb4d   :  { %v7046_v42 = vpop.f32.mrf.mxu2  ;;  %v7095_v49 = vpop.f32.mrf.mxu3 }
 0xb4e   :  { %v7047_v27 = vadd.f32 %v7046_v42, %v6998_v17  ;;  %v6951_v44 = vpop.f32.mrf.mxu0  ;;  %v7000_v57 = vpop.f32.mrf.mxu1 }
 0xb4f   :  { %v6952_v47 = vadd.f32 %v6951_v44, %v15918_v46 }
 0xb50   :  { %v16084_v52 = vadd.f32 %v7095_v49, %v7047_v27 }
 0xb51   :  { %v7001_v48 = vadd.f32 %v7000_v57, %v6952_v47  ;;  %7146 = vmatmul.bf16.gmra.mxu0 %v15480_v53  ;;  %7195 = vmatmul.bf16.gmra.mxu1 %v15482_v50 }
 0xb52   :  { %7244 = vmatmul.bf16.gmra.mxu2 %v15491_v43  ;;  %7293 = vmatmul.bf16.gmra.mxu3 %v15493_v16 }
 0xb55   :  { %v7049_v28 = vpop.f32.mrf.mxu2  ;;  %v7098_v6 = vpop.f32.mrf.mxu3 }
 0xb56   :  { %v7050_v32 = vadd.f32 %v7049_v28, %v7001_v48  ;;  %v6953_v3 = vpop.f32.mrf.mxu0  ;;  %v7002_v38 = vpop.f32.mrf.mxu1 }
 0xb57   :  { %v6954_v19 = vadd.f32 %v6953_v3, %v15930_v11  ;;  %v18207_v11 = vld [vmem:[#allocation52_spill] sm:$0xff] }
 0xb58   :  { %v16091_v10 = vadd.f32 %v7098_v6, %v7050_v32 }
 0xb59   :  { %v7003_v46 = vadd.f32 %v7002_v38, %v6954_v19  ;;  %v18209_v19 = vld [vmem:[#allocation56_spill] sm:$0xff] }
 0xb5d   :  { %v7051_v59 = vpop.f32.mrf.mxu2  ;;  %v7100_v0 = vpop.f32.mrf.mxu3 }
 0xb5e   :  { %v7052_v58 = vadd.f32 %v7051_v59, %v7003_v46  ;;  %v6956_v53 = vpop.f32.mrf.mxu0  ;;  %v7005_v55 = vpop.f32.mrf.mxu1  ;;  %v18210_v46 = vld [vmem:[#allocation49_spill] sm:$0xff]  ;;  %v18211_v59 = vld [vmem:[#allocation68_spill] sm:$0xff] }
 0xb5f   :  { %v6957_v50 = vadd.f32 %v6956_v53, %v15940_v41 }
 0xb60   :  { %v16094_v43 = vadd.f32 %v7100_v0, %v7052_v58  ;;  %v18212_v0 = vld [vmem:[#allocation58_spill] sm:$0xff] }
 0xb61   :  { %v7006_v16 = vadd.f32 %v7005_v55, %v6957_v50  ;;  %7151 = vmatmul.bf16.gmra.mxu0 %v15524_v23  ;;  %7200 = vmatmul.bf16.gmra.mxu1 %v15526_v1 }
 0xb62   :  { %7249 = vmatmul.bf16.gmra.mxu2 %v18206_v7  ;;  %7298 = vmatmul.bf16.gmra.mxu3 %v18207_v11 }
 0xb65   :  { %v7054_v25 = vpop.f32.mrf.mxu2  ;;  %v7103_v15 = vpop.f32.mrf.mxu3 }
 0xb66   :  { %v7055_v33 = vadd.f32 %v7054_v25, %v7006_v16  ;;  %v6958_v18 = vpop.f32.mrf.mxu0  ;;  %v7007_v40 = vpop.f32.mrf.mxu1 }
 0xb67   :  { %v6959_v8 = vadd.f32 %v6958_v18, %v15952_v39 }
 0xb68   :  { %v16101_v29 = vadd.f32 %v7103_v15, %v7055_v33 }
 0xb69   :  { %v7008_v41 = vadd.f32 %v7007_v40, %v6959_v8  ;;  %v18213_v40 = vld [vmem:[#allocation62_spill] sm:$0xff]  ;;  %v18214_v8 = vld [vmem:[#allocation39_spill] sm:$0xff] }
 0xb6d   :  { %v7056_v20 = vpop.f32.mrf.mxu2  ;;  %v7105_v63 = vpop.f32.mrf.mxu3 }
 0xb6e   :  { %v7057_v14 = vadd.f32 %v7056_v20, %v7008_v41  ;;  %v6961_v23 = vpop.f32.mrf.mxu0  ;;  %v7010_v61 = vpop.f32.mrf.mxu1  ;;  %v18215_v41 = vld [vmem:[#allocation69_spill] sm:$0xff]  ;;  %v18216_v20 = vld [vmem:[#allocation55_spill] sm:$0xff] }
 0xb6f   :  { %v6962_v1 = vadd.f32 %v6961_v23, %v15962_v22 }
 0xb70   :  { %v16104_v12 = vadd.f32 %v7105_v63, %v7057_v14 }
 0xb71   :  { %v7011_v4 = vadd.f32 %v7010_v61, %v6962_v1  ;;  %7156 = vmatmul.bf16.gmra.mxu0 %v15568_v45  ;;  %7205 = vmatmul.bf16.gmra.mxu1 %v15570_v51 }
 0xb72   :  { %7254 = vmatmul.bf16.gmra.mxu2 %v15594_v24  ;;  %7303 = vmatmul.bf16.gmra.mxu3 %v15596_v13  ;;  %v18208_v13 = vld [vmem:[#allocation41_spill] sm:$0xff] }
 0xb75   :  { %v7059_v39 = vpop.f32.mrf.mxu2  ;;  %v7108_v30 = vpop.f32.mrf.mxu3 }
 0xb76   :  { %v7060_v34 = vadd.f32 %v7059_v39, %v7011_v4  ;;  %v16110_v17 = vpop.f32.mrf.mxu0  ;;  %v16112_v42 = vpop.f32.mrf.mxu1 }
 0xb78   :  { %v16114_v49 = vadd.f32 %v7108_v30, %v7060_v34 }
 0xb7d   :  { %v16116_v22 = vpop.f32.mrf.mxu2  ;;  %v16118_v27 = vpop.f32.mrf.mxu3 }
 0xb7e   :  { %v6966_v45 = vpop.f32.mrf.mxu0  ;;  %v7015_v44 = vpop.f32.mrf.mxu1 }
 0xb7f   :  { %v6967_v51 = vadd.f32 %v6966_v45, %v16017_v21 }
 0xb81   :  { %v7016_v24 = vadd.f32 %v7015_v44, %v6967_v51  ;;  %7161 = vmatmul.bf16.gmra.mxu0 %v15648_v5  ;;  %7210 = vmatmul.bf16.gmra.mxu1 %v15650_v37 }
 0xb82   :  { %7259 = vmatmul.bf16.gmra.mxu2 %v15668_v26  ;;  %7308 = vmatmul.bf16.gmra.mxu3 %v18208_v13 }
 0xb85   :  { %v7064_v57 = vpop.f32.mrf.mxu2  ;;  %v7113_v47 = vpop.f32.mrf.mxu3 }
 0xb86   :  { %v7065_v48 = vadd.f32 %v7064_v57, %v7016_v24  ;;  %v16125_v28 = vpop.f32.mrf.mxu0  ;;  %v16127_v6 = vpop.f32.mrf.mxu1 }
 0xb88   :  { %v16129_v32 = vadd.f32 %v7113_v47, %v7065_v48 }
 0xb8d   :  { %v16131_v3 = vpop.f32.mrf.mxu2  ;;  %v16133_v21 = vpop.f32.mrf.mxu3 }
 0xb8e   :  { %v6971_v5 = vpop.f32.mrf.mxu0  ;;  %v7020_v38 = vpop.f32.mrf.mxu1 }
 0xb8f   :  { %v6972_v37 = vadd.f32 %v6971_v5, %v16051_v35 }
 0xb91   :  { %v7021_v26 = vadd.f32 %v7020_v38, %v6972_v37  ;;  %7166 = vmatmul.bf16.gmra.mxu0 %v18209_v19  ;;  %7215 = vmatmul.bf16.gmra.mxu1 %v18210_v46  ;;  %v18217_v38 = vld [vmem:[#allocation46_spill] sm:$0xff] }
 0xb92   :  { %7264 = vmatmul.bf16.gmra.mxu2 %v18211_v59  ;;  %7313 = vmatmul.bf16.gmra.mxu3 %v18212_v0 }
 0xb95   :  { %v7069_v58 = vpop.f32.mrf.mxu2  ;;  %v7118_v53 = vpop.f32.mrf.mxu3 }
 0xb96   :  { %v7070_v55 = vadd.f32 %v7069_v58, %v7021_v26  ;;  %v16140_v50 = vpop.f32.mrf.mxu0  ;;  %v16142_v16 = vpop.f32.mrf.mxu1 }
 0xb98   :  { %v16144_v7 = vadd.f32 %v7118_v53, %v7070_v55 }
 0xb9d   :  { %v16146_v11 = vpop.f32.mrf.mxu2  ;;  %v16148_v35 = vpop.f32.mrf.mxu3 }
 0xb9e   :  { %v6976_v25 = vpop.f32.mrf.mxu0  ;;  %v7025_v15 = vpop.f32.mrf.mxu1 }
 0xb9f   :  { %v6977_v33 = vadd.f32 %v6976_v25, %v16061_v9  ;;  %v18218_v25 = vld [vmem:[#allocation40_spill] sm:$0xff] }
 0xba1   :  { %v7026_v18 = vadd.f32 %v7025_v15, %v6977_v33  ;;  %7171 = vmatmul.bf16.gmra.mxu0 %v18213_v40  ;;  %7220 = vmatmul.bf16.gmra.mxu1 %v18214_v8 }
 0xba2   :  { %7269 = vmatmul.bf16.gmra.mxu2 %v18215_v41  ;;  %7318 = vmatmul.bf16.gmra.mxu3 %v18216_v20 }
 0xba5   :  { %v7074_v63 = vpop.f32.mrf.mxu2  ;;  %v7123_v14 = vpop.f32.mrf.mxu3 }
 0xba6   :  { %v7075_v23 = vadd.f32 %v7074_v63, %v7026_v18  ;;  %v16155_v61 = vpop.f32.mrf.mxu0  ;;  %v16157_v1 = vpop.f32.mrf.mxu1 }
 0xba8   :  { %v16159_v4 = vadd.f32 %v7123_v14, %v7075_v23  ;;  %v18219_v23 = vld [vmem:[#allocation51_spill] sm:$0xff] }
 0xbad   :  { %v16161_v39 = vpop.f32.mrf.mxu2  ;;  %v16163_v9 = vpop.f32.mrf.mxu3 }
 0xbae   :  { %v7137_v30 = vpop.f32.mrf.mxu0  ;;  %v7186_v34 = vpop.f32.mrf.mxu1 }
 0xbaf   :  { %v7138_v45 = vadd.f32 %v7137_v30, %v16071_v31 }
 0xbb1   :  { %v7187_v44 = vadd.f32 %v7186_v34, %v7138_v45 }
 0xbb5   :  { %v7235_v51 = vpop.f32.mrf.mxu2  ;;  %v7284_v24 = vpop.f32.mrf.mxu3 }
 0xbb6   :  { %v7236_v13 = vadd.f32 %v7235_v51, %v7187_v44  ;;  %v7139_v57 = vpop.f32.mrf.mxu0  ;;  %v7188_v47 = vpop.f32.mrf.mxu1 }
 0xbb7   :  { %v7140_v5 = vadd.f32 %v7139_v57, %v16074_v60 }
 0xbb8   :  { %v7285_v48 = vadd.f32 %v7284_v24, %v7236_v13 }
 0xbb9   :  { %v7189_v26 = vadd.f32 %v7188_v47, %v7140_v5 }
 0xbba   :  { %v16168_v37 = vadd.f32 %v7285_v48, %v18217_v38  ;;  %v18220_v48 = vld [vmem:[#allocation57_spill] sm:$0xff] }
 0xbbc   :  { %v7340_v19 = vsel %vm17836_vm0, %v16168_v37, 0.0 }
 0xbbd   :  { %v7237_v46 = vpop.f32.mrf.mxu2  ;;  %v7286_v59 = vpop.f32.mrf.mxu3  ;;  %7341 = vadd.xlane.f32.xlu2 %v7340_v19 }
 0xbbe   :  { %v7238_v31 = vadd.f32 %v7237_v46, %v7189_v26  ;;  %v7142_v0 = vpop.f32.mrf.mxu0  ;;  %v7191_v58 = vpop.f32.mrf.mxu1 }
 0xbbf   :  { %v7143_v55 = vadd.f32 %v7142_v0, %v16081_v2 }
 0xbc0   :  { %v7287_v53 = vadd.f32 %v7286_v59, %v7238_v31 }
 0xbc1   :  { %v7192_v60 = vadd.f32 %v7191_v58, %v7143_v55 }
 0xbc2   :  { %v16174_v15 = vadd.f32 %v7287_v53, %v18218_v25  ;;  %v18221_v53 = vld [vmem:[#allocation38_spill] sm:$0xff] }
 0xbc4   :  { %v7343_v33 = vsel %vm17836_vm0, %v16174_v15, 0.0 }
 0xbc5   :  { %v7240_v18 = vpop.f32.mrf.mxu2  ;;  %v7289_v40 = vpop.f32.mrf.mxu3  ;;  %7344 = vadd.xlane.f32.xlu0 %v7343_v33 }
 0xbc6   :  { %v7241_v8 = vadd.f32 %v7240_v18, %v7192_v60  ;;  %v7144_v41 = vpop.f32.mrf.mxu0  ;;  %v7193_v20 = vpop.f32.mrf.mxu1 }
 0xbc7   :  { %v7145_v14 = vadd.f32 %v7144_v41, %v16084_v52 }
 0xbc8   :  { %v7290_v63 = vadd.f32 %v7289_v40, %v7241_v8 }
 0xbc9   :  { %v7194_v2 = vadd.f32 %v7193_v20, %v7145_v14  ;;  %v18222_v20 = vld [vmem:[#allocation48_spill] sm:$0xff] }
 0xbca   :  { %v16180_v30 = vadd.f32 %v7290_v63, %v18219_v23 }
 0xbcc   :  { %v7346_v34 = vsel %vm17836_vm0, %v16180_v30, 0.0 }
 0xbcd   :  { %v7242_v45 = vpop.f32.mrf.mxu2  ;;  %v7291_v44 = vpop.f32.mrf.mxu3  ;;  %7347 = vadd.xlane.f32.xlu1 %v7346_v34 }
 0xbce   :  { %v7243_v51 = vadd.f32 %v7242_v45, %v7194_v2  ;;  %v7147_v24 = vpop.f32.mrf.mxu0  ;;  %v7196_v13 = vpop.f32.mrf.mxu1 }
 0xbcf   :  { %v7148_v47 = vadd.f32 %v7147_v24, %v16091_v10 }
 0xbd0   :  { %v7292_v57 = vadd.f32 %v7291_v44, %v7243_v51  ;;  %v18223_v51 = vld [vmem:[#allocation54_spill] sm:$0xff] }
 0xbd1   :  { %v7197_v52 = vadd.f32 %v7196_v13, %v7148_v47 }
 0xbd2   :  { %v16186_v5 = vadd.f32 %v7292_v57, %v18220_v48 }
 0xbd4   :  { %v7349_v38 = vsel %vm17836_vm0, %v16186_v5, 0.0 }
 0xbd5   :  { %v7245_v26 = vpop.f32.mrf.mxu2  ;;  %v7294_v19 = vpop.f32.mrf.mxu3  ;;  %7350 = vadd.xlane.f32.xlu2 %v7349_v38 }
 0xbd6   :  { %v7246_v46 = vadd.f32 %v7245_v26, %v7197_v52  ;;  %v7149_v59 = vpop.f32.mrf.mxu0  ;;  %v7198_v58 = vpop.f32.mrf.mxu1 }
 0xbd7   :  { %v7150_v0 = vadd.f32 %v7149_v59, %v16094_v43 }
 0xbd8   :  { %v7295_v31 = vadd.f32 %v7294_v19, %v7246_v46 }
 0xbd9   :  { %v7199_v10 = vadd.f32 %v7198_v58, %v7150_v0  ;;  %v18224_v58 = vld [vmem:[#allocation53_spill] sm:$0xff] }
 0xbda   :  { %v16192_v55 = vadd.f32 %v7295_v31, %v18221_v53  ;;  %v6964_v31 = vadd.f32 %v16110_v17, %v15986_v56 }
 0xbdc   :  { %v7352_v25 = vsel %vm17836_vm0, %v16192_v55, 0.0 }
 0xbdd   :  { %v7247_v60 = vpop.f32.mrf.mxu2  ;;  %v7296_v33 = vpop.f32.mrf.mxu3  ;;  %7353 = vadd.xlane.f32.xlu0 %v7352_v25 }
 0xbde   :  { %v7248_v18 = vadd.f32 %v7247_v60, %v7199_v10  ;;  %v7152_v40 = vpop.f32.mrf.mxu0  ;;  %v7201_v43 = vpop.f32.mrf.mxu1 }
 0xbdf   :  { %v7153_v41 = vadd.f32 %v7152_v40, %v16101_v29 }
 0xbe0   :  { %v7297_v8 = vadd.f32 %v7296_v33, %v7248_v18  ;;  %v7013_v33 = vadd.f32 %v16112_v42, %v6964_v31 }
 0xbe1   :  { %v7202_v14 = vadd.f32 %v7201_v43, %v7153_v41 }
 0xbe2   :  { %v16198_v63 = vadd.f32 %v7297_v8, %v18222_v20  ;;  %v7062_v41 = vadd.f32 %v16116_v22, %v7013_v33 }
 0xbe4   :  { %v7355_v23 = vsel %vm17836_vm0, %v16198_v63, 0.0  ;;  %v7111_v42 = vadd.f32 %v16118_v27, %v7062_v41 }
 0xbe5   :  { %v7250_v2 = vpop.f32.mrf.mxu2  ;;  %7356 = vadd.xlane.f32.xlu1 %v7355_v23  ;;  %v7299_v45 = vpop.f32.mrf.mxu3 }
 0xbe6   :  { %v7251_v34 = vadd.f32 %v7250_v2, %v7202_v14  ;;  %v7154_v29 = vpop.f32.mrf.mxu0  ;;  %v7203_v57 = vpop.f32.mrf.mxu1  ;;  %v18225_v2 = vld [vmem:[#allocation43_spill] sm:$0xff] }
 0xbe7   :  { %v7155_v19 = vadd.f32 %v7154_v29, %v16104_v12 }
 0xbe8   :  { %v7300_v44 = vadd.f32 %v7299_v45, %v7251_v34 }
 0xbe9   :  { %v7204_v0 = vadd.f32 %v7203_v57, %v7155_v19 }
 0xbea   :  { %v16203_v24 = vadd.f32 %v7300_v44, %v18223_v51 }
 0xbec   :  { %v7358_v13 = vsel %vm17836_vm0, %v16203_v24, 0.0 }
 0xbed   :  { %7359 = vadd.xlane.f32.xlu1 %v7358_v13  ;;  %v7252_v47 = vpop.f32.mrf.mxu2  ;;  %v7301_v52 = vpop.f32.mrf.mxu3 }
 0xbee   :  { %v7157_v48 = vpop.f32.mrf.mxu0  ;;  %v7206_v38 = vpop.f32.mrf.mxu1  ;;  %v7253_v25 = vadd.f32 %v7252_v47, %v7204_v0 }
 0xbef   :  { %v7158_v18 = vadd.f32 %v7157_v48, %v16114_v49 }
 0xbf0   :  { %v7302_v56 = vadd.f32 %v7301_v52, %v7253_v25 }
 0xbf1   :  { %v7207_v43 = vadd.f32 %v7206_v38, %v7158_v18  ;;  %v18226_v38 = vld [vmem:[#allocation47_spill] sm:$0xff] }
 0xbf2   :  { %v16226_v34 = vadd.f32 %v7302_v56, %v18225_v2 }
 0xbf4   :  { %v7361_v57 = vsel %vm17836_vm0, %v16226_v34, 0.0 }
 0xbf5   :  { %v7255_v26 = vpop.f32.mrf.mxu2  ;;  %v7304_v10 = vpop.f32.mrf.mxu3 }
 0xbf6   :  { %v7159_v46 = vpop.f32.mrf.mxu0  ;;  %v7208_v40 = vpop.f32.mrf.mxu1  ;;  %v7256_v23 = vadd.f32 %v7255_v26, %v7207_v43 }
 0xbf7   :  { %v7160_v22 = vadd.f32 %v7159_v46, %v7111_v42 }
 0xbf8   :  { %v7305_v51 = vadd.f32 %v7304_v10, %v7256_v23 }
 0xbf9   :  { %v7209_v48 = vadd.f32 %v7208_v40, %v7160_v22  ;;  %v18228_v22 = vld [vmem:[#allocation59_spill] sm:$0xff] }
 0xbfa   :  { %v16237_v26 = vadd.f32 %v7305_v51, %v18226_v38 }
 0xbfc   :  { %v7364_v33 = vsel %vm17836_vm0, %v16237_v26, 0.0 }
 0xbfd   :  { %v7257_v8 = vpop.f32.mrf.mxu2  ;;  %v7306_v45 = vpop.f32.mrf.mxu3 }
 0xbfe   :  { %v7162_v14 = vpop.f32.mrf.mxu0  ;;  %v7211_v13 = vpop.f32.mrf.mxu1  ;;  %v7258_v19 = vadd.f32 %v7257_v8, %v7209_v48 }
 0xbff   :  { %v7163_v0 = vadd.f32 %v7162_v14, %v16129_v32 }
 0xc01   :  { %v7212_v18 = vadd.f32 %v7211_v13, %v7163_v0 }
 0xc05   :  { %v7260_v27 = vpop.f32.mrf.mxu2  ;;  %v7309_v10 = vpop.f32.mrf.mxu3 }
 0xc06   :  { %v7213_v40 = vpop.f32.mrf.mxu1  ;;  %v7261_v8 = vadd.f32 %v7260_v27, %v7212_v18 }
 0xc0d   :  { %v7262_v32 = vpop.f32.mrf.mxu2  ;;  %v7311_v23 = vpop.f32.mrf.mxu3 }
 0xc30   :  { %v7342_v59 = vpop.xlane.xlu2 %7341 }
 0xc31   :  { %v7388_v53 = vmul.f32 %v7342_v59, %v18224_v58  ;;  %v7164_v59 = vpop.f32.mrf.mxu0 }
 0xc33   :  { %v16212_v60 = vsub.f32 %v16168_v37, %v7388_v53 }
 0xc35   :  { %v7420_v12 = vmul.f32 %v16212_v60, %v16212_v60 }
 0xc37   :  { %v7436_v17 = vsel %vm17836_vm0, %v7420_v12, 0.0 }
 0xc38   :  { %v7345_v20 = vpop.xlane.xlu0 %7344  ;;  %7437 = vadd.xlane.f32.xlu2 %v7436_v17 }
 0xc39   :  { %v7389_v37 = vmul.f32 %v7345_v20, %v18224_v58  ;;  %v7167_v43 = vpop.f32.mrf.mxu0 }
 0xc3b   :  { %v16223_v49 = vsub.f32 %v16174_v15, %v7389_v37  ;;  %v6969_v15 = vadd.f32 %v16125_v28, %v16044_v36  ;;  %v7307_v28 = vadd.f32 %v7306_v45, %v7258_v19  ;;  %v7310_v37 = vadd.f32 %v7309_v10, %v7261_v8 }
 0xc3d   :  { %v7421_v44 = vmul.f32 %v16223_v49, %v16223_v49  ;;  %v7018_v31 = vadd.f32 %v16127_v6, %v6969_v15 }
 0xc3f   :  { %v7439_v29 = vsel %vm17836_vm0, %v7421_v44, 0.0  ;;  %v7067_v36 = vadd.f32 %v16131_v3, %v7018_v31  ;;  %v18227_v3 = vld [vmem:[#allocation50_spill] sm:$0xff]  ;;  %v16267_v44 = vadd.f32 %v7310_v37, %v18228_v22 }
 0xc40   :  { %v7348_v47 = vpop.xlane.xlu1 %7347  ;;  %7440 = vadd.xlane.f32.xlu0 %v7439_v29  ;;  %7362 = vadd.xlane.f32.xlu2 %v7361_v57  ;;  %v16256_v56 = vadd.f32 %v7307_v28, %v18227_v3  ;;  %v7216_v29 = vpop.f32.mrf.mxu1 }
 0xc41   :  { %v7390_v52 = vmul.f32 %v7348_v47, %v18224_v58  ;;  %v7116_v12 = vadd.f32 %v16133_v21, %v7067_v36  ;;  %v7265_v57 = vpop.f32.mrf.mxu2  ;;  %v7168_v47 = vadd.f32 %v7167_v43, %v16144_v7  ;;  %v7370_v48 = vsel %vm17836_vm0, %v16267_v44, 0.0  ;;  %v7169_v38 = vpop.f32.mrf.mxu0 }
 0xc42   :  { %v7367_v14 = vsel %vm17836_vm0, %v16256_v56, 0.0 }
 0xc43   :  { %v16240_v46 = vsub.f32 %v16180_v30, %v7390_v52  ;;  %v7165_v17 = vadd.f32 %v7164_v59, %v7116_v12  ;;  %v7217_v19 = vadd.f32 %v7216_v29, %v7168_v47  ;;  %v7314_v59 = vpop.f32.mrf.mxu3  ;;  %v18232_v29 = vld [vmem:[#allocation60_spill] sm:$0xff]  ;;  %v11565_v47 = vld [vmem:[%s17696_s8 + $0x8] sm:$0xff] }
 0xc44   :  { %7781 = vmatpush.bf16.msrb.mxu0 %v11565_v47 }
 0xc45   :  { %v7422_v53 = vmul.f32 %v16240_v46, %v16240_v46  ;;  %v7214_v2 = vadd.f32 %v7213_v40, %v7165_v17  ;;  %v7266_v31 = vadd.f32 %v7265_v57, %v7217_v19 }
 0xc47   :  { %v7442_v25 = vsel %vm17836_vm0, %v7422_v53, 0.0  ;;  %v7263_v51 = vadd.f32 %v7262_v32, %v7214_v2  ;;  %v18230_v32 = vld [vmem:[#allocation45_spill] sm:$0xff] }
 0xc48   :  { %7443 = vadd.xlane.f32.xlu0 %v7442_v25  ;;  %7365 = vadd.xlane.f32.xlu2 %v7364_v33  ;;  %v7351_v30 = vpop.xlane.xlu2 %7350  ;;  %v7218_v28 = vpop.f32.mrf.mxu1  ;;  %v7315_v33 = vadd.f32 %v7314_v59, %v7266_v31 }
 0xc49   :  { %v7391_v6 = vmul.f32 %v7351_v30, %v18224_v58  ;;  %v7267_v25 = vpop.f32.mrf.mxu2  ;;  %v7172_v40 = vpop.f32.mrf.mxu0 }
 0xc4a   :  { %v16295_v12 = vadd.f32 %v7315_v33, %v18230_v32 }
 0xc4b   :  { %v16253_v41 = vsub.f32 %v16186_v5, %v7391_v6  ;;  %v6974_v5 = vadd.f32 %v16140_v50, %v16054_v62  ;;  %v7312_v50 = vadd.f32 %v7311_v23, %v7263_v51  ;;  %v7316_v17 = vpop.f32.mrf.mxu3 }
 0xc4d   :  { %v7423_v20 = vmul.f32 %v16253_v41, %v16253_v41  ;;  %v7023_v27 = vadd.f32 %v16142_v16, %v6974_v5 }
 0xc4f   :  { %v7445_v42 = vsel %vm17836_vm0, %v7423_v20, 0.0  ;;  %v7072_v62 = vadd.f32 %v16146_v11, %v7023_v27  ;;  %v18229_v11 = vld [vmem:[#allocation63_spill] sm:$0xff]  ;;  %v7173_v20 = vadd.f32 %v7172_v40, %v16159_v4 }
 0xc50   :  { %7368 = vadd.xlane.f32.xlu0 %v7367_v14  ;;  %v7354_v21 = vpop.xlane.xlu0 %7353  ;;  %7446 = vadd.xlane.f32.xlu1 %v7445_v42  ;;  %v16286_v53 = vadd.f32 %v7312_v50, %v18229_v11  ;;  %v7376_v42 = vsel %vm17836_vm0, %v16295_v12, 0.0  ;;  %v7221_v23 = vpop.f32.mrf.mxu1  ;;  %v6979_v50 = vadd.f32 %v16155_v61, %v16064_v54 }
 0xc51   :  { %v7392_v45 = vmul.f32 %v7354_v21, %v18224_v58  ;;  %v7121_v7 = vadd.f32 %v16148_v35, %v7072_v62  ;;  %v7270_v21 = vpop.f32.mrf.mxu2  ;;  %v7222_v5 = vadd.f32 %v7221_v23, %v7173_v20  ;;  %v7174_v31 = vpop.f32.mrf.mxu0 }
 0xc52   :  { %v7373_v18 = vsel %vm17836_vm0, %v16286_v53, 0.0  ;;  %v7028_v19 = vadd.f32 %v16157_v1, %v6979_v50 }
 0xc53   :  { %v16270_v13 = vsub.f32 %v16192_v55, %v7392_v45  ;;  %v7170_v10 = vadd.f32 %v7169_v38, %v7121_v7  ;;  %v7271_v2 = vadd.f32 %v7270_v21, %v7222_v5  ;;  %v7319_v22 = vpop.f32.mrf.mxu3  ;;  %v11564_v38 = vld [vmem:[%s17696_s8] sm:$0xff] }
 0xc54   :  { %7782 = vmatpush.bf16.msrb.mxu0 %v11564_v38  ;;  %v7077_v54 = vadd.f32 %v16161_v39, %v7028_v19 }
 0xc55   :  { %v7424_v15 = vmul.f32 %v16270_v13, %v16270_v13  ;;  %v7320_v4 = vadd.f32 %v7319_v22, %v7271_v2 }
 0xc57   :  { %v7448_v52 = vsel %vm17836_vm0, %v7424_v15, 0.0  ;;  %v16312_v57 = vadd.f32 %v7320_v4, %v18232_v29  ;;  %v11572_v15 = vld [vmem:[%s17699_s11 + $0x18] sm:$0xff] }
 0xc58   :  { %v7357_v55 = vpop.xlane.xlu1 %7356  ;;  %7371 = vadd.xlane.f32.xlu0 %v7370_v48  ;;  %7449 = vadd.xlane.f32.xlu1 %v7448_v52 }
 0xc59   :  { %v7393_v16 = vmul.f32 %v7357_v55, %v18224_v58  ;;  %v7382_v27 = vsel %vm17836_vm0, %v16312_v57, 0.0  ;;  %8482 = vmatpush.bf16.msra.mxu3 %v11572_v15  ;;  %v11571_v55 = vld [vmem:[%s17699_s11 + $0x10] sm:$0xff] }
 0xc5b   :  { %v16283_v0 = vsub.f32 %v16198_v63, %v7393_v16  ;;  %v7219_v63 = vadd.f32 %v7218_v28, %v7170_v10  ;;  %v7126_v10 = vadd.f32 %v16163_v9, %v7077_v54  ;;  %v7321_v21 = vpop.f32.mrf.mxu3 }
 0xc5d   :  { %v7425_v36 = vmul.f32 %v16283_v0, %v16283_v0  ;;  %v7268_v8 = vadd.f32 %v7267_v25, %v7219_v63  ;;  %8483 = vmatpush.bf16.msra.mxu3 %v11571_v55  ;;  %v7175_v25 = vadd.f32 %v7174_v31, %v7126_v10  ;;  %v18233_v55 = vld [vmem:[#allocation64_spill] sm:$0xff] }
 0xc5f   :  { %v7451_v30 = vsel %vm17836_vm0, %v7425_v36, 0.0  ;;  %v7317_v37 = vadd.f32 %v7316_v17, %v7268_v8 }
 0xc60   :  { %v7360_v35 = vpop.xlane.xlu1 %7359  ;;  %7452 = vadd.xlane.f32.xlu2 %v7451_v30  ;;  %7374 = vadd.xlane.f32.xlu1 %v7373_v18  ;;  %v7223_v30 = vpop.f32.mrf.mxu1 }
 0xc61   :  { %v7394_v6 = vmul.f32 %v7360_v35, %v18224_v58  ;;  %v7272_v18 = vpop.f32.mrf.mxu2  ;;  %v7224_v9 = vadd.f32 %v7223_v30, %v7175_v25 }
 0xc63   :  { %v16298_v3 = vsub.f32 %v16203_v24, %v7394_v6  ;;  %v18231_v24 = vld [vmem:[#allocation67_spill] sm:$0xff]  ;;  %v7273_v20 = vadd.f32 %v7272_v18, %v7224_v9 }
 0xc64   :  { %v16307_v45 = vadd.f32 %v7317_v37, %v18231_v24 }
 0xc65   :  { %v7426_v43 = vmul.f32 %v16298_v3, %v16298_v3  ;;  %v7322_v24 = vadd.f32 %v7321_v21, %v7273_v20 }
 0xc66   :  { %v7379_v51 = vsel %vm17836_vm0, %v16307_v45, 0.0 }
 0xc67   :  { %v7454_v14 = vsel %vm17836_vm0, %v7426_v43, 0.0  ;;  %v16367_v19 = vadd.f32 %v7322_v24, %v18233_v55 }
 0xc68   :  { %7455 = vadd.xlane.f32.xlu2 %v7454_v14  ;;  %7377 = vadd.xlane.f32.xlu1 %v7376_v42 }
 0xc70   :  { %7380 = vadd.xlane.f32.xlu2 %v7379_v51 }
 0xc78   :  { %7383 = vadd.xlane.f32.xlu2 %v7382_v27 }
 0xcab   :  { %v7438_v62 = vpop.xlane.xlu2 %7437 }
 0xcac   :  { %v7484_v48 = vmul.f32 %v7438_v62, %v18224_v58 }
 0xcae   :  { %v7500_v52 = vadd.f32 1e-05, %v7484_v48 }
 0xcb0   :  { %12021 = vrsqrt.f32 %v7500_v52  ;;  %vm7522_vm2 = vweird.f32 %v7500_v52 }
 0xcb3   :  { %v7441_v61 = vpop.xlane.xlu0 %7440  ;;  %v7363_v16 = vpop.xlane.xlu2 %7362 }
 0xcb4   :  { %v7485_v59 = vmul.f32 %v7441_v61, %v18224_v58  ;;  %v7395_v7 = vmul.f32 %v7363_v16, %v18224_v58 }
 0xcb6   :  { %v12022_v11 = vpop.eup %12021  ;;  %v7501_v36 = vadd.f32 1e-05, %v7485_v59  ;;  %v16337_v28 = vsub.f32 %v16226_v34, %v7395_v7 }
 0xcb7   :  { %v7517_v1 = vmul.f32 %v12022_v11, %v7500_v52  ;;  %vm7523_vm13 = vweird.f32 %v12022_v11 }
 0xcb8   :  { %12023 = vrsqrt.f32 %v7501_v36  ;;  %v7427_v39 = vmul.f32 %v16337_v28, %v16337_v28  ;;  %vm7524_vm14 = vmor %vm7522_vm2, %vm7523_vm13  ;;  %vm7532_vm15 = vweird.f32 %v7501_v36 }
 0xcb9   :  { %v7518_v33 = vmul.f32 %v12022_v11, %v7517_v1 }
 0xcba   :  { %v7457_v35 = vsel %vm17836_vm0, %v7427_v39, 0.0 }
 0xcbb   :  { %v7519_v63 = vmul.f32 0.5, %v7518_v33  ;;  %v7444_v6 = vpop.xlane.xlu0 %7443  ;;  %7458 = vadd.xlane.f32.xlu0 %v7457_v35  ;;  %v7366_v40 = vpop.xlane.xlu2 %7365 }
 0xcbc   :  { %v7486_v32 = vmul.f32 %v7444_v6, %v18224_v58  ;;  %v7396_v34 = vmul.f32 %v7366_v40, %v18224_v58 }
 0xcbd   :  { %v7520_v8 = vsub.f32 1.5, %v7519_v63 }
 0xcbe   :  { %v12024_v17 = vpop.eup %12023  ;;  %v7502_v43 = vadd.f32 1e-05, %v7486_v32  ;;  %v16345_v37 = vsub.f32 %v16237_v26, %v7396_v34  ;;  %v16353_v26 = vld [vmem:[%s17701_s13] sm:$0xff] }
 0xcbf   :  { %v7521_v14 = vmul.f32 %v12022_v11, %v7520_v8  ;;  %v7527_v42 = vmul.f32 %v12024_v17, %v7501_v36  ;;  %v16356_v27 = vperm.slane %v16353_v26, 5  ;;  %vm7533_vm4 = vweird.f32 %v12024_v17 }
 0xcc0   :  { %12025 = vrsqrt.f32 %v7502_v43  ;;  %v7428_v23 = vmul.f32 %v16345_v37, %v16345_v37  ;;  %vm7534_vm1 = vmor %vm7532_vm15, %vm7533_vm4  ;;  %vm7542_vm2 = vweird.f32 %v7502_v43 }
 0xcc1   :  { %v7525_v5 = vsel %vm7524_vm14, %v12022_v11, %v7521_v14  ;;  %v7528_v2 = vmul.f32 %v12024_v17, %v7527_v42  ;;  %v7385_v11 = vsel %vm17836_vm0, %v16367_v19, 0.0 }
 0xcc2   :  { %v7460_v22 = vsel %vm17836_vm0, %v7428_v23, 0.0  ;;  %v7676_v47 = vmul.f32 %v7525_v5, %v16212_v60  ;;  %v16370_v60 = vperm.slane %v16353_v26, 6 }
 0xcc3   :  { %v7529_v4 = vmul.f32 0.5, %v7528_v2  ;;  %v7369_v51 = vpop.xlane.xlu0 %7368  ;;  %v7447_v29 = vpop.xlane.xlu1 %7446  ;;  %7461 = vadd.xlane.f32.xlu0 %v7460_v22 }
 0xcc4   :  { %v7397_v15 = vmul.f32 %v7369_v51, %v18224_v58  ;;  %v7487_v62 = vmul.f32 %v7447_v29, %v18224_v58  ;;  %v7693_v16 = vmul.f32 %v16356_v27, %v7676_v47 }
 0xcc5   :  { %v7530_v50 = vsub.f32 1.5, %v7529_v4 }
 0xcc6   :  { %v12026_v48 = vpop.eup %12025  ;;  %v16362_v52 = vsub.f32 %v16256_v56, %v7397_v15  ;;  %v16364_v38 = vadd.f32 1e-05, %v7487_v62  ;;  %v16381_v39 = vadd.f32 %v16370_v60, %v7693_v16 }
 0xcc7   :  { %v7531_v54 = vmul.f32 %v12024_v17, %v7530_v50  ;;  %v7537_v61 = vmul.f32 %v12026_v48, %v7502_v43  ;;  %vm7543_vm13 = vweird.f32 %v12026_v48  ;;  %v18234_v43 = vld [vmem:[#allocation5_spill] sm:$0xff] }
 0xcc8   :  { %12027 = vrsqrt.f32 %v16364_v38  ;;  %v7429_v56 = vmul.f32 %v16362_v52, %v16362_v52  ;;  %v8360_v34 = vrot.slane %v16381_v39, 7  ;;  %vm7544_vm14 = vmor %vm7542_vm2, %vm7543_vm13  ;;  %vm18235_vm4 = vcmp.lt.s32.totalorder %v18234_v43, 1 }
 0xcc9   :  { %v7535_v59 = vsel %vm7534_vm1, %v12024_v17, %v7531_v54  ;;  %v7538_v7 = vmul.f32 %v12026_v48, %v7537_v61  ;;  %vm7552_vm1 = vweird.f32 %v16364_v38  ;;  %vm18236_vm2 = vcmp.lt.s32.totalorder %v18234_v43, 7 }
 0xcca   :  { %v7677_v31 = vmul.f32 %v7535_v59, %v16223_v49  ;;  %v7463_v25 = vsel %vm17836_vm0, %v7429_v56, 0.0 }
 0xccb   :  { %v7539_v10 = vmul.f32 0.5, %v7538_v7  ;;  %v7372_v36 = vpop.xlane.xlu0 %7371  ;;  %v7450_v1 = vpop.xlane.xlu1 %7449  ;;  %7386 = vadd.xlane.f32.xlu0 %v7385_v11  ;;  %7464 = vadd.xlane.f32.xlu1 %v7463_v25  ;;  %v8408_v7 = vrot.slane %v16381_v39, 1 }
 0xccc   :  { %v7694_v33 = vmul.f32 %v16356_v27, %v7677_v31  ;;  %v7398_v30 = vmul.f32 %v7372_v36, %v18224_v58  ;;  %v7488_v18 = vmul.f32 %v7450_v1, %v18224_v58 }
 0xccd   :  { %v7540_v49 = vsub.f32 1.5, %v7539_v10 }
 0xcce   :  { %v12028_v35 = vpop.eup %12027  ;;  %v7711_v63 = vadd.f32 %v16370_v60, %v7694_v33  ;;  %v16388_v6 = vsub.f32 %v16267_v44, %v7398_v30  ;;  %v16390_v40 = vadd.f32 1e-05, %v7488_v18 }
 0xccf   :  { %v7541_v9 = vmul.f32 %v12026_v48, %v7540_v49  ;;  %v7547_v32 = vmul.f32 %v12028_v35, %v16364_v38  ;;  %vm7553_vm15 = vweird.f32 %v12028_v35 }
 0xcd0   :  { %v8361_v8 = vrot.slane %v7711_v63, 7  ;;  %12029 = vrsqrt.f32 %v16390_v40  ;;  %v7726_v14 = vpack.c.bf16 %v7711_v63, %v16381_v39  ;;  %v7430_v44 = vmul.f32 %v16388_v6, %v16388_v6  ;;  %vm7554_vm13 = vmor %vm7552_vm1, %vm7553_vm15 }
 0xcd1   :  { %v7545_v17 = vsel %vm7544_vm14, %v12026_v48, %v7541_v9  ;;  %v7548_v20 = vmul.f32 %v12028_v35, %v7547_v32  ;;  %v8409_v55 = vrot.slane %v7711_v63, 1  ;;  %vm18237_vm14 = vmmov %vm18235_vm4  ;;  %vm7562_vm1 = vweird.f32 %v16390_v40 }
 0xcd2   :  { %v7678_v42 = vmul.f32 %v7545_v17, %v16240_v46  ;;  %v16403_v23 = vsel %vm18235_vm4, %v8360_v34, %v8361_v8  ;;  %11120 = vmatmul.msk.bf16.vlgmr.msrb.gmra.mxu0 %vm17836_vm0, %v7726_v14  ;;  %11180 = vmatmul.msk.bf16.vlgmr.msra.gmra.mxu3 %vm17836_vm0, %v7726_v14  ;;  %v7466_v24 = vsel %vm17836_vm0, %v7430_v44, 0.0  ;;  %vm18239_vm4 = vmmov %vm18236_vm2 }
 0xcd3   :  { %v7549_v21 = vmul.f32 0.5, %v7548_v20  ;;  %v7375_v5 = vpop.xlane.xlu1 %7374  ;;  %v7453_v2 = vpop.xlane.xlu2 %7452  ;;  %7467 = vadd.xlane.f32.xlu1 %v7466_v24  ;;  %v8438_v49 = vsel %vm18239_vm4, %v8408_v7, %v8409_v55 }
 0xcd4   :  { %v7695_v22 = vmul.f32 %v16356_v27, %v7678_v42  ;;  %v7399_v4 = vmul.f32 %v7375_v5, %v18224_v58  ;;  %v7489_v46 = vmul.f32 %v7453_v2, %v18224_v58 }
 0xcd5   :  { %v7550_v51 = vsub.f32 1.5, %v7549_v21 }
 0xcd6   :  { %v12030_v29 = vpop.eup %12029  ;;  %v16412_v47 = vsub.f32 %v16286_v53, %v7399_v4  ;;  %v16414_v15 = vadd.f32 1e-05, %v7489_v46  ;;  %v7712_v62 = vadd.f32 %v16370_v60, %v7695_v22 }
 0xcd7   :  { %v7551_v50 = vmul.f32 %v12028_v35, %v7550_v51  ;;  %v7557_v48 = vmul.f32 %v12030_v29, %v16390_v40  ;;  %vm7563_vm15 = vweird.f32 %v12030_v29 }
 0xcd8   :  { %12031 = vrsqrt.f32 %v16414_v15  ;;  %v7431_v54 = vmul.f32 %v16412_v47, %v16412_v47  ;;  %v8410_v61 = vrot.slane %v7712_v62, 1  ;;  %v8362_v59 = vrot.slane %v7712_v62, 7 }
 0xcd9   :  { %v7555_v16 = vsel %vm7554_vm13, %v12028_v35, %v7551_v50  ;;  %v7558_v53 = vmul.f32 %v12030_v29, %v7557_v48  ;;  %vm7564_vm13 = vmor %vm7562_vm1, %vm7563_vm15  ;;  %vm7572_vm15 = vweird.f32 %v16414_v15 }
 0xcda   :  { %v7679_v56 = vmul.f32 %v7555_v16, %v16253_v41  ;;  %v7469_v31 = vsel %vm17836_vm0, %v7431_v54, 0.0  ;;  %v8437_v38 = vsel %vm18236_vm2, %v8409_v55, %v8410_v61  ;;  %v8389_v1 = vsel %vm18237_vm14, %v8361_v8, %v8362_v59  ;;  %vm18240_vm2 = vmmov %vm18237_vm14 }
 0xcdb   :  { %v7559_v11 = vmul.f32 0.5, %v7558_v53  ;;  %v7456_v10 = vpop.xlane.xlu2 %7455  ;;  %7470 = vadd.xlane.f32.xlu2 %v7469_v31  ;;  %v7378_v36 = vpop.xlane.xlu1 %7377  ;;  %v8441_v33 = vsel %vm12311_vm3, %v8437_v38, 0.0  ;;  %vm18242_vm14 = vmmov %vm18239_vm4 }
 0xcdc   :  { %v7696_v30 = vmul.f32 %v16356_v27, %v7679_v56  ;;  %v7490_v18 = vmul.f32 %v7456_v10, %v18224_v58  ;;  %v7400_v41 = vmul.f32 %v7378_v36, %v18224_v58  ;;  %v16438_v63 = vpack.c.bf16 %v8441_v33, %v8438_v49 }
 0xcdd   :  { %v7560_v35 = vsub.f32 1.5, %v7559_v11 }
 0xcde   :  { %v12032_v9 = vpop.eup %12031  ;;  %v7506_v32 = vadd.f32 1e-05, %v7490_v18  ;;  %v16441_v8 = vsub.f32 %v16295_v12, %v7400_v41  ;;  %v7713_v17 = vadd.f32 %v16370_v60, %v7696_v30 }
 0xcdf   :  { %v7561_v20 = vmul.f32 %v12030_v29, %v7560_v35  ;;  %v7567_v14 = vmul.f32 %v12032_v9, %v16414_v15  ;;  %vm7573_vm4 = vweird.f32 %v12032_v9 }
 0xce0   :  { %12033 = vrsqrt.f32 %v7506_v32  ;;  %v7727_v44 = vpack.c.bf16 %v7713_v17, %v7712_v62  ;;  %v7432_v42 = vmul.f32 %v16441_v8, %v16441_v8  ;;  %v8363_v2 = vrot.slane %v7713_v17, 7  ;;  %vm7574_vm1 = vmor %vm7572_vm15, %vm7573_vm4 }
 0xce1   :  { %v7565_v21 = vsel %vm7564_vm13, %v12030_v29, %v7561_v20  ;;  %v7568_v5 = vmul.f32 %v12032_v9, %v7567_v14  ;;  %v8411_v24 = vrot.slane %v7713_v17, 1  ;;  %v8394_v62 = vsel %vm12336_vm5, %v8389_v1, 0.0  ;;  %vm18243_vm13 = vmmov %vm18240_vm2 }
 0xce2   :  { %v7680_v12 = vmul.f32 %v7565_v21, %v16270_v13  ;;  %v7472_v22 = vsel %vm17836_vm0, %v7432_v42, 0.0  ;;  %11121 = vmatmul.msk.bf16.gmra.mxu0 %vm17836_vm0, %v7727_v44  ;;  %11181 = vmatmul.msk.bf16.gmra.mxu3 %vm17836_vm0, %v7727_v44  ;;  %v8388_v46 = vsel %vm18240_vm2, %v8362_v59, %v8363_v2  ;;  %vm18244_vm2 = vmmov %vm18242_vm14  ;;  %vm7582_vm4 = vweird.f32 %v7506_v32 }
 0xce3   :  { %v7569_v4 = vmul.f32 0.5, %v7568_v5  ;;  %v7381_v40 = vpop.xlane.xlu2 %7380  ;;  %v8436_v29 = vsel %vm18242_vm14, %v8410_v61, %v8411_v24  ;;  %7473 = vadd.xlane.f32.xlu0 %v7472_v22  ;;  %v16460_v48 = vpack.c.bf16 %v8388_v46, %v8394_v62 }
 0xce4   :  { %v7697_v50 = vmul.f32 %v16356_v27, %v7680_v12  ;;  %v7401_v13 = vmul.f32 %v7381_v40, %v18224_v58 }
 0xce5   :  { %v7570_v55 = vsub.f32 1.5, %v7569_v4 }
 0xce6   :  { %v12034_v54 = vpop.eup %12033  ;;  %v16463_v16 = vsub.f32 %v16307_v45, %v7401_v13  ;;  %v7714_v53 = vadd.f32 %v16370_v60, %v7697_v50 }
 0xce7   :  { %v7571_v59 = vmul.f32 %v12032_v9, %v7570_v55  ;;  %v7577_v56 = vmul.f32 %v12034_v54, %v7506_v32  ;;  %vm7583_vm14 = vweird.f32 %v12034_v54 }
 0xce8   :  { %v7433_v61 = vmul.f32 %v16463_v16, %v16463_v16  ;;  %v8364_v31 = vrot.slane %v7714_v53, 7  ;;  %v8412_v38 = vrot.slane %v7714_v53, 1  ;;  %vm7584_vm15 = vmor %vm7582_vm4, %vm7583_vm14 }
 0xce9   :  { %v7575_v11 = vsel %vm7574_vm1, %v12032_v9, %v7571_v59  ;;  %v7578_v10 = vmul.f32 %v12034_v54, %v7577_v56  ;;  %vm18247_vm1 = vmmov %vm18243_vm13 }
 0xcea   :  { %v7681_v36 = vmul.f32 %v7575_v11, %v16283_v0  ;;  %v7475_v1 = vsel %vm17836_vm0, %v7433_v61, 0.0  ;;  %v8387_v45 = vsel %vm18243_vm13, %v8363_v2, %v8364_v31  ;;  %v8435_v33 = vsel %vm18244_vm2, %v8411_v24, %v8412_v38  ;;  %vm18248_vm13 = vmmov %vm18244_vm2 }
 0xceb   :  { %v7579_v15 = vmul.f32 0.5, %v7578_v10  ;;  %v7384_v30 = vpop.xlane.xlu2 %7383  ;;  %7476 = vadd.xlane.f32.xlu1 %v7475_v1  ;;  %v8443_v41 = vsel %vm12342_vm6, %v8435_v33, 0.0 }
 0xcec   :  { %v7698_v49 = vmul.f32 %v16356_v27, %v7681_v36  ;;  %v7402_v35 = vmul.f32 %v7384_v30, %v18224_v58  ;;  %v16479_v9 = vpack.c.bf16 %v8443_v41, %v8436_v29  ;;  %v11566_v36 = vld [vmem:[%s17697_s9] sm:$0xff] }
 0xced   :  { %v7580_v0 = vsub.f32 1.5, %v7579_v15 }
 0xcee   :  { %v16482_v17 = vsub.f32 %v16312_v57, %v7402_v35  ;;  %v16485_v20 = vadd.f32 %v16370_v60, %v7698_v49  ;;  %v8396_v57 = vsel %vm12367_vm7, %v8387_v45, 0.0 }
 0xcef   :  { %v7581_v14 = vmul.f32 %v12034_v54, %v7580_v0 }
 0xcf0   :  { %v7728_v44 = vpack.c.bf16 %v16485_v20, %v7714_v53  ;;  %v7434_v42 = vmul.f32 %v16482_v17, %v16482_v17  ;;  %v8365_v21 = vrot.slane %v16485_v20, 7  ;;  %v8413_v5 = vrot.slane %v16485_v20, 1 }
 0xcf1   :  { %v7585_v2 = vsel %vm7584_vm15, %v12034_v54, %v7581_v14 }
 0xcf2   :  { %v7682_v12 = vmul.f32 %v7585_v2, %v16298_v3  ;;  %v7478_v22 = vsel %vm17836_vm0, %v7434_v42, 0.0  ;;  %v8386_v32 = vsel %vm18247_vm1, %v8364_v31, %v8365_v21  ;;  %v8434_v4 = vsel %vm18248_vm13, %v8412_v38, %v8413_v5  ;;  %11122 = vmatmul.msk.bf16.gmra.mxu0 %vm17836_vm0, %v7728_v44  ;;  %11182 = vmatmul.msk.bf16.gmra.mxu3 %vm17836_vm0, %v7728_v44  ;;  %v11567_v31 = vld [vmem:[%s17697_s9 + $0x8] sm:$0xff]  ;;  %s12163_s9 = smov 128  }
 0xcf3   :  { %v16504_v40 = vpack.c.bf16 %v8386_v32, %v8396_v57  ;;  %7479 = vadd.xlane.f32.xlu2 %v7478_v22  ;;  %7895 = vmatpush.bf16.msrb.mxu1 %v11567_v31 }
 0xcf4   :  { %v7699_v46 = vmul.f32 %v16356_v27, %v7682_v12 }
 0xcf6   :  { %v16508_v3 = vadd.f32 %v16370_v60, %v7699_v46 }
 0xcf7   :  { %7896 = vmatpush.bf16.msrb.mxu1 %v11566_v36 }
 0xcf8   :  { %v8414_v62 = vrot.slane %v16508_v3, 1 }
 0xcfa   :  { %v8433_v29 = vsel %vm18244_vm2, %v8413_v5, %v8414_v62  ;;  %vm18250_vm2 = vcmp.lt.s32.totalorder %v18234_v43, 1 }
 0xcfb   :  { %v8445_v13 = vsel %vm12373_vm8, %v8433_v29, 0.0 }
 0xcfc   :  { %v16517_v55 = vpack.c.bf16 %v8445_v13, %v8434_v4 }
 0xd2e   :  { %v7459_v54 = vpop.xlane.xlu0 %7458 }
 0xd2f   :  { %v7491_v53 = vmul.f32 %v7459_v54, %v18224_v58 }
 0xd31   :  { %v7507_v59 = vadd.f32 1e-05, %v7491_v53 }
 0xd33   :  { %12035 = vrsqrt.f32 %v7507_v59  ;;  %vm7592_vm4 = vweird.f32 %v7507_v59 }
 0xd36   :  { %v7462_v56 = vpop.xlane.xlu0 %7461 }
 0xd37   :  { %v7492_v61 = vmul.f32 %v7462_v56, %v18224_v58 }
 0xd39   :  { %v12036_v38 = vpop.eup %12035  ;;  %v7508_v11 = vadd.f32 1e-05, %v7492_v61 }
 0xd3a   :  { %v7587_v10 = vmul.f32 %v12036_v38, %v7507_v59  ;;  %vm7593_vm14 = vweird.f32 %v12036_v38 }
 0xd3b   :  { %12037 = vrsqrt.f32 %v7508_v11  ;;  %vm7594_vm15 = vmor %vm7592_vm4, %vm7593_vm14  ;;  %vm7602_vm13 = vweird.f32 %v7508_v11 }
 0xd3c   :  { %v7588_v1 = vmul.f32 %v12036_v38, %v7587_v10  ;;  %vm18251_vm4 = vmmov %vm18250_vm2 }
 0xd3e   :  { %v7589_v45 = vmul.f32 0.5, %v7588_v1  ;;  %v7387_v33 = vpop.xlane.xlu0 %7386  ;;  %v7465_v30 = vpop.xlane.xlu1 %7464 }
 0xd3f   :  { %v7403_v15 = vmul.f32 %v7387_v33, %v18224_v58  ;;  %v7493_v49 = vmul.f32 %v7465_v30, %v18224_v58 }
 0xd40   :  { %v7590_v41 = vsub.f32 1.5, %v7589_v45 }
 0xd41   :  { %v12038_v35 = vpop.eup %12037  ;;  %v16530_v0 = vsub.f32 %v16367_v19, %v7403_v15  ;;  %v7509_v42 = vadd.f32 1e-05, %v7493_v49  ;;  %v8366_v19 = vrot.slane %v16508_v3, 7 }
 0xd42   :  { %v7591_v14 = vmul.f32 %v12036_v38, %v7590_v41  ;;  %v7597_v44 = vmul.f32 %v12038_v35, %v7508_v11  ;;  %vm7603_vm1 = vweird.f32 %v12038_v35 }
 0xd43   :  { %v7435_v5 = vmul.f32 %v16530_v0, %v16530_v0  ;;  %12039 = vrsqrt.f32 %v7509_v42  ;;  %vm7604_vm14 = vmor %vm7602_vm13, %vm7603_vm1  ;;  %vm7612_vm1 = vweird.f32 %v7509_v42 }
 0xd44   :  { %v7595_v2 = vsel %vm7594_vm15, %v12036_v38, %v7591_v14  ;;  %v7598_v57 = vmul.f32 %v12038_v35, %v7597_v44 }
 0xd45   :  { %v7683_v12 = vmul.f32 %v7595_v2, %v16337_v28  ;;  %v7481_v22 = vsel %vm17836_vm0, %v7435_v5, 0.0  ;;  %v8385_v28 = vsel %vm18250_vm2, %v8365_v21, %v8366_v19  ;;  %v16560_v5 = vperm.slane %v16353_v26, 7 }
 0xd46   :  { %v7599_v32 = vmul.f32 0.5, %v7598_v57  ;;  %7482 = vadd.xlane.f32.xlu0 %v7481_v22  ;;  %v7468_v46 = vpop.xlane.xlu1 %7467  ;;  %v8398_v21 = vsel %vm12398_vm9, %v8385_v28, 0.0 }
 0xd47   :  { %v7700_v4 = vmul.f32 %v16356_v27, %v7683_v12  ;;  %v7494_v13 = vmul.f32 %v7468_v46, %v18224_v58 }
 0xd48   :  { %v7600_v29 = vsub.f32 1.5, %v7599_v32 }
 0xd49   :  { %v7717_v54 = vadd.f32 %v16370_v60, %v7700_v4  ;;  %v12040_v53 = vpop.eup %12039  ;;  %v7510_v56 = vadd.f32 1e-05, %v7494_v13 }
 0xd4a   :  { %v7601_v59 = vmul.f32 %v12038_v35, %v7600_v29  ;;  %v7607_v61 = vmul.f32 %v12040_v53, %v7509_v42  ;;  %vm7613_vm15 = vweird.f32 %v12040_v53 }
 0xd4b   :  { %v7729_v31 = vpack.c.bf16 %v7717_v54, %v16508_v3  ;;  %v8367_v38 = vrot.slane %v7717_v54, 7  ;;  %12041 = vrsqrt.f32 %v7510_v56  ;;  %v8415_v12 = vrot.slane %v7717_v54, 1  ;;  %vm7614_vm13 = vmor %vm7612_vm1, %vm7613_vm15 }
 0xd4c   :  { %v7605_v10 = vsel %vm7604_vm14, %v12038_v35, %v7601_v59  ;;  %v7608_v1 = vmul.f32 %v12040_v53, %v7607_v61  ;;  %vm18253_vm14 = vcmp.lt.s32.totalorder %v18234_v43, 7  ;;  %vm7622_vm1 = vweird.f32 %v7510_v56 }
 0xd4d   :  { %v7684_v36 = vmul.f32 %v7605_v10, %v16345_v37  ;;  %11123 = vmatmul.msk.bf16.gmra.mxu0 %vm17836_vm0, %v7729_v31  ;;  %11183 = vmatmul.msk.bf16.gmra.mxu3 %vm17836_vm0, %v7729_v31  ;;  %v8384_v20 = vsel %vm18251_vm4, %v8366_v19, %v8367_v38  ;;  %vm18254_vm4 = vmmov %vm18253_vm14 }
 0xd4e   :  { %v7471_v45 = vpop.xlane.xlu2 %7470  ;;  %v16552_v33 = vpack.c.bf16 %v8384_v20, %v8398_v21  ;;  %v7609_v30 = vmul.f32 0.5, %v7608_v1  ;;  %v8432_v54 = vsel %vm18254_vm4, %v8414_v62, %v8415_v12 }
 0xd4f   :  { %v7701_v15 = vmul.f32 %v16356_v27, %v7684_v36  ;;  %v7495_v41 = vmul.f32 %v7471_v45, %v18224_v58  ;;  %v7784_v37 = vpop.f32.mrf.mxu0 }
 0xd50   :  { %v7610_v49 = vsub.f32 1.5, %v7609_v30  ;;  %v7785_v13 = vadd.f32 %v7784_v37, %v16560_v5 }
 0xd51   :  { %v16556_v35 = vadd.f32 1e-05, %v7495_v41  ;;  %v7718_v14 = vadd.f32 %v16370_v60, %v7701_v15  ;;  %v12042_v44 = vpop.eup %12041 }
 0xd52   :  { %v7611_v2 = vmul.f32 %v12040_v53, %v7610_v49  ;;  %v7617_v57 = vmul.f32 %v12042_v44, %v7510_v56  ;;  %vm7623_vm15 = vweird.f32 %v12042_v44  ;;  %v7824_v45 = vmax.f32 %v7785_v13, 0.0 }
 0xd53   :  { %12043 = vrsqrt.f32 %v16556_v35  ;;  %v8368_v22 = vrot.slane %v7718_v14, 7  ;;  %v8416_v32 = vrot.slane %v7718_v14, 1 }
 0xd54   :  { %v7615_v19 = vsel %vm7614_vm13, %v12040_v53, %v7611_v2  ;;  %v7618_v4 = vmul.f32 %v12042_v44, %v7617_v57  ;;  %vm7624_vm13 = vmor %vm7622_vm1, %vm7623_vm15  ;;  %vm7632_vm15 = vweird.f32 %v16556_v35 }
 0xd55   :  { %v7685_v46 = vmul.f32 %v7615_v19, %v16362_v52  ;;  %v8383_v29 = vsel %vm18250_vm2, %v8367_v38, %v8368_v22  ;;  %v8431_v42 = vsel %vm18253_vm14, %v8415_v12, %v8416_v32  ;;  %vm18257_vm14 = vmmov %vm18254_vm4 }
 0xd56   :  { %v7619_v26 = vmul.f32 0.5, %v7618_v4  ;;  %v7474_v59 = vpop.xlane.xlu0 %7473  ;;  %v8447_v53 = vsel %vm12404_vm10, %v8431_v42, 0.0 }
 0xd57   :  { %v7702_v52 = vmul.f32 %v16356_v27, %v7685_v46  ;;  %v7496_v61 = vmul.f32 %v7474_v59, %v18224_v58  ;;  %v7786_v31 = vpop.f32.mrf.mxu0  ;;  %v16577_v38 = vpack.c.bf16 %v8447_v53, %v8432_v54 }
 0xd58   :  { %v7620_v36 = vsub.f32 1.5, %v7619_v26  ;;  %v7787_v1 = vadd.f32 %v7786_v31, %v16560_v5 }
 0xd59   :  { %v12044_v10 = vpop.eup %12043  ;;  %v16581_v20 = vadd.f32 1e-05, %v7496_v61  ;;  %v7719_v62 = vadd.f32 %v16370_v60, %v7702_v52 }
 0xd5a   :  { %v7627_v3 = vmul.f32 %v12044_v10, %v16556_v35  ;;  %v7621_v21 = vmul.f32 %v12042_v44, %v7620_v36  ;;  %v7825_v15 = vmax.f32 %v7787_v1, 0.0  ;;  %vm7633_vm4 = vweird.f32 %v12044_v10 }
 0xd5b   :  { %12045 = vrsqrt.f32 %v16581_v20  ;;  %v7730_v41 = vpack.c.bf16 %v7719_v62, %v7718_v14  ;;  %v8369_v2 = vrot.slane %v7719_v62, 7  ;;  %v8417_v57 = vrot.slane %v7719_v62, 1  ;;  %vm7634_vm1 = vmor %vm7632_vm15, %vm7633_vm4 }
 0xd5c   :  { %v7628_v30 = vmul.f32 %v12044_v10, %v7627_v3  ;;  %v7625_v37 = vsel %vm7624_vm13, %v12042_v44, %v7621_v21  ;;  %v7840_v49 = vpack.c.bf16 %v7825_v15, %v7824_v45  ;;  %v8400_v44 = vsel %vm12429_vm11, %v8383_v29, 0.0  ;;  %vm18258_vm13 = vmmov %vm18250_vm2 }
 0xd5d   :  { %v7686_v12 = vmul.f32 %v7625_v37, %v16388_v6  ;;  %11124 = vmatmul.msk.bf16.gmra.mxu0 %vm17836_vm0, %v7730_v41  ;;  %11184 = vmatmul.msk.bf16.gmra.mxu3 %vm17836_vm0, %v7730_v41  ;;  %v8382_v46 = vsel %vm18250_vm2, %v8368_v22, %v8369_v2  ;;  %v8430_v42 = vsel %vm18257_vm14, %v8416_v32, %v8417_v57  ;;  %vm18259_vm2 = vmmov %vm18257_vm14  ;;  %vm7642_vm4 = vweird.f32 %v16581_v20 }
 0xd5e   :  { %v7629_v19 = vmul.f32 0.5, %v7628_v30  ;;  %v7477_v4 = vpop.xlane.xlu1 %7476  ;;  %11136 = vmatmul.msk.bf16.vlgmr.msrb.gmra.mxu1 %vm17836_vm0, %v7840_v49  ;;  %v16597_v59 = vpack.c.bf16 %v8382_v46, %v8400_v44  ;;  %v18260_v30 = vld [vmem:[#allocation15_spill] sm:$0xff] }
 0xd5f   :  { %v7497_v56 = vmul.f32 %v7477_v4, %v18224_v58  ;;  %v7703_v6 = vmul.f32 %v16356_v27, %v7686_v12  ;;  %v7789_v13 = vpop.f32.mrf.mxu0 }
 0xd60   :  { %v7630_v26 = vsub.f32 1.5, %v7629_v19  ;;  %v7790_v3 = vadd.f32 %v7789_v13, %v16560_v5 }
 0xd61   :  { %v7513_v54 = vadd.f32 1e-05, %v7497_v56  ;;  %v12046_v53 = vpop.eup %12045  ;;  %v7720_v22 = vadd.f32 %v16370_v60, %v7703_v6 }
 0xd62   :  { %v7631_v52 = vmul.f32 %v12044_v10, %v7630_v26  ;;  %v7637_v29 = vmul.f32 %v12046_v53, %v16581_v20  ;;  %vm7643_vm14 = vweird.f32 %v12046_v53  ;;  %v7826_v4 = vmax.f32 %v7790_v3, 0.0 }
 0xd63   :  { %12047 = vrsqrt.f32 %v7513_v54  ;;  %v8370_v32 = vrot.slane %v7720_v22, 7  ;;  %v8418_v31 = vrot.slane %v7720_v22, 1  ;;  %vm7644_vm15 = vmor %vm7642_vm4, %vm7643_vm14  ;;  %vm7652_vm4 = vweird.f32 %v7513_v54 }
 0xd64   :  { %v7635_v61 = vsel %vm7634_vm1, %v12044_v10, %v7631_v52  ;;  %v7638_v1 = vmul.f32 %v12046_v53, %v7637_v29  ;;  %vm18261_vm1 = vmmov %vm18258_vm13 }
 0xd65   :  { %v7687_v36 = vmul.f32 %v7635_v61, %v16412_v47  ;;  %v8381_v62 = vsel %vm18258_vm13, %v8369_v2, %v8370_v32  ;;  %v8429_v35 = vsel %vm18259_vm2, %v8417_v57, %v8418_v31 }
 0xd66   :  { %v7639_v45 = vmul.f32 0.5, %v7638_v1  ;;  %v7480_v15 = vpop.xlane.xlu2 %7479  ;;  %v8449_v10 = vsel %vm12435_vm12, %v8429_v35, 0.0  ;;  %vm18271_vm12 = vcmp.lt.s32.totalorder %v18234_v43, 7 }
 0xd67   :  { %v7704_v21 = vmul.f32 %v16356_v27, %v7687_v36  ;;  %v7498_v41 = vmul.f32 %v7480_v15, %v18224_v58  ;;  %v7791_v37 = vpop.f32.mrf.mxu0  ;;  %v16612_v47 = vpack.c.bf16 %v8449_v10, %v8430_v42  ;;  %v18262_v36 = vld [vmem:[#allocation16_spill] sm:$0xff] }
 0xd68   :  { %v7640_v12 = vsub.f32 1.5, %v7639_v45  ;;  %v7792_v2 = vadd.f32 %v7791_v37, %v16560_v5  ;;  %vm18263_vm13 = vnez %v18262_v36 }
 0xd69   :  { %v12048_v49 = vpop.eup %12047  ;;  %v7721_v19 = vadd.f32 %v16370_v60, %v7704_v21  ;;  %v7514_v56 = vadd.f32 1e-05, %v7498_v41  ;;  %v8402_v1 = vsel %vm18263_vm13, %v8381_v62, 0.0 }
 0xd6a   :  { %v7647_v57 = vmul.f32 %v12048_v49, %v7513_v54  ;;  %v7641_v46 = vmul.f32 %v12046_v53, %v7640_v12  ;;  %v7827_v44 = vmax.f32 %v7792_v2, 0.0  ;;  %vm7653_vm14 = vweird.f32 %v12048_v49 }
 0xd6b   :  { %v7731_v6 = vpack.c.bf16 %v7721_v19, %v7720_v22  ;;  %v8371_v26 = vrot.slane %v7721_v19, 7  ;;  %12049 = vrsqrt.f32 %v7514_v56  ;;  %v8419_v42 = vrot.slane %v7721_v19, 1 }
 0xd6c   :  { %v7648_v13 = vmul.f32 %v12048_v49, %v7647_v57  ;;  %v7645_v52 = vsel %vm7644_vm15, %v12046_v53, %v7641_v46  ;;  %v7841_v29 = vpack.c.bf16 %v7827_v44, %v7826_v4  ;;  %vm7654_vm15 = vmor %vm7652_vm4, %vm7653_vm14  ;;  %v18264_v46 = vld [vmem:[#allocation17_spill] sm:$0xff] }
 0xd6d   :  { %v8380_v61 = vsel %vm18261_vm1, %v8370_v32, %v8371_v26  ;;  %v7688_v20 = vmul.f32 %v7645_v52, %v16441_v8  ;;  %11125 = vmatmul.msk.bf16.gmra.mxu0 %vm17836_vm0, %v7731_v6  ;;  %11185 = vmatmul.msk.bf16.gmra.mxu3 %vm17836_vm0, %v7731_v6  ;;  %v8428_v35 = vsel %vm18259_vm2, %v8418_v31, %v8419_v42 }
 0xd6e   :  { %v7649_v3 = vmul.f32 0.5, %v7648_v13  ;;  %v16624_v22 = vpack.c.bf16 %v8380_v61, %v8402_v1  ;;  %11137 = vmatmul.msk.bf16.gmra.mxu1 %vm17836_vm0, %v7841_v29  ;;  %vm18265_vm14 = vnez %v18264_v46 }
 0xd6f   :  { %v7705_v53 = vmul.f32 %v16356_v27, %v7688_v20  ;;  %v7794_v21 = vpop.f32.mrf.mxu0 }
 0xd70   :  { %v7650_v32 = vsub.f32 1.5, %v7649_v3  ;;  %v7795_v2 = vadd.f32 %v7794_v21, %v16560_v5 }
 0xd71   :  { %v12050_v62 = vpop.eup %12049  ;;  %v7722_v8 = vadd.f32 %v16370_v60, %v7705_v53 }
 0xd72   :  { %v7651_v45 = vmul.f32 %v12048_v49, %v7650_v32  ;;  %v7657_v15 = vmul.f32 %v12050_v62, %v7514_v56  ;;  %vm7663_vm4 = vweird.f32 %v12050_v62  ;;  %v18267_v32 = vld [vmem:[#allocation19_spill] sm:$0xff] }
 0xd73   :  { %v8372_v41 = vrot.slane %v7722_v8, 7  ;;  %v8420_v37 = vrot.slane %v7722_v8, 1  ;;  %vm18268_vm0 = vnez %v18267_v32 }
 0xd74   :  { %v7655_v10 = vsel %vm7654_vm15, %v12048_v49, %v7651_v45  ;;  %v7658_v31 = vmul.f32 %v12050_v62, %v7657_v15  ;;  %vm7662_vm15 = vweird.f32 %v7514_v56 }
 0xd75   :  { %v7689_v12 = vmul.f32 %v7655_v10, %v16463_v16  ;;  %v8379_v19 = vsel %vm18261_vm1, %v8371_v26, %v8372_v41  ;;  %v8427_v57 = vsel %vm18259_vm2, %v8419_v42, %v8420_v37  ;;  %v7828_v26 = vmax.f32 %v7795_v2, 0.0  ;;  %vm7664_vm1 = vmor %vm7662_vm15, %vm7663_vm4 }
 0xd76   :  { %v7659_v4 = vmul.f32 0.5, %v7658_v31  ;;  %v8451_v44 = vsel %vm18265_vm14, %v8427_v57, 0.0  ;;  %vm18266_vm2 = vcmp.lt.s32.totalorder %v18234_v43, 1  ;;  %v8404_v21 = vsel %vm18268_vm0, %v8379_v19, 0.0  ;;  %v11570_v57 = vld [vmem:[%s17699_s11 + $0x8] sm:$0xff] }
 0xd77   :  { %v7706_v54 = vmul.f32 %v16356_v27, %v7689_v12  ;;  %v7796_v49 = vpop.f32.mrf.mxu0  ;;  %v16640_v6 = vpack.c.bf16 %v8451_v44, %v8428_v35  ;;  %vm18269_vm14 = vcmask 261120   ;;  %8567 = vmatpush.bf16.msra.mxu0 %v11570_v57  ;;  %v11569_v44 = vld [vmem:[%s17699_s11] sm:$0xff] }
 0xd78   :  { %v7660_v13 = vsub.f32 1.5, %v7659_v4  ;;  %v7797_v16 = vadd.f32 %v7796_v49, %v16560_v5  ;;  %vm18270_vm13 = vmmov %vm18269_vm14 }
 0xd79   :  { %v7723_v52 = vadd.f32 %v16370_v60, %v7706_v54  ;;  %vm18272_vm4 = vmmov %vm18270_vm13 }
 0xd7a   :  { %v7661_v29 = vmul.f32 %v12050_v62, %v7660_v13  ;;  %v7829_v61 = vmax.f32 %v7797_v16, 0.0  ;;  %v11568_v13 = vld [vmem:[%s17698_s10] sm:$0xff] }
 0xd7b   :  { %v7732_v42 = vpack.c.bf16 %v7723_v52, %v7722_v8  ;;  %v8373_v1 = vrot.slane %v7723_v52, 7  ;;  %v8421_v20 = vrot.slane %v7723_v52, 1  ;;  %8568 = vmatpush.bf16.msra.mxu0 %v11569_v44  ;;  %8002 = vmatpush.bf16.msrb.mxu2 %v11568_v13 }
 0xd7c   :  { %v7665_v3 = vsel %vm7664_vm1, %v12050_v62, %v7661_v29  ;;  %v7842_v53 = vpack.c.bf16 %v7829_v61, %v7828_v26 }
 0xd7d   :  { %v8378_v35 = vsel %vm18266_vm2, %v8372_v41, %v8373_v1  ;;  %v7690_v45 = vmul.f32 %v7665_v3, %v16482_v17  ;;  %11126 = vmatmul.msk.bf16.gmra.mxu0 %vm18269_vm14, %v7732_v42  ;;  %11186 = vmatmul.msk.bf16.gmra.mxu3 %vm18270_vm13, %v7732_v42  ;;  %v8426_v8 = vsel %vm18271_vm12, %v8420_v37, %v8421_v20  ;;  %vm18273_vm14 = vmmov %vm18271_vm12  ;;  %v18274_v41 = vld [vmem:[#allocation18_spill] sm:$0xff] }
 0xd7e   :  { %v16651_v56 = vpack.c.bf16 %v8378_v35, %v8404_v21  ;;  %11138 = vmatmul.msk.bf16.gmra.mxu1 %vm18272_vm4, %v7842_v53  ;;  %vm18275_vm13 = vnez %v18274_v41 }
 0xd7f   :  { %v7707_v62 = vmul.f32 %v16356_v27, %v7690_v45 }
 0xd81   :  { %v16658_v15 = vadd.f32 %v16370_v60, %v7707_v62 }
 0xd83   :  { %v8422_v10 = vrot.slane %v16658_v15, 1 }
 0xd85   :  { %v8425_v17 = vsel %vm18273_vm14, %v8421_v20, %v8422_v10  ;;  %v8374_v20 = vrot.slane %v16658_v15, 7  ;;  %vm18276_vm14 = vmmov %vm18272_vm4 }
 0xd86   :  { %v8453_v12 = vsel %vm18275_vm13, %v8425_v17, 0.0 }
 0xd87   :  { %v16667_v31 = vpack.c.bf16 %v8453_v12, %v8426_v8  ;;  %v8377_v62 = vsel %vm18266_vm2, %v8373_v1, %v8374_v20 }
 0xdb9   :  { %v7483_v37 = vpop.xlane.xlu0 %7482 }
 0xdba   :  { %v7499_v2 = vmul.f32 %v7483_v37, %v18224_v58  ;;  %v18279_v37 = vld [vmem:[#allocation21_spill] sm:$0xff] }
 0xdbc   :  { %v7515_v19 = vadd.f32 1e-05, %v7499_v2  ;;  %v18282_v2 = vld [vmem:[#allocation6_spill] sm:$0xff] }
 0xdbd   :  { %vm18283_vm13 = vnez %v18282_v2 }
 0xdbe   :  { %12051 = vrsqrt.f32 %v7515_v19  ;;  %vm7672_vm15 = vweird.f32 %v7515_v19 }
 0xdc4   :  { %v12052_v54 = vpop.eup %12051 }
 0xdc5   :  { %v7667_v4 = vmul.f32 %v12052_v54, %v7515_v19  ;;  %vm7673_vm12 = vweird.f32 %v12052_v54 }
 0xdc6   :  { %vm7674_vm1 = vmor %vm7672_vm15, %vm7673_vm12 }
 0xdc7   :  { %v7668_v49 = vmul.f32 %v12052_v54, %v7667_v4  ;;  %vm18277_vm12 = vmmov %vm18266_vm2 }
 0xdc8   :  { %vm18278_vm15 = vmmov %vm18266_vm2 }
 0xdc9   :  { %v7669_v58 = vmul.f32 0.5, %v7668_v49  ;;  %vm18281_vm2 = vmmov %vm18272_vm4 }
 0xdca   :  { %v7799_v16 = vpop.f32.mrf.mxu0 }
 0xdcb   :  { %v7670_v52 = vsub.f32 1.5, %v7669_v58  ;;  %v7800_v42 = vadd.f32 %v7799_v16, %v16560_v5 }
 0xdcd   :  { %v7671_v26 = vmul.f32 %v12052_v54, %v7670_v52  ;;  %v7830_v45 = vmax.f32 %v7800_v42, 0.0 }
 0xdcf   :  { %v7675_v29 = vsel %vm7674_vm1, %v12052_v54, %v7671_v26  ;;  %vm18280_vm1 = vnez %v18279_v37 }
 0xdd0   :  { %v7691_v61 = vmul.f32 %v7675_v29, %v16530_v0  ;;  %v8406_v1 = vsel %vm18280_vm1, %v8377_v62, 0.0 }
 0xdd2   :  { %v7708_v3 = vmul.f32 %v16356_v27, %v7691_v61  ;;  %v7801_v53 = vpop.f32.mrf.mxu0 }
 0xdd3   :  { %v7802_v35 = vadd.f32 %v7801_v53, %v16560_v5 }
 0xdd4   :  { %v16685_v21 = vadd.f32 %v16370_v60, %v7708_v3 }
 0xdd5   :  { %v7831_v8 = vmax.f32 %v7802_v35, 0.0 }
 0xdd6   :  { %v7733_v0 = vpack.c.bf16 %v16685_v21, %v16658_v15  ;;  %v8375_v17 = vrot.slane %v16685_v21, 7 }
 0xdd7   :  { %v7843_v12 = vpack.c.bf16 %v7831_v8, %v7830_v45 }
 0xdd8   :  { %11127 = vmatmul.msk.bf16.gmra.mxu0 %vm18272_vm4, %v7733_v0  ;;  %11187 = vmatmul.msk.bf16.gmra.mxu3 %vm18276_vm14, %v7733_v0  ;;  %v8391_v27 = vsel %vm18277_vm12, %v8375_v17, %v8360_v34  ;;  %v8376_v60 = vsel %vm18278_vm15, %v8374_v20, %v8375_v17  ;;  %v16711_v34 = vld [vmem:[%s17701_s13 + $0x8] sm:$0x3f]  ;;  %vm18284_vm4 = vmmov %vm18281_vm2  ;;  %vm18286_vm12 = vcmask 130048  }
 0xdd9   :  { %11139 = vmatmul.msk.bf16.gmra.mxu1 %vm18281_vm2, %v7843_v12  ;;  %v8392_v19 = vsel %vm18283_vm13, %v8391_v27, 0.0  ;;  %v16705_v57 = vpack.c.bf16 %v8376_v60, %v8406_v1  ;;  %v16714_v49 = vperm.slane %v16711_v34, 3  ;;  %vm18285_vm14 = vmmov %vm18281_vm2 }
 0xdda   :  { %v8456_v54 = vpack.c.bf16 %v16403_v23, %v8392_v19  ;;  %v7804_v4 = vpop.f32.mrf.mxu0  ;;  %vm18287_vm15 = vmmov %vm18281_vm2 }
 0xddb   :  { %v7898_v44 = vpop.f32.mrf.mxu1  ;;  %v7805_v13 = vadd.f32 %v7804_v4, %v16560_v5  ;;  %vm18293_vm13 = vmmov %vm18281_vm2 }
 0xddc   :  { %v7899_v58 = vadd.f32 %v7898_v44, %v16714_v49 }
 0xddd   :  { %v7832_v29 = vmax.f32 %v7805_v13, 0.0 }
 0xdde   :  { %v7938_v42 = vmax.f32 %v7899_v58, 0.0 }
 0xde2   :  { %v7806_v16 = vpop.f32.mrf.mxu0 }
 0xde3   :  { %v7807_v52 = vadd.f32 %v7806_v16, %v16560_v5  ;;  %v7900_v26 = vpop.f32.mrf.mxu1 }
 0xde4   :  { %v7901_v23 = vadd.f32 %v7900_v26, %v16714_v49 }
 0xde5   :  { %v7833_v61 = vmax.f32 %v7807_v52, 0.0 }
 0xde6   :  { %v7939_v20 = vmax.f32 %v7901_v23, 0.0 }
 0xde7   :  { %v7844_v3 = vpack.c.bf16 %v7833_v61, %v7832_v29 }
 0xde8   :  { %11196 = vmatmul.msk.bf16.vlgmr.msra.gmra.mxu0 %vm18284_vm4, %v8456_v54  ;;  %v7954_v53 = vpack.c.bf16 %v7939_v20, %v7938_v42  ;;  %vm18288_vm4 = vmmov %vm18286_vm12 }
 0xde9   :  { %11140 = vmatmul.msk.bf16.gmra.mxu1 %vm18285_vm14, %v7844_v3  ;;  %vm18289_vm14 = vmmov %vm18281_vm2 }
 0xdea   :  { %v7809_v35 = vpop.f32.mrf.mxu0  ;;  %11148 = vmatmul.msk.bf16.vlgmr.msrb.gmra.mxu2 %vm18286_vm12, %v7954_v53  ;;  %vm18290_vm12 = vmmov %vm18281_vm2 }
 0xdeb   :  { %v7903_v45 = vpop.f32.mrf.mxu1  ;;  %v7810_v8 = vadd.f32 %v7809_v35, %v16560_v5  ;;  %v11574_v35 = vld [vmem:[%s17699_s11 + $0x28] sm:$0xff] }
 0xdec   :  { %v7904_v62 = vadd.f32 %v7903_v45, %v16714_v49  ;;  %8660 = vmatpush.bf16.msra.mxu1 %v11574_v35 }
 0xded   :  { %v7834_v60 = vmax.f32 %v7810_v8, 0.0 }
 0xdee   :  { %v7940_v19 = vmax.f32 %v7904_v62, 0.0 }
 0xdf2   :  { %v7811_v0 = vpop.f32.mrf.mxu0 }
 0xdf3   :  { %v7812_v17 = vadd.f32 %v7811_v0, %v16560_v5  ;;  %v7905_v12 = vpop.f32.mrf.mxu1 }
 0xdf4   :  { %v7906_v27 = vadd.f32 %v7905_v12, %v16714_v49 }
 0xdf5   :  { %v7835_v1 = vmax.f32 %v7812_v17, 0.0 }
 0xdf6   :  { %v7941_v54 = vmax.f32 %v7906_v27, 0.0 }
 0xdf7   :  { %v7845_v4 = vpack.c.bf16 %v7835_v1, %v7834_v60 }
 0xdf8   :  { %11197 = vmatmul.msk.bf16.gmra.mxu0 %vm18287_vm15, %v16460_v48  ;;  %v7955_v44 = vpack.c.bf16 %v7941_v54, %v7940_v19  ;;  %vm18291_vm15 = vmmov %vm18288_vm4 }
 0xdf9   :  { %11141 = vmatmul.msk.bf16.gmra.mxu1 %vm18281_vm2, %v7845_v4 }
 0xdfa   :  { %v7814_v13 = vpop.f32.mrf.mxu0  ;;  %11149 = vmatmul.msk.bf16.gmra.mxu2 %vm18288_vm4, %v7955_v44  ;;  %vm18292_vm4 = vmmov %vm18281_vm2 }
 0xdfb   :  { %v7908_v58 = vpop.f32.mrf.mxu1  ;;  %v7815_v16 = vadd.f32 %v7814_v13, %v16560_v5 }
 0xdfc   :  { %v7909_v52 = vadd.f32 %v7908_v58, %v16714_v49 }
 0xdfd   :  { %v7836_v42 = vmax.f32 %v7815_v16, 0.0 }
 0xdfe   :  { %v7942_v48 = vmax.f32 %v7909_v52, 0.0 }
 0xe02   :  { %v7816_v26 = vpop.f32.mrf.mxu0 }
 0xe03   :  { %v7817_v23 = vadd.f32 %v7816_v26, %v16560_v5  ;;  %v7910_v29 = vpop.f32.mrf.mxu1 }
 0xe04   :  { %v7911_v61 = vadd.f32 %v7910_v29, %v16714_v49 }
 0xe05   :  { %v7837_v20 = vmax.f32 %v7817_v23, 0.0 }
 0xe06   :  { %v7943_v3 = vmax.f32 %v7911_v61, 0.0 }
 0xe07   :  { %v7846_v53 = vpack.c.bf16 %v7837_v20, %v7836_v42 }
 0xe08   :  { %11198 = vmatmul.msk.bf16.gmra.mxu0 %vm18289_vm14, %v16504_v40  ;;  %v7956_v45 = vpack.c.bf16 %v7943_v3, %v7942_v48  ;;  %vm18294_vm14 = vmmov %vm18281_vm2  ;;  %v11573_v40 = vld [vmem:[%s17699_s11 + $0x20] sm:$0xff] }
 0xe09   :  { %11142 = vmatmul.msk.bf16.gmra.mxu1 %vm18290_vm12, %v7846_v53  ;;  %vm18295_vm12 = vmmov %vm18281_vm2 }
 0xe0a   :  { %11150 = vmatmul.msk.bf16.gmra.mxu2 %vm18291_vm15, %v7956_v45  ;;  %8661 = vmatpush.bf16.msra.mxu1 %v11573_v40 }
 0xe18   :  { %11199 = vmatmul.msk.bf16.gmra.mxu0 %vm18281_vm2, %v16552_v33 }
 0xe28   :  { %11200 = vmatmul.msk.bf16.gmra.mxu0 %vm18292_vm4, %v16597_v59  ;;  %vm18297_vm4 = vmmov %vm18291_vm15 }
 0xe38   :  { %11201 = vmatmul.msk.bf16.gmra.mxu0 %vm18293_vm13, %v16624_v22  ;;  %vm18296_vm13 = vmmov %vm18281_vm2 }
 0xe48   :  { %11202 = vmatmul.msk.bf16.gmra.mxu0 %vm18294_vm14, %v16651_v56  ;;  %vm18298_vm14 = vmmov %vm18281_vm2 }
 0xe55   :  { %v7819_v8 = vpop.f32.mrf.mxu0 }
 0xe56   :  { %v7913_v62 = vpop.f32.mrf.mxu1  ;;  %v7820_v33 = vadd.f32 %v7819_v8, %v16560_v5  ;;  %v8485_v8 = vpop.f32.mrf.mxu3 }
 0xe57   :  { %v7914_v59 = vadd.f32 %v7913_v62, %v16714_v49  ;;  %v8423_v62 = vrot.slane %v16685_v21, 1 }
 0xe58   :  { %11203 = vmatmul.msk.bf16.gmra.mxu0 %vm18295_vm12, %v16705_v57  ;;  %v7838_v12 = vmax.f32 %v7820_v33, 0.0  ;;  %vm18299_vm12 = vmmov %vm18297_vm4 }
 0xe59   :  { %v7944_v60 = vmax.f32 %v7914_v59, 0.0  ;;  %v11577_v59 = vld [vmem:[%s17699_s11 + $0x40] sm:$0xff] }
 0xe5d   :  { %v7821_v0 = vpop.f32.mrf.mxu0 }
 0xe5e   :  { %v7822_v22 = vadd.f32 %v7821_v0, %v16560_v5  ;;  %v7915_v17 = vpop.f32.mrf.mxu1 }
 0xe5f   :  { %v7916_v56 = vadd.f32 %v7915_v17, %v16714_v49 }
 0xe60   :  { %v7839_v27 = vmax.f32 %v7822_v22, 0.0 }
 0xe61   :  { %v7945_v1 = vmax.f32 %v7916_v56, 0.0 }
 0xe62   :  { %v7847_v19 = vpack.c.bf16 %v7839_v27, %v7838_v12  ;;  %v11579_v12 = vld [vmem:[%s17699_s11 + $0x50] sm:$0xff] }
 0xe63   :  { %v7957_v54 = vpack.c.bf16 %v7945_v1, %v7944_v60 }
 0xe64   :  { %11143 = vmatmul.msk.bf16.gmra.mxu1 %vm18296_vm13, %v7847_v19  ;;  %vm18300_vm13 = vmmov %vm18281_vm2 }
 0xe65   :  { %11151 = vmatmul.msk.bf16.gmra.mxu2 %vm18291_vm15, %v7957_v54  ;;  %vm18301_vm15 = vmmov %vm18297_vm4 }
 0xe66   :  { %v7918_v57 = vpop.f32.mrf.mxu1 }
 0xe67   :  { %v7919_v4 = vadd.f32 %v7918_v57, %v16714_v49 }
 0xe69   :  { %v7946_v5 = vmax.f32 %v7919_v4, 0.0 }
 0xe6e   :  { %v7920_v44 = vpop.f32.mrf.mxu1 }
 0xe6f   :  { %v7921_v13 = vadd.f32 %v7920_v44, %v16714_v49 }
 0xe71   :  { %v7947_v58 = vmax.f32 %v7921_v13, 0.0  ;;  %v16812_v13 = vperm.slane %v16711_v34, 0 }
 0xe73   :  { %v7958_v16 = vpack.c.bf16 %v7947_v58, %v7946_v5 }
 0xe74   :  { %11212 = vmatmul.msk.bf16.vlgmr.msra.gmra.mxu1 %vm18281_vm2, %v16438_v63 }
 0xe75   :  { %11152 = vmatmul.msk.bf16.gmra.mxu2 %vm18297_vm4, %v7958_v16  ;;  %vm18302_vm4 = vmmov %vm18281_vm2 }
 0xe76   :  { %v7923_v52 = vpop.f32.mrf.mxu1 }
 0xe77   :  { %v7924_v26 = vadd.f32 %v7923_v52, %v16714_v49 }
 0xe79   :  { %v7948_v61 = vmax.f32 %v7924_v26, 0.0 }
 0xe7e   :  { %v7925_v23 = vpop.f32.mrf.mxu1 }
 0xe7f   :  { %v7926_v29 = vadd.f32 %v7925_v23, %v16714_v49 }
 0xe81   :  { %v7949_v42 = vmax.f32 %v7926_v29, 0.0 }
 0xe83   :  { %v7959_v20 = vpack.c.bf16 %v7949_v42, %v7948_v61 }
 0xe84   :  { %11213 = vmatmul.msk.bf16.gmra.mxu1 %vm18298_vm14, %v16479_v9  ;;  %vm18303_vm14 = vmmov %vm18281_vm2  ;;  %v8570_v9 = vpop.f32.mrf.mxu0 }
 0xe85   :  { %11153 = vmatmul.msk.bf16.gmra.mxu2 %vm18299_vm12, %v7959_v20  ;;  %vm18304_vm12 = vmmov %vm18281_vm2  ;;  %v8571_v57 = vadd.f32 %v8570_v9, %v8485_v8 }
 0xe86   :  { %v7928_v48 = vpop.f32.mrf.mxu1 }
 0xe87   :  { %v7929_v3 = vadd.f32 %v7928_v48, %v16714_v49 }
 0xe89   :  { %v7950_v35 = vmax.f32 %v7929_v3, 0.0 }
 0xe8c   :  { %v8572_v33 = vpop.f32.mrf.mxu0 }
 0xe8e   :  { %v7930_v63 = vpop.f32.mrf.mxu1 }
 0xe8f   :  { %v7931_v53 = vadd.f32 %v7930_v63, %v16714_v49 }
 0xe91   :  { %v7951_v45 = vmax.f32 %v7931_v53, 0.0 }
 0xe93   :  { %v7960_v40 = vpack.c.bf16 %v7951_v45, %v7950_v35 }
 0xe94   :  { %11214 = vmatmul.msk.bf16.gmra.mxu1 %vm18300_vm13, %v16517_v55  ;;  %v11578_v55 = vld [vmem:[%s17699_s11 + $0x48] sm:$0xff]  ;;  %vm18305_vm13 = vcmp.lt.s32.totalorder %v18234_v43, 7  ;;  %v8575_v22 = vpop.f32.mrf.mxu0 }
 0xe95   :  { %11154 = vmatmul.msk.bf16.gmra.mxu2 %vm18301_vm15, %v7960_v40  ;;  %vm18306_vm15 = vmmov %vm18305_vm13 }
 0xe96   :  { %8919 = vmatpush.bf16.msra.mxu2 %v11578_v55 }
 0xe9a   :  { %8920 = vmatpush.bf16.msra.mxu2 %v11577_v59 }
 0xe9c   :  { %v8577_v1 = vpop.f32.mrf.mxu0 }
 0xea4   :  { %11215 = vmatmul.msk.bf16.gmra.mxu1 %vm18281_vm2, %v16577_v38  ;;  %v8439_v38 = vsel %vm18305_vm13, %v8423_v62, %v8408_v7  ;;  %v11580_v7 = vld [vmem:[%s17699_s11 + $0x58] sm:$0xff]  ;;  %v8580_v5 = vpop.f32.mrf.mxu0  ;;  %vm18311_vm13 = vmmov %vm18302_vm4 }
 0xea5   :  { %9097 = vmatpush.bf16.msrb.mxu0 %v11580_v7 }
 0xea9   :  { %9098 = vmatpush.bf16.msrb.mxu0 %v11579_v12 }
 0xeac   :  { %v8582_v63 = vpop.f32.mrf.mxu0 }
 0xeb4   :  { %11216 = vmatmul.msk.bf16.gmra.mxu1 %vm18302_vm4, %v16612_v47  ;;  %v8487_v47 = vpop.f32.mrf.mxu3 }
 0xec4   :  { %11217 = vmatmul.msk.bf16.gmra.mxu1 %vm18303_vm14, %v16640_v6  ;;  %v8424_v6 = vsel %vm18306_vm15, %v8422_v10, %v8423_v62  ;;  %v8490_v10 = vpop.f32.mrf.mxu3  ;;  %vm18309_vm14 = vcmask 130048  }
 0xec5   :  { %v8576_v42 = vadd.f32 %v8575_v22, %v8490_v10 }
 0xecc   :  { %v8492_v4 = vpop.f32.mrf.mxu3 }
 0xed4   :  { %11218 = vmatmul.msk.bf16.gmra.mxu1 %vm18304_vm12, %v16667_v31  ;;  %v18307_v31 = vld [vmem:[#allocation20_spill] sm:$0xff]  ;;  %v8495_v29 = vpop.f32.mrf.mxu3  ;;  %vm18310_vm12 = vcmp.lt.s32.totalorder %v18234_v43, 1 }
 0xed5   :  { %vm18308_vm2 = vnez %v18307_v31  ;;  %v8581_v12 = vadd.f32 %v8580_v5, %v8495_v29  ;;  %v11576_v29 = vld [vmem:[%s17699_s11 + $0x38] sm:$0xff] }
 0xed6   :  { %v8455_v21 = vsel %vm18308_vm2, %v8439_v38, 0.0  ;;  %9004 = vmatpush.bf16.msrb.mxu3 %v11576_v29 }
 0xed7   :  { %v8617_v39 = vpack.c.bf16 %v8455_v21, %v8424_v6 }
 0xedc   :  { %v8497_v8 = vpop.f32.mrf.mxu3 }
 0xedd   :  { %v8583_v5 = vadd.f32 %v8582_v63, %v8497_v8 }
 0xee1   :  { %v7933_v0 = vpop.f32.mrf.mxu1 }
 0xee2   :  { %v7934_v15 = vadd.f32 %v7933_v0, %v16714_v49 }
 0xee4   :  { %11219 = vmatmul.msk.bf16.gmra.mxu1 %vm18302_vm4, %v8617_v39  ;;  %v7952_v27 = vmax.f32 %v7934_v15, 0.0  ;;  %vm18312_vm4 = vmmov %vm18310_vm12  ;;  %v8585_v39 = vpop.f32.mrf.mxu0 }
 0xee9   :  { %v7935_v17 = vpop.f32.mrf.mxu1 }
 0xeea   :  { %v7936_v56 = vadd.f32 %v7935_v17, %v16714_v49  ;;  %v8573_v49 = vadd.f32 %v8572_v33, %v8487_v47  ;;  %v8578_v33 = vadd.f32 %v8577_v1, %v8492_v4 }
 0xeec   :  { %v7953_v60 = vmax.f32 %v7936_v56, 0.0  ;;  %v8500_v56 = vpop.f32.mrf.mxu3 }
 0xeee   :  { %v7961_v19 = vpack.c.bf16 %v7953_v60, %v7952_v27 }
 0xef0   :  { %11155 = vmatmul.msk.bf16.gmra.mxu2 %vm18309_vm14, %v7961_v19  ;;  %vm18313_vm14 = vmmov %vm18306_vm15 }
 0xef1   :  { %v8663_v54 = vpop.f32.mrf.mxu1 }
 0xef2   :  { %v8703_v44 = vadd.f32 %v8663_v54, %v8571_v57 }
 0xef4   :  { %v8720_v58 = vadd.f32 %v16812_v13, %v8703_v44 }
 0xef6   :  { %v16815_v26 = vmax.f32 %v8720_v58, 0.0 }
 0xef8   :  { %v8765_v20 = vrot.slane %v16815_v26, 7  ;;  %v8813_v47 = vrot.slane %v16815_v26, 1 }
 0xef9   :  { %v8665_v16 = vpop.f32.mrf.mxu1 }
 0xefa   :  { %v8704_v52 = vadd.f32 %v8665_v16, %v8573_v49  ;;  %v8587_v49 = vpop.f32.mrf.mxu0 }
 0xefc   :  { %v8721_v23 = vadd.f32 %v16812_v13, %v8704_v52 }
 0xefe   :  { %v8737_v61 = vmax.f32 %v8721_v23, 0.0 }
 0xf00   :  { %v8766_v48 = vrot.slane %v8737_v61, 7  ;;  %v8869_v3 = vpack.c.bf16 %v8737_v61, %v16815_v26  ;;  %v8814_v62 = vrot.slane %v8737_v61, 1  ;;  %v8502_v61 = vpop.f32.mrf.mxu3 }
 0xf01   :  { %v8668_v53 = vpop.f32.mrf.mxu1 }
 0xf02   :  { %v16824_v35 = vsel %vm18310_vm12, %v8765_v20, %v8766_v48  ;;  %v8705_v45 = vadd.f32 %v8668_v53, %v8576_v42  ;;  %11240 = vmatmul.msk.bf16.vlgmr.msra.gmra.mxu2 %vm18311_vm13, %v8869_v3  ;;  %v8843_v22 = vsel %vm18313_vm14, %v8813_v47, %v8814_v62  ;;  %vm18314_vm12 = vmmov %vm18311_vm13 }
 0xf03   :  { %vm18315_vm13 = vmmov %vm18314_vm12 }
 0xf04   :  { %v8722_v40 = vadd.f32 %v16812_v13, %v8705_v45 }
 0xf06   :  { %v8738_v9 = vmax.f32 %v8722_v40, 0.0 }
 0xf08   :  { %v8767_v55 = vrot.slane %v8738_v9, 7  ;;  %v8815_v38 = vrot.slane %v8738_v9, 1 }
 0xf09   :  { %v8670_v6 = vpop.f32.mrf.mxu1 }
 0xf0a   :  { %v8842_v21 = vsel %vm18306_vm15, %v8814_v62, %v8815_v38  ;;  %v8706_v59 = vadd.f32 %v8670_v6, %v8578_v33  ;;  %v8794_v0 = vsel %vm18312_vm4, %v8766_v48, %v8767_v55  ;;  %vm18316_vm15 = vmmov %vm18312_vm4  ;;  %v8590_v62 = vpop.f32.mrf.mxu0  ;;  %v8586_v33 = vadd.f32 %v8585_v39, %v8500_v56 }
 0xf0b   :  { %v8846_v7 = vsel %vm12311_vm3, %v8842_v21, 0.0  ;;  %v8799_v57 = vsel %vm12336_vm5, %v8794_v0, 0.0  ;;  %vm18317_vm4 = vmmov %vm18313_vm14  ;;  %v8588_v39 = vadd.f32 %v8587_v49, %v8502_v61 }
 0xf0c   :  { %v9047_v15 = vpack.c.bf16 %v8846_v7, %v8843_v22  ;;  %v8723_v10 = vadd.f32 %v16812_v13, %v8706_v59  ;;  %vm18318_vm14 = vmmov %vm18316_vm15  ;;  %v8505_v22 = vpop.f32.mrf.mxu3 }
 0xf0d   :  { %v8591_v29 = vadd.f32 %v8590_v62, %v8505_v22 }
 0xf0e   :  { %v8739_v17 = vmax.f32 %v8723_v10, 0.0  ;;  %11272 = vmatmul.msk.bf16.vlgmr.msrb.gmra.mxu0 %vm18314_vm12, %v9047_v15  ;;  %vm18319_vm12 = vmmov %vm18317_vm4 }
 0xf10   :  { %v8768_v27 = vrot.slane %v8739_v17, 7  ;;  %v8870_v60 = vpack.c.bf16 %v8739_v17, %v8738_v9  ;;  %v8816_v16 = vrot.slane %v8739_v17, 1 }
 0xf11   :  { %v8673_v1 = vpop.f32.mrf.mxu1 }
 0xf12   :  { %v8707_v19 = vadd.f32 %v8673_v1, %v8581_v12  ;;  %11241 = vmatmul.msk.bf16.gmra.mxu2 %vm18315_vm13, %v8870_v60  ;;  %v8793_v54 = vsel %vm18316_vm15, %v8767_v55, %v8768_v27  ;;  %v8841_v45 = vsel %vm18319_vm12, %v8815_v38, %v8816_v16  ;;  %vm18320_vm15 = vmmov %vm18315_vm13 }
 0xf13   :  { %v16846_v4 = vpack.c.bf16 %v8793_v54, %v8799_v57 }
 0xf14   :  { %v8724_v44 = vadd.f32 %v16812_v13, %v8707_v19 }
 0xf16   :  { %v8740_v58 = vmax.f32 %v8724_v44, 0.0 }
 0xf18   :  { %v8769_v52 = vrot.slane %v8740_v58, 7  ;;  %v8817_v23 = vrot.slane %v8740_v58, 1 }
 0xf19   :  { %v8675_v42 = vpop.f32.mrf.mxu1 }
 0xf1a   :  { %v8708_v48 = vadd.f32 %v8675_v42, %v8583_v5  ;;  %v8840_v3 = vsel %vm18317_vm4, %v8816_v16, %v8817_v23  ;;  %v8792_v53 = vsel %vm18318_vm14, %v8768_v27, %v8769_v52  ;;  %vm18321_vm4 = vmmov %vm18318_vm14  ;;  %v8592_v27 = vpop.f32.mrf.mxu0  ;;  %v8507_v16 = vpop.f32.mrf.mxu3 }
 0xf1b   :  { %v8848_v63 = vsel %vm12342_vm6, %v8840_v3, 0.0  ;;  %v8801_v0 = vsel %vm12367_vm7, %v8792_v53, 0.0  ;;  %vm18322_vm14 = vmmov %vm18319_vm12  ;;  %v16879_v5 = vpop.f32.mrf.mxu2 }
 0xf1c   :  { %v8725_v40 = vadd.f32 %v16812_v13, %v8708_v48  ;;  %v9048_v9 = vpack.c.bf16 %v8848_v63, %v8841_v45  ;;  %vm18323_vm12 = vmmov %vm18321_vm4 }
 0xf1e   :  { %v8741_v8 = vmax.f32 %v8725_v40, 0.0  ;;  %11273 = vmatmul.msk.bf16.gmra.mxu0 %vm18315_vm13, %v9048_v9  ;;  %vm18324_vm13 = vmmov %vm18322_vm14 }
 0xf20   :  { %v8770_v55 = vrot.slane %v8741_v8, 7  ;;  %v8871_v6 = vpack.c.bf16 %v8741_v8, %v8740_v58  ;;  %v8818_v17 = vrot.slane %v8741_v8, 1 }
 0xf21   :  { %v8678_v21 = vpop.f32.mrf.mxu1 }
 0xf22   :  { %v8709_v59 = vadd.f32 %v8678_v21, %v8586_v33  ;;  %11242 = vmatmul.msk.bf16.gmra.mxu2 %vm18320_vm15, %v8871_v6  ;;  %v8791_v38 = vsel %vm18321_vm4, %v8769_v52, %v8770_v55  ;;  %v8839_v57 = vsel %vm18324_vm13, %v8817_v23, %v8818_v17  ;;  %vm18325_vm4 = vmmov %vm18320_vm15  ;;  %v8595_v45 = vpop.f32.mrf.mxu0  ;;  %v8510_v8 = vpop.f32.mrf.mxu3 }
 0xf23   :  { %v16867_v7 = vpack.c.bf16 %v8791_v38, %v8801_v0  ;;  %v16890_v33 = vpop.f32.mrf.mxu2 }
 0xf24   :  { %v8726_v15 = vadd.f32 %v16812_v13, %v8709_v59 }
 0xf26   :  { %v8742_v10 = vmax.f32 %v8726_v15, 0.0 }
 0xf28   :  { %v8771_v56 = vrot.slane %v8742_v10, 7  ;;  %v8819_v12 = vrot.slane %v8742_v10, 1 }
 0xf29   :  { %v8680_v60 = vpop.f32.mrf.mxu1 }
 0xf2a   :  { %v8710_v1 = vadd.f32 %v8680_v60, %v8588_v39  ;;  %v8838_v19 = vsel %vm18322_vm14, %v8818_v17, %v8819_v12  ;;  %v8790_v54 = vsel %vm18323_vm12, %v8770_v55, %v8771_v56  ;;  %vm18326_vm14 = vmmov %vm18323_vm12  ;;  %v8593_v55 = vadd.f32 %v8592_v27, %v8507_v16 }
 0xf2b   :  { %v8850_v44 = vsel %vm12373_vm8, %v8838_v19, 0.0  ;;  %v8803_v53 = vsel %vm12398_vm9, %v8790_v54, 0.0  ;;  %vm18327_vm12 = vmmov %vm18324_vm13  ;;  %v8596_v60 = vadd.f32 %v8595_v45, %v8510_v8  ;;  %v8512_v54 = vpop.f32.mrf.mxu3 }
 0xf2c   :  { %v8727_v58 = vadd.f32 %v16812_v13, %v8710_v1  ;;  %v9049_v49 = vpack.c.bf16 %v8850_v44, %v8839_v57  ;;  %vm18328_vm13 = vmmov %vm18326_vm14  ;;  %v16902_v44 = vpop.f32.mrf.mxu2 }
 0xf2e   :  { %v8743_v52 = vmax.f32 %v8727_v58, 0.0  ;;  %11274 = vmatmul.msk.bf16.gmra.mxu0 %vm18320_vm15, %v9049_v49  ;;  %vm18329_vm15 = vmmov %vm18327_vm12 }
 0xf30   :  { %v8772_v61 = vrot.slane %v8743_v52, 7  ;;  %v8872_v42 = vpack.c.bf16 %v8743_v52, %v8742_v10  ;;  %v8820_v62 = vrot.slane %v8743_v52, 1 }
 0xf31   :  { %v8683_v48 = vpop.f32.mrf.mxu1 }
 0xf32   :  { %v8711_v3 = vadd.f32 %v8683_v48, %v8591_v29  ;;  %11243 = vmatmul.msk.bf16.gmra.mxu2 %vm18325_vm4, %v8872_v42  ;;  %v8789_v23 = vsel %vm18326_vm14, %v8771_v56, %v8772_v61  ;;  %v8837_v15 = vsel %vm18329_vm15, %v8819_v12, %v8820_v62  ;;  %v8597_v56 = vpop.f32.mrf.mxu0  ;;  %vm18330_vm14 = vmmov %vm18325_vm4 }
 0xf33   :  { %v16887_v63 = vpack.c.bf16 %v8789_v23, %v8803_v53  ;;  %v8598_v48 = vadd.f32 %v8597_v56, %v8512_v54  ;;  %v8515_v8 = vpop.f32.mrf.mxu3 }
 0xf34   :  { %v8728_v40 = vadd.f32 %v16812_v13, %v8711_v3 }
 0xf36   :  { %v8744_v9 = vmax.f32 %v8728_v40, 0.0 }
 0xf38   :  { %v8773_v6 = vrot.slane %v8744_v9, 7  ;;  %v8821_v21 = vrot.slane %v8744_v9, 1 }
 0xf39   :  { %v8685_v59 = vpop.f32.mrf.mxu1 }
 0xf3a   :  { %v8712_v38 = vadd.f32 %v8685_v59, %v8593_v55  ;;  %v8836_v0 = vsel %vm18327_vm12, %v8820_v62, %v8821_v21  ;;  %v8788_v22 = vsel %vm18328_vm13, %v8772_v61, %v8773_v6  ;;  %vm18331_vm12 = vmmov %vm18328_vm13  ;;  %v8600_v61 = vpop.f32.mrf.mxu0 }
 0xf3b   :  { %v8852_v10 = vsel %vm12404_vm10, %v8836_v0, 0.0  ;;  %v8805_v49 = vsel %vm12429_vm11, %v8788_v22, 0.0  ;;  %vm18332_vm13 = vmmov %vm18329_vm15  ;;  %v8601_v22 = vadd.f32 %v8600_v61, %v8515_v8  ;;  %v8517_v54 = vpop.f32.mrf.mxu3 }
 0xf3c   :  { %v8729_v17 = vadd.f32 %v16812_v13, %v8712_v38  ;;  %v9050_v39 = vpack.c.bf16 %v8852_v10, %v8837_v15  ;;  %vm18333_vm15 = vmmov %vm18331_vm12 }
 0xf3e   :  { %v8745_v27 = vmax.f32 %v8729_v17, 0.0  ;;  %11275 = vmatmul.msk.bf16.gmra.mxu0 %vm18325_vm4, %v9050_v39  ;;  %vm18334_vm4 = vmmov %vm18332_vm13 }
 0xf40   :  { %v8774_v1 = vrot.slane %v8745_v27, 7  ;;  %v8873_v19 = vpack.c.bf16 %v8745_v27, %v8744_v9  ;;  %v8822_v42 = vrot.slane %v8745_v27, 1 }
 0xf41   :  { %v8688_v57 = vpop.f32.mrf.mxu1 }
 0xf42   :  { %v8713_v58 = vadd.f32 %v8688_v57, %v8596_v60  ;;  %11244 = vmatmul.msk.bf16.gmra.mxu2 %vm18330_vm14, %v8873_v19  ;;  %v8787_v12 = vsel %vm18331_vm12, %v8773_v6, %v8774_v1  ;;  %v8835_v62 = vsel %vm18334_vm4, %v8821_v21, %v8822_v42  ;;  %vm18335_vm14 = vnez %v18260_v30  ;;  %v16920_v6 = vpop.f32.mrf.mxu2  ;;  %v8602_v17 = vpop.f32.mrf.mxu0  ;;  %v11575_v60 = vld [vmem:[%s17699_s11 + $0x30] sm:$0xff] }
 0xf43   :  { %v16909_v16 = vpack.c.bf16 %v8787_v12, %v8805_v49  ;;  %vm18336_vm12 = vcmask 261120   ;;  %vm18338_vm4 = vnez %v18262_v36  ;;  %9005 = vmatpush.bf16.msrb.mxu3 %v11575_v60  ;;  %v8603_v49 = vadd.f32 %v8602_v17, %v8517_v54 }
 0xf44   :  { %v8730_v52 = vadd.f32 %v16812_v13, %v8713_v58 }
 0xf46   :  { %v8746_v29 = vmax.f32 %v8730_v52, 0.0 }
 0xf48   :  { %v8775_v3 = vrot.slane %v8746_v29, 7  ;;  %v8823_v23 = vrot.slane %v8746_v29, 1 }
 0xf49   :  { %v8690_v53 = vpop.f32.mrf.mxu1 }
 0xf4a   :  { %v8714_v45 = vadd.f32 %v8690_v53, %v8598_v48  ;;  %v8834_v40 = vsel %vm18332_vm13, %v8822_v42, %v8823_v23  ;;  %v8786_v9 = vsel %vm18333_vm15, %v8774_v1, %v8775_v3  ;;  %vm18337_vm13 = vmmov %vm18336_vm12  ;;  %v16935_v57 = vpop.f32.mrf.mxu2  ;;  %v8605_v53 = vpop.f32.mrf.mxu0 }
 0xf4b   :  { %v8854_v55 = vsel %vm18335_vm14, %v8834_v40, 0.0  ;;  %v8807_v27 = vsel %vm18338_vm4, %v8786_v9, 0.0  ;;  %vm18342_vm4 = vnez %v18264_v46  ;;  %vm18343_vm14 = vcmask 261120  }
 0xf4c   :  { %v8731_v59 = vadd.f32 %v16812_v13, %v8714_v45  ;;  %v9051_v38 = vpack.c.bf16 %v8854_v55, %v8835_v62  ;;  %v8520_v62 = vpop.f32.mrf.mxu3 }
 0xf4e   :  { %v8747_v0 = vmax.f32 %v8731_v59, 0.0  ;;  %11276 = vmatmul.msk.bf16.gmra.mxu0 %vm18336_vm12, %v9051_v38  ;;  %vm18339_vm12 = vcmp.lt.s32.totalorder %v18234_v43, 7  ;;  %v8606_v38 = vadd.f32 %v8605_v53, %v8520_v62 }
 0xf50   :  { %v8776_v15 = vrot.slane %v8747_v0, 7  ;;  %v8874_v10 = vpack.c.bf16 %v8747_v0, %v8746_v29  ;;  %v8824_v12 = vrot.slane %v8747_v0, 1 }
 0xf51   :  { %v8693_v39 = vpop.f32.mrf.mxu1 }
 0xf52   :  { %v8715_v56 = vadd.f32 %v8693_v39, %v8601_v22  ;;  %11245 = vmatmul.msk.bf16.gmra.mxu2 %vm18337_vm13, %v8874_v10  ;;  %v8785_v21 = vsel %vm18333_vm15, %v8775_v3, %v8776_v15  ;;  %vm18340_vm13 = vmmov %vm18333_vm15  ;;  %v16947_v59 = vpop.f32.mrf.mxu2 }
 0xf53   :  { %v16932_v1 = vpack.c.bf16 %v8785_v21, %v8807_v27  ;;  %vm18341_vm15 = vmmov %vm18339_vm12  ;;  %v8607_v21 = vpop.f32.mrf.mxu0 }
 0xf54   :  { %v8732_v19 = vadd.f32 %v16812_v13, %v8715_v56  ;;  %v8833_v45 = vsel %vm18341_vm15, %v8823_v23, %v8824_v12  ;;  %v8522_v60 = vpop.f32.mrf.mxu3 }
 0xf55   :  { %v8608_v54 = vadd.f32 %v8607_v21, %v8522_v60 }
 0xf56   :  { %v8748_v58 = vmax.f32 %v8732_v19, 0.0 }
 0xf58   :  { %v8777_v52 = vrot.slane %v8748_v58, 7  ;;  %v8825_v29 = vrot.slane %v8748_v58, 1 }
 0xf59   :  { %v8695_v61 = vpop.f32.mrf.mxu1 }
 0xf5a   :  { %v8716_v42 = vadd.f32 %v8695_v61, %v8603_v49  ;;  %v8832_v48 = vsel %vm18339_vm12, %v8824_v12, %v8825_v29  ;;  %v8784_v3 = vsel %vm18340_vm13, %v8776_v15, %v8777_v52  ;;  %vm18344_vm12 = vmmov %vm18343_vm14  ;;  %v16955_v12 = vpop.f32.mrf.mxu2 }
 0xf5b   :  { %v8856_v40 = vsel %vm18342_vm4, %v8832_v48, 0.0  ;;  %v8809_v17 = vsel %vm18268_vm0, %v8784_v3, 0.0  ;;  %vm18349_vm0 = vcmask 261120  }
 0xf5c   :  { %v8733_v9 = vadd.f32 %v16812_v13, %v8716_v42  ;;  %v9052_v8 = vpack.c.bf16 %v8856_v40, %v8833_v45 }
 0xf5e   :  { %v8749_v55 = vmax.f32 %v8733_v9, 0.0  ;;  %11277 = vmatmul.msk.bf16.gmra.mxu0 %vm18343_vm14, %v9052_v8  ;;  %vm18345_vm14 = vmmov %vm18341_vm15 }
 0xf5f   :  { %vm18346_vm15 = vmmov %vm18340_vm13 }
 0xf60   :  { %v8778_v0 = vrot.slane %v8749_v55, 7  ;;  %v8875_v22 = vpack.c.bf16 %v8749_v55, %v8748_v58  ;;  %v8826_v19 = vrot.slane %v8749_v55, 1 }
 0xf61   :  { %v8698_v15 = vpop.f32.mrf.mxu1 }
 0xf62   :  { %v8717_v10 = vadd.f32 %v8698_v15, %v8606_v38  ;;  %11246 = vmatmul.msk.bf16.gmra.mxu2 %vm18344_vm12, %v8875_v22  ;;  %v8783_v23 = vsel %vm18340_vm13, %v8777_v52, %v8778_v0  ;;  %vm18347_vm12 = vmmov %vm18345_vm14  ;;  %vm18348_vm13 = vnez %v18274_v41  ;;  %v16967_v55 = vpop.f32.mrf.mxu2 }
 0xf63   :  { %v8867_v39 = vpack.c.bf16 %v8783_v23, %v8809_v17  ;;  %v8831_v3 = vsel %vm18347_vm12, %v8825_v29, %v8826_v19 }
 0xf64   :  { %v8734_v56 = vadd.f32 %v16812_v13, %v8717_v10 }
 0xf66   :  { %v8750_v27 = vmax.f32 %v8734_v56, 0.0 }
 0xf68   :  { %v8779_v58 = vrot.slane %v8750_v27, 7  ;;  %v8827_v49 = vrot.slane %v8750_v27, 1 }
 0xf69   :  { %v8700_v61 = vpop.f32.mrf.mxu1 }
 0xf6a   :  { %v8718_v42 = vadd.f32 %v8700_v61, %v8608_v54  ;;  %v8830_v52 = vsel %vm18345_vm14, %v8826_v19, %v8827_v49  ;;  %v8782_v48 = vsel %vm18346_vm15, %v8778_v0, %v8779_v58  ;;  %vm18350_vm14 = vmmov %vm18346_vm15 }
 0xf6b   :  { %v8858_v53 = vsel %vm18348_vm13, %v8830_v52, 0.0  ;;  %vm18351_vm15 = vmmov %vm18349_vm0 }
 0xf6c   :  { %v8735_v45 = vadd.f32 %v16812_v13, %v8718_v42  ;;  %v9053_v40 = vpack.c.bf16 %v8858_v53, %v8831_v3  ;;  %vm18352_vm12 = vmmov %vm18350_vm14  ;;  %v8811_v13 = vsel %vm18280_vm1, %v8782_v48, 0.0  ;;  %v11585_v42 = vld [vmem:[%s17699_s11 + $0x80] sm:$0xff] }
 0xf6d   :  { %vm18354_vm13 = vmmov %vm18351_vm15 }
 0xf6e   :  { %v8751_v9 = vmax.f32 %v8735_v45, 0.0  ;;  %11278 = vmatmul.msk.bf16.gmra.mxu0 %vm18349_vm0, %v9053_v40  ;;  %vm18353_vm0 = vnez %v18282_v2  ;;  %v17032_v40 = vperm.slane %v16711_v34, 1 }
 0xf70   :  { %v8780_v8 = vrot.slane %v8751_v9, 7  ;;  %v8876_v62 = vpack.c.bf16 %v8751_v9, %v8750_v27  ;;  %v8828_v0 = vrot.slane %v8751_v9, 1 }
 0xf72   :  { %v8796_v38 = vsel %vm18350_vm14, %v8780_v8, %v8765_v20  ;;  %11247 = vmatmul.msk.bf16.gmra.mxu2 %vm18351_vm15, %v8876_v62  ;;  %v8781_v29 = vsel %vm18352_vm12, %v8779_v58, %v8780_v8  ;;  %vm18355_vm14 = vcmp.lt.s32.totalorder %v18234_v43, 7  ;;  %vm18357_vm12 = vmmov %vm18354_vm13 }
 0xf73   :  { %v8797_v22 = vsel %vm18353_vm0, %v8796_v38, 0.0  ;;  %v8868_v15 = vpack.c.bf16 %v8781_v29, %v8811_v13  ;;  %v8844_v20 = vsel %vm18355_vm14, %v8828_v0, %v8813_v47  ;;  %vm18356_vm15 = vmmov %vm18355_vm14 }
 0xf74   :  { %v8861_v10 = vpack.c.bf16 %v16824_v35, %v8797_v22  ;;  %v8829_v23 = vsel %vm18356_vm15, %v8827_v49, %v8828_v0  ;;  %v8860_v17 = vsel %vm18308_vm2, %v8844_v20, 0.0  ;;  %vm18358_vm0 = vmmov %vm18357_vm12  ;;  %v16993_v35 = vpop.f32.mrf.mxu2 }
 0xf75   :  { %v9054_v56 = vpack.c.bf16 %v8860_v17, %v8829_v23  ;;  %vm18360_vm14 = vmmov %vm18358_vm0 }
 0xf76   :  { %11256 = vmatmul.msk.bf16.vlgmr.msrb.gmra.mxu3 %vm18354_vm13, %v8861_v10  ;;  %vm18359_vm13 = vmmov %vm18358_vm0 }
 0xf77   :  { %vm18361_vm15 = vmmov %vm18358_vm0 }
 0xf7c   :  { %v16997_v26 = vpop.f32.mrf.mxu2 }
 0xf7e   :  { %11279 = vmatmul.msk.bf16.gmra.mxu0 %vm18357_vm12, %v9054_v56  ;;  %vm18362_vm12 = vmmov %vm18358_vm0 }
 0xf84   :  { %v16999_v47 = vpop.f32.mrf.mxu2 }
 0xf86   :  { %11257 = vmatmul.msk.bf16.gmra.mxu3 %vm18358_vm0, %v16846_v4 }
 0xf8c   :  { %v17003_v21 = vpop.f32.mrf.mxu2 }
 0xf94   :  { %v17007_v27 = vpop.f32.mrf.mxu2 }
 0xf96   :  { %11258 = vmatmul.msk.bf16.gmra.mxu3 %vm18359_vm13, %v16867_v7  ;;  %vm18363_vm13 = vmmov %vm18358_vm0 }
 0xf9c   :  { %v17009_v4 = vpop.f32.mrf.mxu2 }
 0xfa4   :  { %v17013_v7 = vpop.f32.mrf.mxu2 }
 0xfa6   :  { %11259 = vmatmul.msk.bf16.gmra.mxu3 %vm18360_vm14, %v16887_v63  ;;  %v9100_v63 = vpop.f32.mrf.mxu0  ;;  %vm18364_vm14 = vcmp.lt.s32.totalorder %v18234_v43, 1 }
 0xfac   :  { %v17015_v60 = vpop.f32.mrf.mxu2 }
 0xfae   :  { %v9102_v58 = vpop.f32.mrf.mxu0 }
 0xfb4   :  { %v8922_v19 = vpop.f32.mrf.mxu2 }
 0xfb6   :  { %11260 = vmatmul.msk.bf16.gmra.mxu3 %vm18361_vm15, %v16909_v16  ;;  %v11584_v16 = vld [vmem:[%s17699_s11 + $0x78] sm:$0xff]  ;;  %v9105_v61 = vpop.f32.mrf.mxu0  ;;  %vm18365_vm15 = vmmov %vm18358_vm0 }
 0xfb7   :  { %9356 = vmatpush.bf16.msrb.mxu1 %v11584_v16 }
 0xfbc   :  { %v8924_v54 = vpop.f32.mrf.mxu2 }
 0xfbe   :  { %v9107_v53 = vpop.f32.mrf.mxu0 }
 0xfc4   :  { %v8927_v49 = vpop.f32.mrf.mxu2 }
 0xfc6   :  { %11261 = vmatmul.msk.bf16.gmra.mxu3 %vm18358_vm0, %v16932_v1  ;;  %v11583_v1 = vld [vmem:[%s17699_s11 + $0x70] sm:$0xff]  ;;  %v9110_v29 = vpop.f32.mrf.mxu0  ;;  %vm18366_vm0 = vcmp.lt.s32.totalorder %v18234_v43, 7 }
 0xfc7   :  { %9357 = vmatpush.bf16.msrb.mxu1 %v11583_v1 }
 0xfcc   :  { %v8929_v52 = vpop.f32.mrf.mxu2 }
 0xfce   :  { %v9112_v16 = vpop.f32.mrf.mxu0 }
 0xfd4   :  { %v8932_v38 = vpop.f32.mrf.mxu2 }
 0xfd6   :  { %11262 = vmatmul.msk.bf16.gmra.mxu3 %vm18362_vm12, %v8867_v39  ;;  %v11586_v39 = vld [vmem:[%s17699_s11 + $0x88] sm:$0xff]  ;;  %vm18367_vm12 = vmmov %vm18364_vm14 }
 0xfd7   :  { %9534 = vmatpush.bf16.msra.mxu3 %v11586_v39 }
 0xfdb   :  { %9535 = vmatpush.bf16.msra.mxu3 %v11585_v42 }
 0xfe6   :  { %11263 = vmatmul.msk.bf16.gmra.mxu3 %vm18363_vm13, %v8868_v15  ;;  %vm18368_vm13 = vmmov %vm18366_vm0 }
 0xff9   :  { %v9007_v48 = vpop.f32.mrf.mxu3 }
 0xffa   :  { %v9008_v3 = vadd.f32 %v9007_v48, %v8922_v19 }
 0xffc   :  { %v9140_v45 = vadd.f32 %v9100_v63, %v9008_v3  ;;  %v8934_v63 = vpop.f32.mrf.mxu2 }
 0xffe   :  { %v9157_v8 = vadd.f32 %v17032_v40, %v9140_v45 }
0x1000   :  { %v17035_v13 = vmax.f32 %v9157_v8, 0.0 }
0x1001   :  { %v9009_v9 = vpop.f32.mrf.mxu3 }
0x1002   :  { %v9010_v62 = vadd.f32 %v9009_v9, %v8924_v54  ;;  %v9202_v20 = vrot.slane %v17035_v13, 7 }
0x1004   :  { %v9141_v0 = vadd.f32 %v9102_v58, %v9010_v62 }
0x1006   :  { %v9158_v22 = vadd.f32 %v17032_v40, %v9141_v0 }
0x1008   :  { %v9174_v15 = vmax.f32 %v9158_v22, 0.0  ;;  %v8937_v22 = vpop.f32.mrf.mxu2 }
0x1009   :  { %v9012_v10 = vpop.f32.mrf.mxu3 }
0x100a   :  { %v9203_v23 = vrot.slane %v9174_v15, 7  ;;  %v9306_v17 = vpack.c.bf16 %v9174_v15, %v17035_v13  ;;  %v9013_v34 = vadd.f32 %v9012_v10, %v8927_v49  ;;  %v9251_v1 = vrot.slane %v9174_v15, 1  ;;  %v9115_v10 = vpop.f32.mrf.mxu0 }
0x100b   :  { %v17840_v49 = vrot.slane %v17035_v13, 1 }
0x100c   :  { %v17044_v56 = vsel %vm18364_vm14, %v9202_v20, %v9203_v23  ;;  %v9142_v19 = vadd.f32 %v9105_v61, %v9013_v34  ;;  %11300 = vmatmul.msk.bf16.vlgmr.msrb.gmra.mxu1 %vm18365_vm15, %v9306_v17  ;;  %vm18369_vm14 = vmmov %vm18365_vm15 }
0x100d   :  { %v9280_v8 = vsel %vm18368_vm13, %v17840_v49, %v9251_v1  ;;  %vm18370_vm15 = vmmov %vm18369_vm14 }
0x100e   :  { %v9159_v54 = vadd.f32 %v17032_v40, %v9142_v19 }
0x1010   :  { %v9175_v58 = vmax.f32 %v9159_v54, 0.0 }
0x1011   :  { %v9014_v39 = vpop.f32.mrf.mxu3 }
0x1012   :  { %v9204_v42 = vrot.slane %v9175_v58, 7  ;;  %v9252_v48 = vrot.slane %v9175_v58, 1  ;;  %v9015_v3 = vadd.f32 %v9014_v39, %v8929_v52 }
0x1014   :  { %v9279_v45 = vsel %vm18366_vm0, %v9251_v1, %v9252_v48  ;;  %v9143_v9 = vadd.f32 %v9107_v53, %v9015_v3  ;;  %v9231_v61 = vsel %vm18367_vm12, %v9203_v23, %v9204_v42  ;;  %vm18371_vm0 = vmmov %vm18367_vm12 }
0x1015   :  { %v9283_v62 = vsel %vm12311_vm3, %v9279_v45, 0.0  ;;  %v9236_v1 = vsel %vm12336_vm5, %v9231_v61, 0.0  ;;  %vm18372_vm12 = vmmov %vm18368_vm13 }
0x1016   :  { %v9484_v0 = vpack.c.bf16 %v9283_v62, %v9280_v8  ;;  %v9160_v52 = vadd.f32 %v17032_v40, %v9143_v9  ;;  %v8939_v9 = vpop.f32.mrf.mxu2  ;;  %vm18373_vm13 = vmmov %vm18371_vm0 }
0x1018   :  { %v9176_v15 = vmax.f32 %v9160_v52, 0.0  ;;  %11332 = vmatmul.msk.bf16.vlgmr.msra.gmra.mxu3 %vm18369_vm14, %v9484_v0  ;;  %vm18374_vm14 = vmmov %vm18372_vm12 }
0x1019   :  { %v9017_v53 = vpop.f32.mrf.mxu3 }
0x101a   :  { %v9205_v17 = vrot.slane %v9176_v15, 7  ;;  %v9018_v34 = vadd.f32 %v9017_v53, %v8932_v38  ;;  %v9307_v23 = vpack.c.bf16 %v9176_v15, %v9175_v58  ;;  %v9253_v8 = vrot.slane %v9176_v15, 1 }
0x101c   :  { %v9144_v19 = vadd.f32 %v9110_v29, %v9018_v34  ;;  %11301 = vmatmul.msk.bf16.gmra.mxu1 %vm18370_vm15, %v9307_v23  ;;  %v9230_v54 = vsel %vm18371_vm0, %v9204_v42, %v9205_v17  ;;  %v9117_v29 = vpop.f32.mrf.mxu0  ;;  %v9278_v61 = vsel %vm18374_vm14, %v9252_v48, %v9253_v8  ;;  %vm18375_vm0 = vmmov %vm18370_vm15 }
0x101d   :  { %v17066_v39 = vpack.c.bf16 %v9230_v54, %v9236_v1 }
0x101e   :  { %v9161_v3 = vadd.f32 %v17032_v40, %v9144_v19 }
0x1020   :  { %v9177_v45 = vmax.f32 %v9161_v3, 0.0  ;;  %v8942_v3 = vpop.f32.mrf.mxu2 }
0x1021   :  { %v9019_v62 = vpop.f32.mrf.mxu3 }
0x1022   :  { %v9206_v0 = vrot.slane %v9177_v45, 7  ;;  %v9254_v38 = vrot.slane %v9177_v45, 1  ;;  %v9020_v58 = vadd.f32 %v9019_v62, %v8934_v63 }
0x1024   :  { %v9145_v52 = vadd.f32 %v9112_v16, %v9020_v58  ;;  %v9277_v53 = vsel %vm18372_vm12, %v9253_v8, %v9254_v38  ;;  %v9229_v42 = vsel %vm18373_vm13, %v9205_v17, %v9206_v0  ;;  %v11582_v17 = vld [vmem:[%s17699_s11 + $0x68] sm:$0xff]  ;;  %vm18376_vm12 = vmmov %vm18373_vm13  ;;  %v9120_v58 = vpop.f32.mrf.mxu0 }
0x1025   :  { %v9285_v34 = vsel %vm12342_vm6, %v9277_v53, 0.0  ;;  %9441 = vmatpush.bf16.msrb.mxu2 %v11582_v17  ;;  %v9238_v8 = vsel %vm12367_vm7, %v9229_v42, 0.0  ;;  %vm18377_vm13 = vmmov %vm18374_vm14 }
0x1026   :  { %v9162_v15 = vadd.f32 %v17032_v40, %v9145_v52  ;;  %v9485_v23 = vpack.c.bf16 %v9285_v34, %v9278_v61  ;;  %vm18378_vm14 = vmmov %vm18376_vm12 }
0x1028   :  { %v9178_v19 = vmax.f32 %v9162_v15, 0.0  ;;  %11333 = vmatmul.msk.bf16.gmra.mxu3 %vm18370_vm15, %v9485_v23  ;;  %vm18379_vm15 = vmmov %vm18377_vm13 }
0x1029   :  { %v9022_v63 = vpop.f32.mrf.mxu3 }
0x102a   :  { %v9207_v16 = vrot.slane %v9178_v19, 7  ;;  %v9023_v54 = vadd.f32 %v9022_v63, %v8937_v22  ;;  %v9308_v1 = vpack.c.bf16 %v9178_v19, %v9177_v45  ;;  %v9255_v53 = vrot.slane %v9178_v19, 1 }
0x102c   :  { %v9146_v62 = vadd.f32 %v9115_v10, %v9023_v54  ;;  %11302 = vmatmul.msk.bf16.gmra.mxu1 %vm18375_vm0, %v9308_v1  ;;  %v9228_v48 = vsel %vm18376_vm12, %v9206_v0, %v9207_v16  ;;  %v8944_v54 = vpop.f32.mrf.mxu2  ;;  %v9276_v42 = vsel %vm18379_vm15, %v9254_v38, %v9255_v53  ;;  %vm18380_vm12 = vmmov %vm18375_vm0 }
0x102d   :  { %v17087_v52 = vpack.c.bf16 %v9228_v48, %v9238_v8 }
0x102e   :  { %v9163_v22 = vadd.f32 %v17032_v40, %v9146_v62  ;;  %v9122_v62 = vpop.f32.mrf.mxu0 }
0x1030   :  { %v9179_v45 = vmax.f32 %v9163_v22, 0.0 }
0x1031   :  { %v9024_v61 = vpop.f32.mrf.mxu3 }
0x1032   :  { %v9208_v34 = vrot.slane %v9179_v45, 7  ;;  %v9256_v15 = vrot.slane %v9179_v45, 1  ;;  %v9025_v10 = vadd.f32 %v9024_v61, %v8939_v9 }
0x1034   :  { %v9147_v23 = vadd.f32 %v9117_v29, %v9025_v10  ;;  %v9275_v63 = vsel %vm18377_vm13, %v9255_v53, %v9256_v15  ;;  %v9227_v0 = vsel %vm18378_vm14, %v9207_v16, %v9208_v34  ;;  %vm18381_vm13 = vmmov %vm18378_vm14 }
0x1035   :  { %v9287_v1 = vsel %vm12373_vm8, %v9275_v63, 0.0  ;;  %v9240_v16 = vsel %vm12398_vm9, %v9227_v0, 0.0  ;;  %vm18382_vm14 = vmmov %vm18379_vm15 }
0x1036   :  { %v9164_v19 = vadd.f32 %v17032_v40, %v9147_v23  ;;  %v9486_v17 = vpack.c.bf16 %v9287_v1, %v9276_v42  ;;  %v8947_v23 = vpop.f32.mrf.mxu2  ;;  %v9125_v42 = vpop.f32.mrf.mxu0  ;;  %vm18383_vm15 = vmmov %vm18381_vm13 }
0x1038   :  { %v9180_v48 = vmax.f32 %v9164_v19, 0.0  ;;  %11334 = vmatmul.msk.bf16.gmra.mxu3 %vm18375_vm0, %v9486_v17  ;;  %vm18384_vm0 = vmmov %vm18382_vm14 }
0x1039   :  { %v9027_v9 = vpop.f32.mrf.mxu3 }
0x103a   :  { %v9209_v29 = vrot.slane %v9180_v48, 7  ;;  %v9028_v8 = vadd.f32 %v9027_v9, %v8942_v3  ;;  %v9309_v22 = vpack.c.bf16 %v9180_v48, %v9179_v45  ;;  %v9257_v1 = vrot.slane %v9180_v48, 1 }
0x103c   :  { %v9148_v61 = vadd.f32 %v9120_v58, %v9028_v8  ;;  %11303 = vmatmul.msk.bf16.gmra.mxu1 %vm18380_vm12, %v9309_v22  ;;  %v9226_v38 = vsel %vm18381_vm13, %v9208_v34, %v9209_v29  ;;  %v9274_v0 = vsel %vm18384_vm0, %v9256_v15, %v9257_v1  ;;  %vm18385_vm13 = vmmov %vm18380_vm12 }
0x103d   :  { %v17105_v53 = vpack.c.bf16 %v9226_v38, %v9240_v16 }
0x103e   :  { %v9165_v10 = vadd.f32 %v17032_v40, %v9148_v61 }
0x1040   :  { %v9181_v63 = vmax.f32 %v9165_v10, 0.0 }
0x1041   :  { %v9029_v19 = vpop.f32.mrf.mxu3 }
0x1042   :  { %v9210_v3 = vrot.slane %v9181_v63, 7  ;;  %v9258_v45 = vrot.slane %v9181_v63, 1  ;;  %v9030_v58 = vadd.f32 %v9029_v19, %v8944_v54  ;;  %v8949_v54 = vpop.f32.mrf.mxu2  ;;  %v9127_v19 = vpop.f32.mrf.mxu0 }
0x1044   :  { %v9149_v17 = vadd.f32 %v9122_v62, %v9030_v58  ;;  %v9273_v9 = vsel %vm18382_vm14, %v9257_v1, %v9258_v45  ;;  %v9225_v34 = vsel %vm18383_vm15, %v9209_v29, %v9210_v3  ;;  %vm18386_vm14 = vmmov %vm18383_vm15 }
0x1045   :  { %v9289_v8 = vsel %vm12404_vm10, %v9273_v9, 0.0  ;;  %v9242_v29 = vsel %vm12429_vm11, %v9225_v34, 0.0  ;;  %vm18387_vm15 = vmmov %vm18384_vm0 }
0x1046   :  { %v9166_v22 = vadd.f32 %v17032_v40, %v9149_v17  ;;  %v9487_v48 = vpack.c.bf16 %v9289_v8, %v9274_v0  ;;  %vm18388_vm0 = vmmov %vm18386_vm14 }
0x1048   :  { %v9182_v61 = vmax.f32 %v9166_v22, 0.0  ;;  %11335 = vmatmul.msk.bf16.gmra.mxu3 %vm18380_vm12, %v9487_v48  ;;  %vm18389_vm12 = vmmov %vm18387_vm15 }
0x1049   :  { %v9032_v62 = vpop.f32.mrf.mxu3 }
0x104a   :  { %v9211_v38 = vrot.slane %v9182_v61, 7  ;;  %v9033_v16 = vadd.f32 %v9032_v62, %v8947_v23  ;;  %v9310_v10 = vpack.c.bf16 %v9182_v61, %v9181_v63  ;;  %v9259_v0 = vrot.slane %v9182_v61, 1  ;;  %v8952_v48 = vpop.f32.mrf.mxu2 }
0x104c   :  { %v9150_v58 = vadd.f32 %v9125_v42, %v9033_v16  ;;  %11304 = vmatmul.msk.bf16.gmra.mxu1 %vm18385_vm13, %v9310_v10  ;;  %v9224_v15 = vsel %vm18386_vm14, %v9210_v3, %v9211_v38  ;;  %v9130_v16 = vpop.f32.mrf.mxu0  ;;  %v9272_v34 = vsel %vm18389_vm12, %v9258_v45, %v9259_v0  ;;  %vm18390_vm13 = vnez %v18260_v30 }
0x104d   :  { %v17123_v1 = vpack.c.bf16 %v9224_v15, %v9242_v29  ;;  %vm18391_vm14 = vcmask 261120   ;;  %vm18393_vm12 = vnez %v18262_v36 }
0x104e   :  { %v9167_v17 = vadd.f32 %v17032_v40, %v9150_v58 }
0x1050   :  { %v9183_v9 = vmax.f32 %v9167_v17, 0.0 }
0x1051   :  { %v9034_v8 = vpop.f32.mrf.mxu3 }
0x1052   :  { %v9212_v22 = vrot.slane %v9183_v9, 7  ;;  %v9260_v23 = vrot.slane %v9183_v9, 1  ;;  %v9035_v63 = vadd.f32 %v9034_v8, %v8949_v54 }
0x1054   :  { %v9151_v42 = vadd.f32 %v9127_v19, %v9035_v63  ;;  %v9271_v62 = vsel %vm18387_vm15, %v9259_v0, %v9260_v23  ;;  %v9223_v3 = vsel %vm18388_vm0, %v9211_v38, %v9212_v22  ;;  %vm18392_vm15 = vmmov %vm18391_vm14  ;;  %v8954_v0 = vpop.f32.mrf.mxu2  ;;  %v11581_v63 = vld [vmem:[%s17699_s11 + $0x60] sm:$0xff] }
0x1055   :  { %v9291_v10 = vsel %vm18390_vm13, %v9271_v62, 0.0  ;;  %v9244_v45 = vsel %vm18393_vm12, %v9223_v3, 0.0  ;;  %9442 = vmatpush.bf16.msrb.mxu2 %v11581_v63  ;;  %vm18397_vm12 = vcmask 261120  }
0x1056   :  { %v9168_v61 = vadd.f32 %v17032_v40, %v9151_v42  ;;  %v9488_v58 = vpack.c.bf16 %v9291_v10, %v9272_v34 }
0x1058   :  { %v9184_v15 = vmax.f32 %v9168_v61, 0.0  ;;  %11336 = vmatmul.msk.bf16.gmra.mxu3 %vm18391_vm14, %v9488_v58  ;;  %vm18394_vm14 = vcmp.lt.s32.totalorder %v18234_v43, 7 }
0x1059   :  { %v9037_v54 = vpop.f32.mrf.mxu3 }
0x105a   :  { %v9213_v19 = vrot.slane %v9184_v15, 7  ;;  %v9038_v29 = vadd.f32 %v9037_v54, %v8952_v48  ;;  %v9311_v17 = vpack.c.bf16 %v9184_v15, %v9183_v9  ;;  %v9132_v48 = vpop.f32.mrf.mxu0 }
0x105c   :  { %v9152_v8 = vadd.f32 %v9130_v16, %v9038_v29  ;;  %11305 = vmatmul.msk.bf16.gmra.mxu1 %vm18392_vm15, %v9311_v17  ;;  %v9222_v38 = vsel %vm18388_vm0, %v9212_v22, %v9213_v19  ;;  %v9261_v16 = vrot.slane %v9184_v15, 1  ;;  %vm18395_vm15 = vmmov %vm18388_vm0 }
0x105d   :  { %v17144_v42 = vpack.c.bf16 %v9222_v38, %v9244_v45  ;;  %vm18396_vm0 = vmmov %vm18394_vm14  ;;  %v8957_v38 = vpop.f32.mrf.mxu2 }
0x105e   :  { %v9169_v62 = vadd.f32 %v17032_v40, %v9152_v8  ;;  %v9270_v29 = vsel %vm18396_vm0, %v9260_v23, %v9261_v16  ;;  %vm18399_vm0 = vnez %v18267_v32 }
0x1060   :  { %v9185_v9 = vmax.f32 %v9169_v62, 0.0 }
0x1061   :  { %v9039_v34 = vpop.f32.mrf.mxu3 }
0x1062   :  { %v9214_v10 = vrot.slane %v9185_v9, 7  ;;  %v9262_v61 = vrot.slane %v9185_v9, 1  ;;  %v9040_v22 = vadd.f32 %v9039_v34, %v8954_v0  ;;  %v9135_v0 = vpop.f32.mrf.mxu0 }
0x1064   :  { %v9153_v58 = vadd.f32 %v9132_v48, %v9040_v22  ;;  %v9269_v3 = vsel %vm18394_vm14, %v9261_v16, %v9262_v61  ;;  %v9221_v54 = vsel %vm18395_vm15, %v9213_v19, %v9214_v10  ;;  %vm18398_vm14 = vmmov %vm18397_vm12 }
0x1065   :  { %v9293_v17 = vsel %vm18342_vm4, %v9269_v3, 0.0  ;;  %v9246_v19 = vsel %vm18399_vm0, %v9221_v54, 0.0  ;;  %vm18403_vm0 = vnez %v18274_v41  ;;  %vm18404_vm4 = vcmask 261120  }
0x1066   :  { %v9170_v8 = vadd.f32 %v17032_v40, %v9153_v58  ;;  %v9489_v15 = vpack.c.bf16 %v9293_v17, %v9270_v29  ;;  %v8959_v29 = vpop.f32.mrf.mxu2 }
0x1068   :  { %v9186_v45 = vmax.f32 %v9170_v8, 0.0  ;;  %11337 = vmatmul.msk.bf16.gmra.mxu3 %vm18397_vm12, %v9489_v15  ;;  %vm18400_vm12 = vcmp.lt.s32.totalorder %v18234_v43, 7 }
0x1069   :  { %v9042_v63 = vpop.f32.mrf.mxu3 }
0x106a   :  { %v9215_v62 = vrot.slane %v9186_v45, 7  ;;  %v9043_v48 = vadd.f32 %v9042_v63, %v8957_v38  ;;  %v9312_v34 = vpack.c.bf16 %v9186_v45, %v9185_v9  ;;  %v9263_v17 = vrot.slane %v9186_v45, 1  ;;  %v9137_v9 = vpop.f32.mrf.mxu0 }
0x106c   :  { %v9154_v22 = vadd.f32 %v9135_v0, %v9043_v48  ;;  %11306 = vmatmul.msk.bf16.gmra.mxu1 %vm18398_vm14, %v9312_v34  ;;  %v9220_v23 = vsel %vm18395_vm15, %v9214_v10, %v9215_v62  ;;  %vm18401_vm14 = vmmov %vm18395_vm15 }
0x106d   :  { %v9304_v16 = vpack.c.bf16 %v9220_v23, %v9246_v19  ;;  %vm18402_vm15 = vmmov %vm18400_vm12 }
0x106e   :  { %v9171_v58 = vadd.f32 %v17032_v40, %v9154_v22  ;;  %v9268_v54 = vsel %vm18402_vm15, %v9262_v61, %v9263_v17 }
0x1070   :  { %v9187_v3 = vmax.f32 %v9171_v58, 0.0 }
0x1071   :  { %v9044_v8 = vpop.f32.mrf.mxu3 }
0x1072   :  { %v9216_v15 = vrot.slane %v9187_v3, 7  ;;  %v9264_v49 = vrot.slane %v9187_v3, 1  ;;  %v9045_v38 = vadd.f32 %v9044_v8, %v8959_v29  ;;  %v18409_v8 = vrot.slane %v17035_v13, 1 }
0x1074   :  { %v9155_v0 = vadd.f32 %v9137_v9, %v9045_v38  ;;  %v9267_v63 = vsel %vm18400_vm12, %v9263_v17, %v9264_v49  ;;  %v9219_v10 = vsel %vm18401_vm14, %v9215_v62, %v9216_v15  ;;  %vm18405_vm12 = vmmov %vm18401_vm14 }
0x1075   :  { %v9295_v48 = vsel %vm18403_vm0, %v9267_v63, 0.0  ;;  %vm18406_vm14 = vmmov %vm18404_vm4  ;;  %vm18408_vm0 = vnez %v18282_v2 }
0x1076   :  { %v9172_v45 = vadd.f32 %v17032_v40, %v9155_v0  ;;  %v9490_v34 = vpack.c.bf16 %v9295_v48, %v9268_v54  ;;  %vm18407_vm15 = vmmov %vm18405_vm12  ;;  %v9248_v40 = vsel %vm18280_vm1, %v9219_v10, 0.0  ;;  %v11591_v0 = vld [vmem:[%s17700_s12 + $0x20] sm:$0xff] }
0x1078   :  { %v9188_v22 = vmax.f32 %v9172_v45, 0.0  ;;  %11338 = vmatmul.msk.bf16.gmra.mxu3 %vm18404_vm4, %v9490_v34  ;;  %v17222_v34 = vld [vmem:[%s17701_s13 + $0x8] sm:$0x3f] }
0x107a   :  { %v9217_v23 = vrot.slane %v9188_v22, 7  ;;  %v9313_v19 = vpack.c.bf16 %v9188_v22, %v9187_v3  ;;  %v9265_v62 = vrot.slane %v9188_v22, 1  ;;  %v17225_v22 = vperm.slane %v17222_v34, 2 }
0x107c   :  { %v9233_v58 = vsel %vm18405_vm12, %v9217_v23, %v9202_v20  ;;  %11307 = vmatmul.msk.bf16.gmra.mxu1 %vm18406_vm14, %v9313_v19  ;;  %v9218_v61 = vsel %vm18407_vm15, %v9216_v15, %v9217_v23  ;;  %vm18410_vm12 = vcmp.lt.s32.totalorder %v18234_v43, 7  ;;  %vm18412_vm15 = vmmov %vm18404_vm4 }
0x107d   :  { %v9234_v29 = vsel %vm18408_vm0, %v9233_v58, 0.0  ;;  %v9305_v17 = vpack.c.bf16 %v9218_v61, %v9248_v40  ;;  %v9281_v20 = vsel %vm18410_vm12, %v9265_v62, %v18409_v8  ;;  %vm18411_vm14 = vmmov %vm18410_vm12 }
0x107e   :  { %v9298_v3 = vpack.c.bf16 %v17044_v56, %v9234_v29  ;;  %v9266_v38 = vsel %vm18411_vm14, %v9264_v49, %v9265_v62  ;;  %v9297_v15 = vsel %vm18308_vm2, %v9281_v20, 0.0  ;;  %vm18413_vm0 = vmmov %vm18404_vm4 }
0x107f   :  { %v9491_v9 = vpack.c.bf16 %v9297_v15, %v9266_v38  ;;  %vm18414_vm1 = vmmov %vm18413_vm0 }
0x1080   :  { %11316 = vmatmul.msk.bf16.vlgmr.msrb.gmra.mxu2 %vm18404_vm4, %v9298_v3  ;;  %vm18415_vm4 = vmmov %vm18413_vm0 }
0x1081   :  { %vm18416_vm12 = vmmov %vm18413_vm0 }
0x1082   :  { %vm18417_vm14 = vmmov %vm18413_vm0 }
0x1083   :  { %vm18418_vm13 = vmmov %vm18413_vm0 }
0x1088   :  { %11339 = vmatmul.msk.bf16.gmra.mxu3 %vm18412_vm15, %v9491_v9  ;;  %vm18421_vm15 = vcmp.lt.s32.totalorder %v18234_v43, 7 }
0x1089   :  { %v9359_v13 = vpop.f32.mrf.mxu1 }
0x1090   :  { %11317 = vmatmul.msk.bf16.gmra.mxu2 %vm18413_vm0, %v17066_v39  ;;  %v11590_v39 = vld [vmem:[%s17700_s12 + $0x18] sm:$0xff] }
0x1091   :  { %v9361_v49 = vpop.f32.mrf.mxu1  ;;  %9792 = vmatpush.bf16.msra.mxu0 %v11590_v39 }
0x109b   :  { %v9537_v56 = vpop.f32.mrf.mxu3 }
0x10a0   :  { %11318 = vmatmul.msk.bf16.gmra.mxu2 %vm18414_vm1, %v17087_v52  ;;  %vm18419_vm1 = vcmp.lt.s32.totalorder %v18234_v43, 1 }
0x10a3   :  { %v9539_v52 = vpop.f32.mrf.mxu3 }
0x10b0   :  { %11319 = vmatmul.msk.bf16.gmra.mxu2 %vm18415_vm4, %v17105_v53  ;;  %v11589_v53 = vld [vmem:[%s17700_s12 + $0x10] sm:$0xff]  ;;  %vm18422_vm4 = vmmov %vm18419_vm1 }
0x10b1   :  { %9793 = vmatpush.bf16.msra.mxu0 %v11589_v53 }
0x10c0   :  { %11320 = vmatmul.msk.bf16.gmra.mxu2 %vm18416_vm12, %v17123_v1  ;;  %v9364_v1 = vpop.f32.mrf.mxu1  ;;  %vm18423_vm12 = vmmov %vm18421_vm15 }
0x10c8   :  { %v9366_v63 = vpop.f32.mrf.mxu1 }
0x10d0   :  { %11321 = vmatmul.msk.bf16.gmra.mxu2 %vm18417_vm14, %v17144_v42  ;;  %v9542_v42 = vpop.f32.mrf.mxu3  ;;  %v9369_v62 = vpop.f32.mrf.mxu1  ;;  %vm18424_vm14 = vmmov %vm18413_vm0 }
0x10d8   :  { %v9544_v48 = vpop.f32.mrf.mxu3 }
0x10e0   :  { %11322 = vmatmul.msk.bf16.gmra.mxu2 %vm18418_vm13, %v9304_v16  ;;  %v11592_v16 = vld [vmem:[%s17700_s12 + $0x28] sm:$0xff]  ;;  %v9547_v40 = vpop.f32.mrf.mxu3  ;;  %vm18420_vm13 = vmmov %vm18413_vm0 }
0x10e1   :  { %9970 = vmatpush.bf16.msra.mxu2 %v11592_v16 }
0x10e5   :  { %9971 = vmatpush.bf16.msra.mxu2 %v11591_v0 }
0x10f0   :  { %11323 = vmatmul.msk.bf16.gmra.mxu2 %vm18413_vm0, %v9305_v17 }
0x1103   :  { %v9444_v10 = vpop.f32.mrf.mxu2 }
0x1104   :  { %v9445_v54 = vadd.f32 %v9444_v10, %v9359_v13 }
0x1106   :  { %v9577_v45 = vadd.f32 %v9537_v56, %v9445_v54 }
0x1108   :  { %v9594_v19 = vadd.f32 %v17225_v22, %v9577_v45 }
0x110a   :  { %v17228_v29 = vmax.f32 %v9594_v19, 0.0 }
0x110b   :  { %v9446_v23 = vpop.f32.mrf.mxu2 }
0x110c   :  { %v9447_v58 = vadd.f32 %v9446_v23, %v9361_v49  ;;  %v9638_v20 = vrot.slane %v17228_v29, 7  ;;  %v9371_v49 = vpop.f32.mrf.mxu1 }
0x110e   :  { %v9578_v61 = vadd.f32 %v9539_v52, %v9447_v58  ;;  %v9549_v52 = vpop.f32.mrf.mxu3 }
0x1110   :  { %v9595_v17 = vadd.f32 %v17225_v22, %v9578_v61 }
0x1112   :  { %v9611_v3 = vmax.f32 %v9595_v17, 0.0 }
0x1113   :  { %v9449_v8 = vpop.f32.mrf.mxu2 }
0x1114   :  { %v9639_v38 = vrot.slane %v9611_v3, 7  ;;  %v9742_v15 = vpack.c.bf16 %v9611_v3, %v17228_v29  ;;  %v9450_v9 = vadd.f32 %v9449_v8, %v9364_v1  ;;  %v9687_v16 = vrot.slane %v9611_v3, 1  ;;  %v9374_v3 = vpop.f32.mrf.mxu1 }
0x1115   :  { %v9686_v1 = vrot.slane %v17228_v29, 1 }
0x1116   :  { %v17237_v13 = vsel %vm18419_vm1, %v9638_v20, %v9639_v38  ;;  %v9579_v56 = vadd.f32 %v9542_v42, %v9450_v9  ;;  %11348 = vmatmul.msk.bf16.vlgmr.msra.gmra.mxu0 %vm18420_vm13, %v9742_v15  ;;  %v9552_v15 = vpop.f32.mrf.mxu3  ;;  %vm18426_vm13 = vmmov %vm18419_vm1 }
0x1117   :  { %v9716_v58 = vsel %vm18423_vm12, %v9686_v1, %v9687_v16 }
0x1118   :  { %v9596_v39 = vadd.f32 %v17225_v22, %v9579_v56 }
0x111a   :  { %v9612_v53 = vmax.f32 %v9596_v39, 0.0 }
0x111b   :  { %v9451_v0 = vpop.f32.mrf.mxu2 }
0x111c   :  { %v9640_v10 = vrot.slane %v9612_v53, 7  ;;  %v9688_v54 = vrot.slane %v9612_v53, 1  ;;  %v9452_v45 = vadd.f32 %v9451_v0, %v9366_v63 }
0x111e   :  { %v9715_v23 = vsel %vm18421_vm15, %v9687_v16, %v9688_v54  ;;  %v9580_v19 = vadd.f32 %v9544_v48, %v9452_v45  ;;  %v9667_v42 = vsel %vm18422_vm4, %v9639_v38, %v9640_v10  ;;  %vm18428_vm15 = vmmov %vm18413_vm0 }
0x111f   :  { %v9719_v61 = vsel %vm12311_vm3, %v9715_v23, 0.0  ;;  %v9672_v25 = vsel %vm12336_vm5, %v9667_v42, 0.0  ;;  %vm18425_vm3 = vmmov %vm18423_vm12 }
0x1120   :  { %v9920_v17 = vpack.c.bf16 %v9719_v61, %v9716_v58  ;;  %v9597_v63 = vadd.f32 %v17225_v22, %v9580_v19  ;;  %v9376_v19 = vpop.f32.mrf.mxu1  ;;  %vm18427_vm5 = vmmov %vm18425_vm3 }
0x1121   :  { %vm18429_vm4 = vmmov %vm18413_vm0 }
0x1122   :  { %v9613_v8 = vmax.f32 %v9597_v63, 0.0  ;;  %11380 = vmatmul.msk.bf16.vlgmr.msra.gmra.mxu2 %vm18424_vm14, %v9920_v17  ;;  %vm18431_vm12 = vmmov %vm18425_vm3 }
0x1123   :  { %v9454_v48 = vpop.f32.mrf.mxu2  ;;  %vm18432_vm14 = vmmov %vm18419_vm1 }
0x1124   :  { %v9641_v9 = vrot.slane %v9613_v8, 7  ;;  %v9455_v56 = vadd.f32 %v9454_v48, %v9369_v62  ;;  %v9743_v38 = vpack.c.bf16 %v9613_v8, %v9612_v53  ;;  %v9689_v58 = vrot.slane %v9613_v8, 1 }
0x1126   :  { %v9581_v39 = vadd.f32 %v9547_v40, %v9455_v56  ;;  %11349 = vmatmul.msk.bf16.gmra.mxu0 %vm18413_vm0, %v9743_v38  ;;  %v9666_v16 = vsel %vm18419_vm1, %v9640_v10, %v9641_v9  ;;  %v9554_v40 = vpop.f32.mrf.mxu3  ;;  %v9714_v10 = vsel %vm18427_vm5, %v9688_v54, %v9689_v58 }
0x1127   :  { %v17259_v0 = vpack.c.bf16 %v9666_v16, %v9672_v25 }
0x1128   :  { %v9598_v45 = vadd.f32 %v17225_v22, %v9581_v39  ;;  %v9379_v25 = vpop.f32.mrf.mxu1 }
0x112a   :  { %v9614_v23 = vmax.f32 %v9598_v45, 0.0 }
0x112b   :  { %v9456_v61 = vpop.f32.mrf.mxu2 }
0x112c   :  { %v9642_v17 = vrot.slane %v9614_v23, 7  ;;  %v9690_v62 = vrot.slane %v9614_v23, 1  ;;  %v9457_v53 = vadd.f32 %v9456_v61, %v9371_v49 }
0x112e   :  { %v9582_v63 = vadd.f32 %v9549_v52, %v9457_v53  ;;  %v9713_v48 = vsel %vm18425_vm3, %v9689_v58, %v9690_v62  ;;  %v9665_v51 = vsel %vm18426_vm13, %v9641_v9, %v9642_v17  ;;  %v11588_v9 = vld [vmem:[%s17700_s12 + $0x8] sm:$0xff]  ;;  %v9557_v58 = vpop.f32.mrf.mxu3 }
0x112f   :  { %v9721_v42 = vsel %vm12342_vm6, %v9713_v48, 0.0  ;;  %9877 = vmatpush.bf16.msra.mxu1 %v11588_v9  ;;  %vm18430_vm6 = vmmov %vm18419_vm1  ;;  %v9674_v54 = vsel %vm12367_vm7, %v9665_v51, 0.0 }
0x1130   :  { %v9599_v8 = vadd.f32 %v17225_v22, %v9582_v63  ;;  %v9921_v56 = vpack.c.bf16 %v9721_v42, %v9714_v10  ;;  %v9381_v24 = vpop.f32.mrf.mxu1  ;;  %vm18433_vm7 = vmmov %vm18425_vm3 }
0x1131   :  { %vm18434_vm1 = vmmov %vm18413_vm0 }
0x1132   :  { %v9615_v38 = vmax.f32 %v9599_v8, 0.0  ;;  %11381 = vmatmul.msk.bf16.gmra.mxu2 %vm18428_vm15, %v9921_v56  ;;  %vm18435_vm3 = vmmov %vm18430_vm6 }
0x1133   :  { %v9459_v49 = vpop.f32.mrf.mxu2  ;;  %vm18437_vm13 = vmmov %vm18435_vm3 }
0x1134   :  { %v9643_v52 = vrot.slane %v9615_v38, 7  ;;  %v9460_v39 = vadd.f32 %v9459_v49, %v9374_v3  ;;  %v9744_v16 = vpack.c.bf16 %v9615_v38, %v9614_v23  ;;  %v9691_v53 = vrot.slane %v9615_v38, 1  ;;  %vm18440_vm15 = vmmov %vm18413_vm0 }
0x1136   :  { %v9583_v45 = vadd.f32 %v9552_v15, %v9460_v39  ;;  %11350 = vmatmul.msk.bf16.gmra.mxu0 %vm18429_vm4, %v9744_v16  ;;  %v9664_v18 = vsel %vm18430_vm6, %v9642_v17, %v9643_v52  ;;  %v9712_v51 = vsel %vm18433_vm7, %v9690_v62, %v9691_v53  ;;  %v9559_v39 = vpop.f32.mrf.mxu3  ;;  %vm18441_vm4 = vmmov %vm18435_vm3 }
0x1137   :  { %v17280_v61 = vpack.c.bf16 %v9664_v18, %v9674_v54  ;;  %vm18443_vm6 = vmmov %vm18435_vm3 }
0x1138   :  { %v9600_v3 = vadd.f32 %v17225_v22, %v9583_v45 }
0x113a   :  { %v9616_v23 = vmax.f32 %v9600_v3, 0.0  ;;  %v9384_v3 = vpop.f32.mrf.mxu1 }
0x113b   :  { %v9461_v63 = vpop.f32.mrf.mxu2 }
0x113c   :  { %v9644_v48 = vrot.slane %v9616_v23, 7  ;;  %v9692_v10 = vrot.slane %v9616_v23, 1  ;;  %v9462_v15 = vadd.f32 %v9461_v63, %v9376_v19 }
0x113e   :  { %v9584_v42 = vadd.f32 %v9554_v40, %v9462_v15  ;;  %v9711_v8 = vsel %vm18431_vm12, %v9691_v53, %v9692_v10  ;;  %v9663_v17 = vsel %vm18432_vm14, %v9643_v52, %v9644_v48  ;;  %v9562_v63 = vpop.f32.mrf.mxu3  ;;  %vm18445_vm12 = vnez %v18260_v30  ;;  %vm18446_vm14 = vmmov %vm18413_vm0 }
0x113f   :  { %v9723_v56 = vsel %vm12373_vm8, %v9711_v8, 0.0  ;;  %v9676_v50 = vsel %vm12398_vm9, %v9663_v17, 0.0  ;;  %vm18436_vm8 = vmmov %vm18427_vm5 }
0x1140   :  { %v9601_v38 = vadd.f32 %v17225_v22, %v9584_v42  ;;  %v9922_v49 = vpack.c.bf16 %v9723_v56, %v9712_v51  ;;  %vm18438_vm9 = vmmov %vm18427_vm5 }
0x1141   :  { %vm18439_vm5 = vmmov %vm18413_vm0 }
0x1142   :  { %v9617_v16 = vmax.f32 %v9601_v38, 0.0  ;;  %11382 = vmatmul.msk.bf16.gmra.mxu2 %vm18413_vm0, %v9922_v49 }
0x1143   :  { %v9464_v19 = vpop.f32.mrf.mxu2 }
0x1144   :  { %v9645_v40 = vrot.slane %v9617_v16, 7  ;;  %v9465_v9 = vadd.f32 %v9464_v19, %v9379_v25  ;;  %v9745_v45 = vpack.c.bf16 %v9617_v16, %v9616_v23  ;;  %v9693_v15 = vrot.slane %v9617_v16, 1 }
0x1146   :  { %v9585_v18 = vadd.f32 %v9557_v58, %v9465_v9  ;;  %11351 = vmatmul.msk.bf16.gmra.mxu0 %vm18434_vm1, %v9745_v45  ;;  %v9662_v62 = vsel %vm18435_vm3, %v9644_v48, %v9645_v40  ;;  %v9710_v48 = vsel %vm18438_vm9, %v9692_v10, %v9693_v15  ;;  %v9564_v45 = vpop.f32.mrf.mxu3  ;;  %vm18449_vm1 = vnez %v18262_v36 }
0x1147   :  { %v17298_v52 = vpack.c.bf16 %v9662_v62, %v9676_v50  ;;  %vm18453_vm9 = vnez %v18264_v46 }
0x1148   :  { %v9602_v54 = vadd.f32 %v17225_v22, %v9585_v18 }
0x114a   :  { %v9618_v53 = vmax.f32 %v9602_v54, 0.0 }
0x114b   :  { %v9466_v42 = vpop.f32.mrf.mxu2 }
0x114c   :  { %v9646_v25 = vrot.slane %v9618_v53, 7  ;;  %v9694_v23 = vrot.slane %v9618_v53, 1  ;;  %v9467_v58 = vadd.f32 %v9466_v42, %v9381_v24  ;;  %v9386_v24 = vpop.f32.mrf.mxu1 }
0x114e   :  { %v9586_v8 = vadd.f32 %v9559_v39, %v9467_v58  ;;  %v9709_v51 = vsel %vm18436_vm8, %v9693_v15, %v9694_v23  ;;  %v9661_v11 = vsel %vm18437_vm13, %v9645_v40, %v9646_v25  ;;  %v9567_v14 = vpop.f32.mrf.mxu3 }
0x114f   :  { %v9725_v17 = vsel %vm12404_vm10, %v9709_v51, 0.0  ;;  %v9678_v28 = vsel %vm12429_vm11, %v9661_v11, 0.0  ;;  %vm18442_vm10 = vmmov %vm18433_vm7 }
0x1150   :  { %v9603_v56 = vadd.f32 %v17225_v22, %v9586_v8  ;;  %v9923_v38 = vpack.c.bf16 %v9725_v17, %v9710_v48  ;;  %vm18444_vm11 = vmmov %vm18433_vm7 }
0x1151   :  { %vm18447_vm7 = vmmov %vm18413_vm0 }
0x1152   :  { %v9619_v49 = vmax.f32 %v9603_v56, 0.0  ;;  %11383 = vmatmul.msk.bf16.gmra.mxu2 %vm18439_vm5, %v9923_v38  ;;  %vm18448_vm0 = vmmov %vm18435_vm3 }
0x1153   :  { %v9469_v39 = vpop.f32.mrf.mxu2  ;;  %vm18450_vm3 = vmmov %vm18436_vm8 }
0x1154   :  { %v9647_v16 = vrot.slane %v9619_v49, 7  ;;  %v9470_v19 = vadd.f32 %v9469_v39, %v9384_v3  ;;  %v9746_v9 = vpack.c.bf16 %v9619_v49, %v9618_v53  ;;  %v9695_v54 = vrot.slane %v9619_v49, 1  ;;  %v9389_v58 = vpop.f32.mrf.mxu1  ;;  %vm18451_vm8 = vmmov %vm18448_vm0 }
0x1155   :  { %vm18452_vm13 = vmmov %vm18450_vm3 }
0x1156   :  { %v9587_v18 = vadd.f32 %v9562_v63, %v9470_v19  ;;  %11352 = vmatmul.msk.bf16.gmra.mxu0 %vm18440_vm15, %v9746_v9  ;;  %v9660_v10 = vsel %vm18441_vm4, %v9646_v25, %v9647_v16  ;;  %v9708_v51 = vsel %vm18444_vm11, %v9694_v23, %v9695_v54  ;;  %v11587_v9 = vld [vmem:[%s17700_s12] sm:$0xff]  ;;  %vm18454_vm15 = vmmov %vm18439_vm5 }
0x1157   :  { %v17316_v40 = vpack.c.bf16 %v9660_v10, %v9678_v28  ;;  %v9569_v10 = vpop.f32.mrf.mxu3  ;;  %9878 = vmatpush.bf16.msra.mxu1 %v11587_v9  ;;  %vm18455_vm4 = vmmov %vm18448_vm0 }
0x1158   :  { %v9604_v62 = vadd.f32 %v17225_v22, %v9587_v18  ;;  %vm18458_vm11 = vmmov %vm18448_vm0 }
0x115a   :  { %v9620_v50 = vmax.f32 %v9604_v62, 0.0 }
0x115b   :  { %v9471_v15 = vpop.f32.mrf.mxu2 }
0x115c   :  { %v9648_v42 = vrot.slane %v9620_v50, 7  ;;  %v9696_v3 = vrot.slane %v9620_v50, 1  ;;  %v9472_v53 = vadd.f32 %v9471_v15, %v9386_v24  ;;  %v9391_v23 = vpop.f32.mrf.mxu1 }
0x115e   :  { %v9588_v63 = vadd.f32 %v9564_v45, %v9472_v53  ;;  %v9707_v8 = vsel %vm18442_vm10, %v9695_v54, %v9696_v3  ;;  %v9659_v25 = vsel %vm18443_vm6, %v9647_v16, %v9648_v42  ;;  %vm18456_vm10 = vnez %v18267_v32  ;;  %vm18457_vm6 = vmmov %vm18450_vm3 }
0x115f   :  { %v9727_v11 = vsel %vm18445_vm12, %v9707_v8, 0.0  ;;  %v9680_v30 = vsel %vm18449_vm1, %v9659_v25, 0.0  ;;  %vm18459_vm12 = vmmov %vm18450_vm3 }
0x1160   :  { %v9605_v48 = vadd.f32 %v17225_v22, %v9588_v63  ;;  %v9924_v17 = vpack.c.bf16 %v9727_v11, %v9708_v51  ;;  %vm18462_vm1 = vmmov %vm18439_vm5 }
0x1162   :  { %v9621_v56 = vmax.f32 %v9605_v48, 0.0  ;;  %11384 = vmatmul.msk.bf16.gmra.mxu2 %vm18446_vm14, %v9924_v17  ;;  %v9572_v48 = vpop.f32.mrf.mxu3  ;;  %vm18460_vm14 = vnez %v18274_v41 }
0x1163   :  { %v9474_v38 = vpop.f32.mrf.mxu2 }
0x1164   :  { %v9649_v49 = vrot.slane %v9621_v56, 7  ;;  %v9475_v24 = vadd.f32 %v9474_v38, %v9389_v58  ;;  %v9747_v39 = vpack.c.bf16 %v9621_v56, %v9620_v50  ;;  %v9697_v62 = vrot.slane %v9621_v56, 1  ;;  %v9394_v51 = vpop.f32.mrf.mxu1 }
0x1166   :  { %v9589_v19 = vadd.f32 %v9567_v14, %v9475_v24  ;;  %11353 = vmatmul.msk.bf16.gmra.mxu0 %vm18447_vm7, %v9747_v39  ;;  %v9658_v16 = vsel %vm18448_vm0, %v9648_v42, %v9649_v49  ;;  %v9706_v63 = vsel %vm18452_vm13, %v9696_v3, %v9697_v62  ;;  %vm18461_vm7 = vmmov %vm18439_vm5  ;;  %vm18465_vm13 = vnez %v18282_v2 }
0x1167   :  { %v17337_v45 = vpack.c.bf16 %v9658_v16, %v9680_v30 }
0x1168   :  { %v9606_v18 = vadd.f32 %v17225_v22, %v9589_v19 }
0x116a   :  { %v9622_v28 = vmax.f32 %v9606_v18, 0.0 }
0x116b   :  { %v9476_v50 = vpop.f32.mrf.mxu2 }
0x116c   :  { %v9650_v54 = vrot.slane %v9622_v28, 7  ;;  %v9698_v15 = vrot.slane %v9622_v28, 1  ;;  %v9477_v42 = vadd.f32 %v9476_v50, %v9391_v23  ;;  %v9396_v30 = vpop.f32.mrf.mxu1 }
0x116e   :  { %v9590_v53 = vadd.f32 %v9569_v10, %v9477_v42  ;;  %v9705_v36 = vsel %vm18450_vm3, %v9697_v62, %v9698_v15  ;;  %v9657_v58 = vsel %vm18451_vm8, %v9649_v49, %v9650_v54  ;;  %vm18463_vm3 = vmmov %vm18448_vm0  ;;  %vm18464_vm8 = vnez %v18279_v37 }
0x116f   :  { %v9729_v8 = vsel %vm18453_vm9, %v9705_v36, 0.0  ;;  %v9682_v46 = vsel %vm18456_vm10, %v9657_v58, 0.0  ;;  %vm18466_vm9 = vmmov %vm18462_vm1 }
0x1170   :  { %v9607_v25 = vadd.f32 %v17225_v22, %v9590_v53  ;;  %v9925_v14 = vpack.c.bf16 %v9729_v8, %v9706_v63  ;;  %vm18470_vm10 = vmmov %vm18462_vm1 }
0x1172   :  { %v9623_v11 = vmax.f32 %v9607_v25, 0.0  ;;  %11385 = vmatmul.msk.bf16.gmra.mxu2 %vm18439_vm5, %v9925_v14  ;;  %vm18467_vm5 = vmmov %vm18457_vm6 }
0x1173   :  { %v9479_v17 = vpop.f32.mrf.mxu2 }
0x1174   :  { %v9651_v56 = vrot.slane %v9623_v11, 7  ;;  %v9480_v38 = vadd.f32 %v9479_v17, %v9394_v51  ;;  %v9748_v24 = vpack.c.bf16 %v9623_v11, %v9622_v28  ;;  %v9699_v23 = vrot.slane %v9623_v11, 1  ;;  %v9574_v28 = vpop.f32.mrf.mxu3 }
0x1176   :  { %v9591_v39 = vadd.f32 %v9572_v48, %v9480_v38  ;;  %11354 = vmatmul.msk.bf16.gmra.mxu0 %vm18454_vm15, %v9748_v24  ;;  %v9656_v3 = vsel %vm18455_vm4, %v9650_v54, %v9651_v56  ;;  %v9704_v32 = vsel %vm18459_vm12, %v9698_v15, %v9699_v23  ;;  %vm18468_vm15 = vmmov %vm18467_vm5 }
0x1177   :  { %v9740_v49 = vpack.c.bf16 %v9656_v3, %v9682_v46  ;;  %vm18469_vm4 = vmmov %vm18462_vm1 }
0x1178   :  { %v9608_v19 = vadd.f32 %v17225_v22, %v9591_v39  ;;  %vm18473_vm12 = vmmov %vm18462_vm1 }
0x117a   :  { %v9624_v16 = vmax.f32 %v9608_v19, 0.0 }
0x117b   :  { %v9481_v9 = vpop.f32.mrf.mxu2 }
0x117c   :  { %v9652_v18 = vrot.slane %v9624_v16, 7  ;;  %v9700_v10 = vrot.slane %v9624_v16, 1  ;;  %v9482_v62 = vadd.f32 %v9481_v9, %v9396_v30 }
0x117e   :  { %v9592_v50 = vadd.f32 %v9574_v28, %v9482_v62  ;;  %v9703_v42 = vsel %vm18457_vm6, %v9699_v23, %v9700_v10  ;;  %v9655_v54 = vsel %vm18458_vm11, %v9651_v56, %v9652_v18  ;;  %vm18471_vm6 = vmmov %vm18462_vm1 }
0x117f   :  { %v9731_v53 = vsel %vm18460_vm14, %v9703_v42, 0.0  ;;  %vm18472_vm11 = vmmov %vm18462_vm1 }
0x1180   :  { %v9609_v36 = vadd.f32 %v17225_v22, %v9592_v50  ;;  %v9926_v58 = vpack.c.bf16 %v9731_v53, %v9704_v32  ;;  %v9684_v22 = vsel %vm18464_vm8, %v9655_v54, 0.0  ;;  %vm18474_vm14 = vmmov %vm18462_vm1 }
0x1182   :  { %v9625_v63 = vmax.f32 %v9609_v36, 0.0  ;;  %11386 = vmatmul.msk.bf16.gmra.mxu2 %vm18461_vm7, %v9926_v58  ;;  %vm18476_vm7 = vmmov %vm18462_vm1 }
0x1184   :  { %v9653_v8 = vrot.slane %v9625_v63, 7  ;;  %v9749_v25 = vpack.c.bf16 %v9625_v63, %v9624_v16  ;;  %v9701_v51 = vrot.slane %v9625_v63, 1 }
0x1186   :  { %v9669_v14 = vsel %vm18448_vm0, %v9653_v8, %v9638_v20  ;;  %11355 = vmatmul.msk.bf16.gmra.mxu0 %vm18462_vm1, %v9749_v25  ;;  %v9654_v41 = vsel %vm18463_vm3, %v9652_v18, %v9653_v8  ;;  %v9717_v20 = vsel %vm18467_vm5, %v9701_v51, %v9686_v1  ;;  %v9702_v17 = vsel %vm18468_vm15, %v9700_v10, %v9701_v51 }
0x1187   :  { %v9670_v15 = vsel %vm18465_vm13, %v9669_v14, 0.0  ;;  %v9741_v11 = vpack.c.bf16 %v9654_v41, %v9684_v22  ;;  %v9733_v37 = vsel %vm18308_vm2, %v9717_v20, 0.0  ;;  %vm18475_vm2 = vmmov %vm18462_vm1  ;;  %vm18477_vm13 = vcmask 64512  }
0x1188   :  { %v9734_v48 = vpack.c.bf16 %v17237_v13, %v9670_v15  ;;  %v9927_v56 = vpack.c.bf16 %v9733_v37, %v9702_v17 }
0x118a   :  { %11364 = vmatmul.msk.bf16.vlgmr.msra.gmra.mxu1 %vm18466_vm9, %v9734_v48  ;;  %vm18478_vm9 = vcmask 195584  }
0x1192   :  { %11387 = vmatmul.msk.bf16.gmra.mxu2 %vm18469_vm4, %v9927_v56 }
0x1193   :  { %v9795_v43 = vpop.f32.mrf.mxu0 }
0x119a   :  { %11365 = vmatmul.msk.bf16.gmra.mxu1 %vm18470_vm10, %v17259_v0 }
0x119b   :  { %v9797_v31 = vpop.f32.mrf.mxu0 }
0x11a3   :  { %v9800_v13 = vpop.f32.mrf.mxu0 }
0x11a5   :  { %v9973_v2 = vpop.f32.mrf.mxu2 }
0x11aa   :  { %11366 = vmatmul.msk.bf16.gmra.mxu1 %vm18471_vm6, %v17280_v61  ;;  %vm18479_vm6 = vmmov %vm18477_vm13 }
0x11ab   :  { %v9802_v0 = vpop.f32.mrf.mxu0 }
0x11ad   :  { %v9975_v29 = vpop.f32.mrf.mxu2 }
0x11b3   :  { %v9805_v46 = vpop.f32.mrf.mxu0 }
0x11b5   :  { %v9978_v1 = vpop.f32.mrf.mxu2 }
0x11ba   :  { %11367 = vmatmul.msk.bf16.gmra.mxu1 %vm18472_vm11, %v17298_v52  ;;  %v17401_v52 = vperm.slane %v17222_v34, 5  ;;  %vm18480_vm11 = vmmov %vm18478_vm9 }
0x11bb   :  { %v9807_v18 = vpop.f32.mrf.mxu0 }
0x11c3   :  { %v9810_v32 = vpop.f32.mrf.mxu0 }
0x11ca   :  { %11368 = vmatmul.msk.bf16.gmra.mxu1 %vm18473_vm12, %v17316_v40  ;;  %v9980_v40 = vpop.f32.mrf.mxu2 }
0x11cb   :  { %v9812_v25 = vpop.f32.mrf.mxu0 }
0x11d2   :  { %v9983_v19 = vpop.f32.mrf.mxu2 }
0x11d3   :  { %v9815_v20 = vpop.f32.mrf.mxu0 }
0x11da   :  { %11369 = vmatmul.msk.bf16.gmra.mxu1 %vm18474_vm14, %v17337_v45  ;;  %v9985_v62 = vpop.f32.mrf.mxu2 }
0x11e2   :  { %v9988_v53 = vpop.f32.mrf.mxu2 }
0x11ea   :  { %11370 = vmatmul.msk.bf16.gmra.mxu1 %vm18475_vm2, %v9740_v49  ;;  %v9990_v41 = vpop.f32.mrf.mxu2 }
0x11f2   :  { %v9993_v37 = vpop.f32.mrf.mxu2 }
0x11fa   :  { %11371 = vmatmul.msk.bf16.gmra.mxu1 %vm18476_vm7, %v9741_v11 }
0x1207   :  { %v9880_v61 = vpop.f32.mrf.mxu1 }
0x1208   :  { %v9881_v38 = vadd.f32 %v9880_v61, %v9795_v43  ;;  %v17417_v43 = vperm.slane %v17222_v34, 4 }
0x120a   :  { %v10013_v24 = vadd.f32 %v9973_v2, %v9881_v38  ;;  %v8007_v2 = vadd.f32 %v16890_v33, %v17417_v43  ;;  %v9995_v38 = vpop.f32.mrf.mxu2  ;;  %v8005_v33 = vadd.f32 %v16879_v5, %v17417_v43 }
0x120c   :  { %v10030_v45 = vadd.f32 %v17401_v52, %v10013_v24 }
0x120e   :  { %10062 = vrot.lane.b32.xlu1 %v10030_v45, %s12158_s18 }
0x120f   :  { %v9882_v39 = vpop.f32.mrf.mxu1 }
0x1210   :  { %v9883_v3 = vadd.f32 %v9882_v39, %v9797_v31 }
0x1212   :  { %v10014_v49 = vadd.f32 %v9975_v29, %v9883_v3 }
0x1214   :  { %v10031_v16 = vadd.f32 %v17401_v52, %v10014_v49 }
0x1216   :  { %10064 = vrot.lane.b32.xlu2 %v10031_v16, %s12158_s18 }
0x1217   :  { %v9885_v30 = vpop.f32.mrf.mxu1 }
0x1218   :  { %v9886_v23 = vadd.f32 %v9885_v30, %v9800_v13 }
0x121a   :  { %v10015_v9 = vadd.f32 %v9978_v1, %v9886_v23  ;;  %v11157_v1 = vmul.f32 -1.442695, %v8007_v2  ;;  %v11156_v23 = vmul.f32 -1.442695, %v8005_v33 }
0x121c   :  { %v10032_v10 = vadd.f32 %v17401_v52, %v10015_v9  ;;  %12053 = vpow2.f32 %v11157_v1 }
0x121e   :  { %10066 = vrot.lane.b32.xlu0 %v10032_v10, %s12158_s18 }
0x121f   :  { %v9887_v28 = vpop.f32.mrf.mxu1 }
0x1220   :  { %v9888_v50 = vadd.f32 %v9887_v28, %v9802_v0  ;;  %v9817_v0 = vpop.f32.mrf.mxu0 }
0x1222   :  { %v10016_v42 = vadd.f32 %v9980_v40, %v9888_v50  ;;  %v12054_v39 = vpop.eup %12053 }
0x1224   :  { %v10033_v54 = vadd.f32 %v17401_v52, %v10016_v42 }
0x1226   :  { %10068 = vrot.lane.b32.xlu1 %v10033_v54, %s12158_s18 }
0x1227   :  { %v9890_v36 = vpop.f32.mrf.mxu1 }
0x1228   :  { %v9891_v58 = vadd.f32 %v9890_v36, %v9805_v46  ;;  %v9820_v3 = vpop.f32.mrf.mxu0  ;;  %v9998_v46 = vpop.f32.mrf.mxu2  ;;  %v8017_v36 = vadd.f32 %v16947_v59, %v17417_v43  ;;  %v8012_v59 = vadd.f32 %v16920_v6, %v17417_v43 }
0x122a   :  { %v10017_v63 = vadd.f32 %v9983_v19, %v9891_v58  ;;  %v8093_v19 = vadd.f32 1.0, %v12054_v39 }
0x122c   :  { %v10034_v8 = vadd.f32 %v17401_v52, %v10017_v63  ;;  %12055 = vrcp.f32 %v8093_v19  ;;  %v8134_v2 = vand.u32 2147483648, %v8093_v19  ;;  %vm8128_vm1 = vweird.f32 %v8093_v19 }
0x122d   :  { %12057 = vpow2.f32 %v11156_v23 }
0x122e   :  { %10070 = vrot.lane.b32.xlu0 %v10034_v8, %s12158_s18 }
0x122f   :  { %v9892_v14 = vpop.f32.mrf.mxu1 }
0x1230   :  { %v9893_v51 = vadd.f32 %v9892_v14, %v9807_v18  ;;  %v9822_v18 = vpop.f32.mrf.mxu0  ;;  %v10000_v28 = vpop.f32.mrf.mxu2 }
0x1232   :  { %v10018_v22 = vadd.f32 %v9985_v62, %v9893_v51  ;;  %v12056_v50 = vpop.eup %12055 }
0x1233   :  { %v12058_v54 = vpop.eup %12057  ;;  %vm8129_vm0 = vweird.f32 %v12056_v50 }
0x1234   :  { %v10035_v15 = vadd.f32 %v17401_v52, %v10018_v22  ;;  %v17436_v63 = vadd.f32 1.0, %v12058_v54  ;;  %v11161_v22 = vmul.f32 -1.442695, %v8017_v36  ;;  %vm8130_vm3 = vmor %vm8128_vm1, %vm8129_vm0 }
0x1236   :  { %10072 = vrot.lane.b32.xlu2 %v10035_v15, %s12158_s18  ;;  %12059 = vrcp.f32 %v17436_v63  ;;  %vm8113_vm15 = vweird.f32 %v17436_v63 }
0x1237   :  { %v9895_v11 = vpop.f32.mrf.mxu1 }
0x1238   :  { %v9896_v48 = vadd.f32 %v9895_v11, %v9810_v32  ;;  %v8124_v32 = vmul.f32 %v12056_v50, %v8093_v19  ;;  %v10003_v15 = vpop.f32.mrf.mxu2 }
0x123a   :  { %v10019_v17 = vadd.f32 %v9988_v53, %v9896_v48  ;;  %v8010_v53 = vadd.f32 %v16902_v44, %v17417_v43  ;;  %v8125_v14 = vsub.f32 1.0, %v8124_v32 }
0x123c   :  { %v10036_v56 = vadd.f32 %v17401_v52, %v10019_v17  ;;  %v11158_v51 = vmul.f32 -1.442695, %v8010_v53  ;;  %v8126_v44 = vmul.f32 %v12056_v50, %v8125_v14 }
0x123e   :  { %10074 = vrot.lane.b32.xlu1 %v10036_v56, %s12158_s18  ;;  %12061 = vpow2.f32 %v11158_v51  ;;  %v8127_v17 = vadd.f32 %v12056_v50, %v8126_v44 }
0x123f   :  { %v9897_v31 = vpop.f32.mrf.mxu1  ;;  %12063 = vpow2.f32 %v11161_v22 }
0x1240   :  { %v9898_v29 = vadd.f32 %v9897_v31, %v9812_v25  ;;  %v9825_v25 = vpop.f32.mrf.mxu0  ;;  %v11159_v31 = vmul.f32 -1.442695, %v8012_v59  ;;  %v8131_v6 = vsel %vm8130_vm3, %v12056_v50, %v8127_v17 }
0x1242   :  { %v10020_v13 = vadd.f32 %v9990_v41, %v9898_v29  ;;  %12065 = vpow2.f32 %v11159_v31 }
0x1244   :  { %v10037_v61 = vadd.f32 %v17401_v52, %v10020_v13  ;;  %v8132_v13 = vand.u32 2147483647, %v8093_v19 }
0x1246   :  { %10076 = vrot.lane.b32.xlu0 %v10037_v61, %s12158_s18  ;;  %vm8133_vm8 = vcmp.eq.f32.partialorder %v8132_v13, 8.507059e+37 }
0x1247   :  { %v9900_v40 = vpop.f32.mrf.mxu1 }
0x1248   :  { %v9901_v24 = vadd.f32 %v9900_v40, %v9815_v20  ;;  %v9827_v29 = vpop.f32.mrf.mxu0 }
0x124a   :  { %v10021_v34 = vadd.f32 %v9993_v37, %v9901_v24  ;;  %v17443_v37 = vpop.eup %12059  ;;  %v8135_v24 = vor.u32 1.1754944e-38, %v8134_v2 }
0x124b   :  { %v12062_v1 = vpop.eup %12061  ;;  %v8109_v40 = vmul.f32 %v17443_v37, %v17436_v63  ;;  %vm8114_vm5 = vweird.f32 %v17443_v37 }
0x124c   :  { %v10038_v45 = vadd.f32 %v17401_v52, %v10021_v34  ;;  %v12064_v61 = vpop.eup %12063  ;;  %v17449_v34 = vadd.f32 1.0, %v12062_v1  ;;  %vm8115_vm4 = vmor %vm8113_vm15, %vm8114_vm5 }
0x124d   :  { %vm18486_vm5 = vmmov %vm18479_vm6 }
0x124e   :  { %10078 = vrot.lane.b32.xlu2 %v10038_v45, %s12158_s18  ;;  %v8015_v45 = vadd.f32 %v16935_v57, %v17417_v43  ;;  %12067 = vrcp.f32 %v17449_v34  ;;  %vm8143_vm2 = vweird.f32 %v17449_v34  ;;  %vm18487_vm15 = vmmov %vm18480_vm11 }
0x124f   :  { %v9902_v49 = vpop.f32.mrf.mxu1 }
0x1250   :  { %v9903_v16 = vadd.f32 %v9902_v49, %v9817_v0 }
0x1252   :  { %v10022_v30 = vadd.f32 %v9995_v38, %v9903_v16  ;;  %v10005_v38 = vpop.f32.mrf.mxu2  ;;  %v8110_v16 = vsub.f32 1.0, %v8109_v40 }
0x1254   :  { %v10039_v9 = vadd.f32 %v17401_v52, %v10022_v30 }
0x1256   :  { %10080 = vrot.lane.b32.xlu1 %v10039_v9, %s12158_s18  ;;  %v11160_v9 = vmul.f32 -1.442695, %v8015_v45  ;;  %v8022_v45 = vadd.f32 %v16967_v55, %v17417_v43 }
0x1257   :  { %v9905_v10 = vpop.f32.mrf.mxu1 }
0x1258   :  { %v9906_v62 = vadd.f32 %v9905_v10, %v9820_v3  ;;  %v17453_v3 = vadd.f32 1.0, %v12064_v61  ;;  %v9830_v10 = vpop.f32.mrf.mxu0  ;;  %v11163_v55 = vmul.f32 -1.442695, %v8022_v45 }
0x125a   :  { %v10023_v42 = vadd.f32 %v9998_v46, %v9906_v62  ;;  %v8136_v46 = vsel %vm8133_vm8, %v8135_v24, %v8131_v6  ;;  %12069 = vrcp.f32 %v17453_v3  ;;  %v8111_v62 = vmul.f32 %v17443_v37, %v8110_v16  ;;  %v10008_v50 = vpop.f32.mrf.mxu2 }
0x125b   :  { %12071 = vpow2.f32 %v11160_v9  ;;  %v8194_v16 = vand.u32 2147483648, %v17453_v3  ;;  %vm8188_vm0 = vweird.f32 %v17453_v3  ;;  %v8192_v9 = vand.u32 2147483647, %v17453_v3 }
0x125c   :  { %v10040_v5 = vadd.f32 %v17401_v52, %v10023_v42  ;;  %v8112_v53 = vadd.f32 %v17443_v37, %v8111_v62 }
0x125d   :  { %vm8193_vm8 = vcmp.eq.f32.partialorder %v8192_v9, 8.507059e+37 }
0x125e   :  { %10082 = vrot.lane.b32.xlu0 %v10040_v5, %s12158_s18 }
0x125f   :  { %v9907_v58 = vpop.f32.mrf.mxu1 }
0x1260   :  { %v9908_v8 = vadd.f32 %v9907_v58, %v9822_v18  ;;  %v12066_v18 = vpop.eup %12065  ;;  %v9832_v44 = vpop.f32.mrf.mxu0 }
0x1261   :  { %v17464_v5 = vadd.f32 1.0, %v12066_v18  ;;  %v17466_v32 = vpop.eup %12067 }
0x1262   :  { %v10024_v41 = vadd.f32 %v10000_v28, %v9908_v8  ;;  %v8025_v28 = vadd.f32 %v16993_v35, %v17417_v43  ;;  %v17470_v36 = vpop.eup %12069  ;;  %v8119_v8 = vand.u32 2147483648, %v17436_v63  ;;  %v8117_v35 = vand.u32 2147483647, %v17436_v63 }
0x1263   :  { %12073 = vrcp.f32 %v17464_v5  ;;  %v12072_v51 = vpop.eup %12071  ;;  %v8139_v22 = vmul.f32 %v17466_v32, %v17449_v34  ;;  %v8020_v63 = vadd.f32 %v16955_v12, %v17417_v43  ;;  %vm8144_vm12 = vweird.f32 %v17466_v32 }
0x1264   :  { %v10041_v11 = vadd.f32 %v17401_v52, %v10024_v41  ;;  %v8116_v41 = vsel %vm8115_vm4, %v17443_v37, %v8112_v53  ;;  %vm8118_vm10 = vcmp.eq.f32.partialorder %v8117_v35, 8.507059e+37  ;;  %vm8189_vm14 = vweird.f32 %v17470_v36  ;;  %vm17511_vm7 = vmor %vm8143_vm2, %vm8144_vm12 }
0x1265   :  { %v8140_v31 = vsub.f32 1.0, %v8139_v22  ;;  %v11162_v12 = vmul.f32 -1.442695, %v8020_v63  ;;  %vm17519_vm1 = vmor %vm8188_vm0, %vm8189_vm14  ;;  %v8164_v22 = vand.u32 2147483648, %v17464_v5 }
0x1266   :  { %10084 = vrot.lane.b32.xlu2 %v10041_v11, %s12158_s18  ;;  %v8120_v11 = vor.u32 1.1754944e-38, %v8119_v8  ;;  %vm18488_vm4 = vmmov %vm18480_vm11 }
0x1267   :  { %v9910_v48 = vpop.f32.mrf.mxu1  ;;  %v8141_v6 = vmul.f32 %v17466_v32, %v8140_v31  ;;  %vm18489_vm12 = vmmov %vm18486_vm5 }
0x1268   :  { %v9911_v20 = vadd.f32 %v9910_v48, %v9825_v25  ;;  %v11164_v25 = vmul.f32 -1.442695, %v8025_v28  ;;  %v17485_v48 = vadd.f32 1.0, %v12072_v51  ;;  %v8121_v17 = vsel %vm8118_vm10, %v8120_v11, %v8116_v41  ;;  %vm18490_vm2 = vmmov %vm18488_vm4 }
0x1269   :  { %v17488_v13 = vpop.eup %12073  ;;  %vm8158_vm10 = vweird.f32 %v17464_v5  ;;  %v8162_v11 = vand.u32 2147483647, %v17464_v5 }
0x126a   :  { %v10025_v56 = vadd.f32 %v10003_v15, %v9911_v20  ;;  %v8184_v15 = vmul.f32 %v17470_v36, %v17453_v3  ;;  %12075 = vpow2.f32 %v11164_v25  ;;  %v8154_v24 = vmul.f32 %v17488_v13, %v17464_v5 }
0x126b   :  { %12077 = vrcp.f32 %v17485_v48 }
0x126c   :  { %v10042_v0 = vadd.f32 %v17401_v52, %v10025_v56  ;;  %v10010_v56 = vpop.f32.mrf.mxu2  ;;  %12079 = vpow2.f32 %v11162_v12  ;;  %v8179_v12 = vand.u32 2147483648, %v17485_v48 }
0x126e   :  { %10086 = vrot.lane.b32.xlu1 %v10042_v0, %s12158_s18  ;;  %v8180_v45 = vor.u32 1.1754944e-38, %v8179_v12 }
0x126f   :  { %v9912_v39 = vpop.f32.mrf.mxu1 }
0x1270   :  { %v9913_v33 = vadd.f32 %v9912_v39, %v9827_v29  ;;  %v10065_v49 = vpop.permute.xlu2 %10064  ;;  %v8185_v29 = vsub.f32 1.0, %v8184_v15 }
0x1271   :  { %v10111_v19 = vsel %vm18477_vm13, %v8136_v46, %v10065_v49  ;;  %v8155_v46 = vsub.f32 1.0, %v8154_v24  ;;  %vm8159_vm13 = vweird.f32 %v17488_v13 }
0x1272   :  { %v10026_v30 = vadd.f32 %v10005_v38, %v9913_v33  ;;  %v10127_v23 = vsel %vm18478_vm9, %v10111_v19, 0.0  ;;  %v12076_v38 = vpop.eup %12075  ;;  %v8186_v40 = vmul.f32 %v17470_v36, %v8185_v29  ;;  %v8149_v19 = vand.u32 2147483648, %v17449_v34  ;;  %vm18485_vm9 = vmmov %vm18479_vm6 }
0x1273   :  { %10143 = vst [vmem:[#allocation2 + $0x8] sm:$0xff] %v10127_v23  ;;  %v17500_v39 = vadd.f32 1.0, %v12076_v38  ;;  %v17506_v49 = vpop.eup %12077  ;;  %v8147_v23 = vand.u32 2147483647, %v17449_v34  ;;  %v8156_v34 = vmul.f32 %v17488_v13, %v8155_v46 }
0x1274   :  { %v10043_v57 = vadd.f32 %v17401_v52, %v10026_v30  ;;  %v8187_v33 = vadd.f32 %v17470_v36, %v8186_v40  ;;  %v12080_v18 = vpop.eup %12079  ;;  %v8169_v3 = vmul.f32 %v17506_v49, %v17485_v48  ;;  %v8150_v28 = vor.u32 1.1754944e-38, %v8149_v19 }
0x1275   :  { %12081 = vrcp.f32 %v17500_v39  ;;  %vm8148_vm3 = vcmp.eq.f32.partialorder %v8147_v23, 8.507059e+37  ;;  %v8157_v35 = vadd.f32 %v17488_v13, %v8156_v34  ;;  %vm8174_vm14 = vweird.f32 %v17506_v49 }
0x1276   :  { %10088 = vrot.lane.b32.xlu0 %v10043_v57, %s12158_s18  ;;  %v8191_v62 = vsel %vm17519_vm1, %v17470_v36, %v8187_v33  ;;  %12083 = vpow2.f32 %v11163_v55  ;;  %v8239_v23 = vand.u32 2147483648, %v17500_v39 }
0x1277   :  { %v9915_v42 = vpop.f32.mrf.mxu1 }
0x1278   :  { %v9916_v54 = vadd.f32 %v9915_v42, %v9830_v10  ;;  %v8032_v42 = vadd.f32 %v17003_v21, %v17417_v43  ;;  %v8240_v34 = vor.u32 1.1754944e-38, %v8239_v23 }
0x127a   :  { %v10027_v58 = vadd.f32 %v10008_v50, %v9916_v54  ;;  %v8195_v50 = vor.u32 1.1754944e-38, %v8194_v16  ;;  %v17534_v54 = vadd.f32 1.0, %v12080_v18  ;;  %v11167_v15 = vmul.f32 -1.442695, %v8032_v42 }
0x127b   :  { %v17540_v51 = vpop.eup %12081 }
0x127c   :  { %v10044_v14 = vadd.f32 %v17401_v52, %v10027_v58  ;;  %v8196_v58 = vsel %vm8193_vm8, %v8195_v50, %v8191_v62  ;;  %12085 = vrcp.f32 %v17534_v54  ;;  %v12084_v63 = vpop.eup %12083  ;;  %vm8234_vm8 = vweird.f32 %v17540_v51 }
0x127d   :  { %12087 = vpow2.f32 %v11167_v15  ;;  %v17556_v5 = vadd.f32 1.0, %v12084_v63 }
0x127e   :  { %10090 = vrot.lane.b32.xlu2 %v10044_v14, %s12158_s18  ;;  %v8170_v14 = vsub.f32 1.0, %v8169_v3  ;;  %v8040_v3 = vadd.f32 %v17013_v7, %v17417_v43  ;;  %v8207_v7 = vand.u32 2147483647, %v17534_v54 }
0x127f   :  { %v9917_v59 = vpop.f32.mrf.mxu1  ;;  %12089 = vrcp.f32 %v17556_v5 }
0x1280   :  { %v9918_v20 = vadd.f32 %v9917_v59, %v9832_v44  ;;  %v10063_v37 = vpop.permute.xlu1 %10062  ;;  %v8171_v59 = vmul.f32 %v17506_v49, %v8170_v14 }
0x1281   :  { %v10110_v2 = vsel %vm18479_vm6, %v8121_v17, %v10063_v37  ;;  %vm8160_vm6 = vmor %vm8158_vm10, %vm8159_vm13  ;;  %v8165_v17 = vor.u32 1.1754944e-38, %v8164_v22  ;;  %v8027_v37 = vadd.f32 %v16997_v26, %v17417_v43  ;;  %v8035_v22 = vadd.f32 %v17007_v27, %v17417_v43 }
0x1282   :  { %v10028_v1 = vadd.f32 %v10010_v56, %v9918_v20  ;;  %v10126_v0 = vsel %vm18480_vm11, %v10110_v2, 0.0  ;;  %v8161_v44 = vsel %vm8160_vm6, %v17488_v13, %v8157_v35  ;;  %v8229_v20 = vmul.f32 %v17540_v51, %v17500_v39  ;;  %vm18492_vm13 = vmmov %vm18490_vm2 }
0x1283   :  { %10142 = vst [vmem:[#allocation2] sm:$0xff] %v10126_v0  ;;  %vm8163_vm11 = vcmp.eq.f32.partialorder %v8162_v11, 8.507059e+37  ;;  %v8172_v29 = vadd.f32 %v17506_v49, %v8171_v59  ;;  %v11165_v26 = vmul.f32 -1.442695, %v8027_v37  ;;  %vm18494_vm6 = vmmov %vm18490_vm2  ;;  %v8224_v37 = vand.u32 2147483648, %v17556_v5 }
0x1284   :  { %v10045_v61 = vadd.f32 %v17401_v52, %v10028_v1  ;;  %v8142_v52 = vadd.f32 %v17466_v32, %v8141_v6  ;;  %v8166_v56 = vsel %vm8163_vm11, %v8165_v17, %v8161_v44  ;;  %v8230_v13 = vsub.f32 1.0, %v8229_v20  ;;  %v17561_v1 = vpop.eup %12085 }
0x1285   :  { %v12088_v38 = vpop.eup %12087  ;;  %v8199_v24 = vmul.f32 %v17561_v1, %v17534_v54  ;;  %12091 = vpow2.f32 %v11165_v26  ;;  %vm8204_vm10 = vweird.f32 %v17561_v1  ;;  %vm8203_vm11 = vweird.f32 %v17534_v54 }
0x1286   :  { %10092 = vrot.lane.b32.xlu1 %v10045_v61, %s12158_s18  ;;  %v8146_v10 = vsel %vm17511_vm7, %v17466_v32, %v8142_v52  ;;  %vm8173_vm7 = vweird.f32 %v17485_v48  ;;  %v8177_v61 = vand.u32 2147483647, %v17485_v48  ;;  %v8231_v40 = vmul.f32 %v17540_v51, %v8230_v13  ;;  %v17579_v55 = vpop.eup %12089 }
0x1287   :  { %v8151_v32 = vsel %vm8148_vm3, %v8150_v28, %v8146_v10  ;;  %vm8175_vm0 = vmor %vm8173_vm7, %vm8174_vm14  ;;  %v8030_v52 = vadd.f32 %v16999_v47, %v17417_v43  ;;  %v17574_v33 = vadd.f32 1.0, %v12088_v38  ;;  %v8237_v47 = vand.u32 2147483647, %v17500_v39 }
0x1288   :  { %v8176_v6 = vsel %vm8175_vm0, %v17506_v49, %v8172_v29  ;;  %vm8178_vm1 = vcmp.eq.f32.partialorder %v8177_v61, 8.507059e+37  ;;  %vm18491_vm3 = vmmov %vm18486_vm5  ;;  %v8232_v16 = vadd.f32 %v17540_v51, %v8231_v40  ;;  %v8200_v49 = vsub.f32 1.0, %v8199_v24 }
0x1289   :  { %v8181_v48 = vsel %vm8178_vm1, %v8180_v45, %v8176_v6  ;;  %v11166_v9 = vmul.f32 -1.442695, %v8030_v52  ;;  %12093 = vrcp.f32 %v17574_v33  ;;  %v8214_v62 = vmul.f32 %v17579_v55, %v17556_v5  ;;  %vm18496_vm0 = vmmov %vm18494_vm6 }
0x128a   :  { %v8201_v10 = vmul.f32 %v17561_v1, %v8200_v49  ;;  %vm8208_vm14 = vcmp.eq.f32.partialorder %v8207_v7, 8.507059e+37  ;;  %vm8219_vm7 = vweird.f32 %v17579_v55  ;;  %v11168_v27 = vmul.f32 -1.442695, %v8035_v22 }
0x128b   :  { %v12092_v57 = vpop.eup %12091  ;;  %12095 = vpow2.f32 %v11166_v9  ;;  %vm8218_vm1 = vweird.f32 %v17556_v5  ;;  %v8284_v45 = vand.u32 2147483648, %v17574_v33 }
0x128c   :  { %v17592_v28 = vadd.f32 1.0, %v12092_v57 }
0x128d   :  { %v8285_v49 = vor.u32 1.1754944e-38, %v8284_v45 }
0x128e   :  { %12097 = vrcp.f32 %v17592_v28 }
0x1290   :  { %v10067_v53 = vpop.permute.xlu0 %10066  ;;  %v10073_v8 = vpop.permute.xlu2 %10072 }
0x1291   :  { %v10112_v36 = vsel %vm18485_vm9, %v8151_v32, %v10067_v53  ;;  %v10115_v25 = vsel %vm18486_vm5, %v8196_v58, %v10073_v8  ;;  %vm8233_vm9 = vweird.f32 %v17500_v39  ;;  %v8202_v32 = vadd.f32 %v17561_v1, %v8201_v10  ;;  %v17597_v58 = vpop.eup %12093 }
0x1292   :  { %v10128_v21 = vsel %vm18487_vm15, %v10112_v36, 0.0  ;;  %v10131_v41 = vsel %vm18488_vm4, %v10115_v25, 0.0  ;;  %vm8235_vm5 = vmor %vm8233_vm9, %vm8234_vm8  ;;  %vm8238_vm15 = vcmp.eq.f32.partialorder %v8237_v47, 8.507059e+37  ;;  %v8215_v53 = vsub.f32 1.0, %v8214_v62  ;;  %v12096_v35 = vpop.eup %12095 }
0x1293   :  { %10144 = vst [vmem:[#allocation2 + $0x10] sm:$0xff] %v10128_v21  ;;  %v8236_v18 = vsel %vm8235_vm5, %v17540_v51, %v8232_v16  ;;  %vm18493_vm4 = vmmov %vm18491_vm3  ;;  %v8209_v36 = vand.u32 2147483648, %v17534_v54  ;;  %v11170_v25 = vmul.f32 -1.442695, %v8040_v3  ;;  %v8274_v21 = vmul.f32 %v17597_v58, %v17574_v33 }
0x1294   :  { %10147 = vst [vmem:[#allocation2 + $0x28] sm:$0xff] %v10131_v41  ;;  %v8241_v39 = vsel %vm8238_vm15, %v8240_v34, %v8236_v18  ;;  %v8216_v51 = vmul.f32 %v17579_v55, %v8215_v53  ;;  %v17610_v15 = vadd.f32 1.0, %v12096_v35  ;;  %v17615_v20 = vpop.eup %12097  ;;  %vm8279_vm9 = vweird.f32 %v17597_v58  ;;  %vm18498_vm5 = vmmov %vm18496_vm0 }
0x1295   :  { %v8210_v41 = vor.u32 1.1754944e-38, %v8209_v36  ;;  %12099 = vpow2.f32 %v11170_v25  ;;  %v8275_v59 = vsub.f32 1.0, %v8274_v21  ;;  %v8244_v13 = vmul.f32 %v17615_v20, %v17592_v28 }
0x1296   :  { %v8217_v44 = vadd.f32 %v17579_v55, %v8216_v51  ;;  %12101 = vrcp.f32 %v17610_v15  ;;  %vm8278_vm15 = vweird.f32 %v17574_v33  ;;  %v8254_v10 = vand.u32 2147483648, %v17592_v28 }
0x1297   :  { %v8276_v29 = vmul.f32 %v17597_v58, %v8275_v59  ;;  %12103 = vpow2.f32 %v11168_v27  ;;  %v8245_v6 = vsub.f32 1.0, %v8244_v13  ;;  %v8252_v62 = vand.u32 2147483647, %v17592_v28 }
0x1298   :  { %v10069_v2 = vpop.permute.xlu1 %10068 }
0x1299   :  { %v10113_v31 = vsel %vm18489_vm12, %v8166_v56, %v10069_v2  ;;  %vm8205_vm12 = vmor %vm8203_vm11, %vm8204_vm10  ;;  %v8222_v56 = vand.u32 2147483647, %v17556_v5  ;;  %v8277_v38 = vadd.f32 %v17597_v58, %v8276_v29  ;;  %vm8249_vm11 = vweird.f32 %v17615_v20 }
0x129a   :  { %v10129_v0 = vsel %vm18490_vm2, %v10113_v31, 0.0  ;;  %v8206_v14 = vsel %vm8205_vm12, %v17561_v1, %v8202_v32  ;;  %vm18495_vm2 = vmmov %vm18491_vm3  ;;  %v8225_v1 = vor.u32 1.1754944e-38, %v8224_v37  ;;  %v8042_v32 = vadd.f32 %v17015_v60, %v17417_v43 }
0x129b   :  { %10145 = vst [vmem:[#allocation2 + $0x18] sm:$0xff] %v10129_v0  ;;  %v8211_v54 = vsel %vm8208_vm14, %v8210_v41, %v8206_v14  ;;  %v12100_v2 = vpop.eup %12099  ;;  %v8037_v0 = vadd.f32 %v17009_v4, %v17417_v43  ;;  %vm8223_vm8 = vcmp.eq.f32.partialorder %v8222_v56, 8.507059e+37  ;;  %v8282_v4 = vand.u32 2147483647, %v17574_v33  ;;  %vm18500_vm12 = vmmov %vm18496_vm0 }
0x129c   :  { %v17628_v12 = vadd.f32 1.0, %v12100_v2  ;;  %v12102_v40 = vpop.eup %12101  ;;  %vm8248_vm14 = vweird.f32 %v17592_v28  ;;  %v8269_v14 = vand.u32 2147483648, %v17610_v15  ;;  %v11171_v51 = vmul.f32 -1.442695, %v8042_v32 }
0x129d   :  { %v11169_v52 = vmul.f32 -1.442695, %v8037_v0  ;;  %v8259_v16 = vmul.f32 %v12102_v40, %v17610_v15  ;;  %vm8283_vm10 = vcmp.eq.f32.partialorder %v8282_v4, 8.507059e+37  ;;  %v8267_v60 = vand.u32 2147483647, %v17610_v15 }
0x129e   :  { %12105 = vrcp.f32 %v17628_v12  ;;  %v8270_v22 = vor.u32 1.1754944e-38, %v8269_v14  ;;  %v8327_v37 = vand.u32 2147483647, %v17628_v12 }
0x129f   :  { %12107 = vpow2.f32 %v11169_v52  ;;  %v8260_v47 = vsub.f32 1.0, %v8259_v16 }
0x12a0   :  { %v10071_v46 = vpop.permute.xlu0 %10070 }
0x12a1   :  { %v10114_v19 = vsel %vm18491_vm3, %v8181_v48, %v10071_v46  ;;  %vm8220_vm3 = vmor %vm8218_vm1, %vm8219_vm7  ;;  %v12104_v48 = vpop.eup %12103  ;;  %vm8253_vm7 = vcmp.eq.f32.partialorder %v8252_v62, 8.507059e+37  ;;  %vm8264_vm1 = vweird.f32 %v12102_v40 }
0x12a2   :  { %v10130_v30 = vsel %vm18492_vm13, %v10114_v19, 0.0  ;;  %v8221_v31 = vsel %vm8220_vm3, %v17579_v55, %v8217_v44  ;;  %vm18497_vm13 = vmmov %vm18495_vm2  ;;  %v8246_v19 = vmul.f32 %v17615_v20, %v8245_v6  ;;  %v17641_v55 = vadd.f32 1.0, %v12104_v48 }
0x12a3   :  { %10146 = vst [vmem:[#allocation2 + $0x20] sm:$0xff] %v10130_v30  ;;  %v8226_v5 = vsel %vm8223_vm8, %v8225_v1, %v8221_v31  ;;  %vm18502_vm3 = vmmov %vm18498_vm5  ;;  %vm8263_vm8 = vweird.f32 %v17610_v15 }
0x12a4   :  { %v8247_v33 = vadd.f32 %v17615_v20, %v8246_v19  ;;  %v12106_v57 = vpop.eup %12105  ;;  %12109 = vrcp.f32 %v17641_v55  ;;  %v8297_v6 = vand.u32 2147483647, %v17641_v55 }
0x12a5   :  { %v12108_v34 = vpop.eup %12107 }
0x12a6   :  { %v17655_v53 = vadd.f32 1.0, %v12108_v34 }
0x12a8   :  { %v10079_v50 = vpop.permute.xlu2 %10078  ;;  %12111 = vrcp.f32 %v17655_v53 }
0x12a9   :  { %v10118_v42 = vsel %vm18493_vm4, %v8241_v39, %v10079_v50  ;;  %vm8280_vm4 = vmor %vm8278_vm15, %vm8279_vm9  ;;  %v8261_v39 = vmul.f32 %v12102_v40, %v8260_v47  ;;  %v8319_v50 = vmul.f32 %v12106_v57, %v17628_v12  ;;  %12113 = vpow2.f32 %v11171_v51 }
0x12aa   :  { %v10134_v8 = vsel %vm18494_vm6, %v10118_v42, 0.0  ;;  %v8281_v46 = vsel %vm8280_vm4, %v17597_v58, %v8277_v38  ;;  %vm18499_vm6 = vmmov %vm18495_vm2  ;;  %v8255_v42 = vor.u32 1.1754944e-38, %v8254_v10  ;;  %v12110_v7 = vpop.eup %12109  ;;  %vm8268_vm9 = vcmp.eq.f32.partialorder %v8267_v60, 8.507059e+37 }
0x12ab   :  { %10150 = vst [vmem:[#allocation2 + $0x40] sm:$0xff] %v10134_v8  ;;  %v8286_v30 = vsel %vm8283_vm10, %v8285_v49, %v8281_v46  ;;  %v8262_v36 = vadd.f32 %v12102_v40, %v8261_v39  ;;  %v8320_v25 = vsub.f32 1.0, %v8319_v50  ;;  %v8289_v41 = vmul.f32 %v12110_v7, %v17641_v55  ;;  %vm18504_vm4 = vmmov %vm18502_vm3 }
0x12ac   :  { %vm8324_vm15 = vweird.f32 %v12106_v57  ;;  %vm8323_vm10 = vweird.f32 %v17628_v12  ;;  %v8314_v49 = vand.u32 2147483648, %v17655_v53 }
0x12ad   :  { %v8321_v21 = vmul.f32 %v12106_v57, %v8320_v25  ;;  %v8290_v59 = vsub.f32 1.0, %v8289_v41 }
0x12af   :  { %v8322_v44 = vadd.f32 %v12106_v57, %v8321_v21  ;;  %v8291_v2 = vmul.f32 %v12110_v7, %v8290_v59 }
0x12b0   :  { %v10075_v11 = vpop.permute.xlu1 %10074 }
0x12b1   :  { %v10116_v63 = vsel %vm18495_vm2, %v8211_v54, %v10075_v11  ;;  %vm8250_vm2 = vmor %vm8248_vm14, %vm8249_vm11  ;;  %vm8328_vm11 = vcmp.eq.f32.partialorder %v8327_v37, 8.507059e+37  ;;  %vm8294_vm14 = vweird.f32 %v12110_v7 }
0x12b2   :  { %v10132_v17 = vsel %vm18496_vm0, %v10116_v63, 0.0  ;;  %v8251_v3 = vsel %vm8250_vm2, %v17615_v20, %v8247_v33  ;;  %vm18501_vm0 = vmmov %vm18499_vm6  ;;  %v12112_v20 = vpop.eup %12111 }
0x12b3   :  { %10148 = vst [vmem:[#allocation2 + $0x30] sm:$0xff] %v10132_v17  ;;  %v8256_v58 = vsel %vm8253_vm7, %v8255_v42, %v8251_v3  ;;  %v8329_v17 = vand.u32 2147483648, %v17628_v12  ;;  %v12114_v27 = vpop.eup %12113  ;;  %v8304_v31 = vmul.f32 %v12112_v20, %v17655_v53  ;;  %vm18506_vm2 = vmmov %vm18502_vm3  ;;  %v8299_v12 = vand.u32 2147483648, %v17641_v55 }
0x12b4   :  { %v8107_v13 = vadd.f32 1.0, %v12114_v27  ;;  %vm8293_vm7 = vweird.f32 %v17641_v55  ;;  %v8312_v55 = vand.u32 2147483647, %v17655_v53 }
0x12b5   :  { %v8330_v29 = vor.u32 1.1754944e-38, %v8329_v17  ;;  %v8300_v45 = vor.u32 1.1754944e-38, %v8299_v12 }
0x12b6   :  { %12115 = vrcp.f32 %v8107_v13  ;;  %v8344_v3 = vand.u32 2147483648, %v8107_v13  ;;  %v8342_v39 = vand.u32 2147483647, %v8107_v13 }
0x12b8   :  { %v10077_v26 = vpop.permute.xlu0 %10076  ;;  %v8345_v42 = vor.u32 1.1754944e-38, %v8344_v3 }
0x12b9   :  { %v10117_v61 = vsel %vm18497_vm13, %v8226_v5, %v10077_v26  ;;  %vm8265_vm13 = vmor %vm8263_vm8, %vm8264_vm1  ;;  %v8292_v26 = vadd.f32 %v12110_v7, %v8291_v2  ;;  %vm8298_vm1 = vcmp.eq.f32.partialorder %v8297_v6, 8.507059e+37  ;;  %vm8309_vm8 = vweird.f32 %v12112_v20 }
0x12ba   :  { %v10133_v24 = vsel %vm18498_vm5, %v10117_v61, 0.0  ;;  %v8266_v43 = vsel %vm8265_vm13, %v12102_v40, %v8262_v36  ;;  %vm18503_vm5 = vmmov %vm18501_vm0  ;;  %v8305_v61 = vsub.f32 1.0, %v8304_v31 }
0x12bb   :  { %10149 = vst [vmem:[#allocation2 + $0x38] sm:$0xff] %v10133_v24  ;;  %v8271_v54 = vsel %vm8268_vm9, %v8270_v22, %v8266_v43  ;;  %vm18508_vm13 = vmmov %vm18506_vm2  ;;  %vm8308_vm9 = vweird.f32 %v17655_v53 }
0x12bc   :  { %v8306_v24 = vmul.f32 %v12112_v20, %v8305_v61  ;;  %v12116_v19 = vpop.eup %12115 }
0x12be   :  { %v8307_v46 = vadd.f32 %v12112_v20, %v8306_v24 }
0x12c0   :  { %v10085_v23 = vpop.permute.xlu2 %10084 }
0x12c1   :  { %v10121_v9 = vsel %vm18499_vm6, %v8286_v30, %v10085_v23  ;;  %vm8325_vm6 = vmor %vm8323_vm10, %vm8324_vm15  ;;  %v8334_v23 = vmul.f32 %v12116_v19, %v8107_v13  ;;  %vm8313_vm15 = vcmp.eq.f32.partialorder %v8312_v55, 8.507059e+37 }
0x12c2   :  { %v10137_v18 = vsel %vm18500_vm12, %v10121_v9, 0.0  ;;  %v8326_v56 = vsel %vm8325_vm6, %v12106_v57, %v8322_v44  ;;  %vm18505_vm12 = vmmov %vm18501_vm0  ;;  %v8315_v9 = vor.u32 1.1754944e-38, %v8314_v49  ;;  %vm8339_vm6 = vweird.f32 %v12116_v19 }
0x12c3   :  { %10153 = vst [vmem:[#allocation2 + $0x58] sm:$0xff] %v10137_v18  ;;  %v8331_v0 = vsel %vm8328_vm11, %v8330_v29, %v8326_v56  ;;  %v8335_v18 = vsub.f32 1.0, %v8334_v23  ;;  %vm18510_vm10 = vmmov %vm18506_vm2  ;;  %vm8338_vm11 = vweird.f32 %v8107_v13 }
0x12c5   :  { %v8336_v62 = vmul.f32 %v12116_v19, %v8335_v18 }
0x12c7   :  { %v8337_v34 = vadd.f32 %v12116_v19, %v8336_v62 }
0x12c8   :  { %v10081_v8 = vpop.permute.xlu1 %10080 }
0x12c9   :  { %v10119_v28 = vsel %vm18501_vm0, %v8256_v58, %v10081_v8  ;;  %vm8295_vm0 = vmor %vm8293_vm7, %vm8294_vm14  ;;  %vm8343_vm14 = vcmp.eq.f32.partialorder %v8342_v39, 8.507059e+37 }
0x12ca   :  { %v10135_v35 = vsel %vm18502_vm3, %v10119_v28, 0.0  ;;  %v8296_v40 = vsel %vm8295_vm0, %v12110_v7, %v8292_v26  ;;  %vm18507_vm3 = vmmov %vm18503_vm5 }
0x12cb   :  { %10151 = vst [vmem:[#allocation2 + $0x48] sm:$0xff] %v10135_v35  ;;  %v8301_v4 = vsel %vm8298_vm1, %v8300_v45, %v8296_v40  ;;  %vm18512_vm7 = vmmov %vm18510_vm10 }
0x12d0   :  { %v10083_v11 = vpop.permute.xlu0 %10082 }
0x12d1   :  { %v10120_v63 = vsel %vm18503_vm5, %v8271_v54, %v10083_v11  ;;  %vm8310_vm5 = vmor %vm8308_vm9, %vm8309_vm8 }
0x12d2   :  { %v10136_v15 = vsel %vm18504_vm4, %v10120_v63, 0.0  ;;  %v8311_v30 = vsel %vm8310_vm5, %v12112_v20, %v8307_v46  ;;  %vm18509_vm4 = vmmov %vm18507_vm3 }
0x12d3   :  { %10152 = vst [vmem:[#allocation2 + $0x50] sm:$0xff] %v10136_v15  ;;  %v8316_v47 = vsel %vm8313_vm15, %v8315_v9, %v8311_v30 }
0x12d8   :  { %v10091_v1 = vpop.permute.xlu2 %10090 }
0x12d9   :  { %v10124_v5 = vsel %vm18505_vm12, %v8331_v0, %v10091_v1  ;;  %vm8340_vm12 = vmor %vm8338_vm11, %vm8339_vm6 }
0x12da   :  { %v10140_v38 = vsel %vm18506_vm2, %v10124_v5, 0.0  ;;  %v8341_v50 = vsel %vm8340_vm12, %v12116_v19, %v8337_v34  ;;  %vm18511_vm2 = vmmov %vm18507_vm3 }
0x12db   :  { %10156 = vst [vmem:[#allocation2 + $0x70] sm:$0xff] %v10140_v38  ;;  %v8346_v53 = vsel %vm8343_vm14, %v8345_v42, %v8341_v50 }
0x12e0   :  { %v10087_v52 = vpop.permute.xlu1 %10086 }
0x12e1   :  { %v10122_v48 = vsel %vm18507_vm3, %v8301_v4, %v10087_v52 }
0x12e2   :  { %v10138_v16 = vsel %vm18508_vm13, %v10122_v48, 0.0 }
0x12e3   :  { %10154 = vst [vmem:[#allocation2 + $0x60] sm:$0xff] %v10138_v16 }
0x12e8   :  { %v10089_v33 = vpop.permute.xlu0 %10088 }
0x12e9   :  { %v10123_v57 = vsel %vm18509_vm4, %v8316_v47, %v10089_v33 }
0x12ea   :  { %v10139_v10 = vsel %vm18510_vm10, %v10123_v57, 0.0 }
0x12eb   :  { %10155 = vst [vmem:[#allocation2 + $0x68] sm:$0xff] %v10139_v10 }
0x12f8   :  { %v10093_v32 = vpop.permute.xlu1 %10092 }
0x12f9   :  { %v10125_v58 = vsel %vm18511_vm2, %v8346_v53, %v10093_v32 }
0x12fa   :  { %v10141_v8 = vsel %vm18512_vm7, %v10125_v58, 0.0 }
0x12fb   :  { %10157 = vst [vmem:[#allocation2 + $0x78] sm:$0xff] %v10141_v8 }
0x12fc   :  { %10170 = dma.vmem_to_hbm [thread:$0]  %s10163_s21, 2048, %s10165_s19, [#allocation3], %s12163_s9, %s12163_s9, %s12158_s18  }
0x12fd   :  { %12145 = dma.done.wait [#allocation3], 2048  }
0x12fe   :  { %12146 = vsyncadd [#allocation3], 4294965248 }
0x12ff   :  { %10175 = vsyncpa [#allocation3], 1 }

</bundles_post_ra>
